<compile_context>
chip_gen: v5e
topology: v5e:2x2
jax: 0.10.0
libtpu: 0.0.40
codegen_flags: <defaults>
</compile_context>

<pallas_src>
import jax
import jax.numpy as jnp
from jax import lax
from jax.experimental import pallas as pl
from jax.experimental.pallas import tpu as pltpu


K = 5  # conv kernel size


# ------------------------------ fused kernel ------------------------------

def _net_kernel(x4_ref, w1b_ref, b1_ref, w2b_ref, b2_ref,
                wfc1_ref, bfc1_ref, wfc2_ref, bfc2_ref, out_ref, p1s_ref):
    """Whole forward pass for ONE image; all intermediates stay on-chip.

    x4_ref  : (1, 4, 4, 7, 7)  parity-split input, x4[0,hp,wp,A,B] = img[4A+hp, 4B+wp]
    w1b_ref : (25, 6, 60)      per-tap block-diagonal conv1 weights
    w2b_ref : (25, 40, 80)     per-tap block-diagonal conv2 weights
    wfc1_ref: (4, 80, 50)      fc1 weight re-packed per pooled row yy
    p1s_ref : (2, 2, 6, 60)    VMEM scratch: stage-1 output, parity-split
    out_ref : (1, 1, 10)       log-softmax output for this image
    """
    f32 = jnp.float32

    # Hoist the tap weights once (reused across all phases).
    w1blk = [w1b_ref[t] for t in range(K * K)]     # each (6, 60)
    w2blk = [w2b_ref[t] for t in range(K * K)]     # each (40, 80)

    # All distinct conv1 patches: xpatch[(u,v)][a,b] = img[4a+u, 4b+v], a,b in 0..5.
    xpatch = {}
    for u in range(8):
        for v in range(8):
            xpatch[(u, v)] = x4_ref[0, u % 4, v % 4,
                                    (u // 4):(u // 4) + 6,
                                    (v // 4):(v // 4) + 6]          # (6, 6)

    # ---- stage 1: conv1 (5x5, 1->10) + 2x2 maxpool + relu -----------------
    # Output kept parity-split for stage 2:
    #   p1s[ph, pw, a, b*10+ci] = relu(pool(conv1+b1))[2a+ph, 2b+pw, ci]
    b1v = b1_ref[...]                                               # (1, 60)
    for ph in range(2):
        for pw in range(2):
            pooled = None
            for di in range(2):                  # pooling phases
                for dj in range(2):
                    acc = None
                    for kh in range(K):          # conv taps
                        for kw in range(K):
                            u = 2 * ph + di + kh
                            v = 2 * pw + dj + kw
                            c = jnp.dot(xpatch[(u, v)], w1blk[kh * K + kw],
                                        preferred_element_type=f32)
                            acc = c if acc is None else acc + c
                    pooled = acc if pooled is None else jnp.maximum(pooled, acc)
            p1s_ref[ph, pw] = jnp.maximum(pooled + b1v, 0.0)        # (6, 60)

    # All distinct conv2 patches: p2patch[(u,v)][yy, xx*10+ci] = act1[2yy+u, 2xx+v, ci]
    p2patch = {}
    for u in range(6):
        for v in range(6):
            p2patch[(u, v)] = p1s_ref[u % 2, v % 2,
                                      (u // 2):(u // 2) + 4,
                                      (v // 2) * 10:(v // 2) * 10 + 40]  # (4, 40)

    # ---- stage 2: conv2 (5x5, 10->20) + 2x2 maxpool + relu ----------------
    # TODO(synk): nn.Dropout2d is identity here (inference mode).
    b2v = b2_ref[...]                                               # (1, 80)
    pooled = None
    for di in range(2):
        for dj in range(2):
            acc = None
            for kh in range(K):
                for kw in range(K):
                    c = jnp.dot(p2patch[(di + kh, dj + kw)], w2blk[kh * K + kw],
                                preferred_element_type=f32)
                    acc = c if acc is None else acc + c
            pooled = acc if pooled is None else jnp.maximum(pooled, acc)
    p2 = jnp.maximum(pooled + b2v, 0.0)        # (4, 80): rows=yy, lanes=xx*20+co

    # ---- fc1 + relu, fc2, log_softmax -------------------------------------
    h = None
    for yy in range(4):
        part = jnp.dot(p2[yy:yy + 1, :], wfc1_ref[yy], preferred_element_type=f32)
        h = part if h is None else h + part
    h = jnp.maximum(h + bfc1_ref[...], 0.0)                         # (1, 50)
    # TODO(synk): F.dropout(training=...) is identity here (inference mode).
    logits = jnp.dot(h, wfc2_ref[...], preferred_element_type=f32) + bfc2_ref[...]

    m = jnp.max(logits, axis=-1, keepdims=True)
    s = jnp.sum(jnp.exp(logits - m), axis=-1, keepdims=True)
    out_ref[0] = logits - m - jnp.log(s)                            # (1, 10)


# -------------------------- one-time weight repack -------------------------

def prepare_params(params):
    """Repack PyTorch-layout weights into the kernel's layouts (done once)."""
    w1, b1, w2, b2, fc1_w, fc1_b, fc2_w, fc2_b = params
    eye6 = jnp.eye(6, dtype=jnp.float32)
    eye4 = jnp.eye(4, dtype=jnp.float32)
    # conv1 tap (kh,kw): (6,60) block-diagonal over the 6 output-column blocks,
    #   block [b,b] = w1[:, 0, kh, kw]  (lane packing b*10 + ci).
    w1b = jnp.stack([jnp.kron(eye6, w1[:, 0, kh, kw].reshape(1, 10))
                     for kh in range(K) for kw in range(K)])        # (25, 6, 60)
    # conv2 tap: (40,80) block-diagonal over the 4 output-column blocks,
    #   block [xx,xx] = w2[:, :, kh, kw].T  (in lanes xx*10+ci -> out lanes xx*20+co).
    w2b = jnp.stack([jnp.kron(eye4, jnp.transpose(w2[:, :, kh, kw]))
                     for kh in range(K) for kw in range(K)])        # (25, 40, 80)
    b1v = jnp.tile(b1, 6).reshape(1, 60)
    b2v = jnp.tile(b2, 4).reshape(1, 80)
    # fc1: PyTorch flat index is co*16 + yy*4 + xx ; kernel lanes are xx*20+co per yy.
    wfc1 = fc1_w.reshape(50, 20, 4, 4).transpose(2, 3, 1, 0).reshape(4, 80, 50)
    bfc1 = fc1_b.reshape(1, 50)
    wfc2 = jnp.transpose(fc2_w)                                     # (50, 10)
    bfc2 = fc2_b.reshape(1, 10)
    return (w1b, b1v, w2b, b2v, wfc1, bfc1, wfc2, bfc2)


def _prepare_input(x_nchw):
    """(N,1,28,28) -> (N,4,4,7,7): x4[n,hp,wp,A,B] = img[n, 4A+hp, 4B+wp]."""
    n = x_nchw.shape[0]
    img = x_nchw[:, 0]                           # (N, 28, 28)
    t = img.reshape(n, 7, 4, 7, 4)               # (n, A, hp, B, wp)
    return jnp.transpose(t, (0, 2, 4, 1, 3))     # (n, hp, wp, A, B)


# --------------------------------- wrapper ---------------------------------

def net_forward(x_nchw, kparams):
    n = x_nchw.shape[0]
    x4 = _prepare_input(x_nchw)
    w1b, b1v, w2b, b2v, wfc1, bfc1, wfc2, bfc2 = kparams

    def full(shape):
        nd = len(shape)
        return pl.BlockSpec(shape, lambda i, _nd=nd: (0,) * _nd)

    out = pl.pallas_call(
        _net_kernel,
        out_shape=jax.ShapeDtypeStruct((n, 1, 10), jnp.float32),
        grid=(n,),
        in_specs=[
            pl.BlockSpec((1, 4, 4, 7, 7), lambda i: (i, 0, 0, 0, 0)),
            full(w1b.shape), full(b1v.shape),
            full(w2b.shape), full(b2v.shape),
            full(wfc1.shape), full(bfc1.shape),
            full(wfc2.shape), full(bfc2.shape),
        ],
        out_specs=pl.BlockSpec((1, 1, 10), lambda i: (i, 0, 0)),
        scratch_shapes=[pltpu.VMEM((2, 2, 6, 60), jnp.float32)],
        compiler_params=pltpu.CompilerParams(dimension_semantics=("parallel",)),
    )(x4, w1b, b1v, w2b, b2v, wfc1, bfc1, wfc2, bfc2)
    return out.reshape(n, 10)


def init_params(key):
    """Deterministic PyTorch-like uniform(-1/sqrt(fan_in), 1/sqrt(fan_in))."""
    ks = jax.random.split(key, 8)

    def u(k, shape, fan_in):
        bound = 1.0 / (fan_in ** 0.5)
        return jax.random.uniform(k, shape, jnp.float32, -bound, bound)

    w1 = u(ks[0], (10, 1, 5, 5), 25);    b1 = u(ks[1], (10,), 25)
    w2 = u(ks[2], (20, 10, 5, 5), 250);  b2 = u(ks[3], (20,), 250)
    fc1_w = u(ks[4], (50, 320), 320);    fc1_b = u(ks[5], (50,), 320)
    fc2_w = u(ks[6], (10, 50), 50);      fc2_b = u(ks[7], (10,), 50)
    return (w1, b1, w2, b2, fc1_w, fc1_b, fc2_w, fc2_b)


# ---------------------------- pure-JAX reference ----------------------------

def reference_forward(x, params):
    w1, b1, w2, b2, fc1_w, fc1_b, fc2_w, fc2_b = params
    dn = ('NCHW', 'OIHW', 'NCHW')
    c1 = lax.conv_general_dilated(x, w1, (1, 1), 'VALID', dimension_numbers=dn)
    c1 = c1 + b1[None, :, None, None]
    p1 = lax.reduce_window(c1, -jnp.inf, lax.max, (1, 1, 2, 2), (1, 1, 2, 2), 'VALID')
    a1 = jnp.maximum(p1, 0.0)
    c2 = lax.conv_general_dilated(a1, w2, (1, 1), 'VALID', dimension_numbers=dn)
    c2 = c2 + b2[None, :, None, None]
    p2 = lax.reduce_window(c2, -jnp.inf, lax.max, (1, 1, 2, 2), (1, 1, 2, 2), 'VALID')
    a2 = jnp.maximum(p2, 0.0)
    flat = a2.reshape(a2.shape[0], 320)
    h = jnp.maximum(flat @ fc1_w.T + fc1_b, 0.0)
    logits = h @ fc2_w.T + fc2_b
    return jax.nn.log_softmax(logits, axis=1)


if __name__ == "__main__":
    key = jax.random.PRNGKey(0)
    kx, kp = jax.random.split(key)
    # MNIST-shaped input implied by fc1 (320 = 20*4*4 -> 28x28 spatial).
    x = jax.random.normal(kx, (2, 1, 28, 28), jnp.float32)
    params = init_params(kp)
    kparams = prepare_params(params)   # one-time weight repack (outside hot path)

    out = jax.block_until_ready(net_forward(x, kparams))
    ref = jax.block_until_ready(reference_forward(x, params))

    assert out.shape == (2, 10), out.shape
    max_err = float(jnp.max(jnp.abs(out - ref)))
    assert jnp.allclose(out, ref, atol=1e-4, rtol=1e-4), max_err
    print("KERNEL_OK")
</pallas_src>

<mosaic_0001>
module attributes {stable_mosaic.version = 11 : i64} {
  func.func @_net_kernel(%arg0: i32, %arg1: memref<1x4x4x7x7xf32, #tpu.memory_space<vmem>>, %arg2: memref<25x6x60xf32, #tpu.memory_space<vmem>>, %arg3: memref<1x60xf32, #tpu.memory_space<vmem>>, %arg4: memref<25x40x80xf32, #tpu.memory_space<vmem>>, %arg5: memref<1x80xf32, #tpu.memory_space<vmem>>, %arg6: memref<4x80x50xf32, #tpu.memory_space<vmem>>, %arg7: memref<1x50xf32, #tpu.memory_space<vmem>>, %arg8: memref<50x10xf32, #tpu.memory_space<vmem>>, %arg9: memref<1x10xf32, #tpu.memory_space<vmem>>, %arg10: memref<1x1x10xf32, #tpu.memory_space<vmem>>, %arg11: memref<2x2x6x60xf32, #tpu.memory_space<vmem>>) attributes {dimension_semantics = [#tpu.dimension_semantics<parallel>], iteration_bounds = array<i64: 2>, scalar_prefetch = 0 : i64, scratch_operands = 1 : i64, tpu.core_type = #tpu.core_type<tc>, window_params = [{transform_indices = @transform_0, window_bounds = array<i64: 1, 4, 4, 7, 7>}, {pipeline_mode = #tpu.pipeline_mode<synchronous>, transform_indices = @transform_1, window_bounds = array<i64: 25, 6, 60>}, {pipeline_mode = #tpu.pipeline_mode<synchronous>, transform_indices = @transform_2, window_bounds = array<i64: 1, 60>}, {pipeline_mode = #tpu.pipeline_mode<synchronous>, transform_indices = @transform_3, window_bounds = array<i64: 25, 40, 80>}, {pipeline_mode = #tpu.pipeline_mode<synchronous>, transform_indices = @transform_4, window_bounds = array<i64: 1, 80>}, {pipeline_mode = #tpu.pipeline_mode<synchronous>, transform_indices = @transform_5, window_bounds = array<i64: 4, 80, 50>}, {pipeline_mode = #tpu.pipeline_mode<synchronous>, transform_indices = @transform_6, window_bounds = array<i64: 1, 50>}, {pipeline_mode = #tpu.pipeline_mode<synchronous>, transform_indices = @transform_7, window_bounds = array<i64: 50, 10>}, {pipeline_mode = #tpu.pipeline_mode<synchronous>, transform_indices = @transform_8, window_bounds = array<i64: 1, 10>}, {transform_indices = @transform_9, window_bounds = array<i64: 1, 1, 10>}]} {
    %c0 = arith.constant 0 : index
    %c0_0 = arith.constant 0 : index
    %c0_1 = arith.constant 0 : index
    %0 = vector.load %arg2[%c0, %c0_0, %c0_1] : memref<25x6x60xf32, #tpu.memory_space<vmem>>, vector<1x6x60xf32>
    %1 = vector.shape_cast %0 : vector<1x6x60xf32> to vector<6x60xf32>
    %c1 = arith.constant 1 : index
    %c0_2 = arith.constant 0 : index
    %c0_3 = arith.constant 0 : index
    %2 = vector.load %arg2[%c1, %c0_2, %c0_3] : memref<25x6x60xf32, #tpu.memory_space<vmem>>, vector<1x6x60xf32>
    %3 = vector.shape_cast %2 : vector<1x6x60xf32> to vector<6x60xf32>
    %c2 = arith.constant 2 : index
    %c0_4 = arith.constant 0 : index
    %c0_5 = arith.constant 0 : index
    %4 = vector.load %arg2[%c2, %c0_4, %c0_5] : memref<25x6x60xf32, #tpu.memory_space<vmem>>, vector<1x6x60xf32>
    %5 = vector.shape_cast %4 : vector<1x6x60xf32> to vector<6x60xf32>
    %c3 = arith.constant 3 : index
    %c0_6 = arith.constant 0 : index
    %c0_7 = arith.constant 0 : index
    %6 = vector.load %arg2[%c3, %c0_6, %c0_7] : memref<25x6x60xf32, #tpu.memory_space<vmem>>, vector<1x6x60xf32>
    %7 = vector.shape_cast %6 : vector<1x6x60xf32> to vector<6x60xf32>
    %c4 = arith.constant 4 : index
    %c0_8 = arith.constant 0 : index
    %c0_9 = arith.constant 0 : index
    %8 = vector.load %arg2[%c4, %c0_8, %c0_9] : memref<25x6x60xf32, #tpu.memory_space<vmem>>, vector<1x6x60xf32>
    %9 = vector.shape_cast %8 : vector<1x6x60xf32> to vector<6x60xf32>
    %c5 = arith.constant 5 : index
    %c0_10 = arith.constant 0 : index
    %c0_11 = arith.constant 0 : index
    %10 = vector.load %arg2[%c5, %c0_10, %c0_11] : memref<25x6x60xf32, #tpu.memory_space<vmem>>, vector<1x6x60xf32>
    %11 = vector.shape_cast %10 : vector<1x6x60xf32> to vector<6x60xf32>
    %c6 = arith.constant 6 : index
    %c0_12 = arith.constant 0 : index
    %c0_13 = arith.constant 0 : index
    %12 = vector.load %arg2[%c6, %c0_12, %c0_13] : memref<25x6x60xf32, #tpu.memory_space<vmem>>, vector<1x6x60xf32>
    %13 = vector.shape_cast %12 : vector<1x6x60xf32> to vector<6x60xf32>
    %c7 = arith.constant 7 : index
    %c0_14 = arith.constant 0 : index
    %c0_15 = arith.constant 0 : index
    %14 = vector.load %arg2[%c7, %c0_14, %c0_15] : memref<25x6x60xf32, #tpu.memory_space<vmem>>, vector<1x6x60xf32>
    %15 = vector.shape_cast %14 : vector<1x6x60xf32> to vector<6x60xf32>
    %c8 = arith.constant 8 : index
    %c0_16 = arith.constant 0 : index
    %c0_17 = arith.constant 0 : index
    %16 = vector.load %arg2[%c8, %c0_16, %c0_17] : memref<25x6x60xf32, #tpu.memory_space<vmem>>, vector<1x6x60xf32>
    %17 = vector.shape_cast %16 : vector<1x6x60xf32> to vector<6x60xf32>
    %c9 = arith.constant 9 : index
    %c0_18 = arith.constant 0 : index
    %c0_19 = arith.constant 0 : index
    %18 = vector.load %arg2[%c9, %c0_18, %c0_19] : memref<25x6x60xf32, #tpu.memory_space<vmem>>, vector<1x6x60xf32>
    %19 = vector.shape_cast %18 : vector<1x6x60xf32> to vector<6x60xf32>
    %c10 = arith.constant 10 : index
    %c0_20 = arith.constant 0 : index
    %c0_21 = arith.constant 0 : index
    %20 = vector.load %arg2[%c10, %c0_20, %c0_21] : memref<25x6x60xf32, #tpu.memory_space<vmem>>, vector<1x6x60xf32>
    %21 = vector.shape_cast %20 : vector<1x6x60xf32> to vector<6x60xf32>
    %c11 = arith.constant 11 : index
    %c0_22 = arith.constant 0 : index
    %c0_23 = arith.constant 0 : index
    %22 = vector.load %arg2[%c11, %c0_22, %c0_23] : memref<25x6x60xf32, #tpu.memory_space<vmem>>, vector<1x6x60xf32>
    %23 = vector.shape_cast %22 : vector<1x6x60xf32> to vector<6x60xf32>
    %c12 = arith.constant 12 : index
    %c0_24 = arith.constant 0 : index
    %c0_25 = arith.constant 0 : index
    %24 = vector.load %arg2[%c12, %c0_24, %c0_25] : memref<25x6x60xf32, #tpu.memory_space<vmem>>, vector<1x6x60xf32>
    %25 = vector.shape_cast %24 : vector<1x6x60xf32> to vector<6x60xf32>
    %c13 = arith.constant 13 : index
    %c0_26 = arith.constant 0 : index
    %c0_27 = arith.constant 0 : index
    %26 = vector.load %arg2[%c13, %c0_26, %c0_27] : memref<25x6x60xf32, #tpu.memory_space<vmem>>, vector<1x6x60xf32>
    %27 = vector.shape_cast %26 : vector<1x6x60xf32> to vector<6x60xf32>
    %c14 = arith.constant 14 : index
    %c0_28 = arith.constant 0 : index
    %c0_29 = arith.constant 0 : index
    %28 = vector.load %arg2[%c14, %c0_28, %c0_29] : memref<25x6x60xf32, #tpu.memory_space<vmem>>, vector<1x6x60xf32>
    %29 = vector.shape_cast %28 : vector<1x6x60xf32> to vector<6x60xf32>
    %c15 = arith.constant 15 : index
    %c0_30 = arith.constant 0 : index
    %c0_31 = arith.constant 0 : index
    %30 = vector.load %arg2[%c15, %c0_30, %c0_31] : memref<25x6x60xf32, #tpu.memory_space<vmem>>, vector<1x6x60xf32>
    %31 = vector.shape_cast %30 : vector<1x6x60xf32> to vector<6x60xf32>
    %c16 = arith.constant 16 : index
    %c0_32 = arith.constant 0 : index
    %c0_33 = arith.constant 0 : index
    %32 = vector.load %arg2[%c16, %c0_32, %c0_33] : memref<25x6x60xf32, #tpu.memory_space<vmem>>, vector<1x6x60xf32>
    %33 = vector.shape_cast %32 : vector<1x6x60xf32> to vector<6x60xf32>
    %c17 = arith.constant 17 : index
    %c0_34 = arith.constant 0 : index
    %c0_35 = arith.constant 0 : index
    %34 = vector.load %arg2[%c17, %c0_34, %c0_35] : memref<25x6x60xf32, #tpu.memory_space<vmem>>, vector<1x6x60xf32>
    %35 = vector.shape_cast %34 : vector<1x6x60xf32> to vector<6x60xf32>
    %c18 = arith.constant 18 : index
    %c0_36 = arith.constant 0 : index
    %c0_37 = arith.constant 0 : index
    %36 = vector.load %arg2[%c18, %c0_36, %c0_37] : memref<25x6x60xf32, #tpu.memory_space<vmem>>, vector<1x6x60xf32>
    %37 = vector.shape_cast %36 : vector<1x6x60xf32> to vector<6x60xf32>
    %c19 = arith.constant 19 : index
    %c0_38 = arith.constant 0 : index
    %c0_39 = arith.constant 0 : index
    %38 = vector.load %arg2[%c19, %c0_38, %c0_39] : memref<25x6x60xf32, #tpu.memory_space<vmem>>, vector<1x6x60xf32>
    %39 = vector.shape_cast %38 : vector<1x6x60xf32> to vector<6x60xf32>
    %c20 = arith.constant 20 : index
    %c0_40 = arith.constant 0 : index
    %c0_41 = arith.constant 0 : index
    %40 = vector.load %arg2[%c20, %c0_40, %c0_41] : memref<25x6x60xf32, #tpu.memory_space<vmem>>, vector<1x6x60xf32>
    %41 = vector.shape_cast %40 : vector<1x6x60xf32> to vector<6x60xf32>
    %c21 = arith.constant 21 : index
    %c0_42 = arith.constant 0 : index
    %c0_43 = arith.constant 0 : index
    %42 = vector.load %arg2[%c21, %c0_42, %c0_43] : memref<25x6x60xf32, #tpu.memory_space<vmem>>, vector<1x6x60xf32>
    %43 = vector.shape_cast %42 : vector<1x6x60xf32> to vector<6x60xf32>
    %c22 = arith.constant 22 : index
    %c0_44 = arith.constant 0 : index
    %c0_45 = arith.constant 0 : index
    %44 = vector.load %arg2[%c22, %c0_44, %c0_45] : memref<25x6x60xf32, #tpu.memory_space<vmem>>, vector<1x6x60xf32>
    %45 = vector.shape_cast %44 : vector<1x6x60xf32> to vector<6x60xf32>
    %c23 = arith.constant 23 : index
    %c0_46 = arith.constant 0 : index
    %c0_47 = arith.constant 0 : index
    %46 = vector.load %arg2[%c23, %c0_46, %c0_47] : memref<25x6x60xf32, #tpu.memory_space<vmem>>, vector<1x6x60xf32>
    %47 = vector.shape_cast %46 : vector<1x6x60xf32> to vector<6x60xf32>
    %c24 = arith.constant 24 : index
    %c0_48 = arith.constant 0 : index
    %c0_49 = arith.constant 0 : index
    %48 = vector.load %arg2[%c24, %c0_48, %c0_49] : memref<25x6x60xf32, #tpu.memory_space<vmem>>, vector<1x6x60xf32>
    %49 = vector.shape_cast %48 : vector<1x6x60xf32> to vector<6x60xf32>
    %c0_50 = arith.constant 0 : index
    %c0_51 = arith.constant 0 : index
    %c0_52 = arith.constant 0 : index
    %50 = vector.load %arg4[%c0_50, %c0_51, %c0_52] : memref<25x40x80xf32, #tpu.memory_space<vmem>>, vector<1x40x80xf32>
    %51 = vector.shape_cast %50 : vector<1x40x80xf32> to vector<40x80xf32>
    %c1_53 = arith.constant 1 : index
    %c0_54 = arith.constant 0 : index
    %c0_55 = arith.constant 0 : index
    %52 = vector.load %arg4[%c1_53, %c0_54, %c0_55] : memref<25x40x80xf32, #tpu.memory_space<vmem>>, vector<1x40x80xf32>
    %53 = vector.shape_cast %52 : vector<1x40x80xf32> to vector<40x80xf32>
    %c2_56 = arith.constant 2 : index
    %c0_57 = arith.constant 0 : index
    %c0_58 = arith.constant 0 : index
    %54 = vector.load %arg4[%c2_56, %c0_57, %c0_58] : memref<25x40x80xf32, #tpu.memory_space<vmem>>, vector<1x40x80xf32>
    %55 = vector.shape_cast %54 : vector<1x40x80xf32> to vector<40x80xf32>
    %c3_59 = arith.constant 3 : index
    %c0_60 = arith.constant 0 : index
    %c0_61 = arith.constant 0 : index
    %56 = vector.load %arg4[%c3_59, %c0_60, %c0_61] : memref<25x40x80xf32, #tpu.memory_space<vmem>>, vector<1x40x80xf32>
    %57 = vector.shape_cast %56 : vector<1x40x80xf32> to vector<40x80xf32>
    %c4_62 = arith.constant 4 : index
    %c0_63 = arith.constant 0 : index
    %c0_64 = arith.constant 0 : index
    %58 = vector.load %arg4[%c4_62, %c0_63, %c0_64] : memref<25x40x80xf32, #tpu.memory_space<vmem>>, vector<1x40x80xf32>
    %59 = vector.shape_cast %58 : vector<1x40x80xf32> to vector<40x80xf32>
    %c5_65 = arith.constant 5 : index
    %c0_66 = arith.constant 0 : index
    %c0_67 = arith.constant 0 : index
    %60 = vector.load %arg4[%c5_65, %c0_66, %c0_67] : memref<25x40x80xf32, #tpu.memory_space<vmem>>, vector<1x40x80xf32>
    %61 = vector.shape_cast %60 : vector<1x40x80xf32> to vector<40x80xf32>
    %c6_68 = arith.constant 6 : index
    %c0_69 = arith.constant 0 : index
    %c0_70 = arith.constant 0 : index
    %62 = vector.load %arg4[%c6_68, %c0_69, %c0_70] : memref<25x40x80xf32, #tpu.memory_space<vmem>>, vector<1x40x80xf32>
    %63 = vector.shape_cast %62 : vector<1x40x80xf32> to vector<40x80xf32>
    %c7_71 = arith.constant 7 : index
    %c0_72 = arith.constant 0 : index
    %c0_73 = arith.constant 0 : index
    %64 = vector.load %arg4[%c7_71, %c0_72, %c0_73] : memref<25x40x80xf32, #tpu.memory_space<vmem>>, vector<1x40x80xf32>
    %65 = vector.shape_cast %64 : vector<1x40x80xf32> to vector<40x80xf32>
    %c8_74 = arith.constant 8 : index
    %c0_75 = arith.constant 0 : index
    %c0_76 = arith.constant 0 : index
    %66 = vector.load %arg4[%c8_74, %c0_75, %c0_76] : memref<25x40x80xf32, #tpu.memory_space<vmem>>, vector<1x40x80xf32>
    %67 = vector.shape_cast %66 : vector<1x40x80xf32> to vector<40x80xf32>
    %c9_77 = arith.constant 9 : index
    %c0_78 = arith.constant 0 : index
    %c0_79 = arith.constant 0 : index
    %68 = vector.load %arg4[%c9_77, %c0_78, %c0_79] : memref<25x40x80xf32, #tpu.memory_space<vmem>>, vector<1x40x80xf32>
    %69 = vector.shape_cast %68 : vector<1x40x80xf32> to vector<40x80xf32>
    %c10_80 = arith.constant 10 : index
    %c0_81 = arith.constant 0 : index
    %c0_82 = arith.constant 0 : index
    %70 = vector.load %arg4[%c10_80, %c0_81, %c0_82] : memref<25x40x80xf32, #tpu.memory_space<vmem>>, vector<1x40x80xf32>
    %71 = vector.shape_cast %70 : vector<1x40x80xf32> to vector<40x80xf32>
    %c11_83 = arith.constant 11 : index
    %c0_84 = arith.constant 0 : index
    %c0_85 = arith.constant 0 : index
    %72 = vector.load %arg4[%c11_83, %c0_84, %c0_85] : memref<25x40x80xf32, #tpu.memory_space<vmem>>, vector<1x40x80xf32>
    %73 = vector.shape_cast %72 : vector<1x40x80xf32> to vector<40x80xf32>
    %c12_86 = arith.constant 12 : index
    %c0_87 = arith.constant 0 : index
    %c0_88 = arith.constant 0 : index
    %74 = vector.load %arg4[%c12_86, %c0_87, %c0_88] : memref<25x40x80xf32, #tpu.memory_space<vmem>>, vector<1x40x80xf32>
    %75 = vector.shape_cast %74 : vector<1x40x80xf32> to vector<40x80xf32>
    %c13_89 = arith.constant 13 : index
    %c0_90 = arith.constant 0 : index
    %c0_91 = arith.constant 0 : index
    %76 = vector.load %arg4[%c13_89, %c0_90, %c0_91] : memref<25x40x80xf32, #tpu.memory_space<vmem>>, vector<1x40x80xf32>
    %77 = vector.shape_cast %76 : vector<1x40x80xf32> to vector<40x80xf32>
    %c14_92 = arith.constant 14 : index
    %c0_93 = arith.constant 0 : index
    %c0_94 = arith.constant 0 : index
    %78 = vector.load %arg4[%c14_92, %c0_93, %c0_94] : memref<25x40x80xf32, #tpu.memory_space<vmem>>, vector<1x40x80xf32>
    %79 = vector.shape_cast %78 : vector<1x40x80xf32> to vector<40x80xf32>
    %c15_95 = arith.constant 15 : index
    %c0_96 = arith.constant 0 : index
    %c0_97 = arith.constant 0 : index
    %80 = vector.load %arg4[%c15_95, %c0_96, %c0_97] : memref<25x40x80xf32, #tpu.memory_space<vmem>>, vector<1x40x80xf32>
    %81 = vector.shape_cast %80 : vector<1x40x80xf32> to vector<40x80xf32>
    %c16_98 = arith.constant 16 : index
    %c0_99 = arith.constant 0 : index
    %c0_100 = arith.constant 0 : index
    %82 = vector.load %arg4[%c16_98, %c0_99, %c0_100] : memref<25x40x80xf32, #tpu.memory_space<vmem>>, vector<1x40x80xf32>
    %83 = vector.shape_cast %82 : vector<1x40x80xf32> to vector<40x80xf32>
    %c17_101 = arith.constant 17 : index
    %c0_102 = arith.constant 0 : index
    %c0_103 = arith.constant 0 : index
    %84 = vector.load %arg4[%c17_101, %c0_102, %c0_103] : memref<25x40x80xf32, #tpu.memory_space<vmem>>, vector<1x40x80xf32>
    %85 = vector.shape_cast %84 : vector<1x40x80xf32> to vector<40x80xf32>
    %c18_104 = arith.constant 18 : index
    %c0_105 = arith.constant 0 : index
    %c0_106 = arith.constant 0 : index
    %86 = vector.load %arg4[%c18_104, %c0_105, %c0_106] : memref<25x40x80xf32, #tpu.memory_space<vmem>>, vector<1x40x80xf32>
    %87 = vector.shape_cast %86 : vector<1x40x80xf32> to vector<40x80xf32>
    %c19_107 = arith.constant 19 : index
    %c0_108 = arith.constant 0 : index
    %c0_109 = arith.constant 0 : index
    %88 = vector.load %arg4[%c19_107, %c0_108, %c0_109] : memref<25x40x80xf32, #tpu.memory_space<vmem>>, vector<1x40x80xf32>
    %89 = vector.shape_cast %88 : vector<1x40x80xf32> to vector<40x80xf32>
    %c20_110 = arith.constant 20 : index
    %c0_111 = arith.constant 0 : index
    %c0_112 = arith.constant 0 : index
    %90 = vector.load %arg4[%c20_110, %c0_111, %c0_112] : memref<25x40x80xf32, #tpu.memory_space<vmem>>, vector<1x40x80xf32>
    %91 = vector.shape_cast %90 : vector<1x40x80xf32> to vector<40x80xf32>
    %c21_113 = arith.constant 21 : index
    %c0_114 = arith.constant 0 : index
    %c0_115 = arith.constant 0 : index
    %92 = vector.load %arg4[%c21_113, %c0_114, %c0_115] : memref<25x40x80xf32, #tpu.memory_space<vmem>>, vector<1x40x80xf32>
    %93 = vector.shape_cast %92 : vector<1x40x80xf32> to vector<40x80xf32>
    %c22_116 = arith.constant 22 : index
    %c0_117 = arith.constant 0 : index
    %c0_118 = arith.constant 0 : index
    %94 = vector.load %arg4[%c22_116, %c0_117, %c0_118] : memref<25x40x80xf32, #tpu.memory_space<vmem>>, vector<1x40x80xf32>
    %95 = vector.shape_cast %94 : vector<1x40x80xf32> to vector<40x80xf32>
    %c23_119 = arith.constant 23 : index
    %c0_120 = arith.constant 0 : index
    %c0_121 = arith.constant 0 : index
    %96 = vector.load %arg4[%c23_119, %c0_120, %c0_121] : memref<25x40x80xf32, #tpu.memory_space<vmem>>, vector<1x40x80xf32>
    %97 = vector.shape_cast %96 : vector<1x40x80xf32> to vector<40x80xf32>
    %c24_122 = arith.constant 24 : index
    %c0_123 = arith.constant 0 : index
    %c0_124 = arith.constant 0 : index
    %98 = vector.load %arg4[%c24_122, %c0_123, %c0_124] : memref<25x40x80xf32, #tpu.memory_space<vmem>>, vector<1x40x80xf32>
    %99 = vector.shape_cast %98 : vector<1x40x80xf32> to vector<40x80xf32>
    %c0_125 = arith.constant 0 : index
    %c0_126 = arith.constant 0 : index
    %c0_127 = arith.constant 0 : index
    %c0_128 = arith.constant 0 : index
    %c0_129 = arith.constant 0 : index
    %100 = vector.load %arg1[%c0_125, %c0_126, %c0_127, %c0_128, %c0_129] : memref<1x4x4x7x7xf32, #tpu.memory_space<vmem>>, vector<1x1x1x6x6xf32>
    %101 = vector.shape_cast %100 : vector<1x1x1x6x6xf32> to vector<6x6xf32>
    %c0_130 = arith.constant 0 : index
    %c0_131 = arith.constant 0 : index
    %c1_132 = arith.constant 1 : index
    %c0_133 = arith.constant 0 : index
    %c0_134 = arith.constant 0 : index
    %102 = vector.load %arg1[%c0_130, %c0_131, %c1_132, %c0_133, %c0_134] : memref<1x4x4x7x7xf32, #tpu.memory_space<vmem>>, vector<1x1x1x6x6xf32>
    %103 = vector.shape_cast %102 : vector<1x1x1x6x6xf32> to vector<6x6xf32>
    %c0_135 = arith.constant 0 : index
    %c0_136 = arith.constant 0 : index
    %c2_137 = arith.constant 2 : index
    %c0_138 = arith.constant 0 : index
    %c0_139 = arith.constant 0 : index
    %104 = vector.load %arg1[%c0_135, %c0_136, %c2_137, %c0_138, %c0_139] : memref<1x4x4x7x7xf32, #tpu.memory_space<vmem>>, vector<1x1x1x6x6xf32>
    %105 = vector.shape_cast %104 : vector<1x1x1x6x6xf32> to vector<6x6xf32>
    %c0_140 = arith.constant 0 : index
    %c0_141 = arith.constant 0 : index
    %c3_142 = arith.constant 3 : index
    %c0_143 = arith.constant 0 : index
    %c0_144 = arith.constant 0 : index
    %106 = vector.load %arg1[%c0_140, %c0_141, %c3_142, %c0_143, %c0_144] : memref<1x4x4x7x7xf32, #tpu.memory_space<vmem>>, vector<1x1x1x6x6xf32>
    %107 = vector.shape_cast %106 : vector<1x1x1x6x6xf32> to vector<6x6xf32>
    %c0_145 = arith.constant 0 : index
    %c0_146 = arith.constant 0 : index
    %c0_147 = arith.constant 0 : index
    %c0_148 = arith.constant 0 : index
    %c1_149 = arith.constant 1 : index
    %108 = vector.load %arg1[%c0_145, %c0_146, %c0_147, %c0_148, %c1_149] : memref<1x4x4x7x7xf32, #tpu.memory_space<vmem>>, vector<1x1x1x6x6xf32>
    %109 = vector.shape_cast %108 : vector<1x1x1x6x6xf32> to vector<6x6xf32>
    %c0_150 = arith.constant 0 : index
    %c0_151 = arith.constant 0 : index
    %c1_152 = arith.constant 1 : index
    %c0_153 = arith.constant 0 : index
    %c1_154 = arith.constant 1 : index
    %110 = vector.load %arg1[%c0_150, %c0_151, %c1_152, %c0_153, %c1_154] : memref<1x4x4x7x7xf32, #tpu.memory_space<vmem>>, vector<1x1x1x6x6xf32>
    %111 = vector.shape_cast %110 : vector<1x1x1x6x6xf32> to vector<6x6xf32>
    %c0_155 = arith.constant 0 : index
    %c0_156 = arith.constant 0 : index
    %c2_157 = arith.constant 2 : index
    %c0_158 = arith.constant 0 : index
    %c1_159 = arith.constant 1 : index
    %112 = vector.load %arg1[%c0_155, %c0_156, %c2_157, %c0_158, %c1_159] : memref<1x4x4x7x7xf32, #tpu.memory_space<vmem>>, vector<1x1x1x6x6xf32>
    %113 = vector.shape_cast %112 : vector<1x1x1x6x6xf32> to vector<6x6xf32>
    %c0_160 = arith.constant 0 : index
    %c0_161 = arith.constant 0 : index
    %c3_162 = arith.constant 3 : index
    %c0_163 = arith.constant 0 : index
    %c1_164 = arith.constant 1 : index
    %114 = vector.load %arg1[%c0_160, %c0_161, %c3_162, %c0_163, %c1_164] : memref<1x4x4x7x7xf32, #tpu.memory_space<vmem>>, vector<1x1x1x6x6xf32>
    %115 = vector.shape_cast %114 : vector<1x1x1x6x6xf32> to vector<6x6xf32>
    %c0_165 = arith.constant 0 : index
    %c1_166 = arith.constant 1 : index
    %c0_167 = arith.constant 0 : index
    %c0_168 = arith.constant 0 : index
    %c0_169 = arith.constant 0 : index
    %116 = vector.load %arg1[%c0_165, %c1_166, %c0_167, %c0_168, %c0_169] : memref<1x4x4x7x7xf32, #tpu.memory_space<vmem>>, vector<1x1x1x6x6xf32>
    %117 = vector.shape_cast %116 : vector<1x1x1x6x6xf32> to vector<6x6xf32>
    %c0_170 = arith.constant 0 : index
    %c1_171 = arith.constant 1 : index
    %c1_172 = arith.constant 1 : index
    %c0_173 = arith.constant 0 : index
    %c0_174 = arith.constant 0 : index
    %118 = vector.load %arg1[%c0_170, %c1_171, %c1_172, %c0_173, %c0_174] : memref<1x4x4x7x7xf32, #tpu.memory_space<vmem>>, vector<1x1x1x6x6xf32>
    %119 = vector.shape_cast %118 : vector<1x1x1x6x6xf32> to vector<6x6xf32>
    %c0_175 = arith.constant 0 : index
    %c1_176 = arith.constant 1 : index
    %c2_177 = arith.constant 2 : index
    %c0_178 = arith.constant 0 : index
    %c0_179 = arith.constant 0 : index
    %120 = vector.load %arg1[%c0_175, %c1_176, %c2_177, %c0_178, %c0_179] : memref<1x4x4x7x7xf32, #tpu.memory_space<vmem>>, vector<1x1x1x6x6xf32>
    %121 = vector.shape_cast %120 : vector<1x1x1x6x6xf32> to vector<6x6xf32>
    %c0_180 = arith.constant 0 : index
    %c1_181 = arith.constant 1 : index
    %c3_182 = arith.constant 3 : index
    %c0_183 = arith.constant 0 : index
    %c0_184 = arith.constant 0 : index
    %122 = vector.load %arg1[%c0_180, %c1_181, %c3_182, %c0_183, %c0_184] : memref<1x4x4x7x7xf32, #tpu.memory_space<vmem>>, vector<1x1x1x6x6xf32>
    %123 = vector.shape_cast %122 : vector<1x1x1x6x6xf32> to vector<6x6xf32>
    %c0_185 = arith.constant 0 : index
    %c1_186 = arith.constant 1 : index
    %c0_187 = arith.constant 0 : index
    %c0_188 = arith.constant 0 : index
    %c1_189 = arith.constant 1 : index
    %124 = vector.load %arg1[%c0_185, %c1_186, %c0_187, %c0_188, %c1_189] : memref<1x4x4x7x7xf32, #tpu.memory_space<vmem>>, vector<1x1x1x6x6xf32>
    %125 = vector.shape_cast %124 : vector<1x1x1x6x6xf32> to vector<6x6xf32>
    %c0_190 = arith.constant 0 : index
    %c1_191 = arith.constant 1 : index
    %c1_192 = arith.constant 1 : index
    %c0_193 = arith.constant 0 : index
    %c1_194 = arith.constant 1 : index
    %126 = vector.load %arg1[%c0_190, %c1_191, %c1_192, %c0_193, %c1_194] : memref<1x4x4x7x7xf32, #tpu.memory_space<vmem>>, vector<1x1x1x6x6xf32>
    %127 = vector.shape_cast %126 : vector<1x1x1x6x6xf32> to vector<6x6xf32>
    %c0_195 = arith.constant 0 : index
    %c1_196 = arith.constant 1 : index
    %c2_197 = arith.constant 2 : index
    %c0_198 = arith.constant 0 : index
    %c1_199 = arith.constant 1 : index
    %128 = vector.load %arg1[%c0_195, %c1_196, %c2_197, %c0_198, %c1_199] : memref<1x4x4x7x7xf32, #tpu.memory_space<vmem>>, vector<1x1x1x6x6xf32>
    %129 = vector.shape_cast %128 : vector<1x1x1x6x6xf32> to vector<6x6xf32>
    %c0_200 = arith.constant 0 : index
    %c1_201 = arith.constant 1 : index
    %c3_202 = arith.constant 3 : index
    %c0_203 = arith.constant 0 : index
    %c1_204 = arith.constant 1 : index
    %130 = vector.load %arg1[%c0_200, %c1_201, %c3_202, %c0_203, %c1_204] : memref<1x4x4x7x7xf32, #tpu.memory_space<vmem>>, vector<1x1x1x6x6xf32>
    %131 = vector.shape_cast %130 : vector<1x1x1x6x6xf32> to vector<6x6xf32>
    %c0_205 = arith.constant 0 : index
    %c2_206 = arith.constant 2 : index
    %c0_207 = arith.constant 0 : index
    %c0_208 = arith.constant 0 : index
    %c0_209 = arith.constant 0 : index
    %132 = vector.load %arg1[%c0_205, %c2_206, %c0_207, %c0_208, %c0_209] : memref<1x4x4x7x7xf32, #tpu.memory_space<vmem>>, vector<1x1x1x6x6xf32>
    %133 = vector.shape_cast %132 : vector<1x1x1x6x6xf32> to vector<6x6xf32>
    %c0_210 = arith.constant 0 : index
    %c2_211 = arith.constant 2 : index
    %c1_212 = arith.constant 1 : index
    %c0_213 = arith.constant 0 : index
    %c0_214 = arith.constant 0 : index
    %134 = vector.load %arg1[%c0_210, %c2_211, %c1_212, %c0_213, %c0_214] : memref<1x4x4x7x7xf32, #tpu.memory_space<vmem>>, vector<1x1x1x6x6xf32>
    %135 = vector.shape_cast %134 : vector<1x1x1x6x6xf32> to vector<6x6xf32>
    %c0_215 = arith.constant 0 : index
    %c2_216 = arith.constant 2 : index
    %c2_217 = arith.constant 2 : index
    %c0_218 = arith.constant 0 : index
    %c0_219 = arith.constant 0 : index
    %136 = vector.load %arg1[%c0_215, %c2_216, %c2_217, %c0_218, %c0_219] : memref<1x4x4x7x7xf32, #tpu.memory_space<vmem>>, vector<1x1x1x6x6xf32>
    %137 = vector.shape_cast %136 : vector<1x1x1x6x6xf32> to vector<6x6xf32>
    %c0_220 = arith.constant 0 : index
    %c2_221 = arith.constant 2 : index
    %c3_222 = arith.constant 3 : index
    %c0_223 = arith.constant 0 : index
    %c0_224 = arith.constant 0 : index
    %138 = vector.load %arg1[%c0_220, %c2_221, %c3_222, %c0_223, %c0_224] : memref<1x4x4x7x7xf32, #tpu.memory_space<vmem>>, vector<1x1x1x6x6xf32>
    %139 = vector.shape_cast %138 : vector<1x1x1x6x6xf32> to vector<6x6xf32>
    %c0_225 = arith.constant 0 : index
    %c2_226 = arith.constant 2 : index
    %c0_227 = arith.constant 0 : index
    %c0_228 = arith.constant 0 : index
    %c1_229 = arith.constant 1 : index
    %140 = vector.load %arg1[%c0_225, %c2_226, %c0_227, %c0_228, %c1_229] : memref<1x4x4x7x7xf32, #tpu.memory_space<vmem>>, vector<1x1x1x6x6xf32>
    %141 = vector.shape_cast %140 : vector<1x1x1x6x6xf32> to vector<6x6xf32>
    %c0_230 = arith.constant 0 : index
    %c2_231 = arith.constant 2 : index
    %c1_232 = arith.constant 1 : index
    %c0_233 = arith.constant 0 : index
    %c1_234 = arith.constant 1 : index
    %142 = vector.load %arg1[%c0_230, %c2_231, %c1_232, %c0_233, %c1_234] : memref<1x4x4x7x7xf32, #tpu.memory_space<vmem>>, vector<1x1x1x6x6xf32>
    %143 = vector.shape_cast %142 : vector<1x1x1x6x6xf32> to vector<6x6xf32>
    %c0_235 = arith.constant 0 : index
    %c2_236 = arith.constant 2 : index
    %c2_237 = arith.constant 2 : index
    %c0_238 = arith.constant 0 : index
    %c1_239 = arith.constant 1 : index
    %144 = vector.load %arg1[%c0_235, %c2_236, %c2_237, %c0_238, %c1_239] : memref<1x4x4x7x7xf32, #tpu.memory_space<vmem>>, vector<1x1x1x6x6xf32>
    %145 = vector.shape_cast %144 : vector<1x1x1x6x6xf32> to vector<6x6xf32>
    %c0_240 = arith.constant 0 : index
    %c2_241 = arith.constant 2 : index
    %c3_242 = arith.constant 3 : index
    %c0_243 = arith.constant 0 : index
    %c1_244 = arith.constant 1 : index
    %146 = vector.load %arg1[%c0_240, %c2_241, %c3_242, %c0_243, %c1_244] : memref<1x4x4x7x7xf32, #tpu.memory_space<vmem>>, vector<1x1x1x6x6xf32>
    %147 = vector.shape_cast %146 : vector<1x1x1x6x6xf32> to vector<6x6xf32>
    %c0_245 = arith.constant 0 : index
    %c3_246 = arith.constant 3 : index
    %c0_247 = arith.constant 0 : index
    %c0_248 = arith.constant 0 : index
    %c0_249 = arith.constant 0 : index
    %148 = vector.load %arg1[%c0_245, %c3_246, %c0_247, %c0_248, %c0_249] : memref<1x4x4x7x7xf32, #tpu.memory_space<vmem>>, vector<1x1x1x6x6xf32>
    %149 = vector.shape_cast %148 : vector<1x1x1x6x6xf32> to vector<6x6xf32>
    %c0_250 = arith.constant 0 : index
    %c3_251 = arith.constant 3 : index
    %c1_252 = arith.constant 1 : index
    %c0_253 = arith.constant 0 : index
    %c0_254 = arith.constant 0 : index
    %150 = vector.load %arg1[%c0_250, %c3_251, %c1_252, %c0_253, %c0_254] : memref<1x4x4x7x7xf32, #tpu.memory_space<vmem>>, vector<1x1x1x6x6xf32>
    %151 = vector.shape_cast %150 : vector<1x1x1x6x6xf32> to vector<6x6xf32>
    %c0_255 = arith.constant 0 : index
    %c3_256 = arith.constant 3 : index
    %c2_257 = arith.constant 2 : index
    %c0_258 = arith.constant 0 : index
    %c0_259 = arith.constant 0 : index
    %152 = vector.load %arg1[%c0_255, %c3_256, %c2_257, %c0_258, %c0_259] : memref<1x4x4x7x7xf32, #tpu.memory_space<vmem>>, vector<1x1x1x6x6xf32>
    %153 = vector.shape_cast %152 : vector<1x1x1x6x6xf32> to vector<6x6xf32>
    %c0_260 = arith.constant 0 : index
    %c3_261 = arith.constant 3 : index
    %c3_262 = arith.constant 3 : index
    %c0_263 = arith.constant 0 : index
    %c0_264 = arith.constant 0 : index
    %154 = vector.load %arg1[%c0_260, %c3_261, %c3_262, %c0_263, %c0_264] : memref<1x4x4x7x7xf32, #tpu.memory_space<vmem>>, vector<1x1x1x6x6xf32>
    %155 = vector.shape_cast %154 : vector<1x1x1x6x6xf32> to vector<6x6xf32>
    %c0_265 = arith.constant 0 : index
    %c3_266 = arith.constant 3 : index
    %c0_267 = arith.constant 0 : index
    %c0_268 = arith.constant 0 : index
    %c1_269 = arith.constant 1 : index
    %156 = vector.load %arg1[%c0_265, %c3_266, %c0_267, %c0_268, %c1_269] : memref<1x4x4x7x7xf32, #tpu.memory_space<vmem>>, vector<1x1x1x6x6xf32>
    %157 = vector.shape_cast %156 : vector<1x1x1x6x6xf32> to vector<6x6xf32>
    %c0_270 = arith.constant 0 : index
    %c3_271 = arith.constant 3 : index
    %c1_272 = arith.constant 1 : index
    %c0_273 = arith.constant 0 : index
    %c1_274 = arith.constant 1 : index
    %158 = vector.load %arg1[%c0_270, %c3_271, %c1_272, %c0_273, %c1_274] : memref<1x4x4x7x7xf32, #tpu.memory_space<vmem>>, vector<1x1x1x6x6xf32>
    %159 = vector.shape_cast %158 : vector<1x1x1x6x6xf32> to vector<6x6xf32>
    %c0_275 = arith.constant 0 : index
    %c3_276 = arith.constant 3 : index
    %c2_277 = arith.constant 2 : index
    %c0_278 = arith.constant 0 : index
    %c1_279 = arith.constant 1 : index
    %160 = vector.load %arg1[%c0_275, %c3_276, %c2_277, %c0_278, %c1_279] : memref<1x4x4x7x7xf32, #tpu.memory_space<vmem>>, vector<1x1x1x6x6xf32>
    %161 = vector.shape_cast %160 : vector<1x1x1x6x6xf32> to vector<6x6xf32>
    %c0_280 = arith.constant 0 : index
    %c3_281 = arith.constant 3 : index
    %c3_282 = arith.constant 3 : index
    %c0_283 = arith.constant 0 : index
    %c1_284 = arith.constant 1 : index
    %162 = vector.load %arg1[%c0_280, %c3_281, %c3_282, %c0_283, %c1_284] : memref<1x4x4x7x7xf32, #tpu.memory_space<vmem>>, vector<1x1x1x6x6xf32>
    %163 = vector.shape_cast %162 : vector<1x1x1x6x6xf32> to vector<6x6xf32>
    %c0_285 = arith.constant 0 : index
    %c0_286 = arith.constant 0 : index
    %c0_287 = arith.constant 0 : index
    %c1_288 = arith.constant 1 : index
    %c0_289 = arith.constant 0 : index
    %164 = vector.load %arg1[%c0_285, %c0_286, %c0_287, %c1_288, %c0_289] : memref<1x4x4x7x7xf32, #tpu.memory_space<vmem>>, vector<1x1x1x6x6xf32>
    %165 = vector.shape_cast %164 : vector<1x1x1x6x6xf32> to vector<6x6xf32>
    %c0_290 = arith.constant 0 : index
    %c0_291 = arith.constant 0 : index
    %c1_292 = arith.constant 1 : index
    %c1_293 = arith.constant 1 : index
    %c0_294 = arith.constant 0 : index
    %166 = vector.load %arg1[%c0_290, %c0_291, %c1_292, %c1_293, %c0_294] : memref<1x4x4x7x7xf32, #tpu.memory_space<vmem>>, vector<1x1x1x6x6xf32>
    %167 = vector.shape_cast %166 : vector<1x1x1x6x6xf32> to vector<6x6xf32>
    %c0_295 = arith.constant 0 : index
    %c0_296 = arith.constant 0 : index
    %c2_297 = arith.constant 2 : index
    %c1_298 = arith.constant 1 : index
    %c0_299 = arith.constant 0 : index
    %168 = vector.load %arg1[%c0_295, %c0_296, %c2_297, %c1_298, %c0_299] : memref<1x4x4x7x7xf32, #tpu.memory_space<vmem>>, vector<1x1x1x6x6xf32>
    %169 = vector.shape_cast %168 : vector<1x1x1x6x6xf32> to vector<6x6xf32>
    %c0_300 = arith.constant 0 : index
    %c0_301 = arith.constant 0 : index
    %c3_302 = arith.constant 3 : index
    %c1_303 = arith.constant 1 : index
    %c0_304 = arith.constant 0 : index
    %170 = vector.load %arg1[%c0_300, %c0_301, %c3_302, %c1_303, %c0_304] : memref<1x4x4x7x7xf32, #tpu.memory_space<vmem>>, vector<1x1x1x6x6xf32>
    %171 = vector.shape_cast %170 : vector<1x1x1x6x6xf32> to vector<6x6xf32>
    %c0_305 = arith.constant 0 : index
    %c0_306 = arith.constant 0 : index
    %c0_307 = arith.constant 0 : index
    %c1_308 = arith.constant 1 : index
    %c1_309 = arith.constant 1 : index
    %172 = vector.load %arg1[%c0_305, %c0_306, %c0_307, %c1_308, %c1_309] : memref<1x4x4x7x7xf32, #tpu.memory_space<vmem>>, vector<1x1x1x6x6xf32>
    %173 = vector.shape_cast %172 : vector<1x1x1x6x6xf32> to vector<6x6xf32>
    %c0_310 = arith.constant 0 : index
    %c0_311 = arith.constant 0 : index
    %c1_312 = arith.constant 1 : index
    %c1_313 = arith.constant 1 : index
    %c1_314 = arith.constant 1 : index
    %174 = vector.load %arg1[%c0_310, %c0_311, %c1_312, %c1_313, %c1_314] : memref<1x4x4x7x7xf32, #tpu.memory_space<vmem>>, vector<1x1x1x6x6xf32>
    %175 = vector.shape_cast %174 : vector<1x1x1x6x6xf32> to vector<6x6xf32>
    %c0_315 = arith.constant 0 : index
    %c0_316 = arith.constant 0 : index
    %c2_317 = arith.constant 2 : index
    %c1_318 = arith.constant 1 : index
    %c1_319 = arith.constant 1 : index
    %176 = vector.load %arg1[%c0_315, %c0_316, %c2_317, %c1_318, %c1_319] : memref<1x4x4x7x7xf32, #tpu.memory_space<vmem>>, vector<1x1x1x6x6xf32>
    %177 = vector.shape_cast %176 : vector<1x1x1x6x6xf32> to vector<6x6xf32>
    %c0_320 = arith.constant 0 : index
    %c0_321 = arith.constant 0 : index
    %c3_322 = arith.constant 3 : index
    %c1_323 = arith.constant 1 : index
    %c1_324 = arith.constant 1 : index
    %178 = vector.load %arg1[%c0_320, %c0_321, %c3_322, %c1_323, %c1_324] : memref<1x4x4x7x7xf32, #tpu.memory_space<vmem>>, vector<1x1x1x6x6xf32>
    %179 = vector.shape_cast %178 : vector<1x1x1x6x6xf32> to vector<6x6xf32>
    %c0_325 = arith.constant 0 : index
    %c1_326 = arith.constant 1 : index
    %c0_327 = arith.constant 0 : index
    %c1_328 = arith.constant 1 : index
    %c0_329 = arith.constant 0 : index
    %180 = vector.load %arg1[%c0_325, %c1_326, %c0_327, %c1_328, %c0_329] : memref<1x4x4x7x7xf32, #tpu.memory_space<vmem>>, vector<1x1x1x6x6xf32>
    %181 = vector.shape_cast %180 : vector<1x1x1x6x6xf32> to vector<6x6xf32>
    %c0_330 = arith.constant 0 : index
    %c1_331 = arith.constant 1 : index
    %c1_332 = arith.constant 1 : index
    %c1_333 = arith.constant 1 : index
    %c0_334 = arith.constant 0 : index
    %182 = vector.load %arg1[%c0_330, %c1_331, %c1_332, %c1_333, %c0_334] : memref<1x4x4x7x7xf32, #tpu.memory_space<vmem>>, vector<1x1x1x6x6xf32>
    %183 = vector.shape_cast %182 : vector<1x1x1x6x6xf32> to vector<6x6xf32>
    %c0_335 = arith.constant 0 : index
    %c1_336 = arith.constant 1 : index
    %c2_337 = arith.constant 2 : index
    %c1_338 = arith.constant 1 : index
    %c0_339 = arith.constant 0 : index
    %184 = vector.load %arg1[%c0_335, %c1_336, %c2_337, %c1_338, %c0_339] : memref<1x4x4x7x7xf32, #tpu.memory_space<vmem>>, vector<1x1x1x6x6xf32>
    %185 = vector.shape_cast %184 : vector<1x1x1x6x6xf32> to vector<6x6xf32>
    %c0_340 = arith.constant 0 : index
    %c1_341 = arith.constant 1 : index
    %c3_342 = arith.constant 3 : index
    %c1_343 = arith.constant 1 : index
    %c0_344 = arith.constant 0 : index
    %186 = vector.load %arg1[%c0_340, %c1_341, %c3_342, %c1_343, %c0_344] : memref<1x4x4x7x7xf32, #tpu.memory_space<vmem>>, vector<1x1x1x6x6xf32>
    %187 = vector.shape_cast %186 : vector<1x1x1x6x6xf32> to vector<6x6xf32>
    %c0_345 = arith.constant 0 : index
    %c1_346 = arith.constant 1 : index
    %c0_347 = arith.constant 0 : index
    %c1_348 = arith.constant 1 : index
    %c1_349 = arith.constant 1 : index
    %188 = vector.load %arg1[%c0_345, %c1_346, %c0_347, %c1_348, %c1_349] : memref<1x4x4x7x7xf32, #tpu.memory_space<vmem>>, vector<1x1x1x6x6xf32>
    %189 = vector.shape_cast %188 : vector<1x1x1x6x6xf32> to vector<6x6xf32>
    %c0_350 = arith.constant 0 : index
    %c1_351 = arith.constant 1 : index
    %c1_352 = arith.constant 1 : index
    %c1_353 = arith.constant 1 : index
    %c1_354 = arith.constant 1 : index
    %190 = vector.load %arg1[%c0_350, %c1_351, %c1_352, %c1_353, %c1_354] : memref<1x4x4x7x7xf32, #tpu.memory_space<vmem>>, vector<1x1x1x6x6xf32>
    %191 = vector.shape_cast %190 : vector<1x1x1x6x6xf32> to vector<6x6xf32>
    %c0_355 = arith.constant 0 : index
    %c1_356 = arith.constant 1 : index
    %c2_357 = arith.constant 2 : index
    %c1_358 = arith.constant 1 : index
    %c1_359 = arith.constant 1 : index
    %192 = vector.load %arg1[%c0_355, %c1_356, %c2_357, %c1_358, %c1_359] : memref<1x4x4x7x7xf32, #tpu.memory_space<vmem>>, vector<1x1x1x6x6xf32>
    %193 = vector.shape_cast %192 : vector<1x1x1x6x6xf32> to vector<6x6xf32>
    %c0_360 = arith.constant 0 : index
    %c1_361 = arith.constant 1 : index
    %c3_362 = arith.constant 3 : index
    %c1_363 = arith.constant 1 : index
    %c1_364 = arith.constant 1 : index
    %194 = vector.load %arg1[%c0_360, %c1_361, %c3_362, %c1_363, %c1_364] : memref<1x4x4x7x7xf32, #tpu.memory_space<vmem>>, vector<1x1x1x6x6xf32>
    %195 = vector.shape_cast %194 : vector<1x1x1x6x6xf32> to vector<6x6xf32>
    %c0_365 = arith.constant 0 : index
    %c2_366 = arith.constant 2 : index
    %c0_367 = arith.constant 0 : index
    %c1_368 = arith.constant 1 : index
    %c0_369 = arith.constant 0 : index
    %196 = vector.load %arg1[%c0_365, %c2_366, %c0_367, %c1_368, %c0_369] : memref<1x4x4x7x7xf32, #tpu.memory_space<vmem>>, vector<1x1x1x6x6xf32>
    %197 = vector.shape_cast %196 : vector<1x1x1x6x6xf32> to vector<6x6xf32>
    %c0_370 = arith.constant 0 : index
    %c2_371 = arith.constant 2 : index
    %c1_372 = arith.constant 1 : index
    %c1_373 = arith.constant 1 : index
    %c0_374 = arith.constant 0 : index
    %198 = vector.load %arg1[%c0_370, %c2_371, %c1_372, %c1_373, %c0_374] : memref<1x4x4x7x7xf32, #tpu.memory_space<vmem>>, vector<1x1x1x6x6xf32>
    %199 = vector.shape_cast %198 : vector<1x1x1x6x6xf32> to vector<6x6xf32>
    %c0_375 = arith.constant 0 : index
    %c2_376 = arith.constant 2 : index
    %c2_377 = arith.constant 2 : index
    %c1_378 = arith.constant 1 : index
    %c0_379 = arith.constant 0 : index
    %200 = vector.load %arg1[%c0_375, %c2_376, %c2_377, %c1_378, %c0_379] : memref<1x4x4x7x7xf32, #tpu.memory_space<vmem>>, vector<1x1x1x6x6xf32>
    %201 = vector.shape_cast %200 : vector<1x1x1x6x6xf32> to vector<6x6xf32>
    %c0_380 = arith.constant 0 : index
    %c2_381 = arith.constant 2 : index
    %c3_382 = arith.constant 3 : index
    %c1_383 = arith.constant 1 : index
    %c0_384 = arith.constant 0 : index
    %202 = vector.load %arg1[%c0_380, %c2_381, %c3_382, %c1_383, %c0_384] : memref<1x4x4x7x7xf32, #tpu.memory_space<vmem>>, vector<1x1x1x6x6xf32>
    %203 = vector.shape_cast %202 : vector<1x1x1x6x6xf32> to vector<6x6xf32>
    %c0_385 = arith.constant 0 : index
    %c2_386 = arith.constant 2 : index
    %c0_387 = arith.constant 0 : index
    %c1_388 = arith.constant 1 : index
    %c1_389 = arith.constant 1 : index
    %204 = vector.load %arg1[%c0_385, %c2_386, %c0_387, %c1_388, %c1_389] : memref<1x4x4x7x7xf32, #tpu.memory_space<vmem>>, vector<1x1x1x6x6xf32>
    %205 = vector.shape_cast %204 : vector<1x1x1x6x6xf32> to vector<6x6xf32>
    %c0_390 = arith.constant 0 : index
    %c2_391 = arith.constant 2 : index
    %c1_392 = arith.constant 1 : index
    %c1_393 = arith.constant 1 : index
    %c1_394 = arith.constant 1 : index
    %206 = vector.load %arg1[%c0_390, %c2_391, %c1_392, %c1_393, %c1_394] : memref<1x4x4x7x7xf32, #tpu.memory_space<vmem>>, vector<1x1x1x6x6xf32>
    %207 = vector.shape_cast %206 : vector<1x1x1x6x6xf32> to vector<6x6xf32>
    %c0_395 = arith.constant 0 : index
    %c2_396 = arith.constant 2 : index
    %c2_397 = arith.constant 2 : index
    %c1_398 = arith.constant 1 : index
    %c1_399 = arith.constant 1 : index
    %208 = vector.load %arg1[%c0_395, %c2_396, %c2_397, %c1_398, %c1_399] : memref<1x4x4x7x7xf32, #tpu.memory_space<vmem>>, vector<1x1x1x6x6xf32>
    %209 = vector.shape_cast %208 : vector<1x1x1x6x6xf32> to vector<6x6xf32>
    %c0_400 = arith.constant 0 : index
    %c2_401 = arith.constant 2 : index
    %c3_402 = arith.constant 3 : index
    %c1_403 = arith.constant 1 : index
    %c1_404 = arith.constant 1 : index
    %210 = vector.load %arg1[%c0_400, %c2_401, %c3_402, %c1_403, %c1_404] : memref<1x4x4x7x7xf32, #tpu.memory_space<vmem>>, vector<1x1x1x6x6xf32>
    %211 = vector.shape_cast %210 : vector<1x1x1x6x6xf32> to vector<6x6xf32>
    %c0_405 = arith.constant 0 : index
    %c3_406 = arith.constant 3 : index
    %c0_407 = arith.constant 0 : index
    %c1_408 = arith.constant 1 : index
    %c0_409 = arith.constant 0 : index
    %212 = vector.load %arg1[%c0_405, %c3_406, %c0_407, %c1_408, %c0_409] : memref<1x4x4x7x7xf32, #tpu.memory_space<vmem>>, vector<1x1x1x6x6xf32>
    %213 = vector.shape_cast %212 : vector<1x1x1x6x6xf32> to vector<6x6xf32>
    %c0_410 = arith.constant 0 : index
    %c3_411 = arith.constant 3 : index
    %c1_412 = arith.constant 1 : index
    %c1_413 = arith.constant 1 : index
    %c0_414 = arith.constant 0 : index
    %214 = vector.load %arg1[%c0_410, %c3_411, %c1_412, %c1_413, %c0_414] : memref<1x4x4x7x7xf32, #tpu.memory_space<vmem>>, vector<1x1x1x6x6xf32>
    %215 = vector.shape_cast %214 : vector<1x1x1x6x6xf32> to vector<6x6xf32>
    %c0_415 = arith.constant 0 : index
    %c3_416 = arith.constant 3 : index
    %c2_417 = arith.constant 2 : index
    %c1_418 = arith.constant 1 : index
    %c0_419 = arith.constant 0 : index
    %216 = vector.load %arg1[%c0_415, %c3_416, %c2_417, %c1_418, %c0_419] : memref<1x4x4x7x7xf32, #tpu.memory_space<vmem>>, vector<1x1x1x6x6xf32>
    %217 = vector.shape_cast %216 : vector<1x1x1x6x6xf32> to vector<6x6xf32>
    %c0_420 = arith.constant 0 : index
    %c3_421 = arith.constant 3 : index
    %c3_422 = arith.constant 3 : index
    %c1_423 = arith.constant 1 : index
    %c0_424 = arith.constant 0 : index
    %218 = vector.load %arg1[%c0_420, %c3_421, %c3_422, %c1_423, %c0_424] : memref<1x4x4x7x7xf32, #tpu.memory_space<vmem>>, vector<1x1x1x6x6xf32>
    %219 = vector.shape_cast %218 : vector<1x1x1x6x6xf32> to vector<6x6xf32>
    %c0_425 = arith.constant 0 : index
    %c3_426 = arith.constant 3 : index
    %c0_427 = arith.constant 0 : index
    %c1_428 = arith.constant 1 : index
    %c1_429 = arith.constant 1 : index
    %220 = vector.load %arg1[%c0_425, %c3_426, %c0_427, %c1_428, %c1_429] : memref<1x4x4x7x7xf32, #tpu.memory_space<vmem>>, vector<1x1x1x6x6xf32>
    %221 = vector.shape_cast %220 : vector<1x1x1x6x6xf32> to vector<6x6xf32>
    %c0_430 = arith.constant 0 : index
    %c3_431 = arith.constant 3 : index
    %c1_432 = arith.constant 1 : index
    %c1_433 = arith.constant 1 : index
    %c1_434 = arith.constant 1 : index
    %222 = vector.load %arg1[%c0_430, %c3_431, %c1_432, %c1_433, %c1_434] : memref<1x4x4x7x7xf32, #tpu.memory_space<vmem>>, vector<1x1x1x6x6xf32>
    %223 = vector.shape_cast %222 : vector<1x1x1x6x6xf32> to vector<6x6xf32>
    %c0_435 = arith.constant 0 : index
    %c3_436 = arith.constant 3 : index
    %c2_437 = arith.constant 2 : index
    %c1_438 = arith.constant 1 : index
    %c1_439 = arith.constant 1 : index
    %224 = vector.load %arg1[%c0_435, %c3_436, %c2_437, %c1_438, %c1_439] : memref<1x4x4x7x7xf32, #tpu.memory_space<vmem>>, vector<1x1x1x6x6xf32>
    %225 = vector.shape_cast %224 : vector<1x1x1x6x6xf32> to vector<6x6xf32>
    %c0_440 = arith.constant 0 : index
    %c3_441 = arith.constant 3 : index
    %c3_442 = arith.constant 3 : index
    %c1_443 = arith.constant 1 : index
    %c1_444 = arith.constant 1 : index
    %226 = vector.load %arg1[%c0_440, %c3_441, %c3_442, %c1_443, %c1_444] : memref<1x4x4x7x7xf32, #tpu.memory_space<vmem>>, vector<1x1x1x6x6xf32>
    %227 = vector.shape_cast %226 : vector<1x1x1x6x6xf32> to vector<6x6xf32>
    %c0_445 = arith.constant 0 : index
    %c0_446 = arith.constant 0 : index
    %228 = vector.load %arg3[%c0_445, %c0_446] : memref<1x60xf32, #tpu.memory_space<vmem>>, vector<1x60xf32>
    %cst = arith.constant dense<0.000000e+00> : vector<6x60xf32>
    %229 = tpu.matmul %101, %1, %cst {dimension_numbers = #tpu.dot_dimension_numbers<[1], [0], [0], [1], [0, 0, 1, 1], [], []>} : vector<6x6xf32>, vector<6x60xf32>, vector<6x60xf32> -> vector<6x60xf32>
    %cst_447 = arith.constant dense<0.000000e+00> : vector<6x60xf32>
    %230 = tpu.matmul %103, %3, %cst_447 {dimension_numbers = #tpu.dot_dimension_numbers<[1], [0], [0], [1], [0, 0, 1, 1], [], []>} : vector<6x6xf32>, vector<6x60xf32>, vector<6x60xf32> -> vector<6x60xf32>
    %231 = arith.addf %229, %230 : vector<6x60xf32>
    %cst_448 = arith.constant dense<0.000000e+00> : vector<6x60xf32>
    %232 = tpu.matmul %105, %5, %cst_448 {dimension_numbers = #tpu.dot_dimension_numbers<[1], [0], [0], [1], [0, 0, 1, 1], [], []>} : vector<6x6xf32>, vector<6x60xf32>, vector<6x60xf32> -> vector<6x60xf32>
    %233 = arith.addf %231, %232 : vector<6x60xf32>
    %cst_449 = arith.constant dense<0.000000e+00> : vector<6x60xf32>
    %234 = tpu.matmul %107, %7, %cst_449 {dimension_numbers = #tpu.dot_dimension_numbers<[1], [0], [0], [1], [0, 0, 1, 1], [], []>} : vector<6x6xf32>, vector<6x60xf32>, vector<6x60xf32> -> vector<6x60xf32>
    %235 = arith.addf %233, %234 : vector<6x60xf32>
    %cst_450 = arith.constant dense<0.000000e+00> : vector<6x60xf32>
    %236 = tpu.matmul %109, %9, %cst_450 {dimension_numbers = #tpu.dot_dimension_numbers<[1], [0], [0], [1], [0, 0, 1, 1], [], []>} : vector<6x6xf32>, vector<6x60xf32>, vector<6x60xf32> -> vector<6x60xf32>
    %237 = arith.addf %235, %236 : vector<6x60xf32>
    %cst_451 = arith.constant dense<0.000000e+00> : vector<6x60xf32>
    %238 = tpu.matmul %117, %11, %cst_451 {dimension_numbers = #tpu.dot_dimension_numbers<[1], [0], [0], [1], [0, 0, 1, 1], [], []>} : vector<6x6xf32>, vector<6x60xf32>, vector<6x60xf32> -> vector<6x60xf32>
    %239 = arith.addf %237, %238 : vector<6x60xf32>
    %cst_452 = arith.constant dense<0.000000e+00> : vector<6x60xf32>
    %240 = tpu.matmul %119, %13, %cst_452 {dimension_numbers = #tpu.dot_dimension_numbers<[1], [0], [0], [1], [0, 0, 1, 1], [], []>} : vector<6x6xf32>, vector<6x60xf32>, vector<6x60xf32> -> vector<6x60xf32>
    %241 = arith.addf %239, %240 : vector<6x60xf32>
    %cst_453 = arith.constant dense<0.000000e+00> : vector<6x60xf32>
    %242 = tpu.matmul %121, %15, %cst_453 {dimension_numbers = #tpu.dot_dimension_numbers<[1], [0], [0], [1], [0, 0, 1, 1], [], []>} : vector<6x6xf32>, vector<6x60xf32>, vector<6x60xf32> -> vector<6x60xf32>
    %243 = arith.addf %241, %242 : vector<6x60xf32>
    %cst_454 = arith.constant dense<0.000000e+00> : vector<6x60xf32>
    %244 = tpu.matmul %123, %17, %cst_454 {dimension_numbers = #tpu.dot_dimension_numbers<[1], [0], [0], [1], [0, 0, 1, 1], [], []>} : vector<6x6xf32>, vector<6x60xf32>, vector<6x60xf32> -> vector<6x60xf32>
    %245 = arith.addf %243, %244 : vector<6x60xf32>
    %cst_455 = arith.constant dense<0.000000e+00> : vector<6x60xf32>
    %246 = tpu.matmul %125, %19, %cst_455 {dimension_numbers = #tpu.dot_dimension_numbers<[1], [0], [0], [1], [0, 0, 1, 1], [], []>} : vector<6x6xf32>, vector<6x60xf32>, vector<6x60xf32> -> vector<6x60xf32>
    %247 = arith.addf %245, %246 : vector<6x60xf32>
    %cst_456 = arith.constant dense<0.000000e+00> : vector<6x60xf32>
    %248 = tpu.matmul %133, %21, %cst_456 {dimension_numbers = #tpu.dot_dimension_numbers<[1], [0], [0], [1], [0, 0, 1, 1], [], []>} : vector<6x6xf32>, vector<6x60xf32>, vector<6x60xf32> -> vector<6x60xf32>
    %249 = arith.addf %247, %248 : vector<6x60xf32>
    %cst_457 = arith.constant dense<0.000000e+00> : vector<6x60xf32>
    %250 = tpu.matmul %135, %23, %cst_457 {dimension_numbers = #tpu.dot_dimension_numbers<[1], [0], [0], [1], [0, 0, 1, 1], [], []>} : vector<6x6xf32>, vector<6x60xf32>, vector<6x60xf32> -> vector<6x60xf32>
    %251 = arith.addf %249, %250 : vector<6x60xf32>
    %cst_458 = arith.constant dense<0.000000e+00> : vector<6x60xf32>
    %252 = tpu.matmul %137, %25, %cst_458 {dimension_numbers = #tpu.dot_dimension_numbers<[1], [0], [0], [1], [0, 0, 1, 1], [], []>} : vector<6x6xf32>, vector<6x60xf32>, vector<6x60xf32> -> vector<6x60xf32>
    %253 = arith.addf %251, %252 : vector<6x60xf32>
    %cst_459 = arith.constant dense<0.000000e+00> : vector<6x60xf32>
    %254 = tpu.matmul %139, %27, %cst_459 {dimension_numbers = #tpu.dot_dimension_numbers<[1], [0], [0], [1], [0, 0, 1, 1], [], []>} : vector<6x6xf32>, vector<6x60xf32>, vector<6x60xf32> -> vector<6x60xf32>
    %255 = arith.addf %253, %254 : vector<6x60xf32>
    %cst_460 = arith.constant dense<0.000000e+00> : vector<6x60xf32>
    %256 = tpu.matmul %141, %29, %cst_460 {dimension_numbers = #tpu.dot_dimension_numbers<[1], [0], [0], [1], [0, 0, 1, 1], [], []>} : vector<6x6xf32>, vector<6x60xf32>, vector<6x60xf32> -> vector<6x60xf32>
    %257 = arith.addf %255, %256 : vector<6x60xf32>
    %cst_461 = arith.constant dense<0.000000e+00> : vector<6x60xf32>
    %258 = tpu.matmul %149, %31, %cst_461 {dimension_numbers = #tpu.dot_dimension_numbers<[1], [0], [0], [1], [0, 0, 1, 1], [], []>} : vector<6x6xf32>, vector<6x60xf32>, vector<6x60xf32> -> vector<6x60xf32>
    %259 = arith.addf %257, %258 : vector<6x60xf32>
    %cst_462 = arith.constant dense<0.000000e+00> : vector<6x60xf32>
    %260 = tpu.matmul %151, %33, %cst_462 {dimension_numbers = #tpu.dot_dimension_numbers<[1], [0], [0], [1], [0, 0, 1, 1], [], []>} : vector<6x6xf32>, vector<6x60xf32>, vector<6x60xf32> -> vector<6x60xf32>
    %261 = arith.addf %259, %260 : vector<6x60xf32>
    %cst_463 = arith.constant dense<0.000000e+00> : vector<6x60xf32>
    %262 = tpu.matmul %153, %35, %cst_463 {dimension_numbers = #tpu.dot_dimension_numbers<[1], [0], [0], [1], [0, 0, 1, 1], [], []>} : vector<6x6xf32>, vector<6x60xf32>, vector<6x60xf32> -> vector<6x60xf32>
    %263 = arith.addf %261, %262 : vector<6x60xf32>
    %cst_464 = arith.constant dense<0.000000e+00> : vector<6x60xf32>
    %264 = tpu.matmul %155, %37, %cst_464 {dimension_numbers = #tpu.dot_dimension_numbers<[1], [0], [0], [1], [0, 0, 1, 1], [], []>} : vector<6x6xf32>, vector<6x60xf32>, vector<6x60xf32> -> vector<6x60xf32>
    %265 = arith.addf %263, %264 : vector<6x60xf32>
    %cst_465 = arith.constant dense<0.000000e+00> : vector<6x60xf32>
    %266 = tpu.matmul %157, %39, %cst_465 {dimension_numbers = #tpu.dot_dimension_numbers<[1], [0], [0], [1], [0, 0, 1, 1], [], []>} : vector<6x6xf32>, vector<6x60xf32>, vector<6x60xf32> -> vector<6x60xf32>
    %267 = arith.addf %265, %266 : vector<6x60xf32>
    %cst_466 = arith.constant dense<0.000000e+00> : vector<6x60xf32>
    %268 = tpu.matmul %165, %41, %cst_466 {dimension_numbers = #tpu.dot_dimension_numbers<[1], [0], [0], [1], [0, 0, 1, 1], [], []>} : vector<6x6xf32>, vector<6x60xf32>, vector<6x60xf32> -> vector<6x60xf32>
    %269 = arith.addf %267, %268 : vector<6x60xf32>
    %cst_467 = arith.constant dense<0.000000e+00> : vector<6x60xf32>
    %270 = tpu.matmul %167, %43, %cst_467 {dimension_numbers = #tpu.dot_dimension_numbers<[1], [0], [0], [1], [0, 0, 1, 1], [], []>} : vector<6x6xf32>, vector<6x60xf32>, vector<6x60xf32> -> vector<6x60xf32>
    %271 = arith.addf %269, %270 : vector<6x60xf32>
    %cst_468 = arith.constant dense<0.000000e+00> : vector<6x60xf32>
    %272 = tpu.matmul %169, %45, %cst_468 {dimension_numbers = #tpu.dot_dimension_numbers<[1], [0], [0], [1], [0, 0, 1, 1], [], []>} : vector<6x6xf32>, vector<6x60xf32>, vector<6x60xf32> -> vector<6x60xf32>
    %273 = arith.addf %271, %272 : vector<6x60xf32>
    %cst_469 = arith.constant dense<0.000000e+00> : vector<6x60xf32>
    %274 = tpu.matmul %171, %47, %cst_469 {dimension_numbers = #tpu.dot_dimension_numbers<[1], [0], [0], [1], [0, 0, 1, 1], [], []>} : vector<6x6xf32>, vector<6x60xf32>, vector<6x60xf32> -> vector<6x60xf32>
    %275 = arith.addf %273, %274 : vector<6x60xf32>
    %cst_470 = arith.constant dense<0.000000e+00> : vector<6x60xf32>
    %276 = tpu.matmul %173, %49, %cst_470 {dimension_numbers = #tpu.dot_dimension_numbers<[1], [0], [0], [1], [0, 0, 1, 1], [], []>} : vector<6x6xf32>, vector<6x60xf32>, vector<6x60xf32> -> vector<6x60xf32>
    %277 = arith.addf %275, %276 : vector<6x60xf32>
    %cst_471 = arith.constant dense<0.000000e+00> : vector<6x60xf32>
    %278 = tpu.matmul %103, %1, %cst_471 {dimension_numbers = #tpu.dot_dimension_numbers<[1], [0], [0], [1], [0, 0, 1, 1], [], []>} : vector<6x6xf32>, vector<6x60xf32>, vector<6x60xf32> -> vector<6x60xf32>
    %cst_472 = arith.constant dense<0.000000e+00> : vector<6x60xf32>
    %279 = tpu.matmul %105, %3, %cst_472 {dimension_numbers = #tpu.dot_dimension_numbers<[1], [0], [0], [1], [0, 0, 1, 1], [], []>} : vector<6x6xf32>, vector<6x60xf32>, vector<6x60xf32> -> vector<6x60xf32>
    %280 = arith.addf %278, %279 : vector<6x60xf32>
    %cst_473 = arith.constant dense<0.000000e+00> : vector<6x60xf32>
    %281 = tpu.matmul %107, %5, %cst_473 {dimension_numbers = #tpu.dot_dimension_numbers<[1], [0], [0], [1], [0, 0, 1, 1], [], []>} : vector<6x6xf32>, vector<6x60xf32>, vector<6x60xf32> -> vector<6x60xf32>
    %282 = arith.addf %280, %281 : vector<6x60xf32>
    %cst_474 = arith.constant dense<0.000000e+00> : vector<6x60xf32>
    %283 = tpu.matmul %109, %7, %cst_474 {dimension_numbers = #tpu.dot_dimension_numbers<[1], [0], [0], [1], [0, 0, 1, 1], [], []>} : vector<6x6xf32>, vector<6x60xf32>, vector<6x60xf32> -> vector<6x60xf32>
    %284 = arith.addf %282, %283 : vector<6x60xf32>
    %cst_475 = arith.constant dense<0.000000e+00> : vector<6x60xf32>
    %285 = tpu.matmul %111, %9, %cst_475 {dimension_numbers = #tpu.dot_dimension_numbers<[1], [0], [0], [1], [0, 0, 1, 1], [], []>} : vector<6x6xf32>, vector<6x60xf32>, vector<6x60xf32> -> vector<6x60xf32>
    %286 = arith.addf %284, %285 : vector<6x60xf32>
    %cst_476 = arith.constant dense<0.000000e+00> : vector<6x60xf32>
    %287 = tpu.matmul %119, %11, %cst_476 {dimension_numbers = #tpu.dot_dimension_numbers<[1], [0], [0], [1], [0, 0, 1, 1], [], []>} : vector<6x6xf32>, vector<6x60xf32>, vector<6x60xf32> -> vector<6x60xf32>
    %288 = arith.addf %286, %287 : vector<6x60xf32>
    %cst_477 = arith.constant dense<0.000000e+00> : vector<6x60xf32>
    %289 = tpu.matmul %121, %13, %cst_477 {dimension_numbers = #tpu.dot_dimension_numbers<[1], [0], [0], [1], [0, 0, 1, 1], [], []>} : vector<6x6xf32>, vector<6x60xf32>, vector<6x60xf32> -> vector<6x60xf32>
    %290 = arith.addf %288, %289 : vector<6x60xf32>
    %cst_478 = arith.constant dense<0.000000e+00> : vector<6x60xf32>
    %291 = tpu.matmul %123, %15, %cst_478 {dimension_numbers = #tpu.dot_dimension_numbers<[1], [0], [0], [1], [0, 0, 1, 1], [], []>} : vector<6x6xf32>, vector<6x60xf32>, vector<6x60xf32> -> vector<6x60xf32>
    %292 = arith.addf %290, %291 : vector<6x60xf32>
    %cst_479 = arith.constant dense<0.000000e+00> : vector<6x60xf32>
    %293 = tpu.matmul %125, %17, %cst_479 {dimension_numbers = #tpu.dot_dimension_numbers<[1], [0], [0], [1], [0, 0, 1, 1], [], []>} : vector<6x6xf32>, vector<6x60xf32>, vector<6x60xf32> -> vector<6x60xf32>
    %294 = arith.addf %292, %293 : vector<6x60xf32>
    %cst_480 = arith.constant dense<0.000000e+00> : vector<6x60xf32>
    %295 = tpu.matmul %127, %19, %cst_480 {dimension_numbers = #tpu.dot_dimension_numbers<[1], [0], [0], [1], [0, 0, 1, 1], [], []>} : vector<6x6xf32>, vector<6x60xf32>, vector<6x60xf32> -> vector<6x60xf32>
    %296 = arith.addf %294, %295 : vector<6x60xf32>
    %cst_481 = arith.constant dense<0.000000e+00> : vector<6x60xf32>
    %297 = tpu.matmul %135, %21, %cst_481 {dimension_numbers = #tpu.dot_dimension_numbers<[1], [0], [0], [1], [0, 0, 1, 1], [], []>} : vector<6x6xf32>, vector<6x60xf32>, vector<6x60xf32> -> vector<6x60xf32>
    %298 = arith.addf %296, %297 : vector<6x60xf32>
    %cst_482 = arith.constant dense<0.000000e+00> : vector<6x60xf32>
    %299 = tpu.matmul %137, %23, %cst_482 {dimension_numbers = #tpu.dot_dimension_numbers<[1], [0], [0], [1], [0, 0, 1, 1], [], []>} : vector<6x6xf32>, vector<6x60xf32>, vector<6x60xf32> -> vector<6x60xf32>
    %300 = arith.addf %298, %299 : vector<6x60xf32>
    %cst_483 = arith.constant dense<0.000000e+00> : vector<6x60xf32>
    %301 = tpu.matmul %139, %25, %cst_483 {dimension_numbers = #tpu.dot_dimension_numbers<[1], [0], [0], [1], [0, 0, 1, 1], [], []>} : vector<6x6xf32>, vector<6x60xf32>, vector<6x60xf32> -> vector<6x60xf32>
    %302 = arith.addf %300, %301 : vector<6x60xf32>
    %cst_484 = arith.constant dense<0.000000e+00> : vector<6x60xf32>
    %303 = tpu.matmul %141, %27, %cst_484 {dimension_numbers = #tpu.dot_dimension_numbers<[1], [0], [0], [1], [0, 0, 1, 1], [], []>} : vector<6x6xf32>, vector<6x60xf32>, vector<6x60xf32> -> vector<6x60xf32>
    %304 = arith.addf %302, %303 : vector<6x60xf32>
    %cst_485 = arith.constant dense<0.000000e+00> : vector<6x60xf32>
    %305 = tpu.matmul %143, %29, %cst_485 {dimension_numbers = #tpu.dot_dimension_numbers<[1], [0], [0], [1], [0, 0, 1, 1], [], []>} : vector<6x6xf32>, vector<6x60xf32>, vector<6x60xf32> -> vector<6x60xf32>
    %306 = arith.addf %304, %305 : vector<6x60xf32>
    %cst_486 = arith.constant dense<0.000000e+00> : vector<6x60xf32>
    %307 = tpu.matmul %151, %31, %cst_486 {dimension_numbers = #tpu.dot_dimension_numbers<[1], [0], [0], [1], [0, 0, 1, 1], [], []>} : vector<6x6xf32>, vector<6x60xf32>, vector<6x60xf32> -> vector<6x60xf32>
    %308 = arith.addf %306, %307 : vector<6x60xf32>
    %cst_487 = arith.constant dense<0.000000e+00> : vector<6x60xf32>
    %309 = tpu.matmul %153, %33, %cst_487 {dimension_numbers = #tpu.dot_dimension_numbers<[1], [0], [0], [1], [0, 0, 1, 1], [], []>} : vector<6x6xf32>, vector<6x60xf32>, vector<6x60xf32> -> vector<6x60xf32>
    %310 = arith.addf %308, %309 : vector<6x60xf32>
    %cst_488 = arith.constant dense<0.000000e+00> : vector<6x60xf32>
    %311 = tpu.matmul %155, %35, %cst_488 {dimension_numbers = #tpu.dot_dimension_numbers<[1], [0], [0], [1], [0, 0, 1, 1], [], []>} : vector<6x6xf32>, vector<6x60xf32>, vector<6x60xf32> -> vector<6x60xf32>
    %312 = arith.addf %310, %311 : vector<6x60xf32>
    %cst_489 = arith.constant dense<0.000000e+00> : vector<6x60xf32>
    %313 = tpu.matmul %157, %37, %cst_489 {dimension_numbers = #tpu.dot_dimension_numbers<[1], [0], [0], [1], [0, 0, 1, 1], [], []>} : vector<6x6xf32>, vector<6x60xf32>, vector<6x60xf32> -> vector<6x60xf32>
    %314 = arith.addf %312, %313 : vector<6x60xf32>
    %cst_490 = arith.constant dense<0.000000e+00> : vector<6x60xf32>
    %315 = tpu.matmul %159, %39, %cst_490 {dimension_numbers = #tpu.dot_dimension_numbers<[1], [0], [0], [1], [0, 0, 1, 1], [], []>} : vector<6x6xf32>, vector<6x60xf32>, vector<6x60xf32> -> vector<6x60xf32>
    %316 = arith.addf %314, %315 : vector<6x60xf32>
    %cst_491 = arith.constant dense<0.000000e+00> : vector<6x60xf32>
    %317 = tpu.matmul %167, %41, %cst_491 {dimension_numbers = #tpu.dot_dimension_numbers<[1], [0], [0], [1], [0, 0, 1, 1], [], []>} : vector<6x6xf32>, vector<6x60xf32>, vector<6x60xf32> -> vector<6x60xf32>
    %318 = arith.addf %316, %317 : vector<6x60xf32>
    %cst_492 = arith.constant dense<0.000000e+00> : vector<6x60xf32>
    %319 = tpu.matmul %169, %43, %cst_492 {dimension_numbers = #tpu.dot_dimension_numbers<[1], [0], [0], [1], [0, 0, 1, 1], [], []>} : vector<6x6xf32>, vector<6x60xf32>, vector<6x60xf32> -> vector<6x60xf32>
    %320 = arith.addf %318, %319 : vector<6x60xf32>
    %cst_493 = arith.constant dense<0.000000e+00> : vector<6x60xf32>
    %321 = tpu.matmul %171, %45, %cst_493 {dimension_numbers = #tpu.dot_dimension_numbers<[1], [0], [0], [1], [0, 0, 1, 1], [], []>} : vector<6x6xf32>, vector<6x60xf32>, vector<6x60xf32> -> vector<6x60xf32>
    %322 = arith.addf %320, %321 : vector<6x60xf32>
    %cst_494 = arith.constant dense<0.000000e+00> : vector<6x60xf32>
    %323 = tpu.matmul %173, %47, %cst_494 {dimension_numbers = #tpu.dot_dimension_numbers<[1], [0], [0], [1], [0, 0, 1, 1], [], []>} : vector<6x6xf32>, vector<6x60xf32>, vector<6x60xf32> -> vector<6x60xf32>
    %324 = arith.addf %322, %323 : vector<6x60xf32>
    %cst_495 = arith.constant dense<0.000000e+00> : vector<6x60xf32>
    %325 = tpu.matmul %175, %49, %cst_495 {dimension_numbers = #tpu.dot_dimension_numbers<[1], [0], [0], [1], [0, 0, 1, 1], [], []>} : vector<6x6xf32>, vector<6x60xf32>, vector<6x60xf32> -> vector<6x60xf32>
    %326 = arith.addf %324, %325 : vector<6x60xf32>
    %327 = arith.maximumf %277, %326 : vector<6x60xf32>
    %cst_496 = arith.constant dense<0.000000e+00> : vector<6x60xf32>
    %328 = tpu.matmul %117, %1, %cst_496 {dimension_numbers = #tpu.dot_dimension_numbers<[1], [0], [0], [1], [0, 0, 1, 1], [], []>} : vector<6x6xf32>, vector<6x60xf32>, vector<6x60xf32> -> vector<6x60xf32>
    %cst_497 = arith.constant dense<0.000000e+00> : vector<6x60xf32>
    %329 = tpu.matmul %119, %3, %cst_497 {dimension_numbers = #tpu.dot_dimension_numbers<[1], [0], [0], [1], [0, 0, 1, 1], [], []>} : vector<6x6xf32>, vector<6x60xf32>, vector<6x60xf32> -> vector<6x60xf32>
    %330 = arith.addf %328, %329 : vector<6x60xf32>
    %cst_498 = arith.constant dense<0.000000e+00> : vector<6x60xf32>
    %331 = tpu.matmul %121, %5, %cst_498 {dimension_numbers = #tpu.dot_dimension_numbers<[1], [0], [0], [1], [0, 0, 1, 1], [], []>} : vector<6x6xf32>, vector<6x60xf32>, vector<6x60xf32> -> vector<6x60xf32>
    %332 = arith.addf %330, %331 : vector<6x60xf32>
    %cst_499 = arith.constant dense<0.000000e+00> : vector<6x60xf32>
    %333 = tpu.matmul %123, %7, %cst_499 {dimension_numbers = #tpu.dot_dimension_numbers<[1], [0], [0], [1], [0, 0, 1, 1], [], []>} : vector<6x6xf32>, vector<6x60xf32>, vector<6x60xf32> -> vector<6x60xf32>
    %334 = arith.addf %332, %333 : vector<6x60xf32>
    %cst_500 = arith.constant dense<0.000000e+00> : vector<6x60xf32>
    %335 = tpu.matmul %125, %9, %cst_500 {dimension_numbers = #tpu.dot_dimension_numbers<[1], [0], [0], [1], [0, 0, 1, 1], [], []>} : vector<6x6xf32>, vector<6x60xf32>, vector<6x60xf32> -> vector<6x60xf32>
    %336 = arith.addf %334, %335 : vector<6x60xf32>
    %cst_501 = arith.constant dense<0.000000e+00> : vector<6x60xf32>
    %337 = tpu.matmul %133, %11, %cst_501 {dimension_numbers = #tpu.dot_dimension_numbers<[1], [0], [0], [1], [0, 0, 1, 1], [], []>} : vector<6x6xf32>, vector<6x60xf32>, vector<6x60xf32> -> vector<6x60xf32>
    %338 = arith.addf %336, %337 : vector<6x60xf32>
    %cst_502 = arith.constant dense<0.000000e+00> : vector<6x60xf32>
    %339 = tpu.matmul %135, %13, %cst_502 {dimension_numbers = #tpu.dot_dimension_numbers<[1], [0], [0], [1], [0, 0, 1, 1], [], []>} : vector<6x6xf32>, vector<6x60xf32>, vector<6x60xf32> -> vector<6x60xf32>
    %340 = arith.addf %338, %339 : vector<6x60xf32>
    %cst_503 = arith.constant dense<0.000000e+00> : vector<6x60xf32>
    %341 = tpu.matmul %137, %15, %cst_503 {dimension_numbers = #tpu.dot_dimension_numbers<[1], [0], [0], [1], [0, 0, 1, 1], [], []>} : vector<6x6xf32>, vector<6x60xf32>, vector<6x60xf32> -> vector<6x60xf32>
    %342 = arith.addf %340, %341 : vector<6x60xf32>
    %cst_504 = arith.constant dense<0.000000e+00> : vector<6x60xf32>
    %343 = tpu.matmul %139, %17, %cst_504 {dimension_numbers = #tpu.dot_dimension_numbers<[1], [0], [0], [1], [0, 0, 1, 1], [], []>} : vector<6x6xf32>, vector<6x60xf32>, vector<6x60xf32> -> vector<6x60xf32>
    %344 = arith.addf %342, %343 : vector<6x60xf32>
    %cst_505 = arith.constant dense<0.000000e+00> : vector<6x60xf32>
    %345 = tpu.matmul %141, %19, %cst_505 {dimension_numbers = #tpu.dot_dimension_numbers<[1], [0], [0], [1], [0, 0, 1, 1], [], []>} : vector<6x6xf32>, vector<6x60xf32>, vector<6x60xf32> -> vector<6x60xf32>
    %346 = arith.addf %344, %345 : vector<6x60xf32>
    %cst_506 = arith.constant dense<0.000000e+00> : vector<6x60xf32>
    %347 = tpu.matmul %149, %21, %cst_506 {dimension_numbers = #tpu.dot_dimension_numbers<[1], [0], [0], [1], [0, 0, 1, 1], [], []>} : vector<6x6xf32>, vector<6x60xf32>, vector<6x60xf32> -> vector<6x60xf32>
    %348 = arith.addf %346, %347 : vector<6x60xf32>
    %cst_507 = arith.constant dense<0.000000e+00> : vector<6x60xf32>
    %349 = tpu.matmul %151, %23, %cst_507 {dimension_numbers = #tpu.dot_dimension_numbers<[1], [0], [0], [1], [0, 0, 1, 1], [], []>} : vector<6x6xf32>, vector<6x60xf32>, vector<6x60xf32> -> vector<6x60xf32>
    %350 = arith.addf %348, %349 : vector<6x60xf32>
    %cst_508 = arith.constant dense<0.000000e+00> : vector<6x60xf32>
    %351 = tpu.matmul %153, %25, %cst_508 {dimension_numbers = #tpu.dot_dimension_numbers<[1], [0], [0], [1], [0, 0, 1, 1], [], []>} : vector<6x6xf32>, vector<6x60xf32>, vector<6x60xf32> -> vector<6x60xf32>
    %352 = arith.addf %350, %351 : vector<6x60xf32>
    %cst_509 = arith.constant dense<0.000000e+00> : vector<6x60xf32>
    %353 = tpu.matmul %155, %27, %cst_509 {dimension_numbers = #tpu.dot_dimension_numbers<[1], [0], [0], [1], [0, 0, 1, 1], [], []>} : vector<6x6xf32>, vector<6x60xf32>, vector<6x60xf32> -> vector<6x60xf32>
    %354 = arith.addf %352, %353 : vector<6x60xf32>
    %cst_510 = arith.constant dense<0.000000e+00> : vector<6x60xf32>
    %355 = tpu.matmul %157, %29, %cst_510 {dimension_numbers = #tpu.dot_dimension_numbers<[1], [0], [0], [1], [0, 0, 1, 1], [], []>} : vector<6x6xf32>, vector<6x60xf32>, vector<6x60xf32> -> vector<6x60xf32>
    %356 = arith.addf %354, %355 : vector<6x60xf32>
    %cst_511 = arith.constant dense<0.000000e+00> : vector<6x60xf32>
    %357 = tpu.matmul %165, %31, %cst_511 {dimension_numbers = #tpu.dot_dimension_numbers<[1], [0], [0], [1], [0, 0, 1, 1], [], []>} : vector<6x6xf32>, vector<6x60xf32>, vector<6x60xf32> -> vector<6x60xf32>
    %358 = arith.addf %356, %357 : vector<6x60xf32>
    %cst_512 = arith.constant dense<0.000000e+00> : vector<6x60xf32>
    %359 = tpu.matmul %167, %33, %cst_512 {dimension_numbers = #tpu.dot_dimension_numbers<[1], [0], [0], [1], [0, 0, 1, 1], [], []>} : vector<6x6xf32>, vector<6x60xf32>, vector<6x60xf32> -> vector<6x60xf32>
    %360 = arith.addf %358, %359 : vector<6x60xf32>
    %cst_513 = arith.constant dense<0.000000e+00> : vector<6x60xf32>
    %361 = tpu.matmul %169, %35, %cst_513 {dimension_numbers = #tpu.dot_dimension_numbers<[1], [0], [0], [1], [0, 0, 1, 1], [], []>} : vector<6x6xf32>, vector<6x60xf32>, vector<6x60xf32> -> vector<6x60xf32>
    %362 = arith.addf %360, %361 : vector<6x60xf32>
    %cst_514 = arith.constant dense<0.000000e+00> : vector<6x60xf32>
    %363 = tpu.matmul %171, %37, %cst_514 {dimension_numbers = #tpu.dot_dimension_numbers<[1], [0], [0], [1], [0, 0, 1, 1], [], []>} : vector<6x6xf32>, vector<6x60xf32>, vector<6x60xf32> -> vector<6x60xf32>
    %364 = arith.addf %362, %363 : vector<6x60xf32>
    %cst_515 = arith.constant dense<0.000000e+00> : vector<6x60xf32>
    %365 = tpu.matmul %173, %39, %cst_515 {dimension_numbers = #tpu.dot_dimension_numbers<[1], [0], [0], [1], [0, 0, 1, 1], [], []>} : vector<6x6xf32>, vector<6x60xf32>, vector<6x60xf32> -> vector<6x60xf32>
    %366 = arith.addf %364, %365 : vector<6x60xf32>
    %cst_516 = arith.constant dense<0.000000e+00> : vector<6x60xf32>
    %367 = tpu.matmul %181, %41, %cst_516 {dimension_numbers = #tpu.dot_dimension_numbers<[1], [0], [0], [1], [0, 0, 1, 1], [], []>} : vector<6x6xf32>, vector<6x60xf32>, vector<6x60xf32> -> vector<6x60xf32>
    %368 = arith.addf %366, %367 : vector<6x60xf32>
    %cst_517 = arith.constant dense<0.000000e+00> : vector<6x60xf32>
    %369 = tpu.matmul %183, %43, %cst_517 {dimension_numbers = #tpu.dot_dimension_numbers<[1], [0], [0], [1], [0, 0, 1, 1], [], []>} : vector<6x6xf32>, vector<6x60xf32>, vector<6x60xf32> -> vector<6x60xf32>
    %370 = arith.addf %368, %369 : vector<6x60xf32>
    %cst_518 = arith.constant dense<0.000000e+00> : vector<6x60xf32>
    %371 = tpu.matmul %185, %45, %cst_518 {dimension_numbers = #tpu.dot_dimension_numbers<[1], [0], [0], [1], [0, 0, 1, 1], [], []>} : vector<6x6xf32>, vector<6x60xf32>, vector<6x60xf32> -> vector<6x60xf32>
    %372 = arith.addf %370, %371 : vector<6x60xf32>
    %cst_519 = arith.constant dense<0.000000e+00> : vector<6x60xf32>
    %373 = tpu.matmul %187, %47, %cst_519 {dimension_numbers = #tpu.dot_dimension_numbers<[1], [0], [0], [1], [0, 0, 1, 1], [], []>} : vector<6x6xf32>, vector<6x60xf32>, vector<6x60xf32> -> vector<6x60xf32>
    %374 = arith.addf %372, %373 : vector<6x60xf32>
    %cst_520 = arith.constant dense<0.000000e+00> : vector<6x60xf32>
    %375 = tpu.matmul %189, %49, %cst_520 {dimension_numbers = #tpu.dot_dimension_numbers<[1], [0], [0], [1], [0, 0, 1, 1], [], []>} : vector<6x6xf32>, vector<6x60xf32>, vector<6x60xf32> -> vector<6x60xf32>
    %376 = arith.addf %374, %375 : vector<6x60xf32>
    %377 = arith.maximumf %327, %376 : vector<6x60xf32>
    %cst_521 = arith.constant dense<0.000000e+00> : vector<6x60xf32>
    %378 = tpu.matmul %119, %1, %cst_521 {dimension_numbers = #tpu.dot_dimension_numbers<[1], [0], [0], [1], [0, 0, 1, 1], [], []>} : vector<6x6xf32>, vector<6x60xf32>, vector<6x60xf32> -> vector<6x60xf32>
    %cst_522 = arith.constant dense<0.000000e+00> : vector<6x60xf32>
    %379 = tpu.matmul %121, %3, %cst_522 {dimension_numbers = #tpu.dot_dimension_numbers<[1], [0], [0], [1], [0, 0, 1, 1], [], []>} : vector<6x6xf32>, vector<6x60xf32>, vector<6x60xf32> -> vector<6x60xf32>
    %380 = arith.addf %378, %379 : vector<6x60xf32>
    %cst_523 = arith.constant dense<0.000000e+00> : vector<6x60xf32>
    %381 = tpu.matmul %123, %5, %cst_523 {dimension_numbers = #tpu.dot_dimension_numbers<[1], [0], [0], [1], [0, 0, 1, 1], [], []>} : vector<6x6xf32>, vector<6x60xf32>, vector<6x60xf32> -> vector<6x60xf32>
    %382 = arith.addf %380, %381 : vector<6x60xf32>
    %cst_524 = arith.constant dense<0.000000e+00> : vector<6x60xf32>
    %383 = tpu.matmul %125, %7, %cst_524 {dimension_numbers = #tpu.dot_dimension_numbers<[1], [0], [0], [1], [0, 0, 1, 1], [], []>} : vector<6x6xf32>, vector<6x60xf32>, vector<6x60xf32> -> vector<6x60xf32>
    %384 = arith.addf %382, %383 : vector<6x60xf32>
    %cst_525 = arith.constant dense<0.000000e+00> : vector<6x60xf32>
    %385 = tpu.matmul %127, %9, %cst_525 {dimension_numbers = #tpu.dot_dimension_numbers<[1], [0], [0], [1], [0, 0, 1, 1], [], []>} : vector<6x6xf32>, vector<6x60xf32>, vector<6x60xf32> -> vector<6x60xf32>
    %386 = arith.addf %384, %385 : vector<6x60xf32>
    %cst_526 = arith.constant dense<0.000000e+00> : vector<6x60xf32>
    %387 = tpu.matmul %135, %11, %cst_526 {dimension_numbers = #tpu.dot_dimension_numbers<[1], [0], [0], [1], [0, 0, 1, 1], [], []>} : vector<6x6xf32>, vector<6x60xf32>, vector<6x60xf32> -> vector<6x60xf32>
    %388 = arith.addf %386, %387 : vector<6x60xf32>
    %cst_527 = arith.constant dense<0.000000e+00> : vector<6x60xf32>
    %389 = tpu.matmul %137, %13, %cst_527 {dimension_numbers = #tpu.dot_dimension_numbers<[1], [0], [0], [1], [0, 0, 1, 1], [], []>} : vector<6x6xf32>, vector<6x60xf32>, vector<6x60xf32> -> vector<6x60xf32>
    %390 = arith.addf %388, %389 : vector<6x60xf32>
    %cst_528 = arith.constant dense<0.000000e+00> : vector<6x60xf32>
    %391 = tpu.matmul %139, %15, %cst_528 {dimension_numbers = #tpu.dot_dimension_numbers<[1], [0], [0], [1], [0, 0, 1, 1], [], []>} : vector<6x6xf32>, vector<6x60xf32>, vector<6x60xf32> -> vector<6x60xf32>
    %392 = arith.addf %390, %391 : vector<6x60xf32>
    %cst_529 = arith.constant dense<0.000000e+00> : vector<6x60xf32>
    %393 = tpu.matmul %141, %17, %cst_529 {dimension_numbers = #tpu.dot_dimension_numbers<[1], [0], [0], [1], [0, 0, 1, 1], [], []>} : vector<6x6xf32>, vector<6x60xf32>, vector<6x60xf32> -> vector<6x60xf32>
    %394 = arith.addf %392, %393 : vector<6x60xf32>
    %cst_530 = arith.constant dense<0.000000e+00> : vector<6x60xf32>
    %395 = tpu.matmul %143, %19, %cst_530 {dimension_numbers = #tpu.dot_dimension_numbers<[1], [0], [0], [1], [0, 0, 1, 1], [], []>} : vector<6x6xf32>, vector<6x60xf32>, vector<6x60xf32> -> vector<6x60xf32>
    %396 = arith.addf %394, %395 : vector<6x60xf32>
    %cst_531 = arith.constant dense<0.000000e+00> : vector<6x60xf32>
    %397 = tpu.matmul %151, %21, %cst_531 {dimension_numbers = #tpu.dot_dimension_numbers<[1], [0], [0], [1], [0, 0, 1, 1], [], []>} : vector<6x6xf32>, vector<6x60xf32>, vector<6x60xf32> -> vector<6x60xf32>
    %398 = arith.addf %396, %397 : vector<6x60xf32>
    %cst_532 = arith.constant dense<0.000000e+00> : vector<6x60xf32>
    %399 = tpu.matmul %153, %23, %cst_532 {dimension_numbers = #tpu.dot_dimension_numbers<[1], [0], [0], [1], [0, 0, 1, 1], [], []>} : vector<6x6xf32>, vector<6x60xf32>, vector<6x60xf32> -> vector<6x60xf32>
    %400 = arith.addf %398, %399 : vector<6x60xf32>
    %cst_533 = arith.constant dense<0.000000e+00> : vector<6x60xf32>
    %401 = tpu.matmul %155, %25, %cst_533 {dimension_numbers = #tpu.dot_dimension_numbers<[1], [0], [0], [1], [0, 0, 1, 1], [], []>} : vector<6x6xf32>, vector<6x60xf32>, vector<6x60xf32> -> vector<6x60xf32>
    %402 = arith.addf %400, %401 : vector<6x60xf32>
    %cst_534 = arith.constant dense<0.000000e+00> : vector<6x60xf32>
    %403 = tpu.matmul %157, %27, %cst_534 {dimension_numbers = #tpu.dot_dimension_numbers<[1], [0], [0], [1], [0, 0, 1, 1], [], []>} : vector<6x6xf32>, vector<6x60xf32>, vector<6x60xf32> -> vector<6x60xf32>
    %404 = arith.addf %402, %403 : vector<6x60xf32>
    %cst_535 = arith.constant dense<0.000000e+00> : vector<6x60xf32>
    %405 = tpu.matmul %159, %29, %cst_535 {dimension_numbers = #tpu.dot_dimension_numbers<[1], [0], [0], [1], [0, 0, 1, 1], [], []>} : vector<6x6xf32>, vector<6x60xf32>, vector<6x60xf32> -> vector<6x60xf32>
    %406 = arith.addf %404, %405 : vector<6x60xf32>
    %cst_536 = arith.constant dense<0.000000e+00> : vector<6x60xf32>
    %407 = tpu.matmul %167, %31, %cst_536 {dimension_numbers = #tpu.dot_dimension_numbers<[1], [0], [0], [1], [0, 0, 1, 1], [], []>} : vector<6x6xf32>, vector<6x60xf32>, vector<6x60xf32> -> vector<6x60xf32>
    %408 = arith.addf %406, %407 : vector<6x60xf32>
    %cst_537 = arith.constant dense<0.000000e+00> : vector<6x60xf32>
    %409 = tpu.matmul %169, %33, %cst_537 {dimension_numbers = #tpu.dot_dimension_numbers<[1], [0], [0], [1], [0, 0, 1, 1], [], []>} : vector<6x6xf32>, vector<6x60xf32>, vector<6x60xf32> -> vector<6x60xf32>
    %410 = arith.addf %408, %409 : vector<6x60xf32>
    %cst_538 = arith.constant dense<0.000000e+00> : vector<6x60xf32>
    %411 = tpu.matmul %171, %35, %cst_538 {dimension_numbers = #tpu.dot_dimension_numbers<[1], [0], [0], [1], [0, 0, 1, 1], [], []>} : vector<6x6xf32>, vector<6x60xf32>, vector<6x60xf32> -> vector<6x60xf32>
    %412 = arith.addf %410, %411 : vector<6x60xf32>
    %cst_539 = arith.constant dense<0.000000e+00> : vector<6x60xf32>
    %413 = tpu.matmul %173, %37, %cst_539 {dimension_numbers = #tpu.dot_dimension_numbers<[1], [0], [0], [1], [0, 0, 1, 1], [], []>} : vector<6x6xf32>, vector<6x60xf32>, vector<6x60xf32> -> vector<6x60xf32>
    %414 = arith.addf %412, %413 : vector<6x60xf32>
    %cst_540 = arith.constant dense<0.000000e+00> : vector<6x60xf32>
    %415 = tpu.matmul %175, %39, %cst_540 {dimension_numbers = #tpu.dot_dimension_numbers<[1], [0], [0], [1], [0, 0, 1, 1], [], []>} : vector<6x6xf32>, vector<6x60xf32>, vector<6x60xf32> -> vector<6x60xf32>
    %416 = arith.addf %414, %415 : vector<6x60xf32>
    %cst_541 = arith.constant dense<0.000000e+00> : vector<6x60xf32>
    %417 = tpu.matmul %183, %41, %cst_541 {dimension_numbers = #tpu.dot_dimension_numbers<[1], [0], [0], [1], [0, 0, 1, 1], [], []>} : vector<6x6xf32>, vector<6x60xf32>, vector<6x60xf32> -> vector<6x60xf32>
    %418 = arith.addf %416, %417 : vector<6x60xf32>
    %cst_542 = arith.constant dense<0.000000e+00> : vector<6x60xf32>
    %419 = tpu.matmul %185, %43, %cst_542 {dimension_numbers = #tpu.dot_dimension_numbers<[1], [0], [0], [1], [0, 0, 1, 1], [], []>} : vector<6x6xf32>, vector<6x60xf32>, vector<6x60xf32> -> vector<6x60xf32>
    %420 = arith.addf %418, %419 : vector<6x60xf32>
    %cst_543 = arith.constant dense<0.000000e+00> : vector<6x60xf32>
    %421 = tpu.matmul %187, %45, %cst_543 {dimension_numbers = #tpu.dot_dimension_numbers<[1], [0], [0], [1], [0, 0, 1, 1], [], []>} : vector<6x6xf32>, vector<6x60xf32>, vector<6x60xf32> -> vector<6x60xf32>
    %422 = arith.addf %420, %421 : vector<6x60xf32>
    %cst_544 = arith.constant dense<0.000000e+00> : vector<6x60xf32>
    %423 = tpu.matmul %189, %47, %cst_544 {dimension_numbers = #tpu.dot_dimension_numbers<[1], [0], [0], [1], [0, 0, 1, 1], [], []>} : vector<6x6xf32>, vector<6x60xf32>, vector<6x60xf32> -> vector<6x60xf32>
    %424 = arith.addf %422, %423 : vector<6x60xf32>
    %cst_545 = arith.constant dense<0.000000e+00> : vector<6x60xf32>
    %425 = tpu.matmul %191, %49, %cst_545 {dimension_numbers = #tpu.dot_dimension_numbers<[1], [0], [0], [1], [0, 0, 1, 1], [], []>} : vector<6x6xf32>, vector<6x60xf32>, vector<6x60xf32> -> vector<6x60xf32>
    %426 = arith.addf %424, %425 : vector<6x60xf32>
    %427 = arith.maximumf %377, %426 : vector<6x60xf32>
    %428 = vector.broadcast %228 : vector<1x60xf32> to vector<6x60xf32>
    %429 = arith.addf %427, %428 : vector<6x60xf32>
    %cst_546 = arith.constant 0.000000e+00 : f32
    %430 = vector.broadcast %cst_546 : f32 to vector<6x60xf32>
    %431 = arith.maximumf %429, %430 : vector<6x60xf32>
    %c0_547 = arith.constant 0 : index
    %c0_548 = arith.constant 0 : index
    %c0_549 = arith.constant 0 : index
    %c0_550 = arith.constant 0 : index
    %432 = vector.load %arg11[%c0_547, %c0_548, %c0_549, %c0_550] : memref<2x2x6x60xf32, #tpu.memory_space<vmem>>, vector<1x1x6x60xf32>
    %433 = vector.shape_cast %432 : vector<1x1x6x60xf32> to vector<6x60xf32>
    %434 = vector.shape_cast %431 : vector<6x60xf32> to vector<1x1x6x60xf32>
    tpu.vector_store %arg11[%c0_547, %c0_548, %c0_549, %c0_550], %434 {strides = array<i32>} : memref<2x2x6x60xf32, #tpu.memory_space<vmem>>, vector<1x1x6x60xf32>,
    %cst_551 = arith.constant dense<0.000000e+00> : vector<6x60xf32>
    %435 = tpu.matmul %105, %1, %cst_551 {dimension_numbers = #tpu.dot_dimension_numbers<[1], [0], [0], [1], [0, 0, 1, 1], [], []>} : vector<6x6xf32>, vector<6x60xf32>, vector<6x60xf32> -> vector<6x60xf32>
    %cst_552 = arith.constant dense<0.000000e+00> : vector<6x60xf32>
    %436 = tpu.matmul %107, %3, %cst_552 {dimension_numbers = #tpu.dot_dimension_numbers<[1], [0], [0], [1], [0, 0, 1, 1], [], []>} : vector<6x6xf32>, vector<6x60xf32>, vector<6x60xf32> -> vector<6x60xf32>
    %437 = arith.addf %435, %436 : vector<6x60xf32>
    %cst_553 = arith.constant dense<0.000000e+00> : vector<6x60xf32>
    %438 = tpu.matmul %109, %5, %cst_553 {dimension_numbers = #tpu.dot_dimension_numbers<[1], [0], [0], [1], [0, 0, 1, 1], [], []>} : vector<6x6xf32>, vector<6x60xf32>, vector<6x60xf32> -> vector<6x60xf32>
    %439 = arith.addf %437, %438 : vector<6x60xf32>
    %cst_554 = arith.constant dense<0.000000e+00> : vector<6x60xf32>
    %440 = tpu.matmul %111, %7, %cst_554 {dimension_numbers = #tpu.dot_dimension_numbers<[1], [0], [0], [1], [0, 0, 1, 1], [], []>} : vector<6x6xf32>, vector<6x60xf32>, vector<6x60xf32> -> vector<6x60xf32>
    %441 = arith.addf %439, %440 : vector<6x60xf32>
    %cst_555 = arith.constant dense<0.000000e+00> : vector<6x60xf32>
    %442 = tpu.matmul %113, %9, %cst_555 {dimension_numbers = #tpu.dot_dimension_numbers<[1], [0], [0], [1], [0, 0, 1, 1], [], []>} : vector<6x6xf32>, vector<6x60xf32>, vector<6x60xf32> -> vector<6x60xf32>
    %443 = arith.addf %441, %442 : vector<6x60xf32>
    %cst_556 = arith.constant dense<0.000000e+00> : vector<6x60xf32>
    %444 = tpu.matmul %121, %11, %cst_556 {dimension_numbers = #tpu.dot_dimension_numbers<[1], [0], [0], [1], [0, 0, 1, 1], [], []>} : vector<6x6xf32>, vector<6x60xf32>, vector<6x60xf32> -> vector<6x60xf32>
    %445 = arith.addf %443, %444 : vector<6x60xf32>
    %cst_557 = arith.constant dense<0.000000e+00> : vector<6x60xf32>
    %446 = tpu.matmul %123, %13, %cst_557 {dimension_numbers = #tpu.dot_dimension_numbers<[1], [0], [0], [1], [0, 0, 1, 1], [], []>} : vector<6x6xf32>, vector<6x60xf32>, vector<6x60xf32> -> vector<6x60xf32>
    %447 = arith.addf %445, %446 : vector<6x60xf32>
    %cst_558 = arith.constant dense<0.000000e+00> : vector<6x60xf32>
    %448 = tpu.matmul %125, %15, %cst_558 {dimension_numbers = #tpu.dot_dimension_numbers<[1], [0], [0], [1], [0, 0, 1, 1], [], []>} : vector<6x6xf32>, vector<6x60xf32>, vector<6x60xf32> -> vector<6x60xf32>
    %449 = arith.addf %447, %448 : vector<6x60xf32>
    %cst_559 = arith.constant dense<0.000000e+00> : vector<6x60xf32>
    %450 = tpu.matmul %127, %17, %cst_559 {dimension_numbers = #tpu.dot_dimension_numbers<[1], [0], [0], [1], [0, 0, 1, 1], [], []>} : vector<6x6xf32>, vector<6x60xf32>, vector<6x60xf32> -> vector<6x60xf32>
    %451 = arith.addf %449, %450 : vector<6x60xf32>
    %cst_560 = arith.constant dense<0.000000e+00> : vector<6x60xf32>
    %452 = tpu.matmul %129, %19, %cst_560 {dimension_numbers = #tpu.dot_dimension_numbers<[1], [0], [0], [1], [0, 0, 1, 1], [], []>} : vector<6x6xf32>, vector<6x60xf32>, vector<6x60xf32> -> vector<6x60xf32>
    %453 = arith.addf %451, %452 : vector<6x60xf32>
    %cst_561 = arith.constant dense<0.000000e+00> : vector<6x60xf32>
    %454 = tpu.matmul %137, %21, %cst_561 {dimension_numbers = #tpu.dot_dimension_numbers<[1], [0], [0], [1], [0, 0, 1, 1], [], []>} : vector<6x6xf32>, vector<6x60xf32>, vector<6x60xf32> -> vector<6x60xf32>
    %455 = arith.addf %453, %454 : vector<6x60xf32>
    %cst_562 = arith.constant dense<0.000000e+00> : vector<6x60xf32>
    %456 = tpu.matmul %139, %23, %cst_562 {dimension_numbers = #tpu.dot_dimension_numbers<[1], [0], [0], [1], [0, 0, 1, 1], [], []>} : vector<6x6xf32>, vector<6x60xf32>, vector<6x60xf32> -> vector<6x60xf32>
    %457 = arith.addf %455, %456 : vector<6x60xf32>
    %cst_563 = arith.constant dense<0.000000e+00> : vector<6x60xf32>
    %458 = tpu.matmul %141, %25, %cst_563 {dimension_numbers = #tpu.dot_dimension_numbers<[1], [0], [0], [1], [0, 0, 1, 1], [], []>} : vector<6x6xf32>, vector<6x60xf32>, vector<6x60xf32> -> vector<6x60xf32>
    %459 = arith.addf %457, %458 : vector<6x60xf32>
    %cst_564 = arith.constant dense<0.000000e+00> : vector<6x60xf32>
    %460 = tpu.matmul %143, %27, %cst_564 {dimension_numbers = #tpu.dot_dimension_numbers<[1], [0], [0], [1], [0, 0, 1, 1], [], []>} : vector<6x6xf32>, vector<6x60xf32>, vector<6x60xf32> -> vector<6x60xf32>
    %461 = arith.addf %459, %460 : vector<6x60xf32>
    %cst_565 = arith.constant dense<0.000000e+00> : vector<6x60xf32>
    %462 = tpu.matmul %145, %29, %cst_565 {dimension_numbers = #tpu.dot_dimension_numbers<[1], [0], [0], [1], [0, 0, 1, 1], [], []>} : vector<6x6xf32>, vector<6x60xf32>, vector<6x60xf32> -> vector<6x60xf32>
    %463 = arith.addf %461, %462 : vector<6x60xf32>
    %cst_566 = arith.constant dense<0.000000e+00> : vector<6x60xf32>
    %464 = tpu.matmul %153, %31, %cst_566 {dimension_numbers = #tpu.dot_dimension_numbers<[1], [0], [0], [1], [0, 0, 1, 1], [], []>} : vector<6x6xf32>, vector<6x60xf32>, vector<6x60xf32> -> vector<6x60xf32>
    %465 = arith.addf %463, %464 : vector<6x60xf32>
    %cst_567 = arith.constant dense<0.000000e+00> : vector<6x60xf32>
    %466 = tpu.matmul %155, %33, %cst_567 {dimension_numbers = #tpu.dot_dimension_numbers<[1], [0], [0], [1], [0, 0, 1, 1], [], []>} : vector<6x6xf32>, vector<6x60xf32>, vector<6x60xf32> -> vector<6x60xf32>
    %467 = arith.addf %465, %466 : vector<6x60xf32>
    %cst_568 = arith.constant dense<0.000000e+00> : vector<6x60xf32>
    %468 = tpu.matmul %157, %35, %cst_568 {dimension_numbers = #tpu.dot_dimension_numbers<[1], [0], [0], [1], [0, 0, 1, 1], [], []>} : vector<6x6xf32>, vector<6x60xf32>, vector<6x60xf32> -> vector<6x60xf32>
    %469 = arith.addf %467, %468 : vector<6x60xf32>
    %cst_569 = arith.constant dense<0.000000e+00> : vector<6x60xf32>
    %470 = tpu.matmul %159, %37, %cst_569 {dimension_numbers = #tpu.dot_dimension_numbers<[1], [0], [0], [1], [0, 0, 1, 1], [], []>} : vector<6x6xf32>, vector<6x60xf32>, vector<6x60xf32> -> vector<6x60xf32>
    %471 = arith.addf %469, %470 : vector<6x60xf32>
    %cst_570 = arith.constant dense<0.000000e+00> : vector<6x60xf32>
    %472 = tpu.matmul %161, %39, %cst_570 {dimension_numbers = #tpu.dot_dimension_numbers<[1], [0], [0], [1], [0, 0, 1, 1], [], []>} : vector<6x6xf32>, vector<6x60xf32>, vector<6x60xf32> -> vector<6x60xf32>
    %473 = arith.addf %471, %472 : vector<6x60xf32>
    %cst_571 = arith.constant dense<0.000000e+00> : vector<6x60xf32>
    %474 = tpu.matmul %169, %41, %cst_571 {dimension_numbers = #tpu.dot_dimension_numbers<[1], [0], [0], [1], [0, 0, 1, 1], [], []>} : vector<6x6xf32>, vector<6x60xf32>, vector<6x60xf32> -> vector<6x60xf32>
    %475 = arith.addf %473, %474 : vector<6x60xf32>
    %cst_572 = arith.constant dense<0.000000e+00> : vector<6x60xf32>
    %476 = tpu.matmul %171, %43, %cst_572 {dimension_numbers = #tpu.dot_dimension_numbers<[1], [0], [0], [1], [0, 0, 1, 1], [], []>} : vector<6x6xf32>, vector<6x60xf32>, vector<6x60xf32> -> vector<6x60xf32>
    %477 = arith.addf %475, %476 : vector<6x60xf32>
    %cst_573 = arith.constant dense<0.000000e+00> : vector<6x60xf32>
    %478 = tpu.matmul %173, %45, %cst_573 {dimension_numbers = #tpu.dot_dimension_numbers<[1], [0], [0], [1], [0, 0, 1, 1], [], []>} : vector<6x6xf32>, vector<6x60xf32>, vector<6x60xf32> -> vector<6x60xf32>
    %479 = arith.addf %477, %478 : vector<6x60xf32>
    %cst_574 = arith.constant dense<0.000000e+00> : vector<6x60xf32>
    %480 = tpu.matmul %175, %47, %cst_574 {dimension_numbers = #tpu.dot_dimension_numbers<[1], [0], [0], [1], [0, 0, 1, 1], [], []>} : vector<6x6xf32>, vector<6x60xf32>, vector<6x60xf32> -> vector<6x60xf32>
    %481 = arith.addf %479, %480 : vector<6x60xf32>
    %cst_575 = arith.constant dense<0.000000e+00> : vector<6x60xf32>
    %482 = tpu.matmul %177, %49, %cst_575 {dimension_numbers = #tpu.dot_dimension_numbers<[1], [0], [0], [1], [0, 0, 1, 1], [], []>} : vector<6x6xf32>, vector<6x60xf32>, vector<6x60xf32> -> vector<6x60xf32>
    %483 = arith.addf %481, %482 : vector<6x60xf32>
    %cst_576 = arith.constant dense<0.000000e+00> : vector<6x60xf32>
    %484 = tpu.matmul %107, %1, %cst_576 {dimension_numbers = #tpu.dot_dimension_numbers<[1], [0], [0], [1], [0, 0, 1, 1], [], []>} : vector<6x6xf32>, vector<6x60xf32>, vector<6x60xf32> -> vector<6x60xf32>
    %cst_577 = arith.constant dense<0.000000e+00> : vector<6x60xf32>
    %485 = tpu.matmul %109, %3, %cst_577 {dimension_numbers = #tpu.dot_dimension_numbers<[1], [0], [0], [1], [0, 0, 1, 1], [], []>} : vector<6x6xf32>, vector<6x60xf32>, vector<6x60xf32> -> vector<6x60xf32>
    %486 = arith.addf %484, %485 : vector<6x60xf32>
    %cst_578 = arith.constant dense<0.000000e+00> : vector<6x60xf32>
    %487 = tpu.matmul %111, %5, %cst_578 {dimension_numbers = #tpu.dot_dimension_numbers<[1], [0], [0], [1], [0, 0, 1, 1], [], []>} : vector<6x6xf32>, vector<6x60xf32>, vector<6x60xf32> -> vector<6x60xf32>
    %488 = arith.addf %486, %487 : vector<6x60xf32>
    %cst_579 = arith.constant dense<0.000000e+00> : vector<6x60xf32>
    %489 = tpu.matmul %113, %7, %cst_579 {dimension_numbers = #tpu.dot_dimension_numbers<[1], [0], [0], [1], [0, 0, 1, 1], [], []>} : vector<6x6xf32>, vector<6x60xf32>, vector<6x60xf32> -> vector<6x60xf32>
    %490 = arith.addf %488, %489 : vector<6x60xf32>
    %cst_580 = arith.constant dense<0.000000e+00> : vector<6x60xf32>
    %491 = tpu.matmul %115, %9, %cst_580 {dimension_numbers = #tpu.dot_dimension_numbers<[1], [0], [0], [1], [0, 0, 1, 1], [], []>} : vector<6x6xf32>, vector<6x60xf32>, vector<6x60xf32> -> vector<6x60xf32>
    %492 = arith.addf %490, %491 : vector<6x60xf32>
    %cst_581 = arith.constant dense<0.000000e+00> : vector<6x60xf32>
    %493 = tpu.matmul %123, %11, %cst_581 {dimension_numbers = #tpu.dot_dimension_numbers<[1], [0], [0], [1], [0, 0, 1, 1], [], []>} : vector<6x6xf32>, vector<6x60xf32>, vector<6x60xf32> -> vector<6x60xf32>
    %494 = arith.addf %492, %493 : vector<6x60xf32>
    %cst_582 = arith.constant dense<0.000000e+00> : vector<6x60xf32>
    %495 = tpu.matmul %125, %13, %cst_582 {dimension_numbers = #tpu.dot_dimension_numbers<[1], [0], [0], [1], [0, 0, 1, 1], [], []>} : vector<6x6xf32>, vector<6x60xf32>, vector<6x60xf32> -> vector<6x60xf32>
    %496 = arith.addf %494, %495 : vector<6x60xf32>
    %cst_583 = arith.constant dense<0.000000e+00> : vector<6x60xf32>
    %497 = tpu.matmul %127, %15, %cst_583 {dimension_numbers = #tpu.dot_dimension_numbers<[1], [0], [0], [1], [0, 0, 1, 1], [], []>} : vector<6x6xf32>, vector<6x60xf32>, vector<6x60xf32> -> vector<6x60xf32>
    %498 = arith.addf %496, %497 : vector<6x60xf32>
    %cst_584 = arith.constant dense<0.000000e+00> : vector<6x60xf32>
    %499 = tpu.matmul %129, %17, %cst_584 {dimension_numbers = #tpu.dot_dimension_numbers<[1], [0], [0], [1], [0, 0, 1, 1], [], []>} : vector<6x6xf32>, vector<6x60xf32>, vector<6x60xf32> -> vector<6x60xf32>
    %500 = arith.addf %498, %499 : vector<6x60xf32>
    %cst_585 = arith.constant dense<0.000000e+00> : vector<6x60xf32>
    %501 = tpu.matmul %131, %19, %cst_585 {dimension_numbers = #tpu.dot_dimension_numbers<[1], [0], [0], [1], [0, 0, 1, 1], [], []>} : vector<6x6xf32>, vector<6x60xf32>, vector<6x60xf32> -> vector<6x60xf32>
    %502 = arith.addf %500, %501 : vector<6x60xf32>
    %cst_586 = arith.constant dense<0.000000e+00> : vector<6x60xf32>
    %503 = tpu.matmul %139, %21, %cst_586 {dimension_numbers = #tpu.dot_dimension_numbers<[1], [0], [0], [1], [0, 0, 1, 1], [], []>} : vector<6x6xf32>, vector<6x60xf32>, vector<6x60xf32> -> vector<6x60xf32>
    %504 = arith.addf %502, %503 : vector<6x60xf32>
    %cst_587 = arith.constant dense<0.000000e+00> : vector<6x60xf32>
    %505 = tpu.matmul %141, %23, %cst_587 {dimension_numbers = #tpu.dot_dimension_numbers<[1], [0], [0], [1], [0, 0, 1, 1], [], []>} : vector<6x6xf32>, vector<6x60xf32>, vector<6x60xf32> -> vector<6x60xf32>
    %506 = arith.addf %504, %505 : vector<6x60xf32>
    %cst_588 = arith.constant dense<0.000000e+00> : vector<6x60xf32>
    %507 = tpu.matmul %143, %25, %cst_588 {dimension_numbers = #tpu.dot_dimension_numbers<[1], [0], [0], [1], [0, 0, 1, 1], [], []>} : vector<6x6xf32>, vector<6x60xf32>, vector<6x60xf32> -> vector<6x60xf32>
    %508 = arith.addf %506, %507 : vector<6x60xf32>
    %cst_589 = arith.constant dense<0.000000e+00> : vector<6x60xf32>
    %509 = tpu.matmul %145, %27, %cst_589 {dimension_numbers = #tpu.dot_dimension_numbers<[1], [0], [0], [1], [0, 0, 1, 1], [], []>} : vector<6x6xf32>, vector<6x60xf32>, vector<6x60xf32> -> vector<6x60xf32>
    %510 = arith.addf %508, %509 : vector<6x60xf32>
    %cst_590 = arith.constant dense<0.000000e+00> : vector<6x60xf32>
    %511 = tpu.matmul %147, %29, %cst_590 {dimension_numbers = #tpu.dot_dimension_numbers<[1], [0], [0], [1], [0, 0, 1, 1], [], []>} : vector<6x6xf32>, vector<6x60xf32>, vector<6x60xf32> -> vector<6x60xf32>
    %512 = arith.addf %510, %511 : vector<6x60xf32>
    %cst_591 = arith.constant dense<0.000000e+00> : vector<6x60xf32>
    %513 = tpu.matmul %155, %31, %cst_591 {dimension_numbers = #tpu.dot_dimension_numbers<[1], [0], [0], [1], [0, 0, 1, 1], [], []>} : vector<6x6xf32>, vector<6x60xf32>, vector<6x60xf32> -> vector<6x60xf32>
    %514 = arith.addf %512, %513 : vector<6x60xf32>
    %cst_592 = arith.constant dense<0.000000e+00> : vector<6x60xf32>
    %515 = tpu.matmul %157, %33, %cst_592 {dimension_numbers = #tpu.dot_dimension_numbers<[1], [0], [0], [1], [0, 0, 1, 1], [], []>} : vector<6x6xf32>, vector<6x60xf32>, vector<6x60xf32> -> vector<6x60xf32>
    %516 = arith.addf %514, %515 : vector<6x60xf32>
    %cst_593 = arith.constant dense<0.000000e+00> : vector<6x60xf32>
    %517 = tpu.matmul %159, %35, %cst_593 {dimension_numbers = #tpu.dot_dimension_numbers<[1], [0], [0], [1], [0, 0, 1, 1], [], []>} : vector<6x6xf32>, vector<6x60xf32>, vector<6x60xf32> -> vector<6x60xf32>
    %518 = arith.addf %516, %517 : vector<6x60xf32>
    %cst_594 = arith.constant dense<0.000000e+00> : vector<6x60xf32>
    %519 = tpu.matmul %161, %37, %cst_594 {dimension_numbers = #tpu.dot_dimension_numbers<[1], [0], [0], [1], [0, 0, 1, 1], [], []>} : vector<6x6xf32>, vector<6x60xf32>, vector<6x60xf32> -> vector<6x60xf32>
    %520 = arith.addf %518, %519 : vector<6x60xf32>
    %cst_595 = arith.constant dense<0.000000e+00> : vector<6x60xf32>
    %521 = tpu.matmul %163, %39, %cst_595 {dimension_numbers = #tpu.dot_dimension_numbers<[1], [0], [0], [1], [0, 0, 1, 1], [], []>} : vector<6x6xf32>, vector<6x60xf32>, vector<6x60xf32> -> vector<6x60xf32>
    %522 = arith.addf %520, %521 : vector<6x60xf32>
    %cst_596 = arith.constant dense<0.000000e+00> : vector<6x60xf32>
    %523 = tpu.matmul %171, %41, %cst_596 {dimension_numbers = #tpu.dot_dimension_numbers<[1], [0], [0], [1], [0, 0, 1, 1], [], []>} : vector<6x6xf32>, vector<6x60xf32>, vector<6x60xf32> -> vector<6x60xf32>
    %524 = arith.addf %522, %523 : vector<6x60xf32>
    %cst_597 = arith.constant dense<0.000000e+00> : vector<6x60xf32>
    %525 = tpu.matmul %173, %43, %cst_597 {dimension_numbers = #tpu.dot_dimension_numbers<[1], [0], [0], [1], [0, 0, 1, 1], [], []>} : vector<6x6xf32>, vector<6x60xf32>, vector<6x60xf32> -> vector<6x60xf32>
    %526 = arith.addf %524, %525 : vector<6x60xf32>
    %cst_598 = arith.constant dense<0.000000e+00> : vector<6x60xf32>
    %527 = tpu.matmul %175, %45, %cst_598 {dimension_numbers = #tpu.dot_dimension_numbers<[1], [0], [0], [1], [0, 0, 1, 1], [], []>} : vector<6x6xf32>, vector<6x60xf32>, vector<6x60xf32> -> vector<6x60xf32>
    %528 = arith.addf %526, %527 : vector<6x60xf32>
    %cst_599 = arith.constant dense<0.000000e+00> : vector<6x60xf32>
    %529 = tpu.matmul %177, %47, %cst_599 {dimension_numbers = #tpu.dot_dimension_numbers<[1], [0], [0], [1], [0, 0, 1, 1], [], []>} : vector<6x6xf32>, vector<6x60xf32>, vector<6x60xf32> -> vector<6x60xf32>
    %530 = arith.addf %528, %529 : vector<6x60xf32>
    %cst_600 = arith.constant dense<0.000000e+00> : vector<6x60xf32>
    %531 = tpu.matmul %179, %49, %cst_600 {dimension_numbers = #tpu.dot_dimension_numbers<[1], [0], [0], [1], [0, 0, 1, 1], [], []>} : vector<6x6xf32>, vector<6x60xf32>, vector<6x60xf32> -> vector<6x60xf32>
    %532 = arith.addf %530, %531 : vector<6x60xf32>
    %533 = arith.maximumf %483, %532 : vector<6x60xf32>
    %cst_601 = arith.constant dense<0.000000e+00> : vector<6x60xf32>
    %534 = tpu.matmul %121, %1, %cst_601 {dimension_numbers = #tpu.dot_dimension_numbers<[1], [0], [0], [1], [0, 0, 1, 1], [], []>} : vector<6x6xf32>, vector<6x60xf32>, vector<6x60xf32> -> vector<6x60xf32>
    %cst_602 = arith.constant dense<0.000000e+00> : vector<6x60xf32>
    %535 = tpu.matmul %123, %3, %cst_602 {dimension_numbers = #tpu.dot_dimension_numbers<[1], [0], [0], [1], [0, 0, 1, 1], [], []>} : vector<6x6xf32>, vector<6x60xf32>, vector<6x60xf32> -> vector<6x60xf32>
    %536 = arith.addf %534, %535 : vector<6x60xf32>
    %cst_603 = arith.constant dense<0.000000e+00> : vector<6x60xf32>
    %537 = tpu.matmul %125, %5, %cst_603 {dimension_numbers = #tpu.dot_dimension_numbers<[1], [0], [0], [1], [0, 0, 1, 1], [], []>} : vector<6x6xf32>, vector<6x60xf32>, vector<6x60xf32> -> vector<6x60xf32>
    %538 = arith.addf %536, %537 : vector<6x60xf32>
    %cst_604 = arith.constant dense<0.000000e+00> : vector<6x60xf32>
    %539 = tpu.matmul %127, %7, %cst_604 {dimension_numbers = #tpu.dot_dimension_numbers<[1], [0], [0], [1], [0, 0, 1, 1], [], []>} : vector<6x6xf32>, vector<6x60xf32>, vector<6x60xf32> -> vector<6x60xf32>
    %540 = arith.addf %538, %539 : vector<6x60xf32>
    %cst_605 = arith.constant dense<0.000000e+00> : vector<6x60xf32>
    %541 = tpu.matmul %129, %9, %cst_605 {dimension_numbers = #tpu.dot_dimension_numbers<[1], [0], [0], [1], [0, 0, 1, 1], [], []>} : vector<6x6xf32>, vector<6x60xf32>, vector<6x60xf32> -> vector<6x60xf32>
    %542 = arith.addf %540, %541 : vector<6x60xf32>
    %cst_606 = arith.constant dense<0.000000e+00> : vector<6x60xf32>
    %543 = tpu.matmul %137, %11, %cst_606 {dimension_numbers = #tpu.dot_dimension_numbers<[1], [0], [0], [1], [0, 0, 1, 1], [], []>} : vector<6x6xf32>, vector<6x60xf32>, vector<6x60xf32> -> vector<6x60xf32>
    %544 = arith.addf %542, %543 : vector<6x60xf32>
    %cst_607 = arith.constant dense<0.000000e+00> : vector<6x60xf32>
    %545 = tpu.matmul %139, %13, %cst_607 {dimension_numbers = #tpu.dot_dimension_numbers<[1], [0], [0], [1], [0, 0, 1, 1], [], []>} : vector<6x6xf32>, vector<6x60xf32>, vector<6x60xf32> -> vector<6x60xf32>
    %546 = arith.addf %544, %545 : vector<6x60xf32>
    %cst_608 = arith.constant dense<0.000000e+00> : vector<6x60xf32>
    %547 = tpu.matmul %141, %15, %cst_608 {dimension_numbers = #tpu.dot_dimension_numbers<[1], [0], [0], [1], [0, 0, 1, 1], [], []>} : vector<6x6xf32>, vector<6x60xf32>, vector<6x60xf32> -> vector<6x60xf32>
    %548 = arith.addf %546, %547 : vector<6x60xf32>
    %cst_609 = arith.constant dense<0.000000e+00> : vector<6x60xf32>
    %549 = tpu.matmul %143, %17, %cst_609 {dimension_numbers = #tpu.dot_dimension_numbers<[1], [0], [0], [1], [0, 0, 1, 1], [], []>} : vector<6x6xf32>, vector<6x60xf32>, vector<6x60xf32> -> vector<6x60xf32>
    %550 = arith.addf %548, %549 : vector<6x60xf32>
    %cst_610 = arith.constant dense<0.000000e+00> : vector<6x60xf32>
    %551 = tpu.matmul %145, %19, %cst_610 {dimension_numbers = #tpu.dot_dimension_numbers<[1], [0], [0], [1], [0, 0, 1, 1], [], []>} : vector<6x6xf32>, vector<6x60xf32>, vector<6x60xf32> -> vector<6x60xf32>
    %552 = arith.addf %550, %551 : vector<6x60xf32>
    %cst_611 = arith.constant dense<0.000000e+00> : vector<6x60xf32>
    %553 = tpu.matmul %153, %21, %cst_611 {dimension_numbers = #tpu.dot_dimension_numbers<[1], [0], [0], [1], [0, 0, 1, 1], [], []>} : vector<6x6xf32>, vector<6x60xf32>, vector<6x60xf32> -> vector<6x60xf32>
    %554 = arith.addf %552, %553 : vector<6x60xf32>
    %cst_612 = arith.constant dense<0.000000e+00> : vector<6x60xf32>
    %555 = tpu.matmul %155, %23, %cst_612 {dimension_numbers = #tpu.dot_dimension_numbers<[1], [0], [0], [1], [0, 0, 1, 1], [], []>} : vector<6x6xf32>, vector<6x60xf32>, vector<6x60xf32> -> vector<6x60xf32>
    %556 = arith.addf %554, %555 : vector<6x60xf32>
    %cst_613 = arith.constant dense<0.000000e+00> : vector<6x60xf32>
    %557 = tpu.matmul %157, %25, %cst_613 {dimension_numbers = #tpu.dot_dimension_numbers<[1], [0], [0], [1], [0, 0, 1, 1], [], []>} : vector<6x6xf32>, vector<6x60xf32>, vector<6x60xf32> -> vector<6x60xf32>
    %558 = arith.addf %556, %557 : vector<6x60xf32>
    %cst_614 = arith.constant dense<0.000000e+00> : vector<6x60xf32>
    %559 = tpu.matmul %159, %27, %cst_614 {dimension_numbers = #tpu.dot_dimension_numbers<[1], [0], [0], [1], [0, 0, 1, 1], [], []>} : vector<6x6xf32>, vector<6x60xf32>, vector<6x60xf32> -> vector<6x60xf32>
    %560 = arith.addf %558, %559 : vector<6x60xf32>
    %cst_615 = arith.constant dense<0.000000e+00> : vector<6x60xf32>
    %561 = tpu.matmul %161, %29, %cst_615 {dimension_numbers = #tpu.dot_dimension_numbers<[1], [0], [0], [1], [0, 0, 1, 1], [], []>} : vector<6x6xf32>, vector<6x60xf32>, vector<6x60xf32> -> vector<6x60xf32>
    %562 = arith.addf %560, %561 : vector<6x60xf32>
    %cst_616 = arith.constant dense<0.000000e+00> : vector<6x60xf32>
    %563 = tpu.matmul %169, %31, %cst_616 {dimension_numbers = #tpu.dot_dimension_numbers<[1], [0], [0], [1], [0, 0, 1, 1], [], []>} : vector<6x6xf32>, vector<6x60xf32>, vector<6x60xf32> -> vector<6x60xf32>
    %564 = arith.addf %562, %563 : vector<6x60xf32>
    %cst_617 = arith.constant dense<0.000000e+00> : vector<6x60xf32>
    %565 = tpu.matmul %171, %33, %cst_617 {dimension_numbers = #tpu.dot_dimension_numbers<[1], [0], [0], [1], [0, 0, 1, 1], [], []>} : vector<6x6xf32>, vector<6x60xf32>, vector<6x60xf32> -> vector<6x60xf32>
    %566 = arith.addf %564, %565 : vector<6x60xf32>
    %cst_618 = arith.constant dense<0.000000e+00> : vector<6x60xf32>
    %567 = tpu.matmul %173, %35, %cst_618 {dimension_numbers = #tpu.dot_dimension_numbers<[1], [0], [0], [1], [0, 0, 1, 1], [], []>} : vector<6x6xf32>, vector<6x60xf32>, vector<6x60xf32> -> vector<6x60xf32>
    %568 = arith.addf %566, %567 : vector<6x60xf32>
    %cst_619 = arith.constant dense<0.000000e+00> : vector<6x60xf32>
    %569 = tpu.matmul %175, %37, %cst_619 {dimension_numbers = #tpu.dot_dimension_numbers<[1], [0], [0], [1], [0, 0, 1, 1], [], []>} : vector<6x6xf32>, vector<6x60xf32>, vector<6x60xf32> -> vector<6x60xf32>
    %570 = arith.addf %568, %569 : vector<6x60xf32>
    %cst_620 = arith.constant dense<0.000000e+00> : vector<6x60xf32>
    %571 = tpu.matmul %177, %39, %cst_620 {dimension_numbers = #tpu.dot_dimension_numbers<[1], [0], [0], [1], [0, 0, 1, 1], [], []>} : vector<6x6xf32>, vector<6x60xf32>, vector<6x60xf32> -> vector<6x60xf32>
    %572 = arith.addf %570, %571 : vector<6x60xf32>
    %cst_621 = arith.constant dense<0.000000e+00> : vector<6x60xf32>
    %573 = tpu.matmul %185, %41, %cst_621 {dimension_numbers = #tpu.dot_dimension_numbers<[1], [0], [0], [1], [0, 0, 1, 1], [], []>} : vector<6x6xf32>, vector<6x60xf32>, vector<6x60xf32> -> vector<6x60xf32>
    %574 = arith.addf %572, %573 : vector<6x60xf32>
    %cst_622 = arith.constant dense<0.000000e+00> : vector<6x60xf32>
    %575 = tpu.matmul %187, %43, %cst_622 {dimension_numbers = #tpu.dot_dimension_numbers<[1], [0], [0], [1], [0, 0, 1, 1], [], []>} : vector<6x6xf32>, vector<6x60xf32>, vector<6x60xf32> -> vector<6x60xf32>
    %576 = arith.addf %574, %575 : vector<6x60xf32>
    %cst_623 = arith.constant dense<0.000000e+00> : vector<6x60xf32>
    %577 = tpu.matmul %189, %45, %cst_623 {dimension_numbers = #tpu.dot_dimension_numbers<[1], [0], [0], [1], [0, 0, 1, 1], [], []>} : vector<6x6xf32>, vector<6x60xf32>, vector<6x60xf32> -> vector<6x60xf32>
    %578 = arith.addf %576, %577 : vector<6x60xf32>
    %cst_624 = arith.constant dense<0.000000e+00> : vector<6x60xf32>
    %579 = tpu.matmul %191, %47, %cst_624 {dimension_numbers = #tpu.dot_dimension_numbers<[1], [0], [0], [1], [0, 0, 1, 1], [], []>} : vector<6x6xf32>, vector<6x60xf32>, vector<6x60xf32> -> vector<6x60xf32>
    %580 = arith.addf %578, %579 : vector<6x60xf32>
    %cst_625 = arith.constant dense<0.000000e+00> : vector<6x60xf32>
    %581 = tpu.matmul %193, %49, %cst_625 {dimension_numbers = #tpu.dot_dimension_numbers<[1], [0], [0], [1], [0, 0, 1, 1], [], []>} : vector<6x6xf32>, vector<6x60xf32>, vector<6x60xf32> -> vector<6x60xf32>
    %582 = arith.addf %580, %581 : vector<6x60xf32>
    %583 = arith.maximumf %533, %582 : vector<6x60xf32>
    %cst_626 = arith.constant dense<0.000000e+00> : vector<6x60xf32>
    %584 = tpu.matmul %123, %1, %cst_626 {dimension_numbers = #tpu.dot_dimension_numbers<[1], [0], [0], [1], [0, 0, 1, 1], [], []>} : vector<6x6xf32>, vector<6x60xf32>, vector<6x60xf32> -> vector<6x60xf32>
    %cst_627 = arith.constant dense<0.000000e+00> : vector<6x60xf32>
    %585 = tpu.matmul %125, %3, %cst_627 {dimension_numbers = #tpu.dot_dimension_numbers<[1], [0], [0], [1], [0, 0, 1, 1], [], []>} : vector<6x6xf32>, vector<6x60xf32>, vector<6x60xf32> -> vector<6x60xf32>
    %586 = arith.addf %584, %585 : vector<6x60xf32>
    %cst_628 = arith.constant dense<0.000000e+00> : vector<6x60xf32>
    %587 = tpu.matmul %127, %5, %cst_628 {dimension_numbers = #tpu.dot_dimension_numbers<[1], [0], [0], [1], [0, 0, 1, 1], [], []>} : vector<6x6xf32>, vector<6x60xf32>, vector<6x60xf32> -> vector<6x60xf32>
    %588 = arith.addf %586, %587 : vector<6x60xf32>
    %cst_629 = arith.constant dense<0.000000e+00> : vector<6x60xf32>
    %589 = tpu.matmul %129, %7, %cst_629 {dimension_numbers = #tpu.dot_dimension_numbers<[1], [0], [0], [1], [0, 0, 1, 1], [], []>} : vector<6x6xf32>, vector<6x60xf32>, vector<6x60xf32> -> vector<6x60xf32>
    %590 = arith.addf %588, %589 : vector<6x60xf32>
    %cst_630 = arith.constant dense<0.000000e+00> : vector<6x60xf32>
    %591 = tpu.matmul %131, %9, %cst_630 {dimension_numbers = #tpu.dot_dimension_numbers<[1], [0], [0], [1], [0, 0, 1, 1], [], []>} : vector<6x6xf32>, vector<6x60xf32>, vector<6x60xf32> -> vector<6x60xf32>
    %592 = arith.addf %590, %591 : vector<6x60xf32>
    %cst_631 = arith.constant dense<0.000000e+00> : vector<6x60xf32>
    %593 = tpu.matmul %139, %11, %cst_631 {dimension_numbers = #tpu.dot_dimension_numbers<[1], [0], [0], [1], [0, 0, 1, 1], [], []>} : vector<6x6xf32>, vector<6x60xf32>, vector<6x60xf32> -> vector<6x60xf32>
    %594 = arith.addf %592, %593 : vector<6x60xf32>
    %cst_632 = arith.constant dense<0.000000e+00> : vector<6x60xf32>
    %595 = tpu.matmul %141, %13, %cst_632 {dimension_numbers = #tpu.dot_dimension_numbers<[1], [0], [0], [1], [0, 0, 1, 1], [], []>} : vector<6x6xf32>, vector<6x60xf32>, vector<6x60xf32> -> vector<6x60xf32>
    %596 = arith.addf %594, %595 : vector<6x60xf32>
    %cst_633 = arith.constant dense<0.000000e+00> : vector<6x60xf32>
    %597 = tpu.matmul %143, %15, %cst_633 {dimension_numbers = #tpu.dot_dimension_numbers<[1], [0], [0], [1], [0, 0, 1, 1], [], []>} : vector<6x6xf32>, vector<6x60xf32>, vector<6x60xf32> -> vector<6x60xf32>
    %598 = arith.addf %596, %597 : vector<6x60xf32>
    %cst_634 = arith.constant dense<0.000000e+00> : vector<6x60xf32>
    %599 = tpu.matmul %145, %17, %cst_634 {dimension_numbers = #tpu.dot_dimension_numbers<[1], [0], [0], [1], [0, 0, 1, 1], [], []>} : vector<6x6xf32>, vector<6x60xf32>, vector<6x60xf32> -> vector<6x60xf32>
    %600 = arith.addf %598, %599 : vector<6x60xf32>
    %cst_635 = arith.constant dense<0.000000e+00> : vector<6x60xf32>
    %601 = tpu.matmul %147, %19, %cst_635 {dimension_numbers = #tpu.dot_dimension_numbers<[1], [0], [0], [1], [0, 0, 1, 1], [], []>} : vector<6x6xf32>, vector<6x60xf32>, vector<6x60xf32> -> vector<6x60xf32>
    %602 = arith.addf %600, %601 : vector<6x60xf32>
    %cst_636 = arith.constant dense<0.000000e+00> : vector<6x60xf32>
    %603 = tpu.matmul %155, %21, %cst_636 {dimension_numbers = #tpu.dot_dimension_numbers<[1], [0], [0], [1], [0, 0, 1, 1], [], []>} : vector<6x6xf32>, vector<6x60xf32>, vector<6x60xf32> -> vector<6x60xf32>
    %604 = arith.addf %602, %603 : vector<6x60xf32>
    %cst_637 = arith.constant dense<0.000000e+00> : vector<6x60xf32>
    %605 = tpu.matmul %157, %23, %cst_637 {dimension_numbers = #tpu.dot_dimension_numbers<[1], [0], [0], [1], [0, 0, 1, 1], [], []>} : vector<6x6xf32>, vector<6x60xf32>, vector<6x60xf32> -> vector<6x60xf32>
    %606 = arith.addf %604, %605 : vector<6x60xf32>
    %cst_638 = arith.constant dense<0.000000e+00> : vector<6x60xf32>
    %607 = tpu.matmul %159, %25, %cst_638 {dimension_numbers = #tpu.dot_dimension_numbers<[1], [0], [0], [1], [0, 0, 1, 1], [], []>} : vector<6x6xf32>, vector<6x60xf32>, vector<6x60xf32> -> vector<6x60xf32>
    %608 = arith.addf %606, %607 : vector<6x60xf32>
    %cst_639 = arith.constant dense<0.000000e+00> : vector<6x60xf32>
    %609 = tpu.matmul %161, %27, %cst_639 {dimension_numbers = #tpu.dot_dimension_numbers<[1], [0], [0], [1], [0, 0, 1, 1], [], []>} : vector<6x6xf32>, vector<6x60xf32>, vector<6x60xf32> -> vector<6x60xf32>
    %610 = arith.addf %608, %609 : vector<6x60xf32>
    %cst_640 = arith.constant dense<0.000000e+00> : vector<6x60xf32>
    %611 = tpu.matmul %163, %29, %cst_640 {dimension_numbers = #tpu.dot_dimension_numbers<[1], [0], [0], [1], [0, 0, 1, 1], [], []>} : vector<6x6xf32>, vector<6x60xf32>, vector<6x60xf32> -> vector<6x60xf32>
    %612 = arith.addf %610, %611 : vector<6x60xf32>
    %cst_641 = arith.constant dense<0.000000e+00> : vector<6x60xf32>
    %613 = tpu.matmul %171, %31, %cst_641 {dimension_numbers = #tpu.dot_dimension_numbers<[1], [0], [0], [1], [0, 0, 1, 1], [], []>} : vector<6x6xf32>, vector<6x60xf32>, vector<6x60xf32> -> vector<6x60xf32>
    %614 = arith.addf %612, %613 : vector<6x60xf32>
    %cst_642 = arith.constant dense<0.000000e+00> : vector<6x60xf32>
    %615 = tpu.matmul %173, %33, %cst_642 {dimension_numbers = #tpu.dot_dimension_numbers<[1], [0], [0], [1], [0, 0, 1, 1], [], []>} : vector<6x6xf32>, vector<6x60xf32>, vector<6x60xf32> -> vector<6x60xf32>
    %616 = arith.addf %614, %615 : vector<6x60xf32>
    %cst_643 = arith.constant dense<0.000000e+00> : vector<6x60xf32>
    %617 = tpu.matmul %175, %35, %cst_643 {dimension_numbers = #tpu.dot_dimension_numbers<[1], [0], [0], [1], [0, 0, 1, 1], [], []>} : vector<6x6xf32>, vector<6x60xf32>, vector<6x60xf32> -> vector<6x60xf32>
    %618 = arith.addf %616, %617 : vector<6x60xf32>
    %cst_644 = arith.constant dense<0.000000e+00> : vector<6x60xf32>
    %619 = tpu.matmul %177, %37, %cst_644 {dimension_numbers = #tpu.dot_dimension_numbers<[1], [0], [0], [1], [0, 0, 1, 1], [], []>} : vector<6x6xf32>, vector<6x60xf32>, vector<6x60xf32> -> vector<6x60xf32>
    %620 = arith.addf %618, %619 : vector<6x60xf32>
    %cst_645 = arith.constant dense<0.000000e+00> : vector<6x60xf32>
    %621 = tpu.matmul %179, %39, %cst_645 {dimension_numbers = #tpu.dot_dimension_numbers<[1], [0], [0], [1], [0, 0, 1, 1], [], []>} : vector<6x6xf32>, vector<6x60xf32>, vector<6x60xf32> -> vector<6x60xf32>
    %622 = arith.addf %620, %621 : vector<6x60xf32>
    %cst_646 = arith.constant dense<0.000000e+00> : vector<6x60xf32>
    %623 = tpu.matmul %187, %41, %cst_646 {dimension_numbers = #tpu.dot_dimension_numbers<[1], [0], [0], [1], [0, 0, 1, 1], [], []>} : vector<6x6xf32>, vector<6x60xf32>, vector<6x60xf32> -> vector<6x60xf32>
    %624 = arith.addf %622, %623 : vector<6x60xf32>
    %cst_647 = arith.constant dense<0.000000e+00> : vector<6x60xf32>
    %625 = tpu.matmul %189, %43, %cst_647 {dimension_numbers = #tpu.dot_dimension_numbers<[1], [0], [0], [1], [0, 0, 1, 1], [], []>} : vector<6x6xf32>, vector<6x60xf32>, vector<6x60xf32> -> vector<6x60xf32>
    %626 = arith.addf %624, %625 : vector<6x60xf32>
    %cst_648 = arith.constant dense<0.000000e+00> : vector<6x60xf32>
    %627 = tpu.matmul %191, %45, %cst_648 {dimension_numbers = #tpu.dot_dimension_numbers<[1], [0], [0], [1], [0, 0, 1, 1], [], []>} : vector<6x6xf32>, vector<6x60xf32>, vector<6x60xf32> -> vector<6x60xf32>
    %628 = arith.addf %626, %627 : vector<6x60xf32>
    %cst_649 = arith.constant dense<0.000000e+00> : vector<6x60xf32>
    %629 = tpu.matmul %193, %47, %cst_649 {dimension_numbers = #tpu.dot_dimension_numbers<[1], [0], [0], [1], [0, 0, 1, 1], [], []>} : vector<6x6xf32>, vector<6x60xf32>, vector<6x60xf32> -> vector<6x60xf32>
    %630 = arith.addf %628, %629 : vector<6x60xf32>
    %cst_650 = arith.constant dense<0.000000e+00> : vector<6x60xf32>
    %631 = tpu.matmul %195, %49, %cst_650 {dimension_numbers = #tpu.dot_dimension_numbers<[1], [0], [0], [1], [0, 0, 1, 1], [], []>} : vector<6x6xf32>, vector<6x60xf32>, vector<6x60xf32> -> vector<6x60xf32>
    %632 = arith.addf %630, %631 : vector<6x60xf32>
    %633 = arith.maximumf %583, %632 : vector<6x60xf32>
    %634 = vector.broadcast %228 : vector<1x60xf32> to vector<6x60xf32>
    %635 = arith.addf %633, %634 : vector<6x60xf32>
    %cst_651 = arith.constant 0.000000e+00 : f32
    %636 = vector.broadcast %cst_651 : f32 to vector<6x60xf32>
    %637 = arith.maximumf %635, %636 : vector<6x60xf32>
    %c0_652 = arith.constant 0 : index
    %c1_653 = arith.constant 1 : index
    %c0_654 = arith.constant 0 : index
    %c0_655 = arith.constant 0 : index
    %638 = vector.load %arg11[%c0_652, %c1_653, %c0_654, %c0_655] : memref<2x2x6x60xf32, #tpu.memory_space<vmem>>, vector<1x1x6x60xf32>
    %639 = vector.shape_cast %638 : vector<1x1x6x60xf32> to vector<6x60xf32>
    %640 = vector.shape_cast %637 : vector<6x60xf32> to vector<1x1x6x60xf32>
    tpu.vector_store %arg11[%c0_652, %c1_653, %c0_654, %c0_655], %640 {strides = array<i32>} : memref<2x2x6x60xf32, #tpu.memory_space<vmem>>, vector<1x1x6x60xf32>,
    %cst_656 = arith.constant dense<0.000000e+00> : vector<6x60xf32>
    %641 = tpu.matmul %133, %1, %cst_656 {dimension_numbers = #tpu.dot_dimension_numbers<[1], [0], [0], [1], [0, 0, 1, 1], [], []>} : vector<6x6xf32>, vector<6x60xf32>, vector<6x60xf32> -> vector<6x60xf32>
    %cst_657 = arith.constant dense<0.000000e+00> : vector<6x60xf32>
    %642 = tpu.matmul %135, %3, %cst_657 {dimension_numbers = #tpu.dot_dimension_numbers<[1], [0], [0], [1], [0, 0, 1, 1], [], []>} : vector<6x6xf32>, vector<6x60xf32>, vector<6x60xf32> -> vector<6x60xf32>
    %643 = arith.addf %641, %642 : vector<6x60xf32>
    %cst_658 = arith.constant dense<0.000000e+00> : vector<6x60xf32>
    %644 = tpu.matmul %137, %5, %cst_658 {dimension_numbers = #tpu.dot_dimension_numbers<[1], [0], [0], [1], [0, 0, 1, 1], [], []>} : vector<6x6xf32>, vector<6x60xf32>, vector<6x60xf32> -> vector<6x60xf32>
    %645 = arith.addf %643, %644 : vector<6x60xf32>
    %cst_659 = arith.constant dense<0.000000e+00> : vector<6x60xf32>
    %646 = tpu.matmul %139, %7, %cst_659 {dimension_numbers = #tpu.dot_dimension_numbers<[1], [0], [0], [1], [0, 0, 1, 1], [], []>} : vector<6x6xf32>, vector<6x60xf32>, vector<6x60xf32> -> vector<6x60xf32>
    %647 = arith.addf %645, %646 : vector<6x60xf32>
    %cst_660 = arith.constant dense<0.000000e+00> : vector<6x60xf32>
    %648 = tpu.matmul %141, %9, %cst_660 {dimension_numbers = #tpu.dot_dimension_numbers<[1], [0], [0], [1], [0, 0, 1, 1], [], []>} : vector<6x6xf32>, vector<6x60xf32>, vector<6x60xf32> -> vector<6x60xf32>
    %649 = arith.addf %647, %648 : vector<6x60xf32>
    %cst_661 = arith.constant dense<0.000000e+00> : vector<6x60xf32>
    %650 = tpu.matmul %149, %11, %cst_661 {dimension_numbers = #tpu.dot_dimension_numbers<[1], [0], [0], [1], [0, 0, 1, 1], [], []>} : vector<6x6xf32>, vector<6x60xf32>, vector<6x60xf32> -> vector<6x60xf32>
    %651 = arith.addf %649, %650 : vector<6x60xf32>
    %cst_662 = arith.constant dense<0.000000e+00> : vector<6x60xf32>
    %652 = tpu.matmul %151, %13, %cst_662 {dimension_numbers = #tpu.dot_dimension_numbers<[1], [0], [0], [1], [0, 0, 1, 1], [], []>} : vector<6x6xf32>, vector<6x60xf32>, vector<6x60xf32> -> vector<6x60xf32>
    %653 = arith.addf %651, %652 : vector<6x60xf32>
    %cst_663 = arith.constant dense<0.000000e+00> : vector<6x60xf32>
    %654 = tpu.matmul %153, %15, %cst_663 {dimension_numbers = #tpu.dot_dimension_numbers<[1], [0], [0], [1], [0, 0, 1, 1], [], []>} : vector<6x6xf32>, vector<6x60xf32>, vector<6x60xf32> -> vector<6x60xf32>
    %655 = arith.addf %653, %654 : vector<6x60xf32>
    %cst_664 = arith.constant dense<0.000000e+00> : vector<6x60xf32>
    %656 = tpu.matmul %155, %17, %cst_664 {dimension_numbers = #tpu.dot_dimension_numbers<[1], [0], [0], [1], [0, 0, 1, 1], [], []>} : vector<6x6xf32>, vector<6x60xf32>, vector<6x60xf32> -> vector<6x60xf32>
    %657 = arith.addf %655, %656 : vector<6x60xf32>
    %cst_665 = arith.constant dense<0.000000e+00> : vector<6x60xf32>
    %658 = tpu.matmul %157, %19, %cst_665 {dimension_numbers = #tpu.dot_dimension_numbers<[1], [0], [0], [1], [0, 0, 1, 1], [], []>} : vector<6x6xf32>, vector<6x60xf32>, vector<6x60xf32> -> vector<6x60xf32>
    %659 = arith.addf %657, %658 : vector<6x60xf32>
    %cst_666 = arith.constant dense<0.000000e+00> : vector<6x60xf32>
    %660 = tpu.matmul %165, %21, %cst_666 {dimension_numbers = #tpu.dot_dimension_numbers<[1], [0], [0], [1], [0, 0, 1, 1], [], []>} : vector<6x6xf32>, vector<6x60xf32>, vector<6x60xf32> -> vector<6x60xf32>
    %661 = arith.addf %659, %660 : vector<6x60xf32>
    %cst_667 = arith.constant dense<0.000000e+00> : vector<6x60xf32>
    %662 = tpu.matmul %167, %23, %cst_667 {dimension_numbers = #tpu.dot_dimension_numbers<[1], [0], [0], [1], [0, 0, 1, 1], [], []>} : vector<6x6xf32>, vector<6x60xf32>, vector<6x60xf32> -> vector<6x60xf32>
    %663 = arith.addf %661, %662 : vector<6x60xf32>
    %cst_668 = arith.constant dense<0.000000e+00> : vector<6x60xf32>
    %664 = tpu.matmul %169, %25, %cst_668 {dimension_numbers = #tpu.dot_dimension_numbers<[1], [0], [0], [1], [0, 0, 1, 1], [], []>} : vector<6x6xf32>, vector<6x60xf32>, vector<6x60xf32> -> vector<6x60xf32>
    %665 = arith.addf %663, %664 : vector<6x60xf32>
    %cst_669 = arith.constant dense<0.000000e+00> : vector<6x60xf32>
    %666 = tpu.matmul %171, %27, %cst_669 {dimension_numbers = #tpu.dot_dimension_numbers<[1], [0], [0], [1], [0, 0, 1, 1], [], []>} : vector<6x6xf32>, vector<6x60xf32>, vector<6x60xf32> -> vector<6x60xf32>
    %667 = arith.addf %665, %666 : vector<6x60xf32>
    %cst_670 = arith.constant dense<0.000000e+00> : vector<6x60xf32>
    %668 = tpu.matmul %173, %29, %cst_670 {dimension_numbers = #tpu.dot_dimension_numbers<[1], [0], [0], [1], [0, 0, 1, 1], [], []>} : vector<6x6xf32>, vector<6x60xf32>, vector<6x60xf32> -> vector<6x60xf32>
    %669 = arith.addf %667, %668 : vector<6x60xf32>
    %cst_671 = arith.constant dense<0.000000e+00> : vector<6x60xf32>
    %670 = tpu.matmul %181, %31, %cst_671 {dimension_numbers = #tpu.dot_dimension_numbers<[1], [0], [0], [1], [0, 0, 1, 1], [], []>} : vector<6x6xf32>, vector<6x60xf32>, vector<6x60xf32> -> vector<6x60xf32>
    %671 = arith.addf %669, %670 : vector<6x60xf32>
    %cst_672 = arith.constant dense<0.000000e+00> : vector<6x60xf32>
    %672 = tpu.matmul %183, %33, %cst_672 {dimension_numbers = #tpu.dot_dimension_numbers<[1], [0], [0], [1], [0, 0, 1, 1], [], []>} : vector<6x6xf32>, vector<6x60xf32>, vector<6x60xf32> -> vector<6x60xf32>
    %673 = arith.addf %671, %672 : vector<6x60xf32>
    %cst_673 = arith.constant dense<0.000000e+00> : vector<6x60xf32>
    %674 = tpu.matmul %185, %35, %cst_673 {dimension_numbers = #tpu.dot_dimension_numbers<[1], [0], [0], [1], [0, 0, 1, 1], [], []>} : vector<6x6xf32>, vector<6x60xf32>, vector<6x60xf32> -> vector<6x60xf32>
    %675 = arith.addf %673, %674 : vector<6x60xf32>
    %cst_674 = arith.constant dense<0.000000e+00> : vector<6x60xf32>
    %676 = tpu.matmul %187, %37, %cst_674 {dimension_numbers = #tpu.dot_dimension_numbers<[1], [0], [0], [1], [0, 0, 1, 1], [], []>} : vector<6x6xf32>, vector<6x60xf32>, vector<6x60xf32> -> vector<6x60xf32>
    %677 = arith.addf %675, %676 : vector<6x60xf32>
    %cst_675 = arith.constant dense<0.000000e+00> : vector<6x60xf32>
    %678 = tpu.matmul %189, %39, %cst_675 {dimension_numbers = #tpu.dot_dimension_numbers<[1], [0], [0], [1], [0, 0, 1, 1], [], []>} : vector<6x6xf32>, vector<6x60xf32>, vector<6x60xf32> -> vector<6x60xf32>
    %679 = arith.addf %677, %678 : vector<6x60xf32>
    %cst_676 = arith.constant dense<0.000000e+00> : vector<6x60xf32>
    %680 = tpu.matmul %197, %41, %cst_676 {dimension_numbers = #tpu.dot_dimension_numbers<[1], [0], [0], [1], [0, 0, 1, 1], [], []>} : vector<6x6xf32>, vector<6x60xf32>, vector<6x60xf32> -> vector<6x60xf32>
    %681 = arith.addf %679, %680 : vector<6x60xf32>
    %cst_677 = arith.constant dense<0.000000e+00> : vector<6x60xf32>
    %682 = tpu.matmul %199, %43, %cst_677 {dimension_numbers = #tpu.dot_dimension_numbers<[1], [0], [0], [1], [0, 0, 1, 1], [], []>} : vector<6x6xf32>, vector<6x60xf32>, vector<6x60xf32> -> vector<6x60xf32>
    %683 = arith.addf %681, %682 : vector<6x60xf32>
    %cst_678 = arith.constant dense<0.000000e+00> : vector<6x60xf32>
    %684 = tpu.matmul %201, %45, %cst_678 {dimension_numbers = #tpu.dot_dimension_numbers<[1], [0], [0], [1], [0, 0, 1, 1], [], []>} : vector<6x6xf32>, vector<6x60xf32>, vector<6x60xf32> -> vector<6x60xf32>
    %685 = arith.addf %683, %684 : vector<6x60xf32>
    %cst_679 = arith.constant dense<0.000000e+00> : vector<6x60xf32>
    %686 = tpu.matmul %203, %47, %cst_679 {dimension_numbers = #tpu.dot_dimension_numbers<[1], [0], [0], [1], [0, 0, 1, 1], [], []>} : vector<6x6xf32>, vector<6x60xf32>, vector<6x60xf32> -> vector<6x60xf32>
    %687 = arith.addf %685, %686 : vector<6x60xf32>
    %cst_680 = arith.constant dense<0.000000e+00> : vector<6x60xf32>
    %688 = tpu.matmul %205, %49, %cst_680 {dimension_numbers = #tpu.dot_dimension_numbers<[1], [0], [0], [1], [0, 0, 1, 1], [], []>} : vector<6x6xf32>, vector<6x60xf32>, vector<6x60xf32> -> vector<6x60xf32>
    %689 = arith.addf %687, %688 : vector<6x60xf32>
    %cst_681 = arith.constant dense<0.000000e+00> : vector<6x60xf32>
    %690 = tpu.matmul %135, %1, %cst_681 {dimension_numbers = #tpu.dot_dimension_numbers<[1], [0], [0], [1], [0, 0, 1, 1], [], []>} : vector<6x6xf32>, vector<6x60xf32>, vector<6x60xf32> -> vector<6x60xf32>
    %cst_682 = arith.constant dense<0.000000e+00> : vector<6x60xf32>
    %691 = tpu.matmul %137, %3, %cst_682 {dimension_numbers = #tpu.dot_dimension_numbers<[1], [0], [0], [1], [0, 0, 1, 1], [], []>} : vector<6x6xf32>, vector<6x60xf32>, vector<6x60xf32> -> vector<6x60xf32>
    %692 = arith.addf %690, %691 : vector<6x60xf32>
    %cst_683 = arith.constant dense<0.000000e+00> : vector<6x60xf32>
    %693 = tpu.matmul %139, %5, %cst_683 {dimension_numbers = #tpu.dot_dimension_numbers<[1], [0], [0], [1], [0, 0, 1, 1], [], []>} : vector<6x6xf32>, vector<6x60xf32>, vector<6x60xf32> -> vector<6x60xf32>
    %694 = arith.addf %692, %693 : vector<6x60xf32>
    %cst_684 = arith.constant dense<0.000000e+00> : vector<6x60xf32>
    %695 = tpu.matmul %141, %7, %cst_684 {dimension_numbers = #tpu.dot_dimension_numbers<[1], [0], [0], [1], [0, 0, 1, 1], [], []>} : vector<6x6xf32>, vector<6x60xf32>, vector<6x60xf32> -> vector<6x60xf32>
    %696 = arith.addf %694, %695 : vector<6x60xf32>
    %cst_685 = arith.constant dense<0.000000e+00> : vector<6x60xf32>
    %697 = tpu.matmul %143, %9, %cst_685 {dimension_numbers = #tpu.dot_dimension_numbers<[1], [0], [0], [1], [0, 0, 1, 1], [], []>} : vector<6x6xf32>, vector<6x60xf32>, vector<6x60xf32> -> vector<6x60xf32>
    %698 = arith.addf %696, %697 : vector<6x60xf32>
    %cst_686 = arith.constant dense<0.000000e+00> : vector<6x60xf32>
    %699 = tpu.matmul %151, %11, %cst_686 {dimension_numbers = #tpu.dot_dimension_numbers<[1], [0], [0], [1], [0, 0, 1, 1], [], []>} : vector<6x6xf32>, vector<6x60xf32>, vector<6x60xf32> -> vector<6x60xf32>
    %700 = arith.addf %698, %699 : vector<6x60xf32>
    %cst_687 = arith.constant dense<0.000000e+00> : vector<6x60xf32>
    %701 = tpu.matmul %153, %13, %cst_687 {dimension_numbers = #tpu.dot_dimension_numbers<[1], [0], [0], [1], [0, 0, 1, 1], [], []>} : vector<6x6xf32>, vector<6x60xf32>, vector<6x60xf32> -> vector<6x60xf32>
    %702 = arith.addf %700, %701 : vector<6x60xf32>
    %cst_688 = arith.constant dense<0.000000e+00> : vector<6x60xf32>
    %703 = tpu.matmul %155, %15, %cst_688 {dimension_numbers = #tpu.dot_dimension_numbers<[1], [0], [0], [1], [0, 0, 1, 1], [], []>} : vector<6x6xf32>, vector<6x60xf32>, vector<6x60xf32> -> vector<6x60xf32>
    %704 = arith.addf %702, %703 : vector<6x60xf32>
    %cst_689 = arith.constant dense<0.000000e+00> : vector<6x60xf32>
    %705 = tpu.matmul %157, %17, %cst_689 {dimension_numbers = #tpu.dot_dimension_numbers<[1], [0], [0], [1], [0, 0, 1, 1], [], []>} : vector<6x6xf32>, vector<6x60xf32>, vector<6x60xf32> -> vector<6x60xf32>
    %706 = arith.addf %704, %705 : vector<6x60xf32>
    %cst_690 = arith.constant dense<0.000000e+00> : vector<6x60xf32>
    %707 = tpu.matmul %159, %19, %cst_690 {dimension_numbers = #tpu.dot_dimension_numbers<[1], [0], [0], [1], [0, 0, 1, 1], [], []>} : vector<6x6xf32>, vector<6x60xf32>, vector<6x60xf32> -> vector<6x60xf32>
    %708 = arith.addf %706, %707 : vector<6x60xf32>
    %cst_691 = arith.constant dense<0.000000e+00> : vector<6x60xf32>
    %709 = tpu.matmul %167, %21, %cst_691 {dimension_numbers = #tpu.dot_dimension_numbers<[1], [0], [0], [1], [0, 0, 1, 1], [], []>} : vector<6x6xf32>, vector<6x60xf32>, vector<6x60xf32> -> vector<6x60xf32>
    %710 = arith.addf %708, %709 : vector<6x60xf32>
    %cst_692 = arith.constant dense<0.000000e+00> : vector<6x60xf32>
    %711 = tpu.matmul %169, %23, %cst_692 {dimension_numbers = #tpu.dot_dimension_numbers<[1], [0], [0], [1], [0, 0, 1, 1], [], []>} : vector<6x6xf32>, vector<6x60xf32>, vector<6x60xf32> -> vector<6x60xf32>
    %712 = arith.addf %710, %711 : vector<6x60xf32>
    %cst_693 = arith.constant dense<0.000000e+00> : vector<6x60xf32>
    %713 = tpu.matmul %171, %25, %cst_693 {dimension_numbers = #tpu.dot_dimension_numbers<[1], [0], [0], [1], [0, 0, 1, 1], [], []>} : vector<6x6xf32>, vector<6x60xf32>, vector<6x60xf32> -> vector<6x60xf32>
    %714 = arith.addf %712, %713 : vector<6x60xf32>
    %cst_694 = arith.constant dense<0.000000e+00> : vector<6x60xf32>
    %715 = tpu.matmul %173, %27, %cst_694 {dimension_numbers = #tpu.dot_dimension_numbers<[1], [0], [0], [1], [0, 0, 1, 1], [], []>} : vector<6x6xf32>, vector<6x60xf32>, vector<6x60xf32> -> vector<6x60xf32>
    %716 = arith.addf %714, %715 : vector<6x60xf32>
    %cst_695 = arith.constant dense<0.000000e+00> : vector<6x60xf32>
    %717 = tpu.matmul %175, %29, %cst_695 {dimension_numbers = #tpu.dot_dimension_numbers<[1], [0], [0], [1], [0, 0, 1, 1], [], []>} : vector<6x6xf32>, vector<6x60xf32>, vector<6x60xf32> -> vector<6x60xf32>
    %718 = arith.addf %716, %717 : vector<6x60xf32>
    %cst_696 = arith.constant dense<0.000000e+00> : vector<6x60xf32>
    %719 = tpu.matmul %183, %31, %cst_696 {dimension_numbers = #tpu.dot_dimension_numbers<[1], [0], [0], [1], [0, 0, 1, 1], [], []>} : vector<6x6xf32>, vector<6x60xf32>, vector<6x60xf32> -> vector<6x60xf32>
    %720 = arith.addf %718, %719 : vector<6x60xf32>
    %cst_697 = arith.constant dense<0.000000e+00> : vector<6x60xf32>
    %721 = tpu.matmul %185, %33, %cst_697 {dimension_numbers = #tpu.dot_dimension_numbers<[1], [0], [0], [1], [0, 0, 1, 1], [], []>} : vector<6x6xf32>, vector<6x60xf32>, vector<6x60xf32> -> vector<6x60xf32>
    %722 = arith.addf %720, %721 : vector<6x60xf32>
    %cst_698 = arith.constant dense<0.000000e+00> : vector<6x60xf32>
    %723 = tpu.matmul %187, %35, %cst_698 {dimension_numbers = #tpu.dot_dimension_numbers<[1], [0], [0], [1], [0, 0, 1, 1], [], []>} : vector<6x6xf32>, vector<6x60xf32>, vector<6x60xf32> -> vector<6x60xf32>
    %724 = arith.addf %722, %723 : vector<6x60xf32>
    %cst_699 = arith.constant dense<0.000000e+00> : vector<6x60xf32>
    %725 = tpu.matmul %189, %37, %cst_699 {dimension_numbers = #tpu.dot_dimension_numbers<[1], [0], [0], [1], [0, 0, 1, 1], [], []>} : vector<6x6xf32>, vector<6x60xf32>, vector<6x60xf32> -> vector<6x60xf32>
    %726 = arith.addf %724, %725 : vector<6x60xf32>
    %cst_700 = arith.constant dense<0.000000e+00> : vector<6x60xf32>
    %727 = tpu.matmul %191, %39, %cst_700 {dimension_numbers = #tpu.dot_dimension_numbers<[1], [0], [0], [1], [0, 0, 1, 1], [], []>} : vector<6x6xf32>, vector<6x60xf32>, vector<6x60xf32> -> vector<6x60xf32>
    %728 = arith.addf %726, %727 : vector<6x60xf32>
    %cst_701 = arith.constant dense<0.000000e+00> : vector<6x60xf32>
    %729 = tpu.matmul %199, %41, %cst_701 {dimension_numbers = #tpu.dot_dimension_numbers<[1], [0], [0], [1], [0, 0, 1, 1], [], []>} : vector<6x6xf32>, vector<6x60xf32>, vector<6x60xf32> -> vector<6x60xf32>
    %730 = arith.addf %728, %729 : vector<6x60xf32>
    %cst_702 = arith.constant dense<0.000000e+00> : vector<6x60xf32>
    %731 = tpu.matmul %201, %43, %cst_702 {dimension_numbers = #tpu.dot_dimension_numbers<[1], [0], [0], [1], [0, 0, 1, 1], [], []>} : vector<6x6xf32>, vector<6x60xf32>, vector<6x60xf32> -> vector<6x60xf32>
    %732 = arith.addf %730, %731 : vector<6x60xf32>
    %cst_703 = arith.constant dense<0.000000e+00> : vector<6x60xf32>
    %733 = tpu.matmul %203, %45, %cst_703 {dimension_numbers = #tpu.dot_dimension_numbers<[1], [0], [0], [1], [0, 0, 1, 1], [], []>} : vector<6x6xf32>, vector<6x60xf32>, vector<6x60xf32> -> vector<6x60xf32>
    %734 = arith.addf %732, %733 : vector<6x60xf32>
    %cst_704 = arith.constant dense<0.000000e+00> : vector<6x60xf32>
    %735 = tpu.matmul %205, %47, %cst_704 {dimension_numbers = #tpu.dot_dimension_numbers<[1], [0], [0], [1], [0, 0, 1, 1], [], []>} : vector<6x6xf32>, vector<6x60xf32>, vector<6x60xf32> -> vector<6x60xf32>
    %736 = arith.addf %734, %735 : vector<6x60xf32>
    %cst_705 = arith.constant dense<0.000000e+00> : vector<6x60xf32>
    %737 = tpu.matmul %207, %49, %cst_705 {dimension_numbers = #tpu.dot_dimension_numbers<[1], [0], [0], [1], [0, 0, 1, 1], [], []>} : vector<6x6xf32>, vector<6x60xf32>, vector<6x60xf32> -> vector<6x60xf32>
    %738 = arith.addf %736, %737 : vector<6x60xf32>
    %739 = arith.maximumf %689, %738 : vector<6x60xf32>
    %cst_706 = arith.constant dense<0.000000e+00> : vector<6x60xf32>
    %740 = tpu.matmul %149, %1, %cst_706 {dimension_numbers = #tpu.dot_dimension_numbers<[1], [0], [0], [1], [0, 0, 1, 1], [], []>} : vector<6x6xf32>, vector<6x60xf32>, vector<6x60xf32> -> vector<6x60xf32>
    %cst_707 = arith.constant dense<0.000000e+00> : vector<6x60xf32>
    %741 = tpu.matmul %151, %3, %cst_707 {dimension_numbers = #tpu.dot_dimension_numbers<[1], [0], [0], [1], [0, 0, 1, 1], [], []>} : vector<6x6xf32>, vector<6x60xf32>, vector<6x60xf32> -> vector<6x60xf32>
    %742 = arith.addf %740, %741 : vector<6x60xf32>
    %cst_708 = arith.constant dense<0.000000e+00> : vector<6x60xf32>
    %743 = tpu.matmul %153, %5, %cst_708 {dimension_numbers = #tpu.dot_dimension_numbers<[1], [0], [0], [1], [0, 0, 1, 1], [], []>} : vector<6x6xf32>, vector<6x60xf32>, vector<6x60xf32> -> vector<6x60xf32>
    %744 = arith.addf %742, %743 : vector<6x60xf32>
    %cst_709 = arith.constant dense<0.000000e+00> : vector<6x60xf32>
    %745 = tpu.matmul %155, %7, %cst_709 {dimension_numbers = #tpu.dot_dimension_numbers<[1], [0], [0], [1], [0, 0, 1, 1], [], []>} : vector<6x6xf32>, vector<6x60xf32>, vector<6x60xf32> -> vector<6x60xf32>
    %746 = arith.addf %744, %745 : vector<6x60xf32>
    %cst_710 = arith.constant dense<0.000000e+00> : vector<6x60xf32>
    %747 = tpu.matmul %157, %9, %cst_710 {dimension_numbers = #tpu.dot_dimension_numbers<[1], [0], [0], [1], [0, 0, 1, 1], [], []>} : vector<6x6xf32>, vector<6x60xf32>, vector<6x60xf32> -> vector<6x60xf32>
    %748 = arith.addf %746, %747 : vector<6x60xf32>
    %cst_711 = arith.constant dense<0.000000e+00> : vector<6x60xf32>
    %749 = tpu.matmul %165, %11, %cst_711 {dimension_numbers = #tpu.dot_dimension_numbers<[1], [0], [0], [1], [0, 0, 1, 1], [], []>} : vector<6x6xf32>, vector<6x60xf32>, vector<6x60xf32> -> vector<6x60xf32>
    %750 = arith.addf %748, %749 : vector<6x60xf32>
    %cst_712 = arith.constant dense<0.000000e+00> : vector<6x60xf32>
    %751 = tpu.matmul %167, %13, %cst_712 {dimension_numbers = #tpu.dot_dimension_numbers<[1], [0], [0], [1], [0, 0, 1, 1], [], []>} : vector<6x6xf32>, vector<6x60xf32>, vector<6x60xf32> -> vector<6x60xf32>
    %752 = arith.addf %750, %751 : vector<6x60xf32>
    %cst_713 = arith.constant dense<0.000000e+00> : vector<6x60xf32>
    %753 = tpu.matmul %169, %15, %cst_713 {dimension_numbers = #tpu.dot_dimension_numbers<[1], [0], [0], [1], [0, 0, 1, 1], [], []>} : vector<6x6xf32>, vector<6x60xf32>, vector<6x60xf32> -> vector<6x60xf32>
    %754 = arith.addf %752, %753 : vector<6x60xf32>
    %cst_714 = arith.constant dense<0.000000e+00> : vector<6x60xf32>
    %755 = tpu.matmul %171, %17, %cst_714 {dimension_numbers = #tpu.dot_dimension_numbers<[1], [0], [0], [1], [0, 0, 1, 1], [], []>} : vector<6x6xf32>, vector<6x60xf32>, vector<6x60xf32> -> vector<6x60xf32>
    %756 = arith.addf %754, %755 : vector<6x60xf32>
    %cst_715 = arith.constant dense<0.000000e+00> : vector<6x60xf32>
    %757 = tpu.matmul %173, %19, %cst_715 {dimension_numbers = #tpu.dot_dimension_numbers<[1], [0], [0], [1], [0, 0, 1, 1], [], []>} : vector<6x6xf32>, vector<6x60xf32>, vector<6x60xf32> -> vector<6x60xf32>
    %758 = arith.addf %756, %757 : vector<6x60xf32>
    %cst_716 = arith.constant dense<0.000000e+00> : vector<6x60xf32>
    %759 = tpu.matmul %181, %21, %cst_716 {dimension_numbers = #tpu.dot_dimension_numbers<[1], [0], [0], [1], [0, 0, 1, 1], [], []>} : vector<6x6xf32>, vector<6x60xf32>, vector<6x60xf32> -> vector<6x60xf32>
    %760 = arith.addf %758, %759 : vector<6x60xf32>
    %cst_717 = arith.constant dense<0.000000e+00> : vector<6x60xf32>
    %761 = tpu.matmul %183, %23, %cst_717 {dimension_numbers = #tpu.dot_dimension_numbers<[1], [0], [0], [1], [0, 0, 1, 1], [], []>} : vector<6x6xf32>, vector<6x60xf32>, vector<6x60xf32> -> vector<6x60xf32>
    %762 = arith.addf %760, %761 : vector<6x60xf32>
    %cst_718 = arith.constant dense<0.000000e+00> : vector<6x60xf32>
    %763 = tpu.matmul %185, %25, %cst_718 {dimension_numbers = #tpu.dot_dimension_numbers<[1], [0], [0], [1], [0, 0, 1, 1], [], []>} : vector<6x6xf32>, vector<6x60xf32>, vector<6x60xf32> -> vector<6x60xf32>
    %764 = arith.addf %762, %763 : vector<6x60xf32>
    %cst_719 = arith.constant dense<0.000000e+00> : vector<6x60xf32>
    %765 = tpu.matmul %187, %27, %cst_719 {dimension_numbers = #tpu.dot_dimension_numbers<[1], [0], [0], [1], [0, 0, 1, 1], [], []>} : vector<6x6xf32>, vector<6x60xf32>, vector<6x60xf32> -> vector<6x60xf32>
    %766 = arith.addf %764, %765 : vector<6x60xf32>
    %cst_720 = arith.constant dense<0.000000e+00> : vector<6x60xf32>
    %767 = tpu.matmul %189, %29, %cst_720 {dimension_numbers = #tpu.dot_dimension_numbers<[1], [0], [0], [1], [0, 0, 1, 1], [], []>} : vector<6x6xf32>, vector<6x60xf32>, vector<6x60xf32> -> vector<6x60xf32>
    %768 = arith.addf %766, %767 : vector<6x60xf32>
    %cst_721 = arith.constant dense<0.000000e+00> : vector<6x60xf32>
    %769 = tpu.matmul %197, %31, %cst_721 {dimension_numbers = #tpu.dot_dimension_numbers<[1], [0], [0], [1], [0, 0, 1, 1], [], []>} : vector<6x6xf32>, vector<6x60xf32>, vector<6x60xf32> -> vector<6x60xf32>
    %770 = arith.addf %768, %769 : vector<6x60xf32>
    %cst_722 = arith.constant dense<0.000000e+00> : vector<6x60xf32>
    %771 = tpu.matmul %199, %33, %cst_722 {dimension_numbers = #tpu.dot_dimension_numbers<[1], [0], [0], [1], [0, 0, 1, 1], [], []>} : vector<6x6xf32>, vector<6x60xf32>, vector<6x60xf32> -> vector<6x60xf32>
    %772 = arith.addf %770, %771 : vector<6x60xf32>
    %cst_723 = arith.constant dense<0.000000e+00> : vector<6x60xf32>
    %773 = tpu.matmul %201, %35, %cst_723 {dimension_numbers = #tpu.dot_dimension_numbers<[1], [0], [0], [1], [0, 0, 1, 1], [], []>} : vector<6x6xf32>, vector<6x60xf32>, vector<6x60xf32> -> vector<6x60xf32>
    %774 = arith.addf %772, %773 : vector<6x60xf32>
    %cst_724 = arith.constant dense<0.000000e+00> : vector<6x60xf32>
    %775 = tpu.matmul %203, %37, %cst_724 {dimension_numbers = #tpu.dot_dimension_numbers<[1], [0], [0], [1], [0, 0, 1, 1], [], []>} : vector<6x6xf32>, vector<6x60xf32>, vector<6x60xf32> -> vector<6x60xf32>
    %776 = arith.addf %774, %775 : vector<6x60xf32>
    %cst_725 = arith.constant dense<0.000000e+00> : vector<6x60xf32>
    %777 = tpu.matmul %205, %39, %cst_725 {dimension_numbers = #tpu.dot_dimension_numbers<[1], [0], [0], [1], [0, 0, 1, 1], [], []>} : vector<6x6xf32>, vector<6x60xf32>, vector<6x60xf32> -> vector<6x60xf32>
    %778 = arith.addf %776, %777 : vector<6x60xf32>
    %cst_726 = arith.constant dense<0.000000e+00> : vector<6x60xf32>
    %779 = tpu.matmul %213, %41, %cst_726 {dimension_numbers = #tpu.dot_dimension_numbers<[1], [0], [0], [1], [0, 0, 1, 1], [], []>} : vector<6x6xf32>, vector<6x60xf32>, vector<6x60xf32> -> vector<6x60xf32>
    %780 = arith.addf %778, %779 : vector<6x60xf32>
    %cst_727 = arith.constant dense<0.000000e+00> : vector<6x60xf32>
    %781 = tpu.matmul %215, %43, %cst_727 {dimension_numbers = #tpu.dot_dimension_numbers<[1], [0], [0], [1], [0, 0, 1, 1], [], []>} : vector<6x6xf32>, vector<6x60xf32>, vector<6x60xf32> -> vector<6x60xf32>
    %782 = arith.addf %780, %781 : vector<6x60xf32>
    %cst_728 = arith.constant dense<0.000000e+00> : vector<6x60xf32>
    %783 = tpu.matmul %217, %45, %cst_728 {dimension_numbers = #tpu.dot_dimension_numbers<[1], [0], [0], [1], [0, 0, 1, 1], [], []>} : vector<6x6xf32>, vector<6x60xf32>, vector<6x60xf32> -> vector<6x60xf32>
    %784 = arith.addf %782, %783 : vector<6x60xf32>
    %cst_729 = arith.constant dense<0.000000e+00> : vector<6x60xf32>
    %785 = tpu.matmul %219, %47, %cst_729 {dimension_numbers = #tpu.dot_dimension_numbers<[1], [0], [0], [1], [0, 0, 1, 1], [], []>} : vector<6x6xf32>, vector<6x60xf32>, vector<6x60xf32> -> vector<6x60xf32>
    %786 = arith.addf %784, %785 : vector<6x60xf32>
    %cst_730 = arith.constant dense<0.000000e+00> : vector<6x60xf32>
    %787 = tpu.matmul %221, %49, %cst_730 {dimension_numbers = #tpu.dot_dimension_numbers<[1], [0], [0], [1], [0, 0, 1, 1], [], []>} : vector<6x6xf32>, vector<6x60xf32>, vector<6x60xf32> -> vector<6x60xf32>
    %788 = arith.addf %786, %787 : vector<6x60xf32>
    %789 = arith.maximumf %739, %788 : vector<6x60xf32>
    %cst_731 = arith.constant dense<0.000000e+00> : vector<6x60xf32>
    %790 = tpu.matmul %151, %1, %cst_731 {dimension_numbers = #tpu.dot_dimension_numbers<[1], [0], [0], [1], [0, 0, 1, 1], [], []>} : vector<6x6xf32>, vector<6x60xf32>, vector<6x60xf32> -> vector<6x60xf32>
    %cst_732 = arith.constant dense<0.000000e+00> : vector<6x60xf32>
    %791 = tpu.matmul %153, %3, %cst_732 {dimension_numbers = #tpu.dot_dimension_numbers<[1], [0], [0], [1], [0, 0, 1, 1], [], []>} : vector<6x6xf32>, vector<6x60xf32>, vector<6x60xf32> -> vector<6x60xf32>
    %792 = arith.addf %790, %791 : vector<6x60xf32>
    %cst_733 = arith.constant dense<0.000000e+00> : vector<6x60xf32>
    %793 = tpu.matmul %155, %5, %cst_733 {dimension_numbers = #tpu.dot_dimension_numbers<[1], [0], [0], [1], [0, 0, 1, 1], [], []>} : vector<6x6xf32>, vector<6x60xf32>, vector<6x60xf32> -> vector<6x60xf32>
    %794 = arith.addf %792, %793 : vector<6x60xf32>
    %cst_734 = arith.constant dense<0.000000e+00> : vector<6x60xf32>
    %795 = tpu.matmul %157, %7, %cst_734 {dimension_numbers = #tpu.dot_dimension_numbers<[1], [0], [0], [1], [0, 0, 1, 1], [], []>} : vector<6x6xf32>, vector<6x60xf32>, vector<6x60xf32> -> vector<6x60xf32>
    %796 = arith.addf %794, %795 : vector<6x60xf32>
    %cst_735 = arith.constant dense<0.000000e+00> : vector<6x60xf32>
    %797 = tpu.matmul %159, %9, %cst_735 {dimension_numbers = #tpu.dot_dimension_numbers<[1], [0], [0], [1], [0, 0, 1, 1], [], []>} : vector<6x6xf32>, vector<6x60xf32>, vector<6x60xf32> -> vector<6x60xf32>
    %798 = arith.addf %796, %797 : vector<6x60xf32>
    %cst_736 = arith.constant dense<0.000000e+00> : vector<6x60xf32>
    %799 = tpu.matmul %167, %11, %cst_736 {dimension_numbers = #tpu.dot_dimension_numbers<[1], [0], [0], [1], [0, 0, 1, 1], [], []>} : vector<6x6xf32>, vector<6x60xf32>, vector<6x60xf32> -> vector<6x60xf32>
    %800 = arith.addf %798, %799 : vector<6x60xf32>
    %cst_737 = arith.constant dense<0.000000e+00> : vector<6x60xf32>
    %801 = tpu.matmul %169, %13, %cst_737 {dimension_numbers = #tpu.dot_dimension_numbers<[1], [0], [0], [1], [0, 0, 1, 1], [], []>} : vector<6x6xf32>, vector<6x60xf32>, vector<6x60xf32> -> vector<6x60xf32>
    %802 = arith.addf %800, %801 : vector<6x60xf32>
    %cst_738 = arith.constant dense<0.000000e+00> : vector<6x60xf32>
    %803 = tpu.matmul %171, %15, %cst_738 {dimension_numbers = #tpu.dot_dimension_numbers<[1], [0], [0], [1], [0, 0, 1, 1], [], []>} : vector<6x6xf32>, vector<6x60xf32>, vector<6x60xf32> -> vector<6x60xf32>
    %804 = arith.addf %802, %803 : vector<6x60xf32>
    %cst_739 = arith.constant dense<0.000000e+00> : vector<6x60xf32>
    %805 = tpu.matmul %173, %17, %cst_739 {dimension_numbers = #tpu.dot_dimension_numbers<[1], [0], [0], [1], [0, 0, 1, 1], [], []>} : vector<6x6xf32>, vector<6x60xf32>, vector<6x60xf32> -> vector<6x60xf32>
    %806 = arith.addf %804, %805 : vector<6x60xf32>
    %cst_740 = arith.constant dense<0.000000e+00> : vector<6x60xf32>
    %807 = tpu.matmul %175, %19, %cst_740 {dimension_numbers = #tpu.dot_dimension_numbers<[1], [0], [0], [1], [0, 0, 1, 1], [], []>} : vector<6x6xf32>, vector<6x60xf32>, vector<6x60xf32> -> vector<6x60xf32>
    %808 = arith.addf %806, %807 : vector<6x60xf32>
    %cst_741 = arith.constant dense<0.000000e+00> : vector<6x60xf32>
    %809 = tpu.matmul %183, %21, %cst_741 {dimension_numbers = #tpu.dot_dimension_numbers<[1], [0], [0], [1], [0, 0, 1, 1], [], []>} : vector<6x6xf32>, vector<6x60xf32>, vector<6x60xf32> -> vector<6x60xf32>
    %810 = arith.addf %808, %809 : vector<6x60xf32>
    %cst_742 = arith.constant dense<0.000000e+00> : vector<6x60xf32>
    %811 = tpu.matmul %185, %23, %cst_742 {dimension_numbers = #tpu.dot_dimension_numbers<[1], [0], [0], [1], [0, 0, 1, 1], [], []>} : vector<6x6xf32>, vector<6x60xf32>, vector<6x60xf32> -> vector<6x60xf32>
    %812 = arith.addf %810, %811 : vector<6x60xf32>
    %cst_743 = arith.constant dense<0.000000e+00> : vector<6x60xf32>
    %813 = tpu.matmul %187, %25, %cst_743 {dimension_numbers = #tpu.dot_dimension_numbers<[1], [0], [0], [1], [0, 0, 1, 1], [], []>} : vector<6x6xf32>, vector<6x60xf32>, vector<6x60xf32> -> vector<6x60xf32>
    %814 = arith.addf %812, %813 : vector<6x60xf32>
    %cst_744 = arith.constant dense<0.000000e+00> : vector<6x60xf32>
    %815 = tpu.matmul %189, %27, %cst_744 {dimension_numbers = #tpu.dot_dimension_numbers<[1], [0], [0], [1], [0, 0, 1, 1], [], []>} : vector<6x6xf32>, vector<6x60xf32>, vector<6x60xf32> -> vector<6x60xf32>
    %816 = arith.addf %814, %815 : vector<6x60xf32>
    %cst_745 = arith.constant dense<0.000000e+00> : vector<6x60xf32>
    %817 = tpu.matmul %191, %29, %cst_745 {dimension_numbers = #tpu.dot_dimension_numbers<[1], [0], [0], [1], [0, 0, 1, 1], [], []>} : vector<6x6xf32>, vector<6x60xf32>, vector<6x60xf32> -> vector<6x60xf32>
    %818 = arith.addf %816, %817 : vector<6x60xf32>
    %cst_746 = arith.constant dense<0.000000e+00> : vector<6x60xf32>
    %819 = tpu.matmul %199, %31, %cst_746 {dimension_numbers = #tpu.dot_dimension_numbers<[1], [0], [0], [1], [0, 0, 1, 1], [], []>} : vector<6x6xf32>, vector<6x60xf32>, vector<6x60xf32> -> vector<6x60xf32>
    %820 = arith.addf %818, %819 : vector<6x60xf32>
    %cst_747 = arith.constant dense<0.000000e+00> : vector<6x60xf32>
    %821 = tpu.matmul %201, %33, %cst_747 {dimension_numbers = #tpu.dot_dimension_numbers<[1], [0], [0], [1], [0, 0, 1, 1], [], []>} : vector<6x6xf32>, vector<6x60xf32>, vector<6x60xf32> -> vector<6x60xf32>
    %822 = arith.addf %820, %821 : vector<6x60xf32>
    %cst_748 = arith.constant dense<0.000000e+00> : vector<6x60xf32>
    %823 = tpu.matmul %203, %35, %cst_748 {dimension_numbers = #tpu.dot_dimension_numbers<[1], [0], [0], [1], [0, 0, 1, 1], [], []>} : vector<6x6xf32>, vector<6x60xf32>, vector<6x60xf32> -> vector<6x60xf32>
    %824 = arith.addf %822, %823 : vector<6x60xf32>
    %cst_749 = arith.constant dense<0.000000e+00> : vector<6x60xf32>
    %825 = tpu.matmul %205, %37, %cst_749 {dimension_numbers = #tpu.dot_dimension_numbers<[1], [0], [0], [1], [0, 0, 1, 1], [], []>} : vector<6x6xf32>, vector<6x60xf32>, vector<6x60xf32> -> vector<6x60xf32>
    %826 = arith.addf %824, %825 : vector<6x60xf32>
    %cst_750 = arith.constant dense<0.000000e+00> : vector<6x60xf32>
    %827 = tpu.matmul %207, %39, %cst_750 {dimension_numbers = #tpu.dot_dimension_numbers<[1], [0], [0], [1], [0, 0, 1, 1], [], []>} : vector<6x6xf32>, vector<6x60xf32>, vector<6x60xf32> -> vector<6x60xf32>
    %828 = arith.addf %826, %827 : vector<6x60xf32>
    %cst_751 = arith.constant dense<0.000000e+00> : vector<6x60xf32>
    %829 = tpu.matmul %215, %41, %cst_751 {dimension_numbers = #tpu.dot_dimension_numbers<[1], [0], [0], [1], [0, 0, 1, 1], [], []>} : vector<6x6xf32>, vector<6x60xf32>, vector<6x60xf32> -> vector<6x60xf32>
    %830 = arith.addf %828, %829 : vector<6x60xf32>
    %cst_752 = arith.constant dense<0.000000e+00> : vector<6x60xf32>
    %831 = tpu.matmul %217, %43, %cst_752 {dimension_numbers = #tpu.dot_dimension_numbers<[1], [0], [0], [1], [0, 0, 1, 1], [], []>} : vector<6x6xf32>, vector<6x60xf32>, vector<6x60xf32> -> vector<6x60xf32>
    %832 = arith.addf %830, %831 : vector<6x60xf32>
    %cst_753 = arith.constant dense<0.000000e+00> : vector<6x60xf32>
    %833 = tpu.matmul %219, %45, %cst_753 {dimension_numbers = #tpu.dot_dimension_numbers<[1], [0], [0], [1], [0, 0, 1, 1], [], []>} : vector<6x6xf32>, vector<6x60xf32>, vector<6x60xf32> -> vector<6x60xf32>
    %834 = arith.addf %832, %833 : vector<6x60xf32>
    %cst_754 = arith.constant dense<0.000000e+00> : vector<6x60xf32>
    %835 = tpu.matmul %221, %47, %cst_754 {dimension_numbers = #tpu.dot_dimension_numbers<[1], [0], [0], [1], [0, 0, 1, 1], [], []>} : vector<6x6xf32>, vector<6x60xf32>, vector<6x60xf32> -> vector<6x60xf32>
    %836 = arith.addf %834, %835 : vector<6x60xf32>
    %cst_755 = arith.constant dense<0.000000e+00> : vector<6x60xf32>
    %837 = tpu.matmul %223, %49, %cst_755 {dimension_numbers = #tpu.dot_dimension_numbers<[1], [0], [0], [1], [0, 0, 1, 1], [], []>} : vector<6x6xf32>, vector<6x60xf32>, vector<6x60xf32> -> vector<6x60xf32>
    %838 = arith.addf %836, %837 : vector<6x60xf32>
    %839 = arith.maximumf %789, %838 : vector<6x60xf32>
    %840 = vector.broadcast %228 : vector<1x60xf32> to vector<6x60xf32>
    %841 = arith.addf %839, %840 : vector<6x60xf32>
    %cst_756 = arith.constant 0.000000e+00 : f32
    %842 = vector.broadcast %cst_756 : f32 to vector<6x60xf32>
    %843 = arith.maximumf %841, %842 : vector<6x60xf32>
    %c1_757 = arith.constant 1 : index
    %c0_758 = arith.constant 0 : index
    %c0_759 = arith.constant 0 : index
    %c0_760 = arith.constant 0 : index
    %844 = vector.load %arg11[%c1_757, %c0_758, %c0_759, %c0_760] : memref<2x2x6x60xf32, #tpu.memory_space<vmem>>, vector<1x1x6x60xf32>
    %845 = vector.shape_cast %844 : vector<1x1x6x60xf32> to vector<6x60xf32>
    %846 = vector.shape_cast %843 : vector<6x60xf32> to vector<1x1x6x60xf32>
    tpu.vector_store %arg11[%c1_757, %c0_758, %c0_759, %c0_760], %846 {strides = array<i32>} : memref<2x2x6x60xf32, #tpu.memory_space<vmem>>, vector<1x1x6x60xf32>,
    %cst_761 = arith.constant dense<0.000000e+00> : vector<6x60xf32>
    %847 = tpu.matmul %137, %1, %cst_761 {dimension_numbers = #tpu.dot_dimension_numbers<[1], [0], [0], [1], [0, 0, 1, 1], [], []>} : vector<6x6xf32>, vector<6x60xf32>, vector<6x60xf32> -> vector<6x60xf32>
    %cst_762 = arith.constant dense<0.000000e+00> : vector<6x60xf32>
    %848 = tpu.matmul %139, %3, %cst_762 {dimension_numbers = #tpu.dot_dimension_numbers<[1], [0], [0], [1], [0, 0, 1, 1], [], []>} : vector<6x6xf32>, vector<6x60xf32>, vector<6x60xf32> -> vector<6x60xf32>
    %849 = arith.addf %847, %848 : vector<6x60xf32>
    %cst_763 = arith.constant dense<0.000000e+00> : vector<6x60xf32>
    %850 = tpu.matmul %141, %5, %cst_763 {dimension_numbers = #tpu.dot_dimension_numbers<[1], [0], [0], [1], [0, 0, 1, 1], [], []>} : vector<6x6xf32>, vector<6x60xf32>, vector<6x60xf32> -> vector<6x60xf32>
    %851 = arith.addf %849, %850 : vector<6x60xf32>
    %cst_764 = arith.constant dense<0.000000e+00> : vector<6x60xf32>
    %852 = tpu.matmul %143, %7, %cst_764 {dimension_numbers = #tpu.dot_dimension_numbers<[1], [0], [0], [1], [0, 0, 1, 1], [], []>} : vector<6x6xf32>, vector<6x60xf32>, vector<6x60xf32> -> vector<6x60xf32>
    %853 = arith.addf %851, %852 : vector<6x60xf32>
    %cst_765 = arith.constant dense<0.000000e+00> : vector<6x60xf32>
    %854 = tpu.matmul %145, %9, %cst_765 {dimension_numbers = #tpu.dot_dimension_numbers<[1], [0], [0], [1], [0, 0, 1, 1], [], []>} : vector<6x6xf32>, vector<6x60xf32>, vector<6x60xf32> -> vector<6x60xf32>
    %855 = arith.addf %853, %854 : vector<6x60xf32>
    %cst_766 = arith.constant dense<0.000000e+00> : vector<6x60xf32>
    %856 = tpu.matmul %153, %11, %cst_766 {dimension_numbers = #tpu.dot_dimension_numbers<[1], [0], [0], [1], [0, 0, 1, 1], [], []>} : vector<6x6xf32>, vector<6x60xf32>, vector<6x60xf32> -> vector<6x60xf32>
    %857 = arith.addf %855, %856 : vector<6x60xf32>
    %cst_767 = arith.constant dense<0.000000e+00> : vector<6x60xf32>
    %858 = tpu.matmul %155, %13, %cst_767 {dimension_numbers = #tpu.dot_dimension_numbers<[1], [0], [0], [1], [0, 0, 1, 1], [], []>} : vector<6x6xf32>, vector<6x60xf32>, vector<6x60xf32> -> vector<6x60xf32>
    %859 = arith.addf %857, %858 : vector<6x60xf32>
    %cst_768 = arith.constant dense<0.000000e+00> : vector<6x60xf32>
    %860 = tpu.matmul %157, %15, %cst_768 {dimension_numbers = #tpu.dot_dimension_numbers<[1], [0], [0], [1], [0, 0, 1, 1], [], []>} : vector<6x6xf32>, vector<6x60xf32>, vector<6x60xf32> -> vector<6x60xf32>
    %861 = arith.addf %859, %860 : vector<6x60xf32>
    %cst_769 = arith.constant dense<0.000000e+00> : vector<6x60xf32>
    %862 = tpu.matmul %159, %17, %cst_769 {dimension_numbers = #tpu.dot_dimension_numbers<[1], [0], [0], [1], [0, 0, 1, 1], [], []>} : vector<6x6xf32>, vector<6x60xf32>, vector<6x60xf32> -> vector<6x60xf32>
    %863 = arith.addf %861, %862 : vector<6x60xf32>
    %cst_770 = arith.constant dense<0.000000e+00> : vector<6x60xf32>
    %864 = tpu.matmul %161, %19, %cst_770 {dimension_numbers = #tpu.dot_dimension_numbers<[1], [0], [0], [1], [0, 0, 1, 1], [], []>} : vector<6x6xf32>, vector<6x60xf32>, vector<6x60xf32> -> vector<6x60xf32>
    %865 = arith.addf %863, %864 : vector<6x60xf32>
    %cst_771 = arith.constant dense<0.000000e+00> : vector<6x60xf32>
    %866 = tpu.matmul %169, %21, %cst_771 {dimension_numbers = #tpu.dot_dimension_numbers<[1], [0], [0], [1], [0, 0, 1, 1], [], []>} : vector<6x6xf32>, vector<6x60xf32>, vector<6x60xf32> -> vector<6x60xf32>
    %867 = arith.addf %865, %866 : vector<6x60xf32>
    %cst_772 = arith.constant dense<0.000000e+00> : vector<6x60xf32>
    %868 = tpu.matmul %171, %23, %cst_772 {dimension_numbers = #tpu.dot_dimension_numbers<[1], [0], [0], [1], [0, 0, 1, 1], [], []>} : vector<6x6xf32>, vector<6x60xf32>, vector<6x60xf32> -> vector<6x60xf32>
    %869 = arith.addf %867, %868 : vector<6x60xf32>
    %cst_773 = arith.constant dense<0.000000e+00> : vector<6x60xf32>
    %870 = tpu.matmul %173, %25, %cst_773 {dimension_numbers = #tpu.dot_dimension_numbers<[1], [0], [0], [1], [0, 0, 1, 1], [], []>} : vector<6x6xf32>, vector<6x60xf32>, vector<6x60xf32> -> vector<6x60xf32>
    %871 = arith.addf %869, %870 : vector<6x60xf32>
    %cst_774 = arith.constant dense<0.000000e+00> : vector<6x60xf32>
    %872 = tpu.matmul %175, %27, %cst_774 {dimension_numbers = #tpu.dot_dimension_numbers<[1], [0], [0], [1], [0, 0, 1, 1], [], []>} : vector<6x6xf32>, vector<6x60xf32>, vector<6x60xf32> -> vector<6x60xf32>
    %873 = arith.addf %871, %872 : vector<6x60xf32>
    %cst_775 = arith.constant dense<0.000000e+00> : vector<6x60xf32>
    %874 = tpu.matmul %177, %29, %cst_775 {dimension_numbers = #tpu.dot_dimension_numbers<[1], [0], [0], [1], [0, 0, 1, 1], [], []>} : vector<6x6xf32>, vector<6x60xf32>, vector<6x60xf32> -> vector<6x60xf32>
    %875 = arith.addf %873, %874 : vector<6x60xf32>
    %cst_776 = arith.constant dense<0.000000e+00> : vector<6x60xf32>
    %876 = tpu.matmul %185, %31, %cst_776 {dimension_numbers = #tpu.dot_dimension_numbers<[1], [0], [0], [1], [0, 0, 1, 1], [], []>} : vector<6x6xf32>, vector<6x60xf32>, vector<6x60xf32> -> vector<6x60xf32>
    %877 = arith.addf %875, %876 : vector<6x60xf32>
    %cst_777 = arith.constant dense<0.000000e+00> : vector<6x60xf32>
    %878 = tpu.matmul %187, %33, %cst_777 {dimension_numbers = #tpu.dot_dimension_numbers<[1], [0], [0], [1], [0, 0, 1, 1], [], []>} : vector<6x6xf32>, vector<6x60xf32>, vector<6x60xf32> -> vector<6x60xf32>
    %879 = arith.addf %877, %878 : vector<6x60xf32>
    %cst_778 = arith.constant dense<0.000000e+00> : vector<6x60xf32>
    %880 = tpu.matmul %189, %35, %cst_778 {dimension_numbers = #tpu.dot_dimension_numbers<[1], [0], [0], [1], [0, 0, 1, 1], [], []>} : vector<6x6xf32>, vector<6x60xf32>, vector<6x60xf32> -> vector<6x60xf32>
    %881 = arith.addf %879, %880 : vector<6x60xf32>
    %cst_779 = arith.constant dense<0.000000e+00> : vector<6x60xf32>
    %882 = tpu.matmul %191, %37, %cst_779 {dimension_numbers = #tpu.dot_dimension_numbers<[1], [0], [0], [1], [0, 0, 1, 1], [], []>} : vector<6x6xf32>, vector<6x60xf32>, vector<6x60xf32> -> vector<6x60xf32>
    %883 = arith.addf %881, %882 : vector<6x60xf32>
    %cst_780 = arith.constant dense<0.000000e+00> : vector<6x60xf32>
    %884 = tpu.matmul %193, %39, %cst_780 {dimension_numbers = #tpu.dot_dimension_numbers<[1], [0], [0], [1], [0, 0, 1, 1], [], []>} : vector<6x6xf32>, vector<6x60xf32>, vector<6x60xf32> -> vector<6x60xf32>
    %885 = arith.addf %883, %884 : vector<6x60xf32>
    %cst_781 = arith.constant dense<0.000000e+00> : vector<6x60xf32>
    %886 = tpu.matmul %201, %41, %cst_781 {dimension_numbers = #tpu.dot_dimension_numbers<[1], [0], [0], [1], [0, 0, 1, 1], [], []>} : vector<6x6xf32>, vector<6x60xf32>, vector<6x60xf32> -> vector<6x60xf32>
    %887 = arith.addf %885, %886 : vector<6x60xf32>
    %cst_782 = arith.constant dense<0.000000e+00> : vector<6x60xf32>
    %888 = tpu.matmul %203, %43, %cst_782 {dimension_numbers = #tpu.dot_dimension_numbers<[1], [0], [0], [1], [0, 0, 1, 1], [], []>} : vector<6x6xf32>, vector<6x60xf32>, vector<6x60xf32> -> vector<6x60xf32>
    %889 = arith.addf %887, %888 : vector<6x60xf32>
    %cst_783 = arith.constant dense<0.000000e+00> : vector<6x60xf32>
    %890 = tpu.matmul %205, %45, %cst_783 {dimension_numbers = #tpu.dot_dimension_numbers<[1], [0], [0], [1], [0, 0, 1, 1], [], []>} : vector<6x6xf32>, vector<6x60xf32>, vector<6x60xf32> -> vector<6x60xf32>
    %891 = arith.addf %889, %890 : vector<6x60xf32>
    %cst_784 = arith.constant dense<0.000000e+00> : vector<6x60xf32>
    %892 = tpu.matmul %207, %47, %cst_784 {dimension_numbers = #tpu.dot_dimension_numbers<[1], [0], [0], [1], [0, 0, 1, 1], [], []>} : vector<6x6xf32>, vector<6x60xf32>, vector<6x60xf32> -> vector<6x60xf32>
    %893 = arith.addf %891, %892 : vector<6x60xf32>
    %cst_785 = arith.constant dense<0.000000e+00> : vector<6x60xf32>
    %894 = tpu.matmul %209, %49, %cst_785 {dimension_numbers = #tpu.dot_dimension_numbers<[1], [0], [0], [1], [0, 0, 1, 1], [], []>} : vector<6x6xf32>, vector<6x60xf32>, vector<6x60xf32> -> vector<6x60xf32>
    %895 = arith.addf %893, %894 : vector<6x60xf32>
    %cst_786 = arith.constant dense<0.000000e+00> : vector<6x60xf32>
    %896 = tpu.matmul %139, %1, %cst_786 {dimension_numbers = #tpu.dot_dimension_numbers<[1], [0], [0], [1], [0, 0, 1, 1], [], []>} : vector<6x6xf32>, vector<6x60xf32>, vector<6x60xf32> -> vector<6x60xf32>
    %cst_787 = arith.constant dense<0.000000e+00> : vector<6x60xf32>
    %897 = tpu.matmul %141, %3, %cst_787 {dimension_numbers = #tpu.dot_dimension_numbers<[1], [0], [0], [1], [0, 0, 1, 1], [], []>} : vector<6x6xf32>, vector<6x60xf32>, vector<6x60xf32> -> vector<6x60xf32>
    %898 = arith.addf %896, %897 : vector<6x60xf32>
    %cst_788 = arith.constant dense<0.000000e+00> : vector<6x60xf32>
    %899 = tpu.matmul %143, %5, %cst_788 {dimension_numbers = #tpu.dot_dimension_numbers<[1], [0], [0], [1], [0, 0, 1, 1], [], []>} : vector<6x6xf32>, vector<6x60xf32>, vector<6x60xf32> -> vector<6x60xf32>
    %900 = arith.addf %898, %899 : vector<6x60xf32>
    %cst_789 = arith.constant dense<0.000000e+00> : vector<6x60xf32>
    %901 = tpu.matmul %145, %7, %cst_789 {dimension_numbers = #tpu.dot_dimension_numbers<[1], [0], [0], [1], [0, 0, 1, 1], [], []>} : vector<6x6xf32>, vector<6x60xf32>, vector<6x60xf32> -> vector<6x60xf32>
    %902 = arith.addf %900, %901 : vector<6x60xf32>
    %cst_790 = arith.constant dense<0.000000e+00> : vector<6x60xf32>
    %903 = tpu.matmul %147, %9, %cst_790 {dimension_numbers = #tpu.dot_dimension_numbers<[1], [0], [0], [1], [0, 0, 1, 1], [], []>} : vector<6x6xf32>, vector<6x60xf32>, vector<6x60xf32> -> vector<6x60xf32>
    %904 = arith.addf %902, %903 : vector<6x60xf32>
    %cst_791 = arith.constant dense<0.000000e+00> : vector<6x60xf32>
    %905 = tpu.matmul %155, %11, %cst_791 {dimension_numbers = #tpu.dot_dimension_numbers<[1], [0], [0], [1], [0, 0, 1, 1], [], []>} : vector<6x6xf32>, vector<6x60xf32>, vector<6x60xf32> -> vector<6x60xf32>
    %906 = arith.addf %904, %905 : vector<6x60xf32>
    %cst_792 = arith.constant dense<0.000000e+00> : vector<6x60xf32>
    %907 = tpu.matmul %157, %13, %cst_792 {dimension_numbers = #tpu.dot_dimension_numbers<[1], [0], [0], [1], [0, 0, 1, 1], [], []>} : vector<6x6xf32>, vector<6x60xf32>, vector<6x60xf32> -> vector<6x60xf32>
    %908 = arith.addf %906, %907 : vector<6x60xf32>
    %cst_793 = arith.constant dense<0.000000e+00> : vector<6x60xf32>
    %909 = tpu.matmul %159, %15, %cst_793 {dimension_numbers = #tpu.dot_dimension_numbers<[1], [0], [0], [1], [0, 0, 1, 1], [], []>} : vector<6x6xf32>, vector<6x60xf32>, vector<6x60xf32> -> vector<6x60xf32>
    %910 = arith.addf %908, %909 : vector<6x60xf32>
    %cst_794 = arith.constant dense<0.000000e+00> : vector<6x60xf32>
    %911 = tpu.matmul %161, %17, %cst_794 {dimension_numbers = #tpu.dot_dimension_numbers<[1], [0], [0], [1], [0, 0, 1, 1], [], []>} : vector<6x6xf32>, vector<6x60xf32>, vector<6x60xf32> -> vector<6x60xf32>
    %912 = arith.addf %910, %911 : vector<6x60xf32>
    %cst_795 = arith.constant dense<0.000000e+00> : vector<6x60xf32>
    %913 = tpu.matmul %163, %19, %cst_795 {dimension_numbers = #tpu.dot_dimension_numbers<[1], [0], [0], [1], [0, 0, 1, 1], [], []>} : vector<6x6xf32>, vector<6x60xf32>, vector<6x60xf32> -> vector<6x60xf32>
    %914 = arith.addf %912, %913 : vector<6x60xf32>
    %cst_796 = arith.constant dense<0.000000e+00> : vector<6x60xf32>
    %915 = tpu.matmul %171, %21, %cst_796 {dimension_numbers = #tpu.dot_dimension_numbers<[1], [0], [0], [1], [0, 0, 1, 1], [], []>} : vector<6x6xf32>, vector<6x60xf32>, vector<6x60xf32> -> vector<6x60xf32>
    %916 = arith.addf %914, %915 : vector<6x60xf32>
    %cst_797 = arith.constant dense<0.000000e+00> : vector<6x60xf32>
    %917 = tpu.matmul %173, %23, %cst_797 {dimension_numbers = #tpu.dot_dimension_numbers<[1], [0], [0], [1], [0, 0, 1, 1], [], []>} : vector<6x6xf32>, vector<6x60xf32>, vector<6x60xf32> -> vector<6x60xf32>
    %918 = arith.addf %916, %917 : vector<6x60xf32>
    %cst_798 = arith.constant dense<0.000000e+00> : vector<6x60xf32>
    %919 = tpu.matmul %175, %25, %cst_798 {dimension_numbers = #tpu.dot_dimension_numbers<[1], [0], [0], [1], [0, 0, 1, 1], [], []>} : vector<6x6xf32>, vector<6x60xf32>, vector<6x60xf32> -> vector<6x60xf32>
    %920 = arith.addf %918, %919 : vector<6x60xf32>
    %cst_799 = arith.constant dense<0.000000e+00> : vector<6x60xf32>
    %921 = tpu.matmul %177, %27, %cst_799 {dimension_numbers = #tpu.dot_dimension_numbers<[1], [0], [0], [1], [0, 0, 1, 1], [], []>} : vector<6x6xf32>, vector<6x60xf32>, vector<6x60xf32> -> vector<6x60xf32>
    %922 = arith.addf %920, %921 : vector<6x60xf32>
    %cst_800 = arith.constant dense<0.000000e+00> : vector<6x60xf32>
    %923 = tpu.matmul %179, %29, %cst_800 {dimension_numbers = #tpu.dot_dimension_numbers<[1], [0], [0], [1], [0, 0, 1, 1], [], []>} : vector<6x6xf32>, vector<6x60xf32>, vector<6x60xf32> -> vector<6x60xf32>
    %924 = arith.addf %922, %923 : vector<6x60xf32>
    %cst_801 = arith.constant dense<0.000000e+00> : vector<6x60xf32>
    %925 = tpu.matmul %187, %31, %cst_801 {dimension_numbers = #tpu.dot_dimension_numbers<[1], [0], [0], [1], [0, 0, 1, 1], [], []>} : vector<6x6xf32>, vector<6x60xf32>, vector<6x60xf32> -> vector<6x60xf32>
    %926 = arith.addf %924, %925 : vector<6x60xf32>
    %cst_802 = arith.constant dense<0.000000e+00> : vector<6x60xf32>
    %927 = tpu.matmul %189, %33, %cst_802 {dimension_numbers = #tpu.dot_dimension_numbers<[1], [0], [0], [1], [0, 0, 1, 1], [], []>} : vector<6x6xf32>, vector<6x60xf32>, vector<6x60xf32> -> vector<6x60xf32>
    %928 = arith.addf %926, %927 : vector<6x60xf32>
    %cst_803 = arith.constant dense<0.000000e+00> : vector<6x60xf32>
    %929 = tpu.matmul %191, %35, %cst_803 {dimension_numbers = #tpu.dot_dimension_numbers<[1], [0], [0], [1], [0, 0, 1, 1], [], []>} : vector<6x6xf32>, vector<6x60xf32>, vector<6x60xf32> -> vector<6x60xf32>
    %930 = arith.addf %928, %929 : vector<6x60xf32>
    %cst_804 = arith.constant dense<0.000000e+00> : vector<6x60xf32>
    %931 = tpu.matmul %193, %37, %cst_804 {dimension_numbers = #tpu.dot_dimension_numbers<[1], [0], [0], [1], [0, 0, 1, 1], [], []>} : vector<6x6xf32>, vector<6x60xf32>, vector<6x60xf32> -> vector<6x60xf32>
    %932 = arith.addf %930, %931 : vector<6x60xf32>
    %cst_805 = arith.constant dense<0.000000e+00> : vector<6x60xf32>
    %933 = tpu.matmul %195, %39, %cst_805 {dimension_numbers = #tpu.dot_dimension_numbers<[1], [0], [0], [1], [0, 0, 1, 1], [], []>} : vector<6x6xf32>, vector<6x60xf32>, vector<6x60xf32> -> vector<6x60xf32>
    %934 = arith.addf %932, %933 : vector<6x60xf32>
    %cst_806 = arith.constant dense<0.000000e+00> : vector<6x60xf32>
    %935 = tpu.matmul %203, %41, %cst_806 {dimension_numbers = #tpu.dot_dimension_numbers<[1], [0], [0], [1], [0, 0, 1, 1], [], []>} : vector<6x6xf32>, vector<6x60xf32>, vector<6x60xf32> -> vector<6x60xf32>
    %936 = arith.addf %934, %935 : vector<6x60xf32>
    %cst_807 = arith.constant dense<0.000000e+00> : vector<6x60xf32>
    %937 = tpu.matmul %205, %43, %cst_807 {dimension_numbers = #tpu.dot_dimension_numbers<[1], [0], [0], [1], [0, 0, 1, 1], [], []>} : vector<6x6xf32>, vector<6x60xf32>, vector<6x60xf32> -> vector<6x60xf32>
    %938 = arith.addf %936, %937 : vector<6x60xf32>
    %cst_808 = arith.constant dense<0.000000e+00> : vector<6x60xf32>
    %939 = tpu.matmul %207, %45, %cst_808 {dimension_numbers = #tpu.dot_dimension_numbers<[1], [0], [0], [1], [0, 0, 1, 1], [], []>} : vector<6x6xf32>, vector<6x60xf32>, vector<6x60xf32> -> vector<6x60xf32>
    %940 = arith.addf %938, %939 : vector<6x60xf32>
    %cst_809 = arith.constant dense<0.000000e+00> : vector<6x60xf32>
    %941 = tpu.matmul %209, %47, %cst_809 {dimension_numbers = #tpu.dot_dimension_numbers<[1], [0], [0], [1], [0, 0, 1, 1], [], []>} : vector<6x6xf32>, vector<6x60xf32>, vector<6x60xf32> -> vector<6x60xf32>
    %942 = arith.addf %940, %941 : vector<6x60xf32>
    %cst_810 = arith.constant dense<0.000000e+00> : vector<6x60xf32>
    %943 = tpu.matmul %211, %49, %cst_810 {dimension_numbers = #tpu.dot_dimension_numbers<[1], [0], [0], [1], [0, 0, 1, 1], [], []>} : vector<6x6xf32>, vector<6x60xf32>, vector<6x60xf32> -> vector<6x60xf32>
    %944 = arith.addf %942, %943 : vector<6x60xf32>
    %945 = arith.maximumf %895, %944 : vector<6x60xf32>
    %cst_811 = arith.constant dense<0.000000e+00> : vector<6x60xf32>
    %946 = tpu.matmul %153, %1, %cst_811 {dimension_numbers = #tpu.dot_dimension_numbers<[1], [0], [0], [1], [0, 0, 1, 1], [], []>} : vector<6x6xf32>, vector<6x60xf32>, vector<6x60xf32> -> vector<6x60xf32>
    %cst_812 = arith.constant dense<0.000000e+00> : vector<6x60xf32>
    %947 = tpu.matmul %155, %3, %cst_812 {dimension_numbers = #tpu.dot_dimension_numbers<[1], [0], [0], [1], [0, 0, 1, 1], [], []>} : vector<6x6xf32>, vector<6x60xf32>, vector<6x60xf32> -> vector<6x60xf32>
    %948 = arith.addf %946, %947 : vector<6x60xf32>
    %cst_813 = arith.constant dense<0.000000e+00> : vector<6x60xf32>
    %949 = tpu.matmul %157, %5, %cst_813 {dimension_numbers = #tpu.dot_dimension_numbers<[1], [0], [0], [1], [0, 0, 1, 1], [], []>} : vector<6x6xf32>, vector<6x60xf32>, vector<6x60xf32> -> vector<6x60xf32>
    %950 = arith.addf %948, %949 : vector<6x60xf32>
    %cst_814 = arith.constant dense<0.000000e+00> : vector<6x60xf32>
    %951 = tpu.matmul %159, %7, %cst_814 {dimension_numbers = #tpu.dot_dimension_numbers<[1], [0], [0], [1], [0, 0, 1, 1], [], []>} : vector<6x6xf32>, vector<6x60xf32>, vector<6x60xf32> -> vector<6x60xf32>
    %952 = arith.addf %950, %951 : vector<6x60xf32>
    %cst_815 = arith.constant dense<0.000000e+00> : vector<6x60xf32>
    %953 = tpu.matmul %161, %9, %cst_815 {dimension_numbers = #tpu.dot_dimension_numbers<[1], [0], [0], [1], [0, 0, 1, 1], [], []>} : vector<6x6xf32>, vector<6x60xf32>, vector<6x60xf32> -> vector<6x60xf32>
    %954 = arith.addf %952, %953 : vector<6x60xf32>
    %cst_816 = arith.constant dense<0.000000e+00> : vector<6x60xf32>
    %955 = tpu.matmul %169, %11, %cst_816 {dimension_numbers = #tpu.dot_dimension_numbers<[1], [0], [0], [1], [0, 0, 1, 1], [], []>} : vector<6x6xf32>, vector<6x60xf32>, vector<6x60xf32> -> vector<6x60xf32>
    %956 = arith.addf %954, %955 : vector<6x60xf32>
    %cst_817 = arith.constant dense<0.000000e+00> : vector<6x60xf32>
    %957 = tpu.matmul %171, %13, %cst_817 {dimension_numbers = #tpu.dot_dimension_numbers<[1], [0], [0], [1], [0, 0, 1, 1], [], []>} : vector<6x6xf32>, vector<6x60xf32>, vector<6x60xf32> -> vector<6x60xf32>
    %958 = arith.addf %956, %957 : vector<6x60xf32>
    %cst_818 = arith.constant dense<0.000000e+00> : vector<6x60xf32>
    %959 = tpu.matmul %173, %15, %cst_818 {dimension_numbers = #tpu.dot_dimension_numbers<[1], [0], [0], [1], [0, 0, 1, 1], [], []>} : vector<6x6xf32>, vector<6x60xf32>, vector<6x60xf32> -> vector<6x60xf32>
    %960 = arith.addf %958, %959 : vector<6x60xf32>
    %cst_819 = arith.constant dense<0.000000e+00> : vector<6x60xf32>
    %961 = tpu.matmul %175, %17, %cst_819 {dimension_numbers = #tpu.dot_dimension_numbers<[1], [0], [0], [1], [0, 0, 1, 1], [], []>} : vector<6x6xf32>, vector<6x60xf32>, vector<6x60xf32> -> vector<6x60xf32>
    %962 = arith.addf %960, %961 : vector<6x60xf32>
    %cst_820 = arith.constant dense<0.000000e+00> : vector<6x60xf32>
    %963 = tpu.matmul %177, %19, %cst_820 {dimension_numbers = #tpu.dot_dimension_numbers<[1], [0], [0], [1], [0, 0, 1, 1], [], []>} : vector<6x6xf32>, vector<6x60xf32>, vector<6x60xf32> -> vector<6x60xf32>
    %964 = arith.addf %962, %963 : vector<6x60xf32>
    %cst_821 = arith.constant dense<0.000000e+00> : vector<6x60xf32>
    %965 = tpu.matmul %185, %21, %cst_821 {dimension_numbers = #tpu.dot_dimension_numbers<[1], [0], [0], [1], [0, 0, 1, 1], [], []>} : vector<6x6xf32>, vector<6x60xf32>, vector<6x60xf32> -> vector<6x60xf32>
    %966 = arith.addf %964, %965 : vector<6x60xf32>
    %cst_822 = arith.constant dense<0.000000e+00> : vector<6x60xf32>
    %967 = tpu.matmul %187, %23, %cst_822 {dimension_numbers = #tpu.dot_dimension_numbers<[1], [0], [0], [1], [0, 0, 1, 1], [], []>} : vector<6x6xf32>, vector<6x60xf32>, vector<6x60xf32> -> vector<6x60xf32>
    %968 = arith.addf %966, %967 : vector<6x60xf32>
    %cst_823 = arith.constant dense<0.000000e+00> : vector<6x60xf32>
    %969 = tpu.matmul %189, %25, %cst_823 {dimension_numbers = #tpu.dot_dimension_numbers<[1], [0], [0], [1], [0, 0, 1, 1], [], []>} : vector<6x6xf32>, vector<6x60xf32>, vector<6x60xf32> -> vector<6x60xf32>
    %970 = arith.addf %968, %969 : vector<6x60xf32>
    %cst_824 = arith.constant dense<0.000000e+00> : vector<6x60xf32>
    %971 = tpu.matmul %191, %27, %cst_824 {dimension_numbers = #tpu.dot_dimension_numbers<[1], [0], [0], [1], [0, 0, 1, 1], [], []>} : vector<6x6xf32>, vector<6x60xf32>, vector<6x60xf32> -> vector<6x60xf32>
    %972 = arith.addf %970, %971 : vector<6x60xf32>
    %cst_825 = arith.constant dense<0.000000e+00> : vector<6x60xf32>
    %973 = tpu.matmul %193, %29, %cst_825 {dimension_numbers = #tpu.dot_dimension_numbers<[1], [0], [0], [1], [0, 0, 1, 1], [], []>} : vector<6x6xf32>, vector<6x60xf32>, vector<6x60xf32> -> vector<6x60xf32>
    %974 = arith.addf %972, %973 : vector<6x60xf32>
    %cst_826 = arith.constant dense<0.000000e+00> : vector<6x60xf32>
    %975 = tpu.matmul %201, %31, %cst_826 {dimension_numbers = #tpu.dot_dimension_numbers<[1], [0], [0], [1], [0, 0, 1, 1], [], []>} : vector<6x6xf32>, vector<6x60xf32>, vector<6x60xf32> -> vector<6x60xf32>
    %976 = arith.addf %974, %975 : vector<6x60xf32>
    %cst_827 = arith.constant dense<0.000000e+00> : vector<6x60xf32>
    %977 = tpu.matmul %203, %33, %cst_827 {dimension_numbers = #tpu.dot_dimension_numbers<[1], [0], [0], [1], [0, 0, 1, 1], [], []>} : vector<6x6xf32>, vector<6x60xf32>, vector<6x60xf32> -> vector<6x60xf32>
    %978 = arith.addf %976, %977 : vector<6x60xf32>
    %cst_828 = arith.constant dense<0.000000e+00> : vector<6x60xf32>
    %979 = tpu.matmul %205, %35, %cst_828 {dimension_numbers = #tpu.dot_dimension_numbers<[1], [0], [0], [1], [0, 0, 1, 1], [], []>} : vector<6x6xf32>, vector<6x60xf32>, vector<6x60xf32> -> vector<6x60xf32>
    %980 = arith.addf %978, %979 : vector<6x60xf32>
    %cst_829 = arith.constant dense<0.000000e+00> : vector<6x60xf32>
    %981 = tpu.matmul %207, %37, %cst_829 {dimension_numbers = #tpu.dot_dimension_numbers<[1], [0], [0], [1], [0, 0, 1, 1], [], []>} : vector<6x6xf32>, vector<6x60xf32>, vector<6x60xf32> -> vector<6x60xf32>
    %982 = arith.addf %980, %981 : vector<6x60xf32>
    %cst_830 = arith.constant dense<0.000000e+00> : vector<6x60xf32>
    %983 = tpu.matmul %209, %39, %cst_830 {dimension_numbers = #tpu.dot_dimension_numbers<[1], [0], [0], [1], [0, 0, 1, 1], [], []>} : vector<6x6xf32>, vector<6x60xf32>, vector<6x60xf32> -> vector<6x60xf32>
    %984 = arith.addf %982, %983 : vector<6x60xf32>
    %cst_831 = arith.constant dense<0.000000e+00> : vector<6x60xf32>
    %985 = tpu.matmul %217, %41, %cst_831 {dimension_numbers = #tpu.dot_dimension_numbers<[1], [0], [0], [1], [0, 0, 1, 1], [], []>} : vector<6x6xf32>, vector<6x60xf32>, vector<6x60xf32> -> vector<6x60xf32>
    %986 = arith.addf %984, %985 : vector<6x60xf32>
    %cst_832 = arith.constant dense<0.000000e+00> : vector<6x60xf32>
    %987 = tpu.matmul %219, %43, %cst_832 {dimension_numbers = #tpu.dot_dimension_numbers<[1], [0], [0], [1], [0, 0, 1, 1], [], []>} : vector<6x6xf32>, vector<6x60xf32>, vector<6x60xf32> -> vector<6x60xf32>
    %988 = arith.addf %986, %987 : vector<6x60xf32>
    %cst_833 = arith.constant dense<0.000000e+00> : vector<6x60xf32>
    %989 = tpu.matmul %221, %45, %cst_833 {dimension_numbers = #tpu.dot_dimension_numbers<[1], [0], [0], [1], [0, 0, 1, 1], [], []>} : vector<6x6xf32>, vector<6x60xf32>, vector<6x60xf32> -> vector<6x60xf32>
    %990 = arith.addf %988, %989 : vector<6x60xf32>
    %cst_834 = arith.constant dense<0.000000e+00> : vector<6x60xf32>
    %991 = tpu.matmul %223, %47, %cst_834 {dimension_numbers = #tpu.dot_dimension_numbers<[1], [0], [0], [1], [0, 0, 1, 1], [], []>} : vector<6x6xf32>, vector<6x60xf32>, vector<6x60xf32> -> vector<6x60xf32>
    %992 = arith.addf %990, %991 : vector<6x60xf32>
    %cst_835 = arith.constant dense<0.000000e+00> : vector<6x60xf32>
    %993 = tpu.matmul %225, %49, %cst_835 {dimension_numbers = #tpu.dot_dimension_numbers<[1], [0], [0], [1], [0, 0, 1, 1], [], []>} : vector<6x6xf32>, vector<6x60xf32>, vector<6x60xf32> -> vector<6x60xf32>
    %994 = arith.addf %992, %993 : vector<6x60xf32>
    %995 = arith.maximumf %945, %994 : vector<6x60xf32>
    %cst_836 = arith.constant dense<0.000000e+00> : vector<6x60xf32>
    %996 = tpu.matmul %155, %1, %cst_836 {dimension_numbers = #tpu.dot_dimension_numbers<[1], [0], [0], [1], [0, 0, 1, 1], [], []>} : vector<6x6xf32>, vector<6x60xf32>, vector<6x60xf32> -> vector<6x60xf32>
    %cst_837 = arith.constant dense<0.000000e+00> : vector<6x60xf32>
    %997 = tpu.matmul %157, %3, %cst_837 {dimension_numbers = #tpu.dot_dimension_numbers<[1], [0], [0], [1], [0, 0, 1, 1], [], []>} : vector<6x6xf32>, vector<6x60xf32>, vector<6x60xf32> -> vector<6x60xf32>
    %998 = arith.addf %996, %997 : vector<6x60xf32>
    %cst_838 = arith.constant dense<0.000000e+00> : vector<6x60xf32>
    %999 = tpu.matmul %159, %5, %cst_838 {dimension_numbers = #tpu.dot_dimension_numbers<[1], [0], [0], [1], [0, 0, 1, 1], [], []>} : vector<6x6xf32>, vector<6x60xf32>, vector<6x60xf32> -> vector<6x60xf32>
    %1000 = arith.addf %998, %999 : vector<6x60xf32>
    %cst_839 = arith.constant dense<0.000000e+00> : vector<6x60xf32>
    %1001 = tpu.matmul %161, %7, %cst_839 {dimension_numbers = #tpu.dot_dimension_numbers<[1], [0], [0], [1], [0, 0, 1, 1], [], []>} : vector<6x6xf32>, vector<6x60xf32>, vector<6x60xf32> -> vector<6x60xf32>
    %1002 = arith.addf %1000, %1001 : vector<6x60xf32>
    %cst_840 = arith.constant dense<0.000000e+00> : vector<6x60xf32>
    %1003 = tpu.matmul %163, %9, %cst_840 {dimension_numbers = #tpu.dot_dimension_numbers<[1], [0], [0], [1], [0, 0, 1, 1], [], []>} : vector<6x6xf32>, vector<6x60xf32>, vector<6x60xf32> -> vector<6x60xf32>
    %1004 = arith.addf %1002, %1003 : vector<6x60xf32>
    %cst_841 = arith.constant dense<0.000000e+00> : vector<6x60xf32>
    %1005 = tpu.matmul %171, %11, %cst_841 {dimension_numbers = #tpu.dot_dimension_numbers<[1], [0], [0], [1], [0, 0, 1, 1], [], []>} : vector<6x6xf32>, vector<6x60xf32>, vector<6x60xf32> -> vector<6x60xf32>
    %1006 = arith.addf %1004, %1005 : vector<6x60xf32>
    %cst_842 = arith.constant dense<0.000000e+00> : vector<6x60xf32>
    %1007 = tpu.matmul %173, %13, %cst_842 {dimension_numbers = #tpu.dot_dimension_numbers<[1], [0], [0], [1], [0, 0, 1, 1], [], []>} : vector<6x6xf32>, vector<6x60xf32>, vector<6x60xf32> -> vector<6x60xf32>
    %1008 = arith.addf %1006, %1007 : vector<6x60xf32>
    %cst_843 = arith.constant dense<0.000000e+00> : vector<6x60xf32>
    %1009 = tpu.matmul %175, %15, %cst_843 {dimension_numbers = #tpu.dot_dimension_numbers<[1], [0], [0], [1], [0, 0, 1, 1], [], []>} : vector<6x6xf32>, vector<6x60xf32>, vector<6x60xf32> -> vector<6x60xf32>
    %1010 = arith.addf %1008, %1009 : vector<6x60xf32>
    %cst_844 = arith.constant dense<0.000000e+00> : vector<6x60xf32>
    %1011 = tpu.matmul %177, %17, %cst_844 {dimension_numbers = #tpu.dot_dimension_numbers<[1], [0], [0], [1], [0, 0, 1, 1], [], []>} : vector<6x6xf32>, vector<6x60xf32>, vector<6x60xf32> -> vector<6x60xf32>
    %1012 = arith.addf %1010, %1011 : vector<6x60xf32>
    %cst_845 = arith.constant dense<0.000000e+00> : vector<6x60xf32>
    %1013 = tpu.matmul %179, %19, %cst_845 {dimension_numbers = #tpu.dot_dimension_numbers<[1], [0], [0], [1], [0, 0, 1, 1], [], []>} : vector<6x6xf32>, vector<6x60xf32>, vector<6x60xf32> -> vector<6x60xf32>
    %1014 = arith.addf %1012, %1013 : vector<6x60xf32>
    %cst_846 = arith.constant dense<0.000000e+00> : vector<6x60xf32>
    %1015 = tpu.matmul %187, %21, %cst_846 {dimension_numbers = #tpu.dot_dimension_numbers<[1], [0], [0], [1], [0, 0, 1, 1], [], []>} : vector<6x6xf32>, vector<6x60xf32>, vector<6x60xf32> -> vector<6x60xf32>
    %1016 = arith.addf %1014, %1015 : vector<6x60xf32>
    %cst_847 = arith.constant dense<0.000000e+00> : vector<6x60xf32>
    %1017 = tpu.matmul %189, %23, %cst_847 {dimension_numbers = #tpu.dot_dimension_numbers<[1], [0], [0], [1], [0, 0, 1, 1], [], []>} : vector<6x6xf32>, vector<6x60xf32>, vector<6x60xf32> -> vector<6x60xf32>
    %1018 = arith.addf %1016, %1017 : vector<6x60xf32>
    %cst_848 = arith.constant dense<0.000000e+00> : vector<6x60xf32>
    %1019 = tpu.matmul %191, %25, %cst_848 {dimension_numbers = #tpu.dot_dimension_numbers<[1], [0], [0], [1], [0, 0, 1, 1], [], []>} : vector<6x6xf32>, vector<6x60xf32>, vector<6x60xf32> -> vector<6x60xf32>
    %1020 = arith.addf %1018, %1019 : vector<6x60xf32>
    %cst_849 = arith.constant dense<0.000000e+00> : vector<6x60xf32>
    %1021 = tpu.matmul %193, %27, %cst_849 {dimension_numbers = #tpu.dot_dimension_numbers<[1], [0], [0], [1], [0, 0, 1, 1], [], []>} : vector<6x6xf32>, vector<6x60xf32>, vector<6x60xf32> -> vector<6x60xf32>
    %1022 = arith.addf %1020, %1021 : vector<6x60xf32>
    %cst_850 = arith.constant dense<0.000000e+00> : vector<6x60xf32>
    %1023 = tpu.matmul %195, %29, %cst_850 {dimension_numbers = #tpu.dot_dimension_numbers<[1], [0], [0], [1], [0, 0, 1, 1], [], []>} : vector<6x6xf32>, vector<6x60xf32>, vector<6x60xf32> -> vector<6x60xf32>
    %1024 = arith.addf %1022, %1023 : vector<6x60xf32>
    %cst_851 = arith.constant dense<0.000000e+00> : vector<6x60xf32>
    %1025 = tpu.matmul %203, %31, %cst_851 {dimension_numbers = #tpu.dot_dimension_numbers<[1], [0], [0], [1], [0, 0, 1, 1], [], []>} : vector<6x6xf32>, vector<6x60xf32>, vector<6x60xf32> -> vector<6x60xf32>
    %1026 = arith.addf %1024, %1025 : vector<6x60xf32>
    %cst_852 = arith.constant dense<0.000000e+00> : vector<6x60xf32>
    %1027 = tpu.matmul %205, %33, %cst_852 {dimension_numbers = #tpu.dot_dimension_numbers<[1], [0], [0], [1], [0, 0, 1, 1], [], []>} : vector<6x6xf32>, vector<6x60xf32>, vector<6x60xf32> -> vector<6x60xf32>
    %1028 = arith.addf %1026, %1027 : vector<6x60xf32>
    %cst_853 = arith.constant dense<0.000000e+00> : vector<6x60xf32>
    %1029 = tpu.matmul %207, %35, %cst_853 {dimension_numbers = #tpu.dot_dimension_numbers<[1], [0], [0], [1], [0, 0, 1, 1], [], []>} : vector<6x6xf32>, vector<6x60xf32>, vector<6x60xf32> -> vector<6x60xf32>
    %1030 = arith.addf %1028, %1029 : vector<6x60xf32>
    %cst_854 = arith.constant dense<0.000000e+00> : vector<6x60xf32>
    %1031 = tpu.matmul %209, %37, %cst_854 {dimension_numbers = #tpu.dot_dimension_numbers<[1], [0], [0], [1], [0, 0, 1, 1], [], []>} : vector<6x6xf32>, vector<6x60xf32>, vector<6x60xf32> -> vector<6x60xf32>
    %1032 = arith.addf %1030, %1031 : vector<6x60xf32>
    %cst_855 = arith.constant dense<0.000000e+00> : vector<6x60xf32>
    %1033 = tpu.matmul %211, %39, %cst_855 {dimension_numbers = #tpu.dot_dimension_numbers<[1], [0], [0], [1], [0, 0, 1, 1], [], []>} : vector<6x6xf32>, vector<6x60xf32>, vector<6x60xf32> -> vector<6x60xf32>
    %1034 = arith.addf %1032, %1033 : vector<6x60xf32>
    %cst_856 = arith.constant dense<0.000000e+00> : vector<6x60xf32>
    %1035 = tpu.matmul %219, %41, %cst_856 {dimension_numbers = #tpu.dot_dimension_numbers<[1], [0], [0], [1], [0, 0, 1, 1], [], []>} : vector<6x6xf32>, vector<6x60xf32>, vector<6x60xf32> -> vector<6x60xf32>
    %1036 = arith.addf %1034, %1035 : vector<6x60xf32>
    %cst_857 = arith.constant dense<0.000000e+00> : vector<6x60xf32>
    %1037 = tpu.matmul %221, %43, %cst_857 {dimension_numbers = #tpu.dot_dimension_numbers<[1], [0], [0], [1], [0, 0, 1, 1], [], []>} : vector<6x6xf32>, vector<6x60xf32>, vector<6x60xf32> -> vector<6x60xf32>
    %1038 = arith.addf %1036, %1037 : vector<6x60xf32>
    %cst_858 = arith.constant dense<0.000000e+00> : vector<6x60xf32>
    %1039 = tpu.matmul %223, %45, %cst_858 {dimension_numbers = #tpu.dot_dimension_numbers<[1], [0], [0], [1], [0, 0, 1, 1], [], []>} : vector<6x6xf32>, vector<6x60xf32>, vector<6x60xf32> -> vector<6x60xf32>
    %1040 = arith.addf %1038, %1039 : vector<6x60xf32>
    %cst_859 = arith.constant dense<0.000000e+00> : vector<6x60xf32>
    %1041 = tpu.matmul %225, %47, %cst_859 {dimension_numbers = #tpu.dot_dimension_numbers<[1], [0], [0], [1], [0, 0, 1, 1], [], []>} : vector<6x6xf32>, vector<6x60xf32>, vector<6x60xf32> -> vector<6x60xf32>
    %1042 = arith.addf %1040, %1041 : vector<6x60xf32>
    %cst_860 = arith.constant dense<0.000000e+00> : vector<6x60xf32>
    %1043 = tpu.matmul %227, %49, %cst_860 {dimension_numbers = #tpu.dot_dimension_numbers<[1], [0], [0], [1], [0, 0, 1, 1], [], []>} : vector<6x6xf32>, vector<6x60xf32>, vector<6x60xf32> -> vector<6x60xf32>
    %1044 = arith.addf %1042, %1043 : vector<6x60xf32>
    %1045 = arith.maximumf %995, %1044 : vector<6x60xf32>
    %1046 = vector.broadcast %228 : vector<1x60xf32> to vector<6x60xf32>
    %1047 = arith.addf %1045, %1046 : vector<6x60xf32>
    %cst_861 = arith.constant 0.000000e+00 : f32
    %1048 = vector.broadcast %cst_861 : f32 to vector<6x60xf32>
    %1049 = arith.maximumf %1047, %1048 : vector<6x60xf32>
    %c1_862 = arith.constant 1 : index
    %c1_863 = arith.constant 1 : index
    %c0_864 = arith.constant 0 : index
    %c0_865 = arith.constant 0 : index
    %1050 = vector.load %arg11[%c1_862, %c1_863, %c0_864, %c0_865] : memref<2x2x6x60xf32, #tpu.memory_space<vmem>>, vector<1x1x6x60xf32>
    %1051 = vector.shape_cast %1050 : vector<1x1x6x60xf32> to vector<6x60xf32>
    %1052 = vector.shape_cast %1049 : vector<6x60xf32> to vector<1x1x6x60xf32>
    tpu.vector_store %arg11[%c1_862, %c1_863, %c0_864, %c0_865], %1052 {strides = array<i32>} : memref<2x2x6x60xf32, #tpu.memory_space<vmem>>, vector<1x1x6x60xf32>,
    %c0_866 = arith.constant 0 : index
    %c0_867 = arith.constant 0 : index
    %c0_868 = arith.constant 0 : index
    %c0_869 = arith.constant 0 : index
    %1053 = vector.load %arg11[%c0_866, %c0_867, %c0_868, %c0_869] : memref<2x2x6x60xf32, #tpu.memory_space<vmem>>, vector<1x1x4x40xf32>
    %1054 = vector.shape_cast %1053 : vector<1x1x4x40xf32> to vector<4x40xf32>
    %c0_870 = arith.constant 0 : index
    %c1_871 = arith.constant 1 : index
    %c0_872 = arith.constant 0 : index
    %c0_873 = arith.constant 0 : index
    %1055 = vector.load %arg11[%c0_870, %c1_871, %c0_872, %c0_873] : memref<2x2x6x60xf32, #tpu.memory_space<vmem>>, vector<1x1x4x40xf32>
    %1056 = vector.shape_cast %1055 : vector<1x1x4x40xf32> to vector<4x40xf32>
    %c0_874 = arith.constant 0 : index
    %c0_875 = arith.constant 0 : index
    %c0_876 = arith.constant 0 : index
    %c10_877 = arith.constant 10 : index
    %1057 = vector.load %arg11[%c0_874, %c0_875, %c0_876, %c10_877] : memref<2x2x6x60xf32, #tpu.memory_space<vmem>>, vector<1x1x4x40xf32>
    %1058 = vector.shape_cast %1057 : vector<1x1x4x40xf32> to vector<4x40xf32>
    %c0_878 = arith.constant 0 : index
    %c1_879 = arith.constant 1 : index
    %c0_880 = arith.constant 0 : index
    %c10_881 = arith.constant 10 : index
    %1059 = vector.load %arg11[%c0_878, %c1_879, %c0_880, %c10_881] : memref<2x2x6x60xf32, #tpu.memory_space<vmem>>, vector<1x1x4x40xf32>
    %1060 = vector.shape_cast %1059 : vector<1x1x4x40xf32> to vector<4x40xf32>
    %c0_882 = arith.constant 0 : index
    %c0_883 = arith.constant 0 : index
    %c0_884 = arith.constant 0 : index
    %c20_885 = arith.constant 20 : index
    %1061 = vector.load %arg11[%c0_882, %c0_883, %c0_884, %c20_885] : memref<2x2x6x60xf32, #tpu.memory_space<vmem>>, vector<1x1x4x40xf32>
    %1062 = vector.shape_cast %1061 : vector<1x1x4x40xf32> to vector<4x40xf32>
    %c0_886 = arith.constant 0 : index
    %c1_887 = arith.constant 1 : index
    %c0_888 = arith.constant 0 : index
    %c20_889 = arith.constant 20 : index
    %1063 = vector.load %arg11[%c0_886, %c1_887, %c0_888, %c20_889] : memref<2x2x6x60xf32, #tpu.memory_space<vmem>>, vector<1x1x4x40xf32>
    %1064 = vector.shape_cast %1063 : vector<1x1x4x40xf32> to vector<4x40xf32>
    %c1_890 = arith.constant 1 : index
    %c0_891 = arith.constant 0 : index
    %c0_892 = arith.constant 0 : index
    %c0_893 = arith.constant 0 : index
    %1065 = vector.load %arg11[%c1_890, %c0_891, %c0_892, %c0_893] : memref<2x2x6x60xf32, #tpu.memory_space<vmem>>, vector<1x1x4x40xf32>
    %1066 = vector.shape_cast %1065 : vector<1x1x4x40xf32> to vector<4x40xf32>
    %c1_894 = arith.constant 1 : index
    %c1_895 = arith.constant 1 : index
    %c0_896 = arith.constant 0 : index
    %c0_897 = arith.constant 0 : index
    %1067 = vector.load %arg11[%c1_894, %c1_895, %c0_896, %c0_897] : memref<2x2x6x60xf32, #tpu.memory_space<vmem>>, vector<1x1x4x40xf32>
    %1068 = vector.shape_cast %1067 : vector<1x1x4x40xf32> to vector<4x40xf32>
    %c1_898 = arith.constant 1 : index
    %c0_899 = arith.constant 0 : index
    %c0_900 = arith.constant 0 : index
    %c10_901 = arith.constant 10 : index
    %1069 = vector.load %arg11[%c1_898, %c0_899, %c0_900, %c10_901] : memref<2x2x6x60xf32, #tpu.memory_space<vmem>>, vector<1x1x4x40xf32>
    %1070 = vector.shape_cast %1069 : vector<1x1x4x40xf32> to vector<4x40xf32>
    %c1_902 = arith.constant 1 : index
    %c1_903 = arith.constant 1 : index
    %c0_904 = arith.constant 0 : index
    %c10_905 = arith.constant 10 : index
    %1071 = vector.load %arg11[%c1_902, %c1_903, %c0_904, %c10_905] : memref<2x2x6x60xf32, #tpu.memory_space<vmem>>, vector<1x1x4x40xf32>
    %1072 = vector.shape_cast %1071 : vector<1x1x4x40xf32> to vector<4x40xf32>
    %c1_906 = arith.constant 1 : index
    %c0_907 = arith.constant 0 : index
    %c0_908 = arith.constant 0 : index
    %c20_909 = arith.constant 20 : index
    %1073 = vector.load %arg11[%c1_906, %c0_907, %c0_908, %c20_909] : memref<2x2x6x60xf32, #tpu.memory_space<vmem>>, vector<1x1x4x40xf32>
    %1074 = vector.shape_cast %1073 : vector<1x1x4x40xf32> to vector<4x40xf32>
    %c1_910 = arith.constant 1 : index
    %c1_911 = arith.constant 1 : index
    %c0_912 = arith.constant 0 : index
    %c20_913 = arith.constant 20 : index
    %1075 = vector.load %arg11[%c1_910, %c1_911, %c0_912, %c20_913] : memref<2x2x6x60xf32, #tpu.memory_space<vmem>>, vector<1x1x4x40xf32>
    %1076 = vector.shape_cast %1075 : vector<1x1x4x40xf32> to vector<4x40xf32>
    %c0_914 = arith.constant 0 : index
    %c0_915 = arith.constant 0 : index
    %c1_916 = arith.constant 1 : index
    %c0_917 = arith.constant 0 : index
    %1077 = vector.load %arg11[%c0_914, %c0_915, %c1_916, %c0_917] : memref<2x2x6x60xf32, #tpu.memory_space<vmem>>, vector<1x1x4x40xf32>
    %1078 = vector.shape_cast %1077 : vector<1x1x4x40xf32> to vector<4x40xf32>
    %c0_918 = arith.constant 0 : index
    %c1_919 = arith.constant 1 : index
    %c1_920 = arith.constant 1 : index
    %c0_921 = arith.constant 0 : index
    %1079 = vector.load %arg11[%c0_918, %c1_919, %c1_920, %c0_921] : memref<2x2x6x60xf32, #tpu.memory_space<vmem>>, vector<1x1x4x40xf32>
    %1080 = vector.shape_cast %1079 : vector<1x1x4x40xf32> to vector<4x40xf32>
    %c0_922 = arith.constant 0 : index
    %c0_923 = arith.constant 0 : index
    %c1_924 = arith.constant 1 : index
    %c10_925 = arith.constant 10 : index
    %1081 = vector.load %arg11[%c0_922, %c0_923, %c1_924, %c10_925] : memref<2x2x6x60xf32, #tpu.memory_space<vmem>>, vector<1x1x4x40xf32>
    %1082 = vector.shape_cast %1081 : vector<1x1x4x40xf32> to vector<4x40xf32>
    %c0_926 = arith.constant 0 : index
    %c1_927 = arith.constant 1 : index
    %c1_928 = arith.constant 1 : index
    %c10_929 = arith.constant 10 : index
    %1083 = vector.load %arg11[%c0_926, %c1_927, %c1_928, %c10_929] : memref<2x2x6x60xf32, #tpu.memory_space<vmem>>, vector<1x1x4x40xf32>
    %1084 = vector.shape_cast %1083 : vector<1x1x4x40xf32> to vector<4x40xf32>
    %c0_930 = arith.constant 0 : index
    %c0_931 = arith.constant 0 : index
    %c1_932 = arith.constant 1 : index
    %c20_933 = arith.constant 20 : index
    %1085 = vector.load %arg11[%c0_930, %c0_931, %c1_932, %c20_933] : memref<2x2x6x60xf32, #tpu.memory_space<vmem>>, vector<1x1x4x40xf32>
    %1086 = vector.shape_cast %1085 : vector<1x1x4x40xf32> to vector<4x40xf32>
    %c0_934 = arith.constant 0 : index
    %c1_935 = arith.constant 1 : index
    %c1_936 = arith.constant 1 : index
    %c20_937 = arith.constant 20 : index
    %1087 = vector.load %arg11[%c0_934, %c1_935, %c1_936, %c20_937] : memref<2x2x6x60xf32, #tpu.memory_space<vmem>>, vector<1x1x4x40xf32>
    %1088 = vector.shape_cast %1087 : vector<1x1x4x40xf32> to vector<4x40xf32>
    %c1_938 = arith.constant 1 : index
    %c0_939 = arith.constant 0 : index
    %c1_940 = arith.constant 1 : index
    %c0_941 = arith.constant 0 : index
    %1089 = vector.load %arg11[%c1_938, %c0_939, %c1_940, %c0_941] : memref<2x2x6x60xf32, #tpu.memory_space<vmem>>, vector<1x1x4x40xf32>
    %1090 = vector.shape_cast %1089 : vector<1x1x4x40xf32> to vector<4x40xf32>
    %c1_942 = arith.constant 1 : index
    %c1_943 = arith.constant 1 : index
    %c1_944 = arith.constant 1 : index
    %c0_945 = arith.constant 0 : index
    %1091 = vector.load %arg11[%c1_942, %c1_943, %c1_944, %c0_945] : memref<2x2x6x60xf32, #tpu.memory_space<vmem>>, vector<1x1x4x40xf32>
    %1092 = vector.shape_cast %1091 : vector<1x1x4x40xf32> to vector<4x40xf32>
    %c1_946 = arith.constant 1 : index
    %c0_947 = arith.constant 0 : index
    %c1_948 = arith.constant 1 : index
    %c10_949 = arith.constant 10 : index
    %1093 = vector.load %arg11[%c1_946, %c0_947, %c1_948, %c10_949] : memref<2x2x6x60xf32, #tpu.memory_space<vmem>>, vector<1x1x4x40xf32>
    %1094 = vector.shape_cast %1093 : vector<1x1x4x40xf32> to vector<4x40xf32>
    %c1_950 = arith.constant 1 : index
    %c1_951 = arith.constant 1 : index
    %c1_952 = arith.constant 1 : index
    %c10_953 = arith.constant 10 : index
    %1095 = vector.load %arg11[%c1_950, %c1_951, %c1_952, %c10_953] : memref<2x2x6x60xf32, #tpu.memory_space<vmem>>, vector<1x1x4x40xf32>
    %1096 = vector.shape_cast %1095 : vector<1x1x4x40xf32> to vector<4x40xf32>
    %c1_954 = arith.constant 1 : index
    %c0_955 = arith.constant 0 : index
    %c1_956 = arith.constant 1 : index
    %c20_957 = arith.constant 20 : index
    %1097 = vector.load %arg11[%c1_954, %c0_955, %c1_956, %c20_957] : memref<2x2x6x60xf32, #tpu.memory_space<vmem>>, vector<1x1x4x40xf32>
    %1098 = vector.shape_cast %1097 : vector<1x1x4x40xf32> to vector<4x40xf32>
    %c1_958 = arith.constant 1 : index
    %c1_959 = arith.constant 1 : index
    %c1_960 = arith.constant 1 : index
    %c20_961 = arith.constant 20 : index
    %1099 = vector.load %arg11[%c1_958, %c1_959, %c1_960, %c20_961] : memref<2x2x6x60xf32, #tpu.memory_space<vmem>>, vector<1x1x4x40xf32>
    %1100 = vector.shape_cast %1099 : vector<1x1x4x40xf32> to vector<4x40xf32>
    %c0_962 = arith.constant 0 : index
    %c0_963 = arith.constant 0 : index
    %c2_964 = arith.constant 2 : index
    %c0_965 = arith.constant 0 : index
    %1101 = vector.load %arg11[%c0_962, %c0_963, %c2_964, %c0_965] : memref<2x2x6x60xf32, #tpu.memory_space<vmem>>, vector<1x1x4x40xf32>
    %1102 = vector.shape_cast %1101 : vector<1x1x4x40xf32> to vector<4x40xf32>
    %c0_966 = arith.constant 0 : index
    %c1_967 = arith.constant 1 : index
    %c2_968 = arith.constant 2 : index
    %c0_969 = arith.constant 0 : index
    %1103 = vector.load %arg11[%c0_966, %c1_967, %c2_968, %c0_969] : memref<2x2x6x60xf32, #tpu.memory_space<vmem>>, vector<1x1x4x40xf32>
    %1104 = vector.shape_cast %1103 : vector<1x1x4x40xf32> to vector<4x40xf32>
    %c0_970 = arith.constant 0 : index
    %c0_971 = arith.constant 0 : index
    %c2_972 = arith.constant 2 : index
    %c10_973 = arith.constant 10 : index
    %1105 = vector.load %arg11[%c0_970, %c0_971, %c2_972, %c10_973] : memref<2x2x6x60xf32, #tpu.memory_space<vmem>>, vector<1x1x4x40xf32>
    %1106 = vector.shape_cast %1105 : vector<1x1x4x40xf32> to vector<4x40xf32>
    %c0_974 = arith.constant 0 : index
    %c1_975 = arith.constant 1 : index
    %c2_976 = arith.constant 2 : index
    %c10_977 = arith.constant 10 : index
    %1107 = vector.load %arg11[%c0_974, %c1_975, %c2_976, %c10_977] : memref<2x2x6x60xf32, #tpu.memory_space<vmem>>, vector<1x1x4x40xf32>
    %1108 = vector.shape_cast %1107 : vector<1x1x4x40xf32> to vector<4x40xf32>
    %c0_978 = arith.constant 0 : index
    %c0_979 = arith.constant 0 : index
    %c2_980 = arith.constant 2 : index
    %c20_981 = arith.constant 20 : index
    %1109 = vector.load %arg11[%c0_978, %c0_979, %c2_980, %c20_981] : memref<2x2x6x60xf32, #tpu.memory_space<vmem>>, vector<1x1x4x40xf32>
    %1110 = vector.shape_cast %1109 : vector<1x1x4x40xf32> to vector<4x40xf32>
    %c0_982 = arith.constant 0 : index
    %c1_983 = arith.constant 1 : index
    %c2_984 = arith.constant 2 : index
    %c20_985 = arith.constant 20 : index
    %1111 = vector.load %arg11[%c0_982, %c1_983, %c2_984, %c20_985] : memref<2x2x6x60xf32, #tpu.memory_space<vmem>>, vector<1x1x4x40xf32>
    %1112 = vector.shape_cast %1111 : vector<1x1x4x40xf32> to vector<4x40xf32>
    %c1_986 = arith.constant 1 : index
    %c0_987 = arith.constant 0 : index
    %c2_988 = arith.constant 2 : index
    %c0_989 = arith.constant 0 : index
    %1113 = vector.load %arg11[%c1_986, %c0_987, %c2_988, %c0_989] : memref<2x2x6x60xf32, #tpu.memory_space<vmem>>, vector<1x1x4x40xf32>
    %1114 = vector.shape_cast %1113 : vector<1x1x4x40xf32> to vector<4x40xf32>
    %c1_990 = arith.constant 1 : index
    %c1_991 = arith.constant 1 : index
    %c2_992 = arith.constant 2 : index
    %c0_993 = arith.constant 0 : index
    %1115 = vector.load %arg11[%c1_990, %c1_991, %c2_992, %c0_993] : memref<2x2x6x60xf32, #tpu.memory_space<vmem>>, vector<1x1x4x40xf32>
    %1116 = vector.shape_cast %1115 : vector<1x1x4x40xf32> to vector<4x40xf32>
    %c1_994 = arith.constant 1 : index
    %c0_995 = arith.constant 0 : index
    %c2_996 = arith.constant 2 : index
    %c10_997 = arith.constant 10 : index
    %1117 = vector.load %arg11[%c1_994, %c0_995, %c2_996, %c10_997] : memref<2x2x6x60xf32, #tpu.memory_space<vmem>>, vector<1x1x4x40xf32>
    %1118 = vector.shape_cast %1117 : vector<1x1x4x40xf32> to vector<4x40xf32>
    %c1_998 = arith.constant 1 : index
    %c1_999 = arith.constant 1 : index
    %c2_1000 = arith.constant 2 : index
    %c10_1001 = arith.constant 10 : index
    %1119 = vector.load %arg11[%c1_998, %c1_999, %c2_1000, %c10_1001] : memref<2x2x6x60xf32, #tpu.memory_space<vmem>>, vector<1x1x4x40xf32>
    %1120 = vector.shape_cast %1119 : vector<1x1x4x40xf32> to vector<4x40xf32>
    %c1_1002 = arith.constant 1 : index
    %c0_1003 = arith.constant 0 : index
    %c2_1004 = arith.constant 2 : index
    %c20_1005 = arith.constant 20 : index
    %1121 = vector.load %arg11[%c1_1002, %c0_1003, %c2_1004, %c20_1005] : memref<2x2x6x60xf32, #tpu.memory_space<vmem>>, vector<1x1x4x40xf32>
    %1122 = vector.shape_cast %1121 : vector<1x1x4x40xf32> to vector<4x40xf32>
    %c1_1006 = arith.constant 1 : index
    %c1_1007 = arith.constant 1 : index
    %c2_1008 = arith.constant 2 : index
    %c20_1009 = arith.constant 20 : index
    %1123 = vector.load %arg11[%c1_1006, %c1_1007, %c2_1008, %c20_1009] : memref<2x2x6x60xf32, #tpu.memory_space<vmem>>, vector<1x1x4x40xf32>
    %1124 = vector.shape_cast %1123 : vector<1x1x4x40xf32> to vector<4x40xf32>
    %c0_1010 = arith.constant 0 : index
    %c0_1011 = arith.constant 0 : index
    %1125 = vector.load %arg5[%c0_1010, %c0_1011] : memref<1x80xf32, #tpu.memory_space<vmem>>, vector<1x80xf32>
    %cst_1012 = arith.constant dense<0.000000e+00> : vector<4x80xf32>
    %1126 = tpu.matmul %1054, %51, %cst_1012 {dimension_numbers = #tpu.dot_dimension_numbers<[1], [0], [0], [1], [0, 0, 1, 1], [], []>} : vector<4x40xf32>, vector<40x80xf32>, vector<4x80xf32> -> vector<4x80xf32>
    %cst_1013 = arith.constant dense<0.000000e+00> : vector<4x80xf32>
    %1127 = tpu.matmul %1056, %53, %cst_1013 {dimension_numbers = #tpu.dot_dimension_numbers<[1], [0], [0], [1], [0, 0, 1, 1], [], []>} : vector<4x40xf32>, vector<40x80xf32>, vector<4x80xf32> -> vector<4x80xf32>
    %1128 = arith.addf %1126, %1127 : vector<4x80xf32>
    %cst_1014 = arith.constant dense<0.000000e+00> : vector<4x80xf32>
    %1129 = tpu.matmul %1058, %55, %cst_1014 {dimension_numbers = #tpu.dot_dimension_numbers<[1], [0], [0], [1], [0, 0, 1, 1], [], []>} : vector<4x40xf32>, vector<40x80xf32>, vector<4x80xf32> -> vector<4x80xf32>
    %1130 = arith.addf %1128, %1129 : vector<4x80xf32>
    %cst_1015 = arith.constant dense<0.000000e+00> : vector<4x80xf32>
    %1131 = tpu.matmul %1060, %57, %cst_1015 {dimension_numbers = #tpu.dot_dimension_numbers<[1], [0], [0], [1], [0, 0, 1, 1], [], []>} : vector<4x40xf32>, vector<40x80xf32>, vector<4x80xf32> -> vector<4x80xf32>
    %1132 = arith.addf %1130, %1131 : vector<4x80xf32>
    %cst_1016 = arith.constant dense<0.000000e+00> : vector<4x80xf32>
    %1133 = tpu.matmul %1062, %59, %cst_1016 {dimension_numbers = #tpu.dot_dimension_numbers<[1], [0], [0], [1], [0, 0, 1, 1], [], []>} : vector<4x40xf32>, vector<40x80xf32>, vector<4x80xf32> -> vector<4x80xf32>
    %1134 = arith.addf %1132, %1133 : vector<4x80xf32>
    %cst_1017 = arith.constant dense<0.000000e+00> : vector<4x80xf32>
    %1135 = tpu.matmul %1066, %61, %cst_1017 {dimension_numbers = #tpu.dot_dimension_numbers<[1], [0], [0], [1], [0, 0, 1, 1], [], []>} : vector<4x40xf32>, vector<40x80xf32>, vector<4x80xf32> -> vector<4x80xf32>
    %1136 = arith.addf %1134, %1135 : vector<4x80xf32>
    %cst_1018 = arith.constant dense<0.000000e+00> : vector<4x80xf32>
    %1137 = tpu.matmul %1068, %63, %cst_1018 {dimension_numbers = #tpu.dot_dimension_numbers<[1], [0], [0], [1], [0, 0, 1, 1], [], []>} : vector<4x40xf32>, vector<40x80xf32>, vector<4x80xf32> -> vector<4x80xf32>
    %1138 = arith.addf %1136, %1137 : vector<4x80xf32>
    %cst_1019 = arith.constant dense<0.000000e+00> : vector<4x80xf32>
    %1139 = tpu.matmul %1070, %65, %cst_1019 {dimension_numbers = #tpu.dot_dimension_numbers<[1], [0], [0], [1], [0, 0, 1, 1], [], []>} : vector<4x40xf32>, vector<40x80xf32>, vector<4x80xf32> -> vector<4x80xf32>
    %1140 = arith.addf %1138, %1139 : vector<4x80xf32>
    %cst_1020 = arith.constant dense<0.000000e+00> : vector<4x80xf32>
    %1141 = tpu.matmul %1072, %67, %cst_1020 {dimension_numbers = #tpu.dot_dimension_numbers<[1], [0], [0], [1], [0, 0, 1, 1], [], []>} : vector<4x40xf32>, vector<40x80xf32>, vector<4x80xf32> -> vector<4x80xf32>
    %1142 = arith.addf %1140, %1141 : vector<4x80xf32>
    %cst_1021 = arith.constant dense<0.000000e+00> : vector<4x80xf32>
    %1143 = tpu.matmul %1074, %69, %cst_1021 {dimension_numbers = #tpu.dot_dimension_numbers<[1], [0], [0], [1], [0, 0, 1, 1], [], []>} : vector<4x40xf32>, vector<40x80xf32>, vector<4x80xf32> -> vector<4x80xf32>
    %1144 = arith.addf %1142, %1143 : vector<4x80xf32>
    %cst_1022 = arith.constant dense<0.000000e+00> : vector<4x80xf32>
    %1145 = tpu.matmul %1078, %71, %cst_1022 {dimension_numbers = #tpu.dot_dimension_numbers<[1], [0], [0], [1], [0, 0, 1, 1], [], []>} : vector<4x40xf32>, vector<40x80xf32>, vector<4x80xf32> -> vector<4x80xf32>
    %1146 = arith.addf %1144, %1145 : vector<4x80xf32>
    %cst_1023 = arith.constant dense<0.000000e+00> : vector<4x80xf32>
    %1147 = tpu.matmul %1080, %73, %cst_1023 {dimension_numbers = #tpu.dot_dimension_numbers<[1], [0], [0], [1], [0, 0, 1, 1], [], []>} : vector<4x40xf32>, vector<40x80xf32>, vector<4x80xf32> -> vector<4x80xf32>
    %1148 = arith.addf %1146, %1147 : vector<4x80xf32>
    %cst_1024 = arith.constant dense<0.000000e+00> : vector<4x80xf32>
    %1149 = tpu.matmul %1082, %75, %cst_1024 {dimension_numbers = #tpu.dot_dimension_numbers<[1], [0], [0], [1], [0, 0, 1, 1], [], []>} : vector<4x40xf32>, vector<40x80xf32>, vector<4x80xf32> -> vector<4x80xf32>
    %1150 = arith.addf %1148, %1149 : vector<4x80xf32>
    %cst_1025 = arith.constant dense<0.000000e+00> : vector<4x80xf32>
    %1151 = tpu.matmul %1084, %77, %cst_1025 {dimension_numbers = #tpu.dot_dimension_numbers<[1], [0], [0], [1], [0, 0, 1, 1], [], []>} : vector<4x40xf32>, vector<40x80xf32>, vector<4x80xf32> -> vector<4x80xf32>
    %1152 = arith.addf %1150, %1151 : vector<4x80xf32>
    %cst_1026 = arith.constant dense<0.000000e+00> : vector<4x80xf32>
    %1153 = tpu.matmul %1086, %79, %cst_1026 {dimension_numbers = #tpu.dot_dimension_numbers<[1], [0], [0], [1], [0, 0, 1, 1], [], []>} : vector<4x40xf32>, vector<40x80xf32>, vector<4x80xf32> -> vector<4x80xf32>
    %1154 = arith.addf %1152, %1153 : vector<4x80xf32>
    %cst_1027 = arith.constant dense<0.000000e+00> : vector<4x80xf32>
    %1155 = tpu.matmul %1090, %81, %cst_1027 {dimension_numbers = #tpu.dot_dimension_numbers<[1], [0], [0], [1], [0, 0, 1, 1], [], []>} : vector<4x40xf32>, vector<40x80xf32>, vector<4x80xf32> -> vector<4x80xf32>
    %1156 = arith.addf %1154, %1155 : vector<4x80xf32>
    %cst_1028 = arith.constant dense<0.000000e+00> : vector<4x80xf32>
    %1157 = tpu.matmul %1092, %83, %cst_1028 {dimension_numbers = #tpu.dot_dimension_numbers<[1], [0], [0], [1], [0, 0, 1, 1], [], []>} : vector<4x40xf32>, vector<40x80xf32>, vector<4x80xf32> -> vector<4x80xf32>
    %1158 = arith.addf %1156, %1157 : vector<4x80xf32>
    %cst_1029 = arith.constant dense<0.000000e+00> : vector<4x80xf32>
    %1159 = tpu.matmul %1094, %85, %cst_1029 {dimension_numbers = #tpu.dot_dimension_numbers<[1], [0], [0], [1], [0, 0, 1, 1], [], []>} : vector<4x40xf32>, vector<40x80xf32>, vector<4x80xf32> -> vector<4x80xf32>
    %1160 = arith.addf %1158, %1159 : vector<4x80xf32>
    %cst_1030 = arith.constant dense<0.000000e+00> : vector<4x80xf32>
    %1161 = tpu.matmul %1096, %87, %cst_1030 {dimension_numbers = #tpu.dot_dimension_numbers<[1], [0], [0], [1], [0, 0, 1, 1], [], []>} : vector<4x40xf32>, vector<40x80xf32>, vector<4x80xf32> -> vector<4x80xf32>
    %1162 = arith.addf %1160, %1161 : vector<4x80xf32>
    %cst_1031 = arith.constant dense<0.000000e+00> : vector<4x80xf32>
    %1163 = tpu.matmul %1098, %89, %cst_1031 {dimension_numbers = #tpu.dot_dimension_numbers<[1], [0], [0], [1], [0, 0, 1, 1], [], []>} : vector<4x40xf32>, vector<40x80xf32>, vector<4x80xf32> -> vector<4x80xf32>
    %1164 = arith.addf %1162, %1163 : vector<4x80xf32>
    %cst_1032 = arith.constant dense<0.000000e+00> : vector<4x80xf32>
    %1165 = tpu.matmul %1102, %91, %cst_1032 {dimension_numbers = #tpu.dot_dimension_numbers<[1], [0], [0], [1], [0, 0, 1, 1], [], []>} : vector<4x40xf32>, vector<40x80xf32>, vector<4x80xf32> -> vector<4x80xf32>
    %1166 = arith.addf %1164, %1165 : vector<4x80xf32>
    %cst_1033 = arith.constant dense<0.000000e+00> : vector<4x80xf32>
    %1167 = tpu.matmul %1104, %93, %cst_1033 {dimension_numbers = #tpu.dot_dimension_numbers<[1], [0], [0], [1], [0, 0, 1, 1], [], []>} : vector<4x40xf32>, vector<40x80xf32>, vector<4x80xf32> -> vector<4x80xf32>
    %1168 = arith.addf %1166, %1167 : vector<4x80xf32>
    %cst_1034 = arith.constant dense<0.000000e+00> : vector<4x80xf32>
    %1169 = tpu.matmul %1106, %95, %cst_1034 {dimension_numbers = #tpu.dot_dimension_numbers<[1], [0], [0], [1], [0, 0, 1, 1], [], []>} : vector<4x40xf32>, vector<40x80xf32>, vector<4x80xf32> -> vector<4x80xf32>
    %1170 = arith.addf %1168, %1169 : vector<4x80xf32>
    %cst_1035 = arith.constant dense<0.000000e+00> : vector<4x80xf32>
    %1171 = tpu.matmul %1108, %97, %cst_1035 {dimension_numbers = #tpu.dot_dimension_numbers<[1], [0], [0], [1], [0, 0, 1, 1], [], []>} : vector<4x40xf32>, vector<40x80xf32>, vector<4x80xf32> -> vector<4x80xf32>
    %1172 = arith.addf %1170, %1171 : vector<4x80xf32>
    %cst_1036 = arith.constant dense<0.000000e+00> : vector<4x80xf32>
    %1173 = tpu.matmul %1110, %99, %cst_1036 {dimension_numbers = #tpu.dot_dimension_numbers<[1], [0], [0], [1], [0, 0, 1, 1], [], []>} : vector<4x40xf32>, vector<40x80xf32>, vector<4x80xf32> -> vector<4x80xf32>
    %1174 = arith.addf %1172, %1173 : vector<4x80xf32>
    %cst_1037 = arith.constant dense<0.000000e+00> : vector<4x80xf32>
    %1175 = tpu.matmul %1056, %51, %cst_1037 {dimension_numbers = #tpu.dot_dimension_numbers<[1], [0], [0], [1], [0, 0, 1, 1], [], []>} : vector<4x40xf32>, vector<40x80xf32>, vector<4x80xf32> -> vector<4x80xf32>
    %cst_1038 = arith.constant dense<0.000000e+00> : vector<4x80xf32>
    %1176 = tpu.matmul %1058, %53, %cst_1038 {dimension_numbers = #tpu.dot_dimension_numbers<[1], [0], [0], [1], [0, 0, 1, 1], [], []>} : vector<4x40xf32>, vector<40x80xf32>, vector<4x80xf32> -> vector<4x80xf32>
    %1177 = arith.addf %1175, %1176 : vector<4x80xf32>
    %cst_1039 = arith.constant dense<0.000000e+00> : vector<4x80xf32>
    %1178 = tpu.matmul %1060, %55, %cst_1039 {dimension_numbers = #tpu.dot_dimension_numbers<[1], [0], [0], [1], [0, 0, 1, 1], [], []>} : vector<4x40xf32>, vector<40x80xf32>, vector<4x80xf32> -> vector<4x80xf32>
    %1179 = arith.addf %1177, %1178 : vector<4x80xf32>
    %cst_1040 = arith.constant dense<0.000000e+00> : vector<4x80xf32>
    %1180 = tpu.matmul %1062, %57, %cst_1040 {dimension_numbers = #tpu.dot_dimension_numbers<[1], [0], [0], [1], [0, 0, 1, 1], [], []>} : vector<4x40xf32>, vector<40x80xf32>, vector<4x80xf32> -> vector<4x80xf32>
    %1181 = arith.addf %1179, %1180 : vector<4x80xf32>
    %cst_1041 = arith.constant dense<0.000000e+00> : vector<4x80xf32>
    %1182 = tpu.matmul %1064, %59, %cst_1041 {dimension_numbers = #tpu.dot_dimension_numbers<[1], [0], [0], [1], [0, 0, 1, 1], [], []>} : vector<4x40xf32>, vector<40x80xf32>, vector<4x80xf32> -> vector<4x80xf32>
    %1183 = arith.addf %1181, %1182 : vector<4x80xf32>
    %cst_1042 = arith.constant dense<0.000000e+00> : vector<4x80xf32>
    %1184 = tpu.matmul %1068, %61, %cst_1042 {dimension_numbers = #tpu.dot_dimension_numbers<[1], [0], [0], [1], [0, 0, 1, 1], [], []>} : vector<4x40xf32>, vector<40x80xf32>, vector<4x80xf32> -> vector<4x80xf32>
    %1185 = arith.addf %1183, %1184 : vector<4x80xf32>
    %cst_1043 = arith.constant dense<0.000000e+00> : vector<4x80xf32>
    %1186 = tpu.matmul %1070, %63, %cst_1043 {dimension_numbers = #tpu.dot_dimension_numbers<[1], [0], [0], [1], [0, 0, 1, 1], [], []>} : vector<4x40xf32>, vector<40x80xf32>, vector<4x80xf32> -> vector<4x80xf32>
    %1187 = arith.addf %1185, %1186 : vector<4x80xf32>
    %cst_1044 = arith.constant dense<0.000000e+00> : vector<4x80xf32>
    %1188 = tpu.matmul %1072, %65, %cst_1044 {dimension_numbers = #tpu.dot_dimension_numbers<[1], [0], [0], [1], [0, 0, 1, 1], [], []>} : vector<4x40xf32>, vector<40x80xf32>, vector<4x80xf32> -> vector<4x80xf32>
    %1189 = arith.addf %1187, %1188 : vector<4x80xf32>
    %cst_1045 = arith.constant dense<0.000000e+00> : vector<4x80xf32>
    %1190 = tpu.matmul %1074, %67, %cst_1045 {dimension_numbers = #tpu.dot_dimension_numbers<[1], [0], [0], [1], [0, 0, 1, 1], [], []>} : vector<4x40xf32>, vector<40x80xf32>, vector<4x80xf32> -> vector<4x80xf32>
    %1191 = arith.addf %1189, %1190 : vector<4x80xf32>
    %cst_1046 = arith.constant dense<0.000000e+00> : vector<4x80xf32>
    %1192 = tpu.matmul %1076, %69, %cst_1046 {dimension_numbers = #tpu.dot_dimension_numbers<[1], [0], [0], [1], [0, 0, 1, 1], [], []>} : vector<4x40xf32>, vector<40x80xf32>, vector<4x80xf32> -> vector<4x80xf32>
    %1193 = arith.addf %1191, %1192 : vector<4x80xf32>
    %cst_1047 = arith.constant dense<0.000000e+00> : vector<4x80xf32>
    %1194 = tpu.matmul %1080, %71, %cst_1047 {dimension_numbers = #tpu.dot_dimension_numbers<[1], [0], [0], [1], [0, 0, 1, 1], [], []>} : vector<4x40xf32>, vector<40x80xf32>, vector<4x80xf32> -> vector<4x80xf32>
    %1195 = arith.addf %1193, %1194 : vector<4x80xf32>
    %cst_1048 = arith.constant dense<0.000000e+00> : vector<4x80xf32>
    %1196 = tpu.matmul %1082, %73, %cst_1048 {dimension_numbers = #tpu.dot_dimension_numbers<[1], [0], [0], [1], [0, 0, 1, 1], [], []>} : vector<4x40xf32>, vector<40x80xf32>, vector<4x80xf32> -> vector<4x80xf32>
    %1197 = arith.addf %1195, %1196 : vector<4x80xf32>
    %cst_1049 = arith.constant dense<0.000000e+00> : vector<4x80xf32>
    %1198 = tpu.matmul %1084, %75, %cst_1049 {dimension_numbers = #tpu.dot_dimension_numbers<[1], [0], [0], [1], [0, 0, 1, 1], [], []>} : vector<4x40xf32>, vector<40x80xf32>, vector<4x80xf32> -> vector<4x80xf32>
    %1199 = arith.addf %1197, %1198 : vector<4x80xf32>
    %cst_1050 = arith.constant dense<0.000000e+00> : vector<4x80xf32>
    %1200 = tpu.matmul %1086, %77, %cst_1050 {dimension_numbers = #tpu.dot_dimension_numbers<[1], [0], [0], [1], [0, 0, 1, 1], [], []>} : vector<4x40xf32>, vector<40x80xf32>, vector<4x80xf32> -> vector<4x80xf32>
    %1201 = arith.addf %1199, %1200 : vector<4x80xf32>
    %cst_1051 = arith.constant dense<0.000000e+00> : vector<4x80xf32>
    %1202 = tpu.matmul %1088, %79, %cst_1051 {dimension_numbers = #tpu.dot_dimension_numbers<[1], [0], [0], [1], [0, 0, 1, 1], [], []>} : vector<4x40xf32>, vector<40x80xf32>, vector<4x80xf32> -> vector<4x80xf32>
    %1203 = arith.addf %1201, %1202 : vector<4x80xf32>
    %cst_1052 = arith.constant dense<0.000000e+00> : vector<4x80xf32>
    %1204 = tpu.matmul %1092, %81, %cst_1052 {dimension_numbers = #tpu.dot_dimension_numbers<[1], [0], [0], [1], [0, 0, 1, 1], [], []>} : vector<4x40xf32>, vector<40x80xf32>, vector<4x80xf32> -> vector<4x80xf32>
    %1205 = arith.addf %1203, %1204 : vector<4x80xf32>
    %cst_1053 = arith.constant dense<0.000000e+00> : vector<4x80xf32>
    %1206 = tpu.matmul %1094, %83, %cst_1053 {dimension_numbers = #tpu.dot_dimension_numbers<[1], [0], [0], [1], [0, 0, 1, 1], [], []>} : vector<4x40xf32>, vector<40x80xf32>, vector<4x80xf32> -> vector<4x80xf32>
    %1207 = arith.addf %1205, %1206 : vector<4x80xf32>
    %cst_1054 = arith.constant dense<0.000000e+00> : vector<4x80xf32>
    %1208 = tpu.matmul %1096, %85, %cst_1054 {dimension_numbers = #tpu.dot_dimension_numbers<[1], [0], [0], [1], [0, 0, 1, 1], [], []>} : vector<4x40xf32>, vector<40x80xf32>, vector<4x80xf32> -> vector<4x80xf32>
    %1209 = arith.addf %1207, %1208 : vector<4x80xf32>
    %cst_1055 = arith.constant dense<0.000000e+00> : vector<4x80xf32>
    %1210 = tpu.matmul %1098, %87, %cst_1055 {dimension_numbers = #tpu.dot_dimension_numbers<[1], [0], [0], [1], [0, 0, 1, 1], [], []>} : vector<4x40xf32>, vector<40x80xf32>, vector<4x80xf32> -> vector<4x80xf32>
    %1211 = arith.addf %1209, %1210 : vector<4x80xf32>
    %cst_1056 = arith.constant dense<0.000000e+00> : vector<4x80xf32>
    %1212 = tpu.matmul %1100, %89, %cst_1056 {dimension_numbers = #tpu.dot_dimension_numbers<[1], [0], [0], [1], [0, 0, 1, 1], [], []>} : vector<4x40xf32>, vector<40x80xf32>, vector<4x80xf32> -> vector<4x80xf32>
    %1213 = arith.addf %1211, %1212 : vector<4x80xf32>
    %cst_1057 = arith.constant dense<0.000000e+00> : vector<4x80xf32>
    %1214 = tpu.matmul %1104, %91, %cst_1057 {dimension_numbers = #tpu.dot_dimension_numbers<[1], [0], [0], [1], [0, 0, 1, 1], [], []>} : vector<4x40xf32>, vector<40x80xf32>, vector<4x80xf32> -> vector<4x80xf32>
    %1215 = arith.addf %1213, %1214 : vector<4x80xf32>
    %cst_1058 = arith.constant dense<0.000000e+00> : vector<4x80xf32>
    %1216 = tpu.matmul %1106, %93, %cst_1058 {dimension_numbers = #tpu.dot_dimension_numbers<[1], [0], [0], [1], [0, 0, 1, 1], [], []>} : vector<4x40xf32>, vector<40x80xf32>, vector<4x80xf32> -> vector<4x80xf32>
    %1217 = arith.addf %1215, %1216 : vector<4x80xf32>
    %cst_1059 = arith.constant dense<0.000000e+00> : vector<4x80xf32>
    %1218 = tpu.matmul %1108, %95, %cst_1059 {dimension_numbers = #tpu.dot_dimension_numbers<[1], [0], [0], [1], [0, 0, 1, 1], [], []>} : vector<4x40xf32>, vector<40x80xf32>, vector<4x80xf32> -> vector<4x80xf32>
    %1219 = arith.addf %1217, %1218 : vector<4x80xf32>
    %cst_1060 = arith.constant dense<0.000000e+00> : vector<4x80xf32>
    %1220 = tpu.matmul %1110, %97, %cst_1060 {dimension_numbers = #tpu.dot_dimension_numbers<[1], [0], [0], [1], [0, 0, 1, 1], [], []>} : vector<4x40xf32>, vector<40x80xf32>, vector<4x80xf32> -> vector<4x80xf32>
    %1221 = arith.addf %1219, %1220 : vector<4x80xf32>
    %cst_1061 = arith.constant dense<0.000000e+00> : vector<4x80xf32>
    %1222 = tpu.matmul %1112, %99, %cst_1061 {dimension_numbers = #tpu.dot_dimension_numbers<[1], [0], [0], [1], [0, 0, 1, 1], [], []>} : vector<4x40xf32>, vector<40x80xf32>, vector<4x80xf32> -> vector<4x80xf32>
    %1223 = arith.addf %1221, %1222 : vector<4x80xf32>
    %1224 = arith.maximumf %1174, %1223 : vector<4x80xf32>
    %cst_1062 = arith.constant dense<0.000000e+00> : vector<4x80xf32>
    %1225 = tpu.matmul %1066, %51, %cst_1062 {dimension_numbers = #tpu.dot_dimension_numbers<[1], [0], [0], [1], [0, 0, 1, 1], [], []>} : vector<4x40xf32>, vector<40x80xf32>, vector<4x80xf32> -> vector<4x80xf32>
    %cst_1063 = arith.constant dense<0.000000e+00> : vector<4x80xf32>
    %1226 = tpu.matmul %1068, %53, %cst_1063 {dimension_numbers = #tpu.dot_dimension_numbers<[1], [0], [0], [1], [0, 0, 1, 1], [], []>} : vector<4x40xf32>, vector<40x80xf32>, vector<4x80xf32> -> vector<4x80xf32>
    %1227 = arith.addf %1225, %1226 : vector<4x80xf32>
    %cst_1064 = arith.constant dense<0.000000e+00> : vector<4x80xf32>
    %1228 = tpu.matmul %1070, %55, %cst_1064 {dimension_numbers = #tpu.dot_dimension_numbers<[1], [0], [0], [1], [0, 0, 1, 1], [], []>} : vector<4x40xf32>, vector<40x80xf32>, vector<4x80xf32> -> vector<4x80xf32>
    %1229 = arith.addf %1227, %1228 : vector<4x80xf32>
    %cst_1065 = arith.constant dense<0.000000e+00> : vector<4x80xf32>
    %1230 = tpu.matmul %1072, %57, %cst_1065 {dimension_numbers = #tpu.dot_dimension_numbers<[1], [0], [0], [1], [0, 0, 1, 1], [], []>} : vector<4x40xf32>, vector<40x80xf32>, vector<4x80xf32> -> vector<4x80xf32>
    %1231 = arith.addf %1229, %1230 : vector<4x80xf32>
    %cst_1066 = arith.constant dense<0.000000e+00> : vector<4x80xf32>
    %1232 = tpu.matmul %1074, %59, %cst_1066 {dimension_numbers = #tpu.dot_dimension_numbers<[1], [0], [0], [1], [0, 0, 1, 1], [], []>} : vector<4x40xf32>, vector<40x80xf32>, vector<4x80xf32> -> vector<4x80xf32>
    %1233 = arith.addf %1231, %1232 : vector<4x80xf32>
    %cst_1067 = arith.constant dense<0.000000e+00> : vector<4x80xf32>
    %1234 = tpu.matmul %1078, %61, %cst_1067 {dimension_numbers = #tpu.dot_dimension_numbers<[1], [0], [0], [1], [0, 0, 1, 1], [], []>} : vector<4x40xf32>, vector<40x80xf32>, vector<4x80xf32> -> vector<4x80xf32>
    %1235 = arith.addf %1233, %1234 : vector<4x80xf32>
    %cst_1068 = arith.constant dense<0.000000e+00> : vector<4x80xf32>
    %1236 = tpu.matmul %1080, %63, %cst_1068 {dimension_numbers = #tpu.dot_dimension_numbers<[1], [0], [0], [1], [0, 0, 1, 1], [], []>} : vector<4x40xf32>, vector<40x80xf32>, vector<4x80xf32> -> vector<4x80xf32>
    %1237 = arith.addf %1235, %1236 : vector<4x80xf32>
    %cst_1069 = arith.constant dense<0.000000e+00> : vector<4x80xf32>
    %1238 = tpu.matmul %1082, %65, %cst_1069 {dimension_numbers = #tpu.dot_dimension_numbers<[1], [0], [0], [1], [0, 0, 1, 1], [], []>} : vector<4x40xf32>, vector<40x80xf32>, vector<4x80xf32> -> vector<4x80xf32>
    %1239 = arith.addf %1237, %1238 : vector<4x80xf32>
    %cst_1070 = arith.constant dense<0.000000e+00> : vector<4x80xf32>
    %1240 = tpu.matmul %1084, %67, %cst_1070 {dimension_numbers = #tpu.dot_dimension_numbers<[1], [0], [0], [1], [0, 0, 1, 1], [], []>} : vector<4x40xf32>, vector<40x80xf32>, vector<4x80xf32> -> vector<4x80xf32>
    %1241 = arith.addf %1239, %1240 : vector<4x80xf32>
    %cst_1071 = arith.constant dense<0.000000e+00> : vector<4x80xf32>
    %1242 = tpu.matmul %1086, %69, %cst_1071 {dimension_numbers = #tpu.dot_dimension_numbers<[1], [0], [0], [1], [0, 0, 1, 1], [], []>} : vector<4x40xf32>, vector<40x80xf32>, vector<4x80xf32> -> vector<4x80xf32>
    %1243 = arith.addf %1241, %1242 : vector<4x80xf32>
    %cst_1072 = arith.constant dense<0.000000e+00> : vector<4x80xf32>
    %1244 = tpu.matmul %1090, %71, %cst_1072 {dimension_numbers = #tpu.dot_dimension_numbers<[1], [0], [0], [1], [0, 0, 1, 1], [], []>} : vector<4x40xf32>, vector<40x80xf32>, vector<4x80xf32> -> vector<4x80xf32>
    %1245 = arith.addf %1243, %1244 : vector<4x80xf32>
    %cst_1073 = arith.constant dense<0.000000e+00> : vector<4x80xf32>
    %1246 = tpu.matmul %1092, %73, %cst_1073 {dimension_numbers = #tpu.dot_dimension_numbers<[1], [0], [0], [1], [0, 0, 1, 1], [], []>} : vector<4x40xf32>, vector<40x80xf32>, vector<4x80xf32> -> vector<4x80xf32>
    %1247 = arith.addf %1245, %1246 : vector<4x80xf32>
    %cst_1074 = arith.constant dense<0.000000e+00> : vector<4x80xf32>
    %1248 = tpu.matmul %1094, %75, %cst_1074 {dimension_numbers = #tpu.dot_dimension_numbers<[1], [0], [0], [1], [0, 0, 1, 1], [], []>} : vector<4x40xf32>, vector<40x80xf32>, vector<4x80xf32> -> vector<4x80xf32>
    %1249 = arith.addf %1247, %1248 : vector<4x80xf32>
    %cst_1075 = arith.constant dense<0.000000e+00> : vector<4x80xf32>
    %1250 = tpu.matmul %1096, %77, %cst_1075 {dimension_numbers = #tpu.dot_dimension_numbers<[1], [0], [0], [1], [0, 0, 1, 1], [], []>} : vector<4x40xf32>, vector<40x80xf32>, vector<4x80xf32> -> vector<4x80xf32>
    %1251 = arith.addf %1249, %1250 : vector<4x80xf32>
    %cst_1076 = arith.constant dense<0.000000e+00> : vector<4x80xf32>
    %1252 = tpu.matmul %1098, %79, %cst_1076 {dimension_numbers = #tpu.dot_dimension_numbers<[1], [0], [0], [1], [0, 0, 1, 1], [], []>} : vector<4x40xf32>, vector<40x80xf32>, vector<4x80xf32> -> vector<4x80xf32>
    %1253 = arith.addf %1251, %1252 : vector<4x80xf32>
    %cst_1077 = arith.constant dense<0.000000e+00> : vector<4x80xf32>
    %1254 = tpu.matmul %1102, %81, %cst_1077 {dimension_numbers = #tpu.dot_dimension_numbers<[1], [0], [0], [1], [0, 0, 1, 1], [], []>} : vector<4x40xf32>, vector<40x80xf32>, vector<4x80xf32> -> vector<4x80xf32>
    %1255 = arith.addf %1253, %1254 : vector<4x80xf32>
    %cst_1078 = arith.constant dense<0.000000e+00> : vector<4x80xf32>
    %1256 = tpu.matmul %1104, %83, %cst_1078 {dimension_numbers = #tpu.dot_dimension_numbers<[1], [0], [0], [1], [0, 0, 1, 1], [], []>} : vector<4x40xf32>, vector<40x80xf32>, vector<4x80xf32> -> vector<4x80xf32>
    %1257 = arith.addf %1255, %1256 : vector<4x80xf32>
    %cst_1079 = arith.constant dense<0.000000e+00> : vector<4x80xf32>
    %1258 = tpu.matmul %1106, %85, %cst_1079 {dimension_numbers = #tpu.dot_dimension_numbers<[1], [0], [0], [1], [0, 0, 1, 1], [], []>} : vector<4x40xf32>, vector<40x80xf32>, vector<4x80xf32> -> vector<4x80xf32>
    %1259 = arith.addf %1257, %1258 : vector<4x80xf32>
    %cst_1080 = arith.constant dense<0.000000e+00> : vector<4x80xf32>
    %1260 = tpu.matmul %1108, %87, %cst_1080 {dimension_numbers = #tpu.dot_dimension_numbers<[1], [0], [0], [1], [0, 0, 1, 1], [], []>} : vector<4x40xf32>, vector<40x80xf32>, vector<4x80xf32> -> vector<4x80xf32>
    %1261 = arith.addf %1259, %1260 : vector<4x80xf32>
    %cst_1081 = arith.constant dense<0.000000e+00> : vector<4x80xf32>
    %1262 = tpu.matmul %1110, %89, %cst_1081 {dimension_numbers = #tpu.dot_dimension_numbers<[1], [0], [0], [1], [0, 0, 1, 1], [], []>} : vector<4x40xf32>, vector<40x80xf32>, vector<4x80xf32> -> vector<4x80xf32>
    %1263 = arith.addf %1261, %1262 : vector<4x80xf32>
    %cst_1082 = arith.constant dense<0.000000e+00> : vector<4x80xf32>
    %1264 = tpu.matmul %1114, %91, %cst_1082 {dimension_numbers = #tpu.dot_dimension_numbers<[1], [0], [0], [1], [0, 0, 1, 1], [], []>} : vector<4x40xf32>, vector<40x80xf32>, vector<4x80xf32> -> vector<4x80xf32>
    %1265 = arith.addf %1263, %1264 : vector<4x80xf32>
    %cst_1083 = arith.constant dense<0.000000e+00> : vector<4x80xf32>
    %1266 = tpu.matmul %1116, %93, %cst_1083 {dimension_numbers = #tpu.dot_dimension_numbers<[1], [0], [0], [1], [0, 0, 1, 1], [], []>} : vector<4x40xf32>, vector<40x80xf32>, vector<4x80xf32> -> vector<4x80xf32>
    %1267 = arith.addf %1265, %1266 : vector<4x80xf32>
    %cst_1084 = arith.constant dense<0.000000e+00> : vector<4x80xf32>
    %1268 = tpu.matmul %1118, %95, %cst_1084 {dimension_numbers = #tpu.dot_dimension_numbers<[1], [0], [0], [1], [0, 0, 1, 1], [], []>} : vector<4x40xf32>, vector<40x80xf32>, vector<4x80xf32> -> vector<4x80xf32>
    %1269 = arith.addf %1267, %1268 : vector<4x80xf32>
    %cst_1085 = arith.constant dense<0.000000e+00> : vector<4x80xf32>
    %1270 = tpu.matmul %1120, %97, %cst_1085 {dimension_numbers = #tpu.dot_dimension_numbers<[1], [0], [0], [1], [0, 0, 1, 1], [], []>} : vector<4x40xf32>, vector<40x80xf32>, vector<4x80xf32> -> vector<4x80xf32>
    %1271 = arith.addf %1269, %1270 : vector<4x80xf32>
    %cst_1086 = arith.constant dense<0.000000e+00> : vector<4x80xf32>
    %1272 = tpu.matmul %1122, %99, %cst_1086 {dimension_numbers = #tpu.dot_dimension_numbers<[1], [0], [0], [1], [0, 0, 1, 1], [], []>} : vector<4x40xf32>, vector<40x80xf32>, vector<4x80xf32> -> vector<4x80xf32>
    %1273 = arith.addf %1271, %1272 : vector<4x80xf32>
    %1274 = arith.maximumf %1224, %1273 : vector<4x80xf32>
    %cst_1087 = arith.constant dense<0.000000e+00> : vector<4x80xf32>
    %1275 = tpu.matmul %1068, %51, %cst_1087 {dimension_numbers = #tpu.dot_dimension_numbers<[1], [0], [0], [1], [0, 0, 1, 1], [], []>} : vector<4x40xf32>, vector<40x80xf32>, vector<4x80xf32> -> vector<4x80xf32>
    %cst_1088 = arith.constant dense<0.000000e+00> : vector<4x80xf32>
    %1276 = tpu.matmul %1070, %53, %cst_1088 {dimension_numbers = #tpu.dot_dimension_numbers<[1], [0], [0], [1], [0, 0, 1, 1], [], []>} : vector<4x40xf32>, vector<40x80xf32>, vector<4x80xf32> -> vector<4x80xf32>
    %1277 = arith.addf %1275, %1276 : vector<4x80xf32>
    %cst_1089 = arith.constant dense<0.000000e+00> : vector<4x80xf32>
    %1278 = tpu.matmul %1072, %55, %cst_1089 {dimension_numbers = #tpu.dot_dimension_numbers<[1], [0], [0], [1], [0, 0, 1, 1], [], []>} : vector<4x40xf32>, vector<40x80xf32>, vector<4x80xf32> -> vector<4x80xf32>
    %1279 = arith.addf %1277, %1278 : vector<4x80xf32>
    %cst_1090 = arith.constant dense<0.000000e+00> : vector<4x80xf32>
    %1280 = tpu.matmul %1074, %57, %cst_1090 {dimension_numbers = #tpu.dot_dimension_numbers<[1], [0], [0], [1], [0, 0, 1, 1], [], []>} : vector<4x40xf32>, vector<40x80xf32>, vector<4x80xf32> -> vector<4x80xf32>
    %1281 = arith.addf %1279, %1280 : vector<4x80xf32>
    %cst_1091 = arith.constant dense<0.000000e+00> : vector<4x80xf32>
    %1282 = tpu.matmul %1076, %59, %cst_1091 {dimension_numbers = #tpu.dot_dimension_numbers<[1], [0], [0], [1], [0, 0, 1, 1], [], []>} : vector<4x40xf32>, vector<40x80xf32>, vector<4x80xf32> -> vector<4x80xf32>
    %1283 = arith.addf %1281, %1282 : vector<4x80xf32>
    %cst_1092 = arith.constant dense<0.000000e+00> : vector<4x80xf32>
    %1284 = tpu.matmul %1080, %61, %cst_1092 {dimension_numbers = #tpu.dot_dimension_numbers<[1], [0], [0], [1], [0, 0, 1, 1], [], []>} : vector<4x40xf32>, vector<40x80xf32>, vector<4x80xf32> -> vector<4x80xf32>
    %1285 = arith.addf %1283, %1284 : vector<4x80xf32>
    %cst_1093 = arith.constant dense<0.000000e+00> : vector<4x80xf32>
    %1286 = tpu.matmul %1082, %63, %cst_1093 {dimension_numbers = #tpu.dot_dimension_numbers<[1], [0], [0], [1], [0, 0, 1, 1], [], []>} : vector<4x40xf32>, vector<40x80xf32>, vector<4x80xf32> -> vector<4x80xf32>
    %1287 = arith.addf %1285, %1286 : vector<4x80xf32>
    %cst_1094 = arith.constant dense<0.000000e+00> : vector<4x80xf32>
    %1288 = tpu.matmul %1084, %65, %cst_1094 {dimension_numbers = #tpu.dot_dimension_numbers<[1], [0], [0], [1], [0, 0, 1, 1], [], []>} : vector<4x40xf32>, vector<40x80xf32>, vector<4x80xf32> -> vector<4x80xf32>
    %1289 = arith.addf %1287, %1288 : vector<4x80xf32>
    %cst_1095 = arith.constant dense<0.000000e+00> : vector<4x80xf32>
    %1290 = tpu.matmul %1086, %67, %cst_1095 {dimension_numbers = #tpu.dot_dimension_numbers<[1], [0], [0], [1], [0, 0, 1, 1], [], []>} : vector<4x40xf32>, vector<40x80xf32>, vector<4x80xf32> -> vector<4x80xf32>
    %1291 = arith.addf %1289, %1290 : vector<4x80xf32>
    %cst_1096 = arith.constant dense<0.000000e+00> : vector<4x80xf32>
    %1292 = tpu.matmul %1088, %69, %cst_1096 {dimension_numbers = #tpu.dot_dimension_numbers<[1], [0], [0], [1], [0, 0, 1, 1], [], []>} : vector<4x40xf32>, vector<40x80xf32>, vector<4x80xf32> -> vector<4x80xf32>
    %1293 = arith.addf %1291, %1292 : vector<4x80xf32>
    %cst_1097 = arith.constant dense<0.000000e+00> : vector<4x80xf32>
    %1294 = tpu.matmul %1092, %71, %cst_1097 {dimension_numbers = #tpu.dot_dimension_numbers<[1], [0], [0], [1], [0, 0, 1, 1], [], []>} : vector<4x40xf32>, vector<40x80xf32>, vector<4x80xf32> -> vector<4x80xf32>
    %1295 = arith.addf %1293, %1294 : vector<4x80xf32>
    %cst_1098 = arith.constant dense<0.000000e+00> : vector<4x80xf32>
    %1296 = tpu.matmul %1094, %73, %cst_1098 {dimension_numbers = #tpu.dot_dimension_numbers<[1], [0], [0], [1], [0, 0, 1, 1], [], []>} : vector<4x40xf32>, vector<40x80xf32>, vector<4x80xf32> -> vector<4x80xf32>
    %1297 = arith.addf %1295, %1296 : vector<4x80xf32>
    %cst_1099 = arith.constant dense<0.000000e+00> : vector<4x80xf32>
    %1298 = tpu.matmul %1096, %75, %cst_1099 {dimension_numbers = #tpu.dot_dimension_numbers<[1], [0], [0], [1], [0, 0, 1, 1], [], []>} : vector<4x40xf32>, vector<40x80xf32>, vector<4x80xf32> -> vector<4x80xf32>
    %1299 = arith.addf %1297, %1298 : vector<4x80xf32>
    %cst_1100 = arith.constant dense<0.000000e+00> : vector<4x80xf32>
    %1300 = tpu.matmul %1098, %77, %cst_1100 {dimension_numbers = #tpu.dot_dimension_numbers<[1], [0], [0], [1], [0, 0, 1, 1], [], []>} : vector<4x40xf32>, vector<40x80xf32>, vector<4x80xf32> -> vector<4x80xf32>
    %1301 = arith.addf %1299, %1300 : vector<4x80xf32>
    %cst_1101 = arith.constant dense<0.000000e+00> : vector<4x80xf32>
    %1302 = tpu.matmul %1100, %79, %cst_1101 {dimension_numbers = #tpu.dot_dimension_numbers<[1], [0], [0], [1], [0, 0, 1, 1], [], []>} : vector<4x40xf32>, vector<40x80xf32>, vector<4x80xf32> -> vector<4x80xf32>
    %1303 = arith.addf %1301, %1302 : vector<4x80xf32>
    %cst_1102 = arith.constant dense<0.000000e+00> : vector<4x80xf32>
    %1304 = tpu.matmul %1104, %81, %cst_1102 {dimension_numbers = #tpu.dot_dimension_numbers<[1], [0], [0], [1], [0, 0, 1, 1], [], []>} : vector<4x40xf32>, vector<40x80xf32>, vector<4x80xf32> -> vector<4x80xf32>
    %1305 = arith.addf %1303, %1304 : vector<4x80xf32>
    %cst_1103 = arith.constant dense<0.000000e+00> : vector<4x80xf32>
    %1306 = tpu.matmul %1106, %83, %cst_1103 {dimension_numbers = #tpu.dot_dimension_numbers<[1], [0], [0], [1], [0, 0, 1, 1], [], []>} : vector<4x40xf32>, vector<40x80xf32>, vector<4x80xf32> -> vector<4x80xf32>
    %1307 = arith.addf %1305, %1306 : vector<4x80xf32>
    %cst_1104 = arith.constant dense<0.000000e+00> : vector<4x80xf32>
    %1308 = tpu.matmul %1108, %85, %cst_1104 {dimension_numbers = #tpu.dot_dimension_numbers<[1], [0], [0], [1], [0, 0, 1, 1], [], []>} : vector<4x40xf32>, vector<40x80xf32>, vector<4x80xf32> -> vector<4x80xf32>
    %1309 = arith.addf %1307, %1308 : vector<4x80xf32>
    %cst_1105 = arith.constant dense<0.000000e+00> : vector<4x80xf32>
    %1310 = tpu.matmul %1110, %87, %cst_1105 {dimension_numbers = #tpu.dot_dimension_numbers<[1], [0], [0], [1], [0, 0, 1, 1], [], []>} : vector<4x40xf32>, vector<40x80xf32>, vector<4x80xf32> -> vector<4x80xf32>
    %1311 = arith.addf %1309, %1310 : vector<4x80xf32>
    %cst_1106 = arith.constant dense<0.000000e+00> : vector<4x80xf32>
    %1312 = tpu.matmul %1112, %89, %cst_1106 {dimension_numbers = #tpu.dot_dimension_numbers<[1], [0], [0], [1], [0, 0, 1, 1], [], []>} : vector<4x40xf32>, vector<40x80xf32>, vector<4x80xf32> -> vector<4x80xf32>
    %1313 = arith.addf %1311, %1312 : vector<4x80xf32>
    %cst_1107 = arith.constant dense<0.000000e+00> : vector<4x80xf32>
    %1314 = tpu.matmul %1116, %91, %cst_1107 {dimension_numbers = #tpu.dot_dimension_numbers<[1], [0], [0], [1], [0, 0, 1, 1], [], []>} : vector<4x40xf32>, vector<40x80xf32>, vector<4x80xf32> -> vector<4x80xf32>
    %1315 = arith.addf %1313, %1314 : vector<4x80xf32>
    %cst_1108 = arith.constant dense<0.000000e+00> : vector<4x80xf32>
    %1316 = tpu.matmul %1118, %93, %cst_1108 {dimension_numbers = #tpu.dot_dimension_numbers<[1], [0], [0], [1], [0, 0, 1, 1], [], []>} : vector<4x40xf32>, vector<40x80xf32>, vector<4x80xf32> -> vector<4x80xf32>
    %1317 = arith.addf %1315, %1316 : vector<4x80xf32>
    %cst_1109 = arith.constant dense<0.000000e+00> : vector<4x80xf32>
    %1318 = tpu.matmul %1120, %95, %cst_1109 {dimension_numbers = #tpu.dot_dimension_numbers<[1], [0], [0], [1], [0, 0, 1, 1], [], []>} : vector<4x40xf32>, vector<40x80xf32>, vector<4x80xf32> -> vector<4x80xf32>
    %1319 = arith.addf %1317, %1318 : vector<4x80xf32>
    %cst_1110 = arith.constant dense<0.000000e+00> : vector<4x80xf32>
    %1320 = tpu.matmul %1122, %97, %cst_1110 {dimension_numbers = #tpu.dot_dimension_numbers<[1], [0], [0], [1], [0, 0, 1, 1], [], []>} : vector<4x40xf32>, vector<40x80xf32>, vector<4x80xf32> -> vector<4x80xf32>
    %1321 = arith.addf %1319, %1320 : vector<4x80xf32>
    %cst_1111 = arith.constant dense<0.000000e+00> : vector<4x80xf32>
    %1322 = tpu.matmul %1124, %99, %cst_1111 {dimension_numbers = #tpu.dot_dimension_numbers<[1], [0], [0], [1], [0, 0, 1, 1], [], []>} : vector<4x40xf32>, vector<40x80xf32>, vector<4x80xf32> -> vector<4x80xf32>
    %1323 = arith.addf %1321, %1322 : vector<4x80xf32>
    %1324 = arith.maximumf %1274, %1323 : vector<4x80xf32>
    %1325 = vector.broadcast %1125 : vector<1x80xf32> to vector<4x80xf32>
    %1326 = arith.addf %1324, %1325 : vector<4x80xf32>
    %cst_1112 = arith.constant 0.000000e+00 : f32
    %1327 = vector.broadcast %cst_1112 : f32 to vector<4x80xf32>
    %1328 = arith.maximumf %1326, %1327 : vector<4x80xf32>
    %1329 = vector.extract_strided_slice %1328 {offsets = [0, 0], sizes = [1, 80], strides = [1, 1]} : vector<4x80xf32> to vector<1x80xf32>
    %c0_1113 = arith.constant 0 : index
    %c0_1114 = arith.constant 0 : index
    %c0_1115 = arith.constant 0 : index
    %1330 = vector.load %arg6[%c0_1113, %c0_1114, %c0_1115] : memref<4x80x50xf32, #tpu.memory_space<vmem>>, vector<1x80x50xf32>
    %1331 = vector.shape_cast %1330 : vector<1x80x50xf32> to vector<80x50xf32>
    %cst_1116 = arith.constant dense<0.000000e+00> : vector<1x50xf32>
    %1332 = tpu.matmul %1329, %1331, %cst_1116 {dimension_numbers = #tpu.dot_dimension_numbers<[1], [0], [0], [1], [0, 0, 1, 1], [], []>} : vector<1x80xf32>, vector<80x50xf32>, vector<1x50xf32> -> vector<1x50xf32>
    %1333 = vector.extract_strided_slice %1328 {offsets = [1, 0], sizes = [1, 80], strides = [1, 1]} : vector<4x80xf32> to vector<1x80xf32>
    %c1_1117 = arith.constant 1 : index
    %c0_1118 = arith.constant 0 : index
    %c0_1119 = arith.constant 0 : index
    %1334 = vector.load %arg6[%c1_1117, %c0_1118, %c0_1119] : memref<4x80x50xf32, #tpu.memory_space<vmem>>, vector<1x80x50xf32>
    %1335 = vector.shape_cast %1334 : vector<1x80x50xf32> to vector<80x50xf32>
    %cst_1120 = arith.constant dense<0.000000e+00> : vector<1x50xf32>
    %1336 = tpu.matmul %1333, %1335, %cst_1120 {dimension_numbers = #tpu.dot_dimension_numbers<[1], [0], [0], [1], [0, 0, 1, 1], [], []>} : vector<1x80xf32>, vector<80x50xf32>, vector<1x50xf32> -> vector<1x50xf32>
    %1337 = arith.addf %1332, %1336 : vector<1x50xf32>
    %1338 = vector.extract_strided_slice %1328 {offsets = [2, 0], sizes = [1, 80], strides = [1, 1]} : vector<4x80xf32> to vector<1x80xf32>
    %c2_1121 = arith.constant 2 : index
    %c0_1122 = arith.constant 0 : index
    %c0_1123 = arith.constant 0 : index
    %1339 = vector.load %arg6[%c2_1121, %c0_1122, %c0_1123] : memref<4x80x50xf32, #tpu.memory_space<vmem>>, vector<1x80x50xf32>
    %1340 = vector.shape_cast %1339 : vector<1x80x50xf32> to vector<80x50xf32>
    %cst_1124 = arith.constant dense<0.000000e+00> : vector<1x50xf32>
    %1341 = tpu.matmul %1338, %1340, %cst_1124 {dimension_numbers = #tpu.dot_dimension_numbers<[1], [0], [0], [1], [0, 0, 1, 1], [], []>} : vector<1x80xf32>, vector<80x50xf32>, vector<1x50xf32> -> vector<1x50xf32>
    %1342 = arith.addf %1337, %1341 : vector<1x50xf32>
    %1343 = vector.extract_strided_slice %1328 {offsets = [3, 0], sizes = [1, 80], strides = [1, 1]} : vector<4x80xf32> to vector<1x80xf32>
    %c3_1125 = arith.constant 3 : index
    %c0_1126 = arith.constant 0 : index
    %c0_1127 = arith.constant 0 : index
    %1344 = vector.load %arg6[%c3_1125, %c0_1126, %c0_1127] : memref<4x80x50xf32, #tpu.memory_space<vmem>>, vector<1x80x50xf32>
    %1345 = vector.shape_cast %1344 : vector<1x80x50xf32> to vector<80x50xf32>
    %cst_1128 = arith.constant dense<0.000000e+00> : vector<1x50xf32>
    %1346 = tpu.matmul %1343, %1345, %cst_1128 {dimension_numbers = #tpu.dot_dimension_numbers<[1], [0], [0], [1], [0, 0, 1, 1], [], []>} : vector<1x80xf32>, vector<80x50xf32>, vector<1x50xf32> -> vector<1x50xf32>
    %1347 = arith.addf %1342, %1346 : vector<1x50xf32>
    %c0_1129 = arith.constant 0 : index
    %c0_1130 = arith.constant 0 : index
    %1348 = vector.load %arg7[%c0_1129, %c0_1130] : memref<1x50xf32, #tpu.memory_space<vmem>>, vector<1x50xf32>
    %1349 = arith.addf %1347, %1348 : vector<1x50xf32>
    %cst_1131 = arith.constant 0.000000e+00 : f32
    %1350 = vector.broadcast %cst_1131 : f32 to vector<1x50xf32>
    %1351 = arith.maximumf %1349, %1350 : vector<1x50xf32>
    %c0_1132 = arith.constant 0 : index
    %c0_1133 = arith.constant 0 : index
    %1352 = vector.load %arg8[%c0_1132, %c0_1133] : memref<50x10xf32, #tpu.memory_space<vmem>>, vector<50x10xf32>
    %cst_1134 = arith.constant dense<0.000000e+00> : vector<1x10xf32>
    %1353 = tpu.matmul %1351, %1352, %cst_1134 {dimension_numbers = #tpu.dot_dimension_numbers<[1], [0], [0], [1], [0, 0, 1, 1], [], []>} : vector<1x50xf32>, vector<50x10xf32>, vector<1x10xf32> -> vector<1x10xf32>
    %c0_1135 = arith.constant 0 : index
    %c0_1136 = arith.constant 0 : index
    %1354 = vector.load %arg9[%c0_1135, %c0_1136] : memref<1x10xf32, #tpu.memory_space<vmem>>, vector<1x10xf32>
    %1355 = arith.addf %1353, %1354 : vector<1x10xf32>
    %cst_1137 = arith.constant dense<0xFF800000> : vector<1xf32>
    %1356 = vector.multi_reduction <maximumf>, %1355, %cst_1137 [1] : vector<1x10xf32> to vector<1xf32>
    %1357 = vector.shape_cast %1356 : vector<1xf32> to vector<1x1xf32>
    %1358 = vector.broadcast %1357 : vector<1x1xf32> to vector<1x10xf32>
    %1359 = arith.subf %1355, %1358 : vector<1x10xf32>
    %1360 = math.exp %1359 : vector<1x10xf32>
    %cst_1138 = arith.constant dense<0.000000e+00> : vector<1xf32>
    %1361 = vector.multi_reduction <add>, %1360, %cst_1138 [1] : vector<1x10xf32> to vector<1xf32>
    %1362 = vector.shape_cast %1361 : vector<1xf32> to vector<1x1xf32>
    %1363 = vector.broadcast %1357 : vector<1x1xf32> to vector<1x10xf32>
    %1364 = arith.subf %1355, %1363 : vector<1x10xf32>
    %1365 = math.log %1362 : vector<1x1xf32>
    %1366 = vector.broadcast %1365 : vector<1x1xf32> to vector<1x10xf32>
    %1367 = arith.subf %1364, %1366 : vector<1x10xf32>
    %c0_1139 = arith.constant 0 : index
    %c0_1140 = arith.constant 0 : index
    %c0_1141 = arith.constant 0 : index
    %1368 = vector.load %arg10[%c0_1139, %c0_1140, %c0_1141] : memref<1x1x10xf32, #tpu.memory_space<vmem>>, vector<1x1x10xf32>
    %1369 = vector.shape_cast %1368 : vector<1x1x10xf32> to vector<1x10xf32>
    %1370 = vector.shape_cast %1367 : vector<1x10xf32> to vector<1x1x10xf32>
    tpu.vector_store %arg10[%c0_1139, %c0_1140, %c0_1141], %1370 {strides = array<i32>} : memref<1x1x10xf32, #tpu.memory_space<vmem>>, vector<1x1x10xf32>,
    return
  }
  func.func @transform_0(%arg0: i32) -> (i32, i32, i32, i32, i32) {
    %c0_i32 = arith.constant 0 : i32
    %c0_i32_0 = arith.constant 0 : i32
    %c0_i32_1 = arith.constant 0 : i32
    %c0_i32_2 = arith.constant 0 : i32
    %c0_i32_3 = arith.constant 0 : i32
    return %arg0, %c0_i32, %c0_i32_0, %c0_i32_1, %c0_i32_2 : i32, i32, i32, i32, i32
  }
  func.func @transform_1(%arg0: i32) -> (i32, i32, i32) {
    %c0_i32 = arith.constant 0 : i32
    %c0_i32_0 = arith.constant 0 : i32
    %c0_i32_1 = arith.constant 0 : i32
    %c0_i32_2 = arith.constant 0 : i32
    return %c0_i32, %c0_i32_0, %c0_i32_1 : i32, i32, i32
  }
  func.func @transform_2(%arg0: i32) -> (i32, i32) {
    %c0_i32 = arith.constant 0 : i32
    %c0_i32_0 = arith.constant 0 : i32
    %c0_i32_1 = arith.constant 0 : i32
    return %c0_i32, %c0_i32_0 : i32, i32
  }
  func.func @transform_3(%arg0: i32) -> (i32, i32, i32) {
    %c0_i32 = arith.constant 0 : i32
    %c0_i32_0 = arith.constant 0 : i32
    %c0_i32_1 = arith.constant 0 : i32
    %c0_i32_2 = arith.constant 0 : i32
    return %c0_i32, %c0_i32_0, %c0_i32_1 : i32, i32, i32
  }
  func.func @transform_4(%arg0: i32) -> (i32, i32) {
    %c0_i32 = arith.constant 0 : i32
    %c0_i32_0 = arith.constant 0 : i32
    %c0_i32_1 = arith.constant 0 : i32
    return %c0_i32, %c0_i32_0 : i32, i32
  }
  func.func @transform_5(%arg0: i32) -> (i32, i32, i32) {
    %c0_i32 = arith.constant 0 : i32
    %c0_i32_0 = arith.constant 0 : i32
    %c0_i32_1 = arith.constant 0 : i32
    %c0_i32_2 = arith.constant 0 : i32
    return %c0_i32, %c0_i32_0, %c0_i32_1 : i32, i32, i32
  }
  func.func @transform_6(%arg0: i32) -> (i32, i32) {
    %c0_i32 = arith.constant 0 : i32
    %c0_i32_0 = arith.constant 0 : i32
    %c0_i32_1 = arith.constant 0 : i32
    return %c0_i32, %c0_i32_0 : i32, i32
  }
  func.func @transform_7(%arg0: i32) -> (i32, i32) {
    %c0_i32 = arith.constant 0 : i32
    %c0_i32_0 = arith.constant 0 : i32
    %c0_i32_1 = arith.constant 0 : i32
    return %c0_i32, %c0_i32_0 : i32, i32
  }
  func.func @transform_8(%arg0: i32) -> (i32, i32) {
    %c0_i32 = arith.constant 0 : i32
    %c0_i32_0 = arith.constant 0 : i32
    %c0_i32_1 = arith.constant 0 : i32
    return %c0_i32, %c0_i32_0 : i32, i32
  }
  func.func @transform_9(%arg0: i32) -> (i32, i32, i32) {
    %c0_i32 = arith.constant 0 : i32
    %c0_i32_0 = arith.constant 0 : i32
    %c0_i32_1 = arith.constant 0 : i32
    return %arg0, %c0_i32, %c0_i32_0 : i32, i32, i32
  }
}

</mosaic_0001>

<bundles_post_ra>
// kernel: tpu_custom_call.1
= control target key start
LH: loop header
LB: loop body
LE: loop exit
PB: predicated region body
PF: predicated region fallthrough
CT: control target
= control target key end

     0   :  { %14 = vsyncpa [#allocation4], 0  ;;  %s17207_s0 = inlined_call_operand.vmem [shape: f32[2,4,4,7,7], index: 0, kind: input, shape index: {}]   ;;  %s17208_s1 = inlined_call_operand.vmem [shape: f32[25,6,60], index: 1, kind: input, shape index: {}]   ;;  %s17209_s2 = inlined_call_operand.vmem [shape: f32[1,60], index: 2, kind: input, shape index: {}]   ;;  %s17210_s3 = inlined_call_operand.hbm [shape: f32[25,40,80], index: 3, kind: input, shape index: {}]   ;;  %s17211_s4 = inlined_call_operand.vmem [shape: f32[1,80], index: 4, kind: input, shape index: {}]   ;;  %s17212_s5 = inlined_call_operand.vmem [shape: f32[4,80,50], index: 5, kind: input, shape index: {}]   ;;  %s17213_s6 = inlined_call_operand.vmem [shape: f32[1,50], index: 6, kind: input, shape index: {}]   ;;  %s17214_s7 = inlined_call_operand.vmem [shape: f32[50,10], index: 7, kind: input, shape index: {}]   ;;  %s17215_s8 = inlined_call_operand.vmem [shape: f32[1,10], index: 8, kind: input, shape index: {}]   ;;  %s17216_s9 = inlined_call_operand.hbm [shape: f32[2,1,10], index: 9, kind: output, shape index: {}]  }
   0x1   :  { %15 = vsyncpa [#allocation5], 0 }
   0x2   :  { %17 = vsyncpa [#allocation5 + $0x1], 0  ;;  %s13201_s30 = smov 0   ;;  %s13203_s10 = smov 0  }
   0x3   :  { %s13205_s11 = smov 0   ;;  %s13207_s12 = smov 0  }
   0x4 LB: > { %s13222_s13 = sadd.s32 4294967295, %s13143_s12   ;;  %s11810_s14 = sadd.s32 4294967294, %s13143_s12   ;;  %s13143_s12 = sphi %s13207_s12, %s17743_s12   ;;  %s13139_s11 = sphi %s13205_s11, %s17742_s11   ;;  %s13135_s10 = sphi %s13203_s10, %s17741_s10   ;;  %s13131_s30 = sphi %s13201_s30, %s17740_s30  }
   0x5   : > { %s13226_s15 = sadd.s32 1, %s13143_s12   ;;  %s224_s16 = sadd.s32 1, %s13139_s11 }
   0x6   : > { %s221_s17 = ssub.s32 %s13143_s12, %s13226_s15  ;;  %p234_p0 = scmp.ne.s32.totalorder %s13139_s11, %s13135_s10 }
   0x7   : > { %p222_p1 = scmp.eq.s32.totalorder %s221_s17, 0  ;;  %p235_p2 = scmp.eq.s32.totalorder %s13222_s13, 1 }
   0x8   : > { %p240_p3 = scmp.ne.s32.totalorder %s13135_s10, %s13131_s30  ;;  %p241_p4 = scmp.eq.s32.totalorder %s11810_s14, 1 }
   0x9   : > { %s13237_s18 = scalar_select %p222_p1, %s13139_s11, %s224_s16  }
   0xa   : > { %p13239_p5 = por %p235_p2, %p234_p0  ;;  %p13243_p6 = por %p241_p4, %p240_p3 }
   0xb   : > { %p11811_p7 = scmp.ge.s32.totalorder %s13143_s12, 1  ;;  %p248_p8 = scmp.lt.s32.totalorder %s13143_s12, 3 }
   0xc   : > { %p12825_p9 = scmp.eq.s32.totalorder %s13222_s13, 0  ;;  %s265_s23 = sshll.u32 %s17210_s3, 4  ;;  %s266_s23 = int_to_ptr.hbm [resolvable:$true] %s265_s23 }
   0xd   : > { %p249_p10 = pnand %p11811_p7, %p248_p8  ;;  %s13145_s24 = smov [#allocation3]  }
   0xe   : > { %s267_s25 = sshll.u32 %s13145_s24, 4  ;;  %s13146_s26 = smov 128   ;;  %s268_s25 = int_to_ptr.vmem [resolvable:$true] %s267_s25 }
   0xf   : > { %p12817_p11 = pneg %p249_p10  ;;  %s13147_s27 = smov 8  }
  0x10   : > { %306 = sbr.rel (%p249_p10) target bundleno = 2100 (0x834), region = 56 }
  0x11   : > { %p12818_p12 = pnand %p12825_p9, %p12817_p11 }
  0x13   : > { %12820 = dma.hbm_to_vmem [thread:$0]  (!%p12818_p12), %s266_s23, 16000, %s268_s25, [#allocation4], %s13146_s26, %s13146_s26, %s13147_s27  }
  0x15   : > { %13122 = dma.done.wait (%p12825_p9), [#allocation4], 16000  }
  0x16   : > { %13124 = vsyncadd (%p12825_p9), [#allocation4], 4294951296  ;;  %p342_p13 = scmp.lt.s32.totalorder %s13222_s13, 1  ;;  %s13148_s21 = smov 127   ;;  %vm597_vm0 = vcmask 1045504   ;;  %vm593_vm1 = vcmask 48128  }
  0x17   : > { %v13281_v3 = vld [vmem:[%s17208_s1 + $0x10] sm:$0x3f]  ;;  %v13286_v4 = vld [vmem:[%s17208_s1 + $0x18] sm:$0x3f]  ;;  %v13304_v8 = vld [vmem:[%s17208_s1 + $0x8] sm:$0x3f] }
  0x18   : > { %s343_s28 = scalar_select %p342_p13, %s13222_s13, 1  ;;  %11876 = vmatpush.msk.msra.mxu2 %vm597_vm0, %v13281_v3  ;;  %11878 = vmatpush.msk.msra.mxu3 %vm597_vm0, %v13286_v4  ;;  %v13316_v10 = vld [vmem:[%s17208_s1 + $0x30] sm:$0x3f]  ;;  %v13321_v11 = vld [vmem:[%s17208_s1 + $0x38] sm:$0x3f]  ;;  %vm2890_vm2 = vcmask 488448  }
  0x19   : > { %11872 = vmatpush.msk.msra.mxu1 %vm597_vm0, %v13304_v8  ;;  %v13333_v13 = vld [vmem:[%s17208_s1] sm:$0x3f]  ;;  %v13338_v14 = vld [vmem:[%s17208_s1 + $0x50] sm:$0x3f]  ;;  %v13347_v15 = vld [vmem:[%s17208_s1 + $0x58] sm:$0x3f] }
  0x1a   : > { %s12810_s29 = sshll.u32 %s343_s28, 7  ;;  %11884 = vmatpush.msk.msrb.mxu2 %vm597_vm0, %v13316_v10  ;;  %11886 = vmatpush.msk.msrb.mxu3 %vm597_vm0, %v13321_v11  ;;  %v13398_v21 = vld [vmem:[%s17208_s1 + $0x20] sm:$0x3f]  ;;  %v13403_v22 = vld [vmem:[%s17208_s1 + $0x28] sm:$0x3f]  ;;  %s13149_s14 = smov 108  }
  0x1b   : > { %s13264_s17 = scalar_lea.vmem %s17207_s0, %s12810_s29  ;;  %11874 = vmatpush.msk.msrb.mxu1 %vm597_vm0, %v13333_v13  ;;  %v13408_v23 = vld [vmem:[%s17208_s1 + $0x70] sm:$0x3f]  ;;  %11880 = vmatpush.msk.msra.mxu0 %vm597_vm0, %v13398_v21  ;;  %v13417_v24 = vld [vmem:[%s17208_s1 + $0x78] sm:$0x3f]  ;;  %v13435_v26 = vld [vmem:[%s17208_s1 + $0x40] sm:$0x3f]  ;;  %s11739_s29 = scalar_lea.hbm %s17216_s9, %s13222_s13 }
  0x1c   : > { %v13267_v0 = vld [vmem:[%s13264_s17 + $0x40] sm:$0x3f]  ;;  %v13296_v6 = vld [vmem:[%s13264_s17 + $0x10] sm:$0x3f]  ;;  %v13299_v7 = vld [vmem:[%s13264_s17 + $0x18] sm:$0x3f] }
  0x1d   : > { %v545_v1 = vld [vmem:[%s13264_s17] sm:$0x3f]  ;;  %973 = vrot.lane.b32.xlu1 %v13267_v0, %s13148_s21  ;;  %17420 = vst [vmem:[#allocation9_spill] sm:$0xff] %v13296_v6  ;;  %11877 = vmatmul.msk.f32.vlgmr.msra.gmra.mxu2 %vm593_vm1, %v13296_v6  ;;  %v13324_v12 = vld [vmem:[%s13264_s17 + $0x8] sm:$0x3f]  ;;  %s13150_s16 = smov 118  }
  0x1e   : > { %701 = vrot.lane.b32.xlu0 %v545_v1, %s13148_s21  ;;  %v13274_v2 = vld [vmem:[%s13264_s17 + $0x1] sm:$0x3f]  ;;  %11879 = vmatmul.msk.f32.vlgmr.msra.gmra.mxu3 %vm593_vm1, %v13299_v7  ;;  %v13358_v16 = vld [vmem:[%s13264_s17 + $0x30] sm:$0x3f]  ;;  %v13365_v17 = vld [vmem:[%s13264_s17 + $0x28] sm:$0x3f] }
  0x1f   : > { %1245 = vrot.lane.b32.xlu2 %v13274_v2, %s13148_s21  ;;  %v13289_v5 = vld [vmem:[%s13264_s17 + $0x60] sm:$0x3f]  ;;  %11873 = vmatmul.msk.f32.vlgmr.msra.gmra.mxu1 %vm593_vm1, %v13324_v12  ;;  %17421 = vst [vmem:[#allocation10_spill] sm:$0xff] %v13358_v16  ;;  %v13372_v18 = vld [vmem:[%s13264_s17 + $0x48] sm:$0x3f]  ;;  %vm9306_vm3 = vcmask 326656  }
  0x20   : > { %v13307_v9 = vld [vmem:[%s13264_s17 + $0x20] sm:$0x3f]  ;;  %11892 = vmatpush.msk.msra.mxu2 %vm597_vm0, %v13338_v14  ;;  %11894 = vmatpush.msk.msra.mxu3 %vm597_vm0, %v13347_v15  ;;  %v13376_v19 = vld [vmem:[%s13264_s17 + $0x68] sm:$0x3f]  ;;  %v13445_v28 = vld [vmem:[%s17208_s1 + $0x90] sm:$0x3f] }
  0x21   : > { %v13389_v20 = vld [vmem:[%s13264_s17 + $0x9] sm:$0x3f]  ;;  %11882 = vmatpush.msk.msra.mxu1 %vm597_vm0, %v13403_v22  ;;  %v13424_v25 = vld [vmem:[%s13264_s17 + $0x21] sm:$0x3f]  ;;  %11888 = vmatpush.msk.msrb.mxu0 %vm597_vm0, %v13435_v26  ;;  %v13454_v29 = vld [vmem:[%s17208_s1 + $0x98] sm:$0x3f] }
  0x22   : > { %v13440_v27 = vld [vmem:[%s17208_s1 + $0x48] sm:$0x3f]  ;;  %v13470_v31 = vld [vmem:[%s17208_s1 + $0xb8] sm:$0x3f]  ;;  %v13477_v32 = vld [vmem:[%s13264_s17 + $0x11] sm:$0x3f] }
  0x23   : > { %v13463_v30 = vld [vmem:[%s17208_s1 + $0x68] sm:$0x3f]  ;;  %v13482_v33 = vld [vmem:[%s13264_s17 + $0x70] sm:$0x3f]  ;;  %v13485_v34 = vld [vmem:[%s13264_s17 + $0x58] sm:$0x3f] }
  0x24   : > { %v13494_v35 = vld [vmem:[%s17208_s1 + $0x60] sm:$0x3f]  ;;  %v13499_v36 = vld [vmem:[%s17208_s1 + $0xb0] sm:$0x3f]  ;;  %v13510_v39 = vld [vmem:[%s13264_s17 + $0x38] sm:$0x3f] }
  0x25   : > { %1109 = vrot.lane.b32.xlu1 %v13289_v5, %s13148_s21  ;;  %11885 = vmatmul.msk.f32.vlgmr.msrb.gmra.mxu2 %vm593_vm1, %v13365_v17  ;;  %v13519_v40 = vld [vmem:[%s13264_s17 + $0x78] sm:$0x3f]  ;;  %v13528_v43 = vld [vmem:[%s17208_s1 + $0x80] sm:$0x3f]  ;;  %v13533_v44 = vld [vmem:[%s17208_s1 + $0x88] sm:$0x3f] }
  0x26   : > { %837 = vrot.lane.b32.xlu0 %v13307_v9, %s13148_s21  ;;  %11887 = vmatmul.msk.f32.vlgmr.msrb.gmra.mxu3 %vm593_vm1, %v13358_v16  ;;  %v13548_v45 = vld [vmem:[%s13264_s17 + $0x19] sm:$0x3f]  ;;  %v13557_v46 = vld [vmem:[%s13264_s17 + $0x50] sm:$0x3f]  ;;  %v13562_v47 = vld [vmem:[%s17208_s1 + $0xa0] sm:$0x3f] }
  0x27   : > { %1355 = vrot.lane.b32.xlu2 %v13324_v12, %s13148_s21  ;;  %11875 = vmatmul.msk.f32.vlgmr.msrb.gmra.mxu1 %vm593_vm1, %v545_v1  ;;  %v13567_v48 = vld [vmem:[%s17208_s1 + $0xa8] sm:$0x3f]  ;;  %v13588_v49 = vld [vmem:[%s17208_s1 + $0xc0] sm:$0x3f]  ;;  %v13790_v60 = vld [vmem:[%s13264_s17 + $0x31] sm:$0x3f] }
  0x28   : > { %11900 = vmatpush.msk.msrb.mxu2 %vm597_vm0, %v13408_v23  ;;  %11902 = vmatpush.msk.msrb.mxu3 %vm597_vm0, %v13417_v24  ;;  %v13635_v52 = vld [vmem:[%s13264_s17 + $0x29] sm:$0x3f]  ;;  %v13793_v61 = vld [vmem:[%s13264_s17 + $0x39] sm:$0x3f]  ;;  %vm11562_vm4 = vcmask 654336   ;;  %vm11692_vm5 = vcmask 1041408  }
  0x29   : > { %11890 = vmatpush.msk.msrb.mxu1 %vm597_vm0, %v13440_v27  ;;  %vm11688_vm6 = vcmask 408576   ;;  %vm11716_vm7 = vcmask 73728   ;;  %s340_s27 = sand.u32 1, %s13135_s10   ;;  %s13097_s26 = scalar_lea.hbm %s17216_s9, 2 }
  0x2a   : > { %s341_s22 = scalar_lea.vmem [#allocation6], %s340_s27  ;;  %s11731_s24 = scalar_lea.sflag [#allocation5], %s340_s27 }
  0x2b   : > { %s11741_s23 = sshll.u32 %s341_s22, 4  ;;  %s11742_s23 = int_to_ptr.vmem [resolvable:$true] %s11741_s23 }
  0x2d   : > { %1573 = vrot.lane.b32.xlu1 %v13372_v18, %s13148_s21  ;;  %11893 = vmatmul.msk.f32.vlgmr.msra.gmra.mxu2 %vm593_vm1, %v13267_v0 }
  0x2e   : > { %1464 = vrot.lane.b32.xlu0 %v13365_v17, %s13148_s21  ;;  %11895 = vmatmul.msk.f32.vlgmr.msra.gmra.mxu3 %vm593_vm1, %v13372_v18 }
  0x2f   : > { %1682 = vrot.lane.b32.xlu2 %v13376_v19, %s13148_s21  ;;  %11883 = vmatmul.msk.f32.vlgmr.msra.gmra.mxu1 %vm593_vm1, %v13307_v9 }
  0x30   : > { %11908 = vmatpush.msk.msra.mxu2 %vm597_vm0, %v13445_v28  ;;  %11910 = vmatpush.msk.msra.mxu3 %vm597_vm0, %v13454_v29 }
  0x31   : > { %11898 = vmatpush.msk.msra.mxu1 %vm597_vm0, %v13463_v30 }
  0x35   : > { %2331 = vrot.lane.b32.xlu1 %v13424_v25, %s13148_s21 }
  0x36   : > { %1791 = vrot.lane.b32.xlu0 %v13389_v20, %s13148_s21  ;;  %11903 = vmatmul.msk.f32.vlgmr.msrb.gmra.mxu3 %vm593_vm1, %v13289_v5 }
  0x37   : > { %11918 = vmatpush.msk.msrb.mxu3 %vm597_vm0, %v13470_v31  ;;  %2859 = vrot.lane.b32.xlu2 %v13635_v52, %s13148_s21 }
  0x3d   : > { %3083 = vrot.lane.b32.xlu1 %v13358_v16, %s13148_s21 }
  0x3e   : > { %2974 = vrot.lane.b32.xlu0 %v13296_v6, %s13148_s21 }
  0x3f   : > { %3192 = vrot.lane.b32.xlu2 %v13557_v46, %s13148_s21 }
  0x45   : > { %3410 = vrot.lane.b32.xlu1 %v13477_v32, %s13148_s21 }
  0x46   : > { %3301 = vrot.lane.b32.xlu0 %v13482_v33, %s13148_s21 }
  0x47   : > { %3517 = vrot.lane.b32.xlu2 %v13299_v7, %s13148_s21 }
  0x4d   : > { %3735 = vrot.lane.b32.xlu1 %v13485_v34, %s13148_s21 }
  0x4e   : > { %3626 = vrot.lane.b32.xlu0 %v13510_v39, %s13148_s21 }
  0x4f   : > { %3844 = vrot.lane.b32.xlu2 %v13519_v40, %s13148_s21 }
  0x55   : > { %4481 = vrot.lane.b32.xlu1 %v13790_v60, %s13148_s21 }
  0x56   : > { %3953 = vrot.lane.b32.xlu0 %v13548_v45, %s13148_s21 }
  0x57   : > { %5009 = vrot.lane.b32.xlu2 %v13793_v61, %s13148_s21 }
  0x79   : > { %v13618_v50 = vpop.permute.xlu2 %1245 }
  0x81   : > { %v13647_v53 = vpop.permute.xlu2 %1355 }
  0x89   : > { %v13721_v55 = vpop.permute.xlu2 %1682 }
  0x8a   : > { %17424 = vst [vmem:[#allocation13_spill] sm:$0xff] %v13721_v55 }
  0x8f   : > { %v13501_v37 = vpop.permute.xlu1 %973 }
  0x90   : > { %17422 = vst [vmem:[#allocation11_spill] sm:$0xff] %v13501_v37  ;;  %v13503_v38 = vpop.permute.xlu0 %701  ;;  %11901 = vmatmul.msk.f32.vlgmr.msrb.gmra.mxu2 %vm593_vm1, %v13501_v37 }
  0x91   : > { %11881 = vmatmul.msk.f32.vlgmr.msra.gmra.mxu0 %vm593_vm1, %v13503_v38  ;;  %11916 = vmatpush.msk.msrb.mxu2 %vm597_vm0, %v13499_v36 }
  0x92   : > { %11896 = vmatpush.msk.msra.mxu0 %vm597_vm0, %v13494_v35 }
  0x97   : > { %v13521_v41 = vpop.permute.xlu1 %1109 }
  0x98   : > { %v13523_v42 = vpop.permute.xlu0 %837  ;;  %11909 = vmatmul.msk.f32.vlgmr.msra.gmra.mxu2 %vm593_vm1, %v13519_v40  ;;  %11911 = vmatmul.msk.f32.vlgmr.msra.gmra.mxu3 %vm593_vm1, %v13521_v41 }
  0x99   : > { %11889 = vmatmul.msk.f32.vlgmr.msrb.gmra.mxu0 %vm593_vm1, %v13510_v39  ;;  %11891 = vmatmul.msk.f32.vlgmr.msrb.gmra.mxu1 %vm593_vm1, %v13523_v42 }
  0x9a   : > { %11904 = vmatpush.msk.msrb.mxu0 %vm597_vm0, %v13528_v43  ;;  %11906 = vmatpush.msk.msrb.mxu1 %vm597_vm0, %v13533_v44 }
  0x9b   : > { %11924 = vmatpush.msk.msra.mxu2 %vm597_vm0, %v13333_v13  ;;  %11926 = vmatpush.msk.msra.mxu3 %vm597_vm0, %v13281_v3 }
  0x9c   : > { %v618_v59 = vpop.f32.mrf.mxu1 }
  0x9f   : > { %v13649_v54 = vpop.permute.xlu1 %1573 }
  0xa0   : > { %11917 = vmatmul.msk.f32.vlgmr.msrb.gmra.mxu2 %vm593_vm1, %v13477_v32  ;;  %11919 = vmatmul.msk.f32.vlgmr.msrb.gmra.mxu3 %vm593_vm1, %v13548_v45  ;;  %v13624_v51 = vpop.permute.xlu0 %1464  ;;  %17423 = vst [vmem:[#allocation12_spill] sm:$0xff] %v13649_v54  ;;  %v670_v58 = vpop.f32.mrf.mxu2 }
  0xa1   : > { %11897 = vmatmul.msk.f32.vlgmr.msra.gmra.mxu0 %vm593_vm1, %v13557_v46  ;;  %11899 = vmatmul.msk.f32.vlgmr.msra.gmra.mxu1 %vm593_vm1, %v13485_v34  ;;  %v697_v57 = vpop.f32.mrf.mxu3 }
  0xa2   : > { %11912 = vmatpush.msk.msra.mxu0 %vm597_vm0, %v13562_v47  ;;  %11914 = vmatpush.msk.msra.mxu1 %vm597_vm0, %v13567_v48 }
  0xa3   : > { %11932 = vmatpush.msk.msrb.mxu2 %vm597_vm0, %v13403_v22  ;;  %11934 = vmatpush.msk.msrb.mxu3 %vm597_vm0, %v13316_v10 }
  0xa8   : > { %11925 = vmatmul.msk.f32.vlgmr.msra.gmra.mxu2 %vm593_vm1, %v13324_v12  ;;  %11927 = vmatmul.msk.f32.vlgmr.msra.gmra.mxu3 %vm593_vm1, %v13299_v7  ;;  %v13739_v56 = vpop.permute.xlu0 %1791  ;;  %v779_v63 = vpop.f32.mrf.mxu2 }
  0xa9   : > { %11905 = vmatmul.msk.f32.vlgmr.msrb.gmra.mxu0 %vm593_vm1, %v13376_v19  ;;  %11907 = vmatmul.msk.f32.vlgmr.msrb.gmra.mxu1 %vm593_vm1, %v13482_v33  ;;  %17425 = vst [vmem:[#allocation14_spill] sm:$0xff] %v13739_v56  ;;  %v806_v62 = vpop.f32.mrf.mxu3 }
  0xaa   : > { %11920 = vmatpush.msk.msrb.mxu0 %vm597_vm0, %v13588_v49  ;;  %11922 = vmatpush.msk.msrb.mxu1 %vm597_vm0, %v13304_v8 }
  0xab   : > { %11940 = vmatpush.msk.msra.mxu2 %vm597_vm0, %v13440_v27  ;;  %11942 = vmatpush.msk.msra.mxu3 %vm597_vm0, %v13338_v14 }
  0xb0   : > { %11933 = vmatmul.msk.f32.vlgmr.msrb.gmra.mxu2 %vm593_vm1, %v13365_v17  ;;  %11935 = vmatmul.msk.f32.vlgmr.msrb.gmra.mxu3 %vm593_vm1, %v13358_v16 }
  0xb1   : > { %11913 = vmatmul.msk.f32.vlgmr.msra.gmra.mxu0 %vm593_vm1, %v13274_v2  ;;  %11915 = vmatmul.msk.f32.vlgmr.msra.gmra.mxu1 %vm593_vm1, %v13389_v20  ;;  %v915_v12 = vpop.f32.mrf.mxu3 }
  0xb2   : > { %11928 = vmatpush.msk.msra.mxu0 %vm597_vm0, %v13286_v4  ;;  %11930 = vmatpush.msk.msra.mxu1 %vm597_vm0, %v13398_v21 }
  0xb3   : > { %11948 = vmatpush.msk.msrb.mxu2 %vm597_vm0, %v13463_v30  ;;  %11950 = vmatpush.msk.msrb.mxu3 %vm597_vm0, %v13408_v23 }
  0xb8   : > { %11941 = vmatmul.msk.f32.vlgmr.msra.gmra.mxu2 %vm593_vm1, %v13624_v51  ;;  %11943 = vmatmul.msk.f32.vlgmr.msra.gmra.mxu3 %vm593_vm1, %v13372_v18 }
  0xb9   : > { %11921 = vmatmul.msk.f32.vlgmr.msrb.gmra.mxu0 %vm593_vm1, %v13618_v50  ;;  %11923 = vmatmul.msk.f32.vlgmr.msrb.gmra.mxu1 %vm593_vm1, %v13296_v6  ;;  %v1024_v6 = vpop.f32.mrf.mxu3 }
  0xba   : > { %11936 = vmatpush.msk.msrb.mxu0 %vm597_vm0, %v13321_v11  ;;  %11938 = vmatpush.msk.msrb.mxu1 %vm597_vm0, %v13435_v26 }
  0xbb   : > { %11956 = vmatpush.msk.msra.mxu2 %vm597_vm0, %v13533_v44  ;;  %11958 = vmatpush.msk.msra.mxu3 %vm597_vm0, %v13445_v28 }
  0xc0   : > { %11949 = vmatmul.msk.f32.vlgmr.msrb.gmra.mxu2 %vm593_vm1, %v13501_v37  ;;  %11951 = vmatmul.msk.f32.vlgmr.msrb.gmra.mxu3 %vm593_vm1, %v13649_v54 }
  0xc1   : > { %11929 = vmatmul.msk.f32.vlgmr.msra.gmra.mxu0 %vm593_vm1, %v13503_v38  ;;  %11931 = vmatmul.msk.f32.vlgmr.msra.gmra.mxu1 %vm593_vm1, %v13647_v53 }
  0xc2   : > { %11944 = vmatpush.msk.msra.mxu0 %vm597_vm0, %v13347_v15  ;;  %11946 = vmatpush.msk.msra.mxu1 %vm597_vm0, %v13494_v35 }
  0xc3   : > { %11964 = vmatpush.msk.msrb.mxu2 %vm597_vm0, %v13567_v48  ;;  %11966 = vmatpush.msk.msrb.mxu3 %vm597_vm0, %v13499_v36 }
  0xc8   : > { %11957 = vmatmul.msk.f32.vlgmr.msra.gmra.mxu2 %vm593_vm1, %v13519_v40  ;;  %11959 = vmatmul.msk.f32.vlgmr.msra.gmra.mxu3 %vm593_vm1, %v13521_v41 }
  0xc9   : > { %11937 = vmatmul.msk.f32.vlgmr.msrb.gmra.mxu0 %vm593_vm1, %v13510_v39  ;;  %11939 = vmatmul.msk.f32.vlgmr.msrb.gmra.mxu1 %vm593_vm1, %v13523_v42 }
  0xca   : > { %11952 = vmatpush.msk.msrb.mxu0 %vm597_vm0, %v13417_v24  ;;  %11954 = vmatpush.msk.msrb.mxu1 %vm597_vm0, %v13528_v43 }
  0xcb   : > { %11972 = vmatpush.msk.msra.mxu2 %vm597_vm0, %v13304_v8  ;;  %11974 = vmatpush.msk.msra.mxu3 %vm597_vm0, %v13333_v13 }
  0xd0   : > { %11965 = vmatmul.msk.f32.vlgmr.msrb.gmra.mxu2 %vm593_vm1, %v13477_v32  ;;  %11967 = vmatmul.msk.f32.vlgmr.msrb.gmra.mxu3 %vm593_vm1, %v13548_v45 }
  0xd1   : > { %11945 = vmatmul.msk.f32.vlgmr.msra.gmra.mxu0 %vm593_vm1, %v13557_v46  ;;  %11947 = vmatmul.msk.f32.vlgmr.msra.gmra.mxu1 %vm593_vm1, %v13485_v34 }
  0xd2   : > { %11960 = vmatpush.msk.msra.mxu0 %vm597_vm0, %v13454_v29  ;;  %11962 = vmatpush.msk.msra.mxu1 %vm597_vm0, %v13562_v47 }
  0xd3   : > { %11980 = vmatpush.msk.msrb.mxu2 %vm597_vm0, %v13398_v21  ;;  %11982 = vmatpush.msk.msrb.mxu3 %vm597_vm0, %v13403_v22 }
  0xd8   : > { %11973 = vmatmul.msk.f32.vlgmr.msra.gmra.mxu2 %vm593_vm1, %v13365_v17  ;;  %11975 = vmatmul.msk.f32.vlgmr.msra.gmra.mxu3 %vm593_vm1, %v13307_v9 }
  0xd9   : > { %11953 = vmatmul.msk.f32.vlgmr.msrb.gmra.mxu0 %vm593_vm1, %v13376_v19  ;;  %11955 = vmatmul.msk.f32.vlgmr.msrb.gmra.mxu1 %vm593_vm1, %v13482_v33 }
  0xda   : > { %11968 = vmatpush.msk.msrb.mxu0 %vm597_vm0, %v13470_v31  ;;  %11970 = vmatpush.msk.msrb.mxu1 %vm597_vm0, %v13588_v49 }
  0xdb   : > { %11988 = vmatpush.msk.msra.mxu2 %vm597_vm0, %v13435_v26  ;;  %11990 = vmatpush.msk.msra.mxu3 %vm597_vm0, %v13440_v27 }
  0xe0   : > { %11981 = vmatmul.msk.f32.vlgmr.msrb.gmra.mxu2 %vm593_vm1, %v13523_v42  ;;  %11983 = vmatmul.msk.f32.vlgmr.msrb.gmra.mxu3 %vm593_vm1, %v13267_v0  ;;  %v644_v0 = vpop.f32.mrf.mxu1 }
  0xe1   : > { %11961 = vmatmul.msk.f32.vlgmr.msra.gmra.mxu0 %vm593_vm1, %v13721_v55  ;;  %11963 = vmatmul.msk.f32.vlgmr.msra.gmra.mxu1 %vm593_vm1, %v13389_v20  ;;  %v645_v1 = vadd.f32 %v644_v0, %v618_v59 }
  0xe2   : > { %11976 = vmatpush.msk.msra.mxu0 %vm597_vm0, %v13281_v3  ;;  %11978 = vmatpush.msk.msra.mxu1 %vm597_vm0, %v13286_v4 }
  0xe3   : > { %11996 = vmatpush.msk.msrb.mxu2 %vm597_vm0, %v13494_v35  ;;  %11998 = vmatpush.msk.msrb.mxu3 %vm597_vm0, %v13463_v30  ;;  %v673_v9 = vadd.f32 %v670_v58, %v645_v1 }
  0xe8   : > { %11989 = vmatmul.msk.f32.vlgmr.msra.gmra.mxu2 %vm593_vm1, %v13485_v34  ;;  %11991 = vmatmul.msk.f32.vlgmr.msra.gmra.mxu3 %vm593_vm1, %v13501_v37  ;;  %v752_v58 = vpop.f32.mrf.mxu1 }
  0xe9   : > { %11969 = vmatmul.msk.f32.vlgmr.msrb.gmra.mxu0 %vm593_vm1, %v13618_v50  ;;  %11971 = vmatmul.msk.f32.vlgmr.msrb.gmra.mxu1 %vm593_vm1, %v13739_v56 }
  0xea   : > { %11984 = vmatpush.msk.msrb.mxu0 %vm597_vm0, %v13316_v10  ;;  %11986 = vmatpush.msk.msrb.mxu1 %vm597_vm0, %v13321_v11 }
  0xeb   : > { %12004 = vmatpush.msk.msra.mxu2 %vm597_vm0, %v13528_v43  ;;  %12006 = vmatpush.msk.msra.mxu3 %vm597_vm0, %v13533_v44 }
  0xf0   : > { %11997 = vmatmul.msk.f32.vlgmr.msrb.gmra.mxu2 %vm593_vm1, %v13482_v33  ;;  %11999 = vmatmul.msk.f32.vlgmr.msrb.gmra.mxu3 %vm593_vm1, %v13519_v40 }
  0xf1   : > { %11977 = vmatmul.msk.f32.vlgmr.msra.gmra.mxu0 %vm593_vm1, %v13358_v16  ;;  %11979 = vmatmul.msk.f32.vlgmr.msra.gmra.mxu1 %vm593_vm1, %v13510_v39 }
  0xf2   : > { %11992 = vmatpush.msk.msra.mxu0 %vm597_vm0, %v13338_v14  ;;  %11994 = vmatpush.msk.msra.mxu1 %vm597_vm0, %v13347_v15 }
  0xf3   : > { %12012 = vmatpush.msk.msrb.mxu2 %vm597_vm0, %v13562_v47  ;;  %12014 = vmatpush.msk.msrb.mxu3 %vm597_vm0, %v13567_v48 }
  0xf8   : > { %12005 = vmatmul.msk.f32.vlgmr.msra.gmra.mxu2 %vm593_vm1, %v13389_v20  ;;  %12007 = vmatmul.msk.f32.vlgmr.msra.gmra.mxu3 %vm593_vm1, %v13477_v32 }
  0xf9   : > { %11985 = vmatmul.msk.f32.vlgmr.msrb.gmra.mxu0 %vm593_vm1, %v13372_v18  ;;  %11987 = vmatmul.msk.f32.vlgmr.msrb.gmra.mxu1 %vm593_vm1, %v13557_v46 }
  0xfa   : > { %12000 = vmatpush.msk.msrb.mxu0 %vm597_vm0, %v13408_v23  ;;  %12002 = vmatpush.msk.msrb.mxu1 %vm597_vm0, %v13417_v24 }
  0xfb   : > { %12020 = vmatpush.msk.msra.mxu2 %vm597_vm0, %v13588_v49  ;;  %12022 = vmatpush.msk.msra.mxu3 %vm597_vm0, %v13304_v8 }
 0x100   : > { %12013 = vmatmul.msk.f32.vlgmr.msrb.gmra.mxu2 %vm593_vm1, %v13424_v25  ;;  %12015 = vmatmul.msk.f32.vlgmr.msrb.gmra.mxu3 %vm593_vm1, %v13635_v52  ;;  %v888_v25 = vpop.f32.mrf.mxu2 }
 0x101   : > { %11993 = vmatmul.msk.f32.vlgmr.msra.gmra.mxu0 %vm593_vm1, %v13289_v5  ;;  %11995 = vmatmul.msk.f32.vlgmr.msra.gmra.mxu1 %vm593_vm1, %v13376_v19  ;;  %v13815_v5 = vpop.permute.xlu1 %2331 }
 0x102   : > { %12008 = vmatpush.msk.msra.mxu0 %vm597_vm0, %v13445_v28  ;;  %12010 = vmatpush.msk.msra.mxu1 %vm597_vm0, %v13454_v29  ;;  %17426 = vst [vmem:[#allocation15_spill] sm:$0xff] %v13815_v5 }
 0x103   : > { %12028 = vmatpush.msk.msrb.mxu2 %vm597_vm0, %v13286_v4  ;;  %12030 = vmatpush.msk.msrb.mxu3 %vm597_vm0, %v13398_v21 }
 0x108   : > { %12021 = vmatmul.msk.f32.vlgmr.msra.gmra.mxu2 %vm593_vm1, %v13815_v5  ;;  %12023 = vmatmul.msk.f32.vlgmr.msra.gmra.mxu3 %vm593_vm1, %v13358_v16 }
 0x109   : > { %12001 = vmatmul.msk.f32.vlgmr.msrb.gmra.mxu0 %vm593_vm1, %v13521_v41  ;;  %12003 = vmatmul.msk.f32.vlgmr.msrb.gmra.mxu1 %vm593_vm1, %v13274_v2  ;;  %v700_v2 = vadd.f32 %v697_v57, %v673_v9 }
 0x10a   : > { %12016 = vmatpush.msk.msrb.mxu0 %vm597_vm0, %v13499_v36  ;;  %12018 = vmatpush.msk.msrb.mxu1 %vm597_vm0, %v13470_v31 }
 0x10b   : > { %12036 = vmatpush.msk.msra.mxu2 %vm597_vm0, %v13321_v11  ;;  %12038 = vmatpush.msk.msra.mxu3 %vm597_vm0, %v13435_v26 }
 0x10e   : > { %v725_v59 = vpop.f32.mrf.mxu0 }
 0x10f   : > { %v728_v0 = vadd.f32 %v725_v59, %v700_v2 }
 0x110   : > { %12029 = vmatmul.msk.f32.vlgmr.msrb.gmra.mxu2 %vm593_vm1, %v13523_v42  ;;  %12031 = vmatmul.msk.f32.vlgmr.msrb.gmra.mxu3 %vm593_vm1, %v13624_v51 }
 0x111   : > { %v755_v1 = vadd.f32 %v752_v58, %v728_v0  ;;  %12009 = vmatmul.msk.f32.vlgmr.msra.gmra.mxu0 %vm593_vm1, %v13548_v45  ;;  %12011 = vmatmul.msk.f32.vlgmr.msra.gmra.mxu1 %vm593_vm1, %v13618_v50 }
 0x112   : > { %12024 = vmatpush.msk.msra.mxu0 %vm597_vm0, %v13333_v13  ;;  %12026 = vmatpush.msk.msra.mxu1 %vm597_vm0, %v13281_v3 }
 0x113   : > { %v782_v16 = vadd.f32 %v779_v63, %v755_v1  ;;  %v997_v57 = vpop.f32.mrf.mxu2  ;;  %12044 = vmatpush.msk.msrb.mxu2 %vm597_vm0, %v13347_v15  ;;  %12046 = vmatpush.msk.msrb.mxu3 %vm597_vm0, %v13494_v35 }
 0x115   : > { %v809_v9 = vadd.f32 %v806_v62, %v782_v16 }
 0x116   : > { %v833_v58 = vpop.f32.mrf.mxu0  ;;  %v861_v2 = vpop.f32.mrf.mxu1 }
 0x117   : > { %v836_v59 = vadd.f32 %v833_v58, %v809_v9 }
 0x118   : > { %12037 = vmatmul.msk.f32.vlgmr.msra.gmra.mxu2 %vm593_vm1, %v13485_v34  ;;  %12039 = vmatmul.msk.f32.vlgmr.msra.gmra.mxu3 %vm593_vm1, %v13501_v37 }
 0x119   : > { %v864_v0 = vadd.f32 %v861_v2, %v836_v59  ;;  %12017 = vmatmul.msk.f32.vlgmr.msrb.gmra.mxu0 %vm593_vm1, %v13790_v60  ;;  %12019 = vmatmul.msk.f32.vlgmr.msrb.gmra.mxu1 %vm593_vm1, %v13793_v61 }
 0x11a   : > { %12032 = vmatpush.msk.msrb.mxu0 %vm597_vm0, %v13403_v22  ;;  %12034 = vmatpush.msk.msrb.mxu1 %vm597_vm0, %v13316_v10 }
 0x11b   : > { %v891_v63 = vadd.f32 %v888_v25, %v864_v0  ;;  %12052 = vmatpush.msk.msra.mxu2 %vm597_vm0, %v13417_v24  ;;  %12054 = vmatpush.msk.msra.mxu3 %vm597_vm0, %v13528_v43  ;;  %v1105_v16 = vpop.f32.mrf.mxu2  ;;  %v1133_v62 = vpop.f32.mrf.mxu3 }
 0x11d   : > { %v918_v1 = vadd.f32 %v915_v12, %v891_v63 }
 0x11e   : > { %v942_v9 = vpop.f32.mrf.mxu0  ;;  %v969_v58 = vpop.f32.mrf.mxu1 }
 0x11f   : > { %v945_v2 = vadd.f32 %v942_v9, %v918_v1 }
 0x120   : > { %12045 = vmatmul.msk.f32.vlgmr.msrb.gmra.mxu2 %vm593_vm1, %v13482_v33  ;;  %12047 = vmatmul.msk.f32.vlgmr.msrb.gmra.mxu3 %vm593_vm1, %v13519_v40 }
 0x121   : > { %v972_v59 = vadd.f32 %v969_v58, %v945_v2  ;;  %12025 = vmatmul.msk.f32.vlgmr.msra.gmra.mxu0 %vm593_vm1, %v13365_v17  ;;  %12027 = vmatmul.msk.f32.vlgmr.msra.gmra.mxu1 %vm593_vm1, %v13510_v39 }
 0x122   : > { %12040 = vmatpush.msk.msra.mxu0 %vm597_vm0, %v13440_v27  ;;  %12042 = vmatpush.msk.msra.mxu1 %vm597_vm0, %v13338_v14 }
 0x123   : > { %v1000_v25 = vadd.f32 %v997_v57, %v972_v59  ;;  %12060 = vmatpush.msk.msrb.mxu2 %vm597_vm0, %v13454_v29  ;;  %12062 = vmatpush.msk.msrb.mxu3 %vm597_vm0, %v13562_v47  ;;  %v1214_v17 = vpop.f32.mrf.mxu2  ;;  %v1241_v12 = vpop.f32.mrf.mxu3 }
 0x125   : > { %v1027_v0 = vadd.f32 %v1024_v6, %v1000_v25 }
 0x126   : > { %v1051_v63 = vpop.f32.mrf.mxu0  ;;  %v1078_v1 = vpop.f32.mrf.mxu1 }
 0x127   : > { %v1054_v9 = vadd.f32 %v1051_v63, %v1027_v0 }
 0x128   : > { %12053 = vmatmul.msk.f32.vlgmr.msra.gmra.mxu2 %vm593_vm1, %v13389_v20  ;;  %12055 = vmatmul.msk.f32.vlgmr.msra.gmra.mxu3 %vm593_vm1, %v13477_v32 }
 0x129   : > { %v1081_v58 = vadd.f32 %v1078_v1, %v1054_v9  ;;  %12033 = vmatmul.msk.f32.vlgmr.msrb.gmra.mxu0 %vm593_vm1, %v13372_v18  ;;  %12035 = vmatmul.msk.f32.vlgmr.msrb.gmra.mxu1 %vm593_vm1, %v13557_v46  ;;  %v13917_v9 = vpop.permute.xlu2 %2859 }
 0x12a   : > { %12048 = vmatpush.msk.msrb.mxu0 %vm597_vm0, %v13463_v30  ;;  %12050 = vmatpush.msk.msrb.mxu1 %vm597_vm0, %v13408_v23  ;;  %17427 = vst [vmem:[#allocation16_spill] sm:$0xff] %v13917_v9 }
 0x12b   : > { %v1108_v57 = vadd.f32 %v1105_v16, %v1081_v58  ;;  %12068 = vmatpush.msk.msra.mxu2 %vm597_vm0, %v13470_v31  ;;  %12070 = vmatpush.msk.msra.mxu3 %vm597_vm0, %v13588_v49  ;;  %v1310_v6 = vpop.f32.mrf.mxu2  ;;  %v1330_v18 = vpop.f32.mrf.mxu3 }
 0x12d   : > { %v1136_v2 = vadd.f32 %v1133_v62, %v1108_v57 }
 0x12e   : > { %v1160_v20 = vpop.f32.mrf.mxu0  ;;  %v1187_v59 = vpop.f32.mrf.mxu1 }
 0x12f   : > { %v1163_v25 = vadd.f32 %v1160_v20, %v1136_v2 }
 0x130   : > { %12061 = vmatmul.msk.f32.vlgmr.msrb.gmra.mxu2 %vm593_vm1, %v13739_v56  ;;  %12063 = vmatmul.msk.f32.vlgmr.msrb.gmra.mxu3 %vm593_vm1, %v13635_v52 }
 0x131   : > { %v1190_v0 = vadd.f32 %v1187_v59, %v1163_v25  ;;  %12041 = vmatmul.msk.f32.vlgmr.msra.gmra.mxu0 %vm593_vm1, %v13649_v54  ;;  %12043 = vmatmul.msk.f32.vlgmr.msra.gmra.mxu1 %vm593_vm1, %v13376_v19 }
 0x132   : > { %12056 = vmatpush.msk.msra.mxu0 %vm597_vm0, %v13533_v44  ;;  %12058 = vmatpush.msk.msra.mxu1 %vm597_vm0, %v13445_v28 }
 0x133   : > { %v1217_v16 = vadd.f32 %v1214_v17, %v1190_v0  ;;  %12076 = vmatpush.msk.msrb.mxu2 %vm597_vm0, %v13281_v3  ;;  %12078 = vmatpush.msk.msrb.mxu3 %vm597_vm0, %v13286_v4  ;;  %v1397_v19 = vpop.f32.mrf.mxu2  ;;  %v1418_v62 = vpop.f32.mrf.mxu3 }
 0x135   : > { %v13913_v63 = vadd.f32 %v1241_v12, %v1217_v16 }
 0x136   : > { %v13915_v1 = vpop.f32.mrf.mxu0  ;;  %v1290_v52 = vpop.f32.mrf.mxu1 }
 0x137   : > { %v1311_v17 = vadd.f32 %v1310_v6, %v1290_v52 }
 0x138   : > { %12069 = vmatmul.msk.f32.vlgmr.msra.gmra.mxu2 %vm593_vm1, %v13815_v5  ;;  %12071 = vmatmul.msk.f32.vlgmr.msra.gmra.mxu3 %vm593_vm1, %v13917_v9 }
 0x139   : > { %12049 = vmatmul.msk.f32.vlgmr.msrb.gmra.mxu0 %vm593_vm1, %v13521_v41  ;;  %12051 = vmatmul.msk.f32.vlgmr.msrb.gmra.mxu1 %vm593_vm1, %v13721_v55  ;;  %v1333_v58 = vadd.f32 %v1330_v18, %v1311_v17 }
 0x13a   : > { %12064 = vmatpush.msk.msrb.mxu0 %vm597_vm0, %v13567_v48  ;;  %12066 = vmatpush.msk.msrb.mxu1 %vm597_vm0, %v13499_v36 }
 0x13b   : > { %12084 = vmatpush.msk.msra.mxu2 %vm597_vm0, %v13316_v10  ;;  %12086 = vmatpush.msk.msra.mxu3 %vm597_vm0, %v13321_v11  ;;  %v1485_v12 = vpop.f32.mrf.mxu2  ;;  %v1506_v57 = vpop.f32.mrf.mxu3 }
 0x13e   : > { %v1351_v6 = vpop.f32.mrf.mxu0  ;;  %v1376_v18 = vpop.f32.mrf.mxu1 }
 0x13f   : > { %v1354_v2 = vadd.f32 %v1351_v6, %v1333_v58 }
 0x140   : > { %12077 = vmatmul.msk.f32.vlgmr.msrb.gmra.mxu2 %vm593_vm1, %v13503_v38  ;;  %12079 = vmatmul.msk.f32.vlgmr.msrb.gmra.mxu3 %vm593_vm1, %v13647_v53 }
 0x141   : > { %v1379_v20 = vadd.f32 %v1376_v18, %v1354_v2  ;;  %12057 = vmatmul.msk.f32.vlgmr.msra.gmra.mxu0 %vm593_vm1, %v13548_v45  ;;  %12059 = vmatmul.msk.f32.vlgmr.msra.gmra.mxu1 %vm593_vm1, %v13618_v50 }
 0x142   : > { %12072 = vmatpush.msk.msra.mxu0 %vm597_vm0, %v13304_v8  ;;  %12074 = vmatpush.msk.msra.mxu1 %vm597_vm0, %v13333_v13 }
 0x143   : > { %v1400_v59 = vadd.f32 %v1397_v19, %v1379_v20  ;;  %12092 = vmatpush.msk.msrb.mxu2 %vm597_vm0, %v13338_v14  ;;  %12094 = vmatpush.msk.msrb.mxu3 %vm597_vm0, %v13347_v15  ;;  %v1569_v25 = vpop.f32.mrf.mxu2  ;;  %v1594_v0 = vpop.f32.mrf.mxu3 }
 0x145   : > { %v1421_v16 = vadd.f32 %v1418_v62, %v1400_v59 }
 0x146   : > { %v1439_v52 = vpop.f32.mrf.mxu0  ;;  %v1460_v17 = vpop.f32.mrf.mxu1 }
 0x147   : > { %v1442_v58 = vadd.f32 %v1439_v52, %v1421_v16 }
 0x148   : > { %12085 = vmatmul.msk.f32.vlgmr.msra.gmra.mxu2 %vm593_vm1, %v13510_v39  ;;  %12087 = vmatmul.msk.f32.vlgmr.msra.gmra.mxu3 %vm593_vm1, %v13523_v42 }
 0x149   : > { %v1463_v6 = vadd.f32 %v1460_v17, %v1442_v58  ;;  %12065 = vmatmul.msk.f32.vlgmr.msrb.gmra.mxu0 %vm593_vm1, %v13790_v60  ;;  %12067 = vmatmul.msk.f32.vlgmr.msrb.gmra.mxu1 %vm593_vm1, %v13793_v61 }
 0x14a   : > { %12080 = vmatpush.msk.msrb.mxu0 %vm597_vm0, %v13398_v21  ;;  %12082 = vmatpush.msk.msrb.mxu1 %vm597_vm0, %v13403_v22 }
 0x14b   : > { %v1488_v19 = vadd.f32 %v1485_v12, %v1463_v6  ;;  %12100 = vmatpush.msk.msra.mxu2 %vm597_vm0, %v13408_v23  ;;  %12102 = vmatpush.msk.msra.mxu3 %vm597_vm0, %v13417_v24  ;;  %v1657_v62 = vpop.f32.mrf.mxu2  ;;  %v1678_v18 = vpop.f32.mrf.mxu3  ;;  %v17428_v12 = vld [vmem:[#allocation9_spill] sm:$0xff] }
 0x14d   : > { %v1509_v2 = vadd.f32 %v1506_v57, %v1488_v19  ;;  %v13979_v57 = vpop.permute.xlu0 %2974 }
 0x14e   : > { %v1527_v20 = vpop.f32.mrf.mxu0  ;;  %v1548_v59 = vpop.f32.mrf.mxu1 }
 0x14f   : > { %v1530_v16 = vadd.f32 %v1527_v20, %v1509_v2 }
 0x150   : > { %12093 = vmatmul.msk.f32.vlgmr.msrb.gmra.mxu2 %vm593_vm1, %v13557_v46  ;;  %12095 = vmatmul.msk.f32.vlgmr.msrb.gmra.mxu3 %vm593_vm1, %v13485_v34 }
 0x151   : > { %v1551_v52 = vadd.f32 %v1548_v59, %v1530_v16  ;;  %12073 = vmatmul.msk.f32.vlgmr.msra.gmra.mxu0 %vm593_vm1, %v13299_v7  ;;  %12075 = vmatmul.msk.f32.vlgmr.msra.gmra.mxu1 %vm593_vm1, %v17428_v12  ;;  %v13985_v59 = vpop.permute.xlu2 %3192 }
 0x152   : > { %12088 = vmatpush.msk.msra.mxu0 %vm597_vm0, %v13435_v26  ;;  %12090 = vmatpush.msk.msra.mxu1 %vm597_vm0, %v13440_v27  ;;  %17429 = vst [vmem:[#allocation9_spill] sm:$0xff] %v13985_v59 }
 0x153   : > { %v1572_v17 = vadd.f32 %v1569_v25, %v1551_v52  ;;  %12108 = vmatpush.msk.msrb.mxu2 %vm597_vm0, %v13445_v28  ;;  %12110 = vmatpush.msk.msrb.mxu3 %vm597_vm0, %v13454_v29  ;;  %v1745_v58 = vpop.f32.mrf.mxu2  ;;  %v1766_v6 = vpop.f32.mrf.mxu3  ;;  %v17430_v52 = vld [vmem:[#allocation10_spill] sm:$0xff] }
 0x155   : > { %v1597_v19 = vadd.f32 %v1594_v0, %v1572_v17  ;;  %v13999_v0 = vpop.permute.xlu1 %3083 }
 0x156   : > { %v1615_v2 = vpop.f32.mrf.mxu0  ;;  %v1636_v20 = vpop.f32.mrf.mxu1 }
 0x157   : > { %v1618_v25 = vadd.f32 %v1615_v2, %v1597_v19 }
 0x158   : > { %12101 = vmatmul.msk.f32.vlgmr.msra.gmra.mxu2 %vm593_vm1, %v13985_v59  ;;  %12103 = vmatmul.msk.f32.vlgmr.msra.gmra.mxu3 %vm593_vm1, %v13482_v33 }
 0x159   : > { %v1639_v16 = vadd.f32 %v1636_v20, %v1618_v25  ;;  %12081 = vmatmul.msk.f32.vlgmr.msrb.gmra.mxu0 %vm593_vm1, %v13979_v57  ;;  %12083 = vmatmul.msk.f32.vlgmr.msrb.gmra.mxu1 %vm593_vm1, %v17430_v52  ;;  %v14005_v25 = vpop.permute.xlu0 %3301 }
 0x15a   : > { %12096 = vmatpush.msk.msrb.mxu0 %vm597_vm0, %v13494_v35  ;;  %12098 = vmatpush.msk.msrb.mxu1 %vm597_vm0, %v13463_v30  ;;  %17431 = vst [vmem:[#allocation10_spill] sm:$0xff] %v14005_v25 }
 0x15b   : > { %v1660_v12 = vadd.f32 %v1657_v62, %v1639_v16  ;;  %12116 = vmatpush.msk.msra.mxu2 %vm597_vm0, %v13499_v36  ;;  %12118 = vmatpush.msk.msra.mxu3 %vm597_vm0, %v13470_v31  ;;  %v1834_v17 = vpop.f32.mrf.mxu2  ;;  %v1854_v19 = vpop.f32.mrf.mxu3 }
 0x15d   : > { %v1681_v2 = vadd.f32 %v1678_v18, %v1660_v12 }
 0x15e   : > { %v1703_v20 = vpop.f32.mrf.mxu0  ;;  %v1724_v33 = vpop.f32.mrf.mxu1 }
 0x15f   : > { %v1706_v62 = vadd.f32 %v1703_v20, %v1681_v2 }
 0x160   : > { %12109 = vmatmul.msk.f32.vlgmr.msrb.gmra.mxu2 %vm593_vm1, %v13721_v55  ;;  %12111 = vmatmul.msk.f32.vlgmr.msrb.gmra.mxu3 %vm593_vm1, %v14005_v25 }
 0x161   : > { %v1727_v16 = vadd.f32 %v1724_v33, %v1706_v62  ;;  %12089 = vmatmul.msk.f32.vlgmr.msra.gmra.mxu0 %vm593_vm1, %v13624_v51  ;;  %12091 = vmatmul.msk.f32.vlgmr.msra.gmra.mxu1 %vm593_vm1, %v13999_v0 }
 0x162   : > { %12104 = vmatpush.msk.msra.mxu0 %vm597_vm0, %v13528_v43  ;;  %12106 = vmatpush.msk.msra.mxu1 %vm597_vm0, %v13533_v44 }
 0x163   : > { %v1748_v9 = vadd.f32 %v1745_v58, %v1727_v16  ;;  %12124 = vmatpush.msk.msrb.mxu2 %vm597_vm0, %v13333_v13  ;;  %12126 = vmatpush.msk.msrb.mxu3 %vm597_vm0, %v13281_v3  ;;  %v1916_v18 = vpop.f32.mrf.mxu2  ;;  %v1937_v12 = vpop.f32.mrf.mxu3  ;;  %v14025_v58 = vadd.f32 %v13915_v1, %v13913_v63 }
 0x165   : > { %v1769_v2 = vadd.f32 %v1766_v6, %v1748_v9 }
 0x166   : > { %v1787_v20 = vpop.f32.mrf.mxu0  ;;  %v1812_v33 = vpop.f32.mrf.mxu1 }
 0x167   : > { %v1790_v62 = vadd.f32 %v1787_v20, %v1769_v2  ;;  %v1855_v2 = vadd.f32 %v1854_v19, %v1834_v17 }
 0x168   : > { %12117 = vmatmul.msk.f32.vlgmr.msra.gmra.mxu2 %vm593_vm1, %v13618_v50  ;;  %12119 = vmatmul.msk.f32.vlgmr.msra.gmra.mxu3 %vm593_vm1, %v13739_v56 }
 0x169   : > { %v14027_v16 = vadd.f32 %v1812_v33, %v1790_v62  ;;  %12097 = vmatmul.msk.f32.vlgmr.msrb.gmra.mxu0 %vm593_vm1, %v13501_v37  ;;  %12099 = vmatmul.msk.f32.vlgmr.msrb.gmra.mxu1 %vm593_vm1, %v13649_v54 }
 0x16a   : > { %12112 = vmatpush.msk.msrb.mxu0 %vm597_vm0, %v13562_v47  ;;  %12114 = vmatpush.msk.msrb.mxu1 %vm597_vm0, %v13567_v48 }
 0x16b   : > { %v1816_v3 = vmax.f32 %v14025_v58, %v14027_v16  ;;  %12132 = vmatpush.msk.msra.mxu2 %vm597_vm0, %v13403_v22  ;;  %12134 = vmatpush.msk.msra.mxu3 %vm597_vm0, %v13316_v10  ;;  %v2000_v63 = vpop.f32.mrf.mxu2  ;;  %v2021_v1 = vpop.f32.mrf.mxu3  ;;  %v14399_v58 = vld [vmem:[%s13264_s17 + $0x11] sm:$0x3f] }
 0x16e   : > { %v1874_v9 = vpop.f32.mrf.mxu0  ;;  %v1895_v6 = vpop.f32.mrf.mxu1 }
 0x16f   : > { %v1877_v20 = vadd.f32 %v1874_v9, %v1855_v2  ;;  %v14089_v2 = vpop.permute.xlu0 %3626 }
 0x170   : > { %12125 = vmatmul.msk.f32.vlgmr.msrb.gmra.mxu2 %vm593_vm1, %v13299_v7  ;;  %12127 = vmatmul.msk.f32.vlgmr.msrb.gmra.mxu3 %vm593_vm1, %v13647_v53 }
 0x171   : > { %12105 = vmatmul.msk.f32.vlgmr.msra.gmra.mxu0 %vm593_vm1, %v13519_v40  ;;  %12107 = vmatmul.msk.f32.vlgmr.msra.gmra.mxu1 %vm593_vm1, %v13521_v41  ;;  %v1898_v10 = vadd.f32 %v1895_v6, %v1877_v20 }
 0x172   : > { %12120 = vmatpush.msk.msra.mxu0 %vm597_vm0, %v13588_v49  ;;  %12122 = vmatpush.msk.msra.mxu1 %vm597_vm0, %v13304_v8 }
 0x173   : > { %12140 = vmatpush.msk.msrb.mxu2 %vm597_vm0, %v13440_v27  ;;  %12142 = vmatpush.msk.msrb.mxu3 %vm597_vm0, %v13338_v14  ;;  %v14063_v17 = vpop.f32.mrf.mxu2  ;;  %v14065_v19 = vpop.f32.mrf.mxu3  ;;  %v1919_v53 = vadd.f32 %v1916_v18, %v1898_v10 }
 0x174   : > { %v14079_v14 = vpop.permute.xlu1 %3410 }
 0x175   : > { %17432 = vst [vmem:[#allocation17_spill] sm:$0xff] %v14079_v14 }
 0x176   : > { %v1958_v7 = vpop.f32.mrf.mxu0  ;;  %v1979_v33 = vpop.f32.mrf.mxu1 }
 0x178   : > { %12133 = vmatmul.msk.f32.vlgmr.msra.gmra.mxu2 %vm593_vm1, %v13510_v39  ;;  %12135 = vmatmul.msk.f32.vlgmr.msra.gmra.mxu3 %vm593_vm1, %v13523_v42 }
 0x179   : > { %12113 = vmatmul.msk.f32.vlgmr.msrb.gmra.mxu0 %vm593_vm1, %v13477_v32  ;;  %12115 = vmatmul.msk.f32.vlgmr.msrb.gmra.mxu1 %vm593_vm1, %v13548_v45  ;;  %v1940_v32 = vadd.f32 %v1937_v12, %v1919_v53 }
 0x17a   : > { %12128 = vmatpush.msk.msrb.mxu0 %vm597_vm0, %v13286_v4  ;;  %12130 = vmatpush.msk.msrb.mxu1 %vm597_vm0, %v13398_v21 }
 0x17b   : > { %12148 = vmatpush.msk.msra.mxu2 %vm597_vm0, %v13463_v30  ;;  %12150 = vmatpush.msk.msra.mxu3 %vm597_vm0, %v13408_v23  ;;  %v14085_v18 = vpop.f32.mrf.mxu2  ;;  %v14087_v62 = vpop.f32.mrf.mxu3  ;;  %v1961_v4 = vadd.f32 %v1958_v7, %v1940_v32 }
 0x17c   : > { %v3518_v23 = vpop.permute.xlu2 %3517  ;;  %v14111_v7 = vpop.permute.xlu1 %3735 }
 0x17d   : > { %17433 = vst [vmem:[#allocation18_spill] sm:$0xff] %v14111_v7 }
 0x17e   : > { %v2042_v9 = vpop.f32.mrf.mxu0  ;;  %v2063_v6 = vpop.f32.mrf.mxu1 }
 0x180   : > { %12141 = vmatmul.msk.f32.vlgmr.msrb.gmra.mxu2 %vm593_vm1, %v14089_v2  ;;  %12143 = vmatmul.msk.f32.vlgmr.msrb.gmra.mxu3 %vm593_vm1, %v13485_v34 }
 0x181   : > { %12121 = vmatmul.msk.f32.vlgmr.msra.gmra.mxu0 %vm593_vm1, %v14079_v14  ;;  %12123 = vmatmul.msk.f32.vlgmr.msra.gmra.mxu1 %vm593_vm1, %v13503_v38  ;;  %v1982_v38 = vadd.f32 %v1979_v33, %v1961_v4 }
 0x182   : > { %12136 = vmatpush.msk.msra.mxu0 %vm597_vm0, %v13321_v11  ;;  %12138 = vmatpush.msk.msra.mxu1 %vm597_vm0, %v13435_v26 }
 0x183   : > { %12156 = vmatpush.msk.msrb.mxu2 %vm597_vm0, %v13533_v44  ;;  %12158 = vmatpush.msk.msrb.mxu3 %vm597_vm0, %v13445_v28  ;;  %v14107_v12 = vpop.f32.mrf.mxu2  ;;  %v14109_v20 = vpop.f32.mrf.mxu3  ;;  %v2003_v11 = vadd.f32 %v2000_v63, %v1982_v38 }
 0x185   : > { %v2024_v28 = vadd.f32 %v2021_v1, %v2003_v11 }
 0x186   : > { %v2126_v10 = vpop.f32.mrf.mxu0  ;;  %v2147_v34 = vpop.f32.mrf.mxu1 }
 0x187   : > { %v2045_v32 = vadd.f32 %v2042_v9, %v2024_v28 }
 0x188   : > { %12149 = vmatmul.msk.f32.vlgmr.msra.gmra.mxu2 %vm593_vm1, %v13985_v59  ;;  %12151 = vmatmul.msk.f32.vlgmr.msra.gmra.mxu3 %vm593_vm1, %v14111_v7 }
 0x189   : > { %12129 = vmatmul.msk.f32.vlgmr.msrb.gmra.mxu0 %vm593_vm1, %v13979_v57  ;;  %12131 = vmatmul.msk.f32.vlgmr.msrb.gmra.mxu1 %vm593_vm1, %v3518_v23 }
 0x18a   : > { %12144 = vmatpush.msk.msrb.mxu0 %vm597_vm0, %v13347_v15  ;;  %12146 = vmatpush.msk.msrb.mxu1 %vm597_vm0, %v13494_v35  ;;  %v2066_v15 = vadd.f32 %v2063_v6, %v2045_v32 }
 0x18b   : > { %12164 = vmatpush.msk.msra.mxu2 %vm597_vm0, %v13567_v48  ;;  %12166 = vmatpush.msk.msra.mxu3 %vm597_vm0, %v13499_v36  ;;  %v14128_v57 = vpop.f32.mrf.mxu2  ;;  %v2374_v63 = vpop.f32.mrf.mxu3 }
 0x18c   : > { %v2087_v23 = vadd.f32 %v14063_v17, %v2066_v15 }
 0x18e   : > { %v14130_v33 = vpop.f32.mrf.mxu0  ;;  %v14132_v53 = vpop.f32.mrf.mxu1 }
 0x190   : > { %12157 = vmatmul.msk.f32.vlgmr.msrb.gmra.mxu2 %vm593_vm1, %v13721_v55  ;;  %12159 = vmatmul.msk.f32.vlgmr.msrb.gmra.mxu3 %vm593_vm1, %v14005_v25 }
 0x191   : > { %12137 = vmatmul.msk.f32.vlgmr.msra.gmra.mxu0 %vm593_vm1, %v13624_v51  ;;  %12139 = vmatmul.msk.f32.vlgmr.msra.gmra.mxu1 %vm593_vm1, %v13999_v0 }
 0x192   : > { %12152 = vmatpush.msk.msra.mxu0 %vm597_vm0, %v13417_v24  ;;  %12154 = vmatpush.msk.msra.mxu1 %vm597_vm0, %v13528_v43 }
 0x193   : > { %12172 = vmatpush.msk.msrb.mxu2 %vm597_vm0, %v13304_v8  ;;  %12174 = vmatpush.msk.msrb.mxu3 %vm597_vm0, %v13333_v13  ;;  %v2435_v36 = vpop.f32.mrf.mxu2  ;;  %v2456_v1 = vpop.f32.mrf.mxu3  ;;  %v2108_v8 = vadd.f32 %v14065_v19, %v2087_v23  ;;  %v14229_v23 = vld [vmem:[%s13264_s17 + $0x61] sm:$0x3f] }
 0x194   : > { %17436 = vst [vmem:[#allocation21_spill] sm:$0xff] %v14229_v23  ;;  %6620 = vrot.lane.b32.xlu2 %v14229_v23, %s13148_s21 }
 0x195   : > { %v2129_v11 = vadd.f32 %v2126_v10, %v2108_v8 }
 0x196   : > { %v14150_v9 = vpop.f32.mrf.mxu0  ;;  %v14152_v4 = vpop.f32.mrf.mxu1 }
 0x198   : > { %12165 = vmatmul.msk.f32.vlgmr.msra.gmra.mxu2 %vm593_vm1, %v13618_v50  ;;  %12167 = vmatmul.msk.f32.vlgmr.msra.gmra.mxu3 %vm593_vm1, %v13739_v56 }
 0x199   : > { %12145 = vmatmul.msk.f32.vlgmr.msrb.gmra.mxu0 %vm593_vm1, %v13501_v37  ;;  %12147 = vmatmul.msk.f32.vlgmr.msrb.gmra.mxu1 %vm593_vm1, %v13649_v54 }
 0x19a   : > { %12160 = vmatpush.msk.msrb.mxu0 %vm597_vm0, %v13454_v29  ;;  %12162 = vmatpush.msk.msrb.mxu1 %vm597_vm0, %v13562_v47  ;;  %v2150_v29 = vadd.f32 %v2147_v34, %v2129_v11 }
 0x19b   : > { %12180 = vmatpush.msk.msra.mxu2 %vm597_vm0, %v13398_v21  ;;  %12182 = vmatpush.msk.msra.mxu3 %vm597_vm0, %v13403_v22  ;;  %v2519_v13 = vpop.f32.mrf.mxu2  ;;  %v2540_v24 = vpop.f32.mrf.mxu3 }
 0x19c   : > { %v14184_v22 = vpop.permute.xlu2 %3844 }
 0x19d   : > { %17434 = vst [vmem:[#allocation19_spill] sm:$0xff] %v14184_v22 }
 0x19e   : > { %v2394_v17 = vpop.f32.mrf.mxu0  ;;  %v2414_v6 = vpop.f32.mrf.mxu1 }
 0x19f   : > { %v2395_v38 = vadd.f32 %v2394_v17, %v2374_v63 }
 0x1a0   : > { %12173 = vmatmul.msk.f32.vlgmr.msrb.gmra.mxu2 %vm593_vm1, %v13510_v39  ;;  %12175 = vmatmul.msk.f32.vlgmr.msrb.gmra.mxu3 %vm593_vm1, %v17430_v52  ;;  %v14191_v52 = vld [vmem:[%s13264_s17 + $0x49] sm:$0x3f] }
 0x1a1   : > { %v2417_v28 = vadd.f32 %v2414_v6, %v2395_v38  ;;  %12153 = vmatmul.msk.f32.vlgmr.msra.gmra.mxu0 %vm593_vm1, %v13519_v40  ;;  %12155 = vmatmul.msk.f32.vlgmr.msra.gmra.mxu1 %vm593_vm1, %v13521_v41 }
 0x1a2   : > { %12168 = vmatpush.msk.msra.mxu0 %vm597_vm0, %v13470_v31  ;;  %12170 = vmatpush.msk.msra.mxu1 %vm597_vm0, %v13588_v49  ;;  %v2171_v49 = vadd.f32 %v14085_v18, %v2150_v29  ;;  %v14218_v18 = vpop.permute.xlu0 %3953  ;;  %v14265_v29 = vld [vmem:[%s13264_s17 + $0x59] sm:$0x3f] }
 0x1a3   : > { %v2438_v21 = vadd.f32 %v2435_v36, %v2417_v28  ;;  %12188 = vmatpush.msk.msrb.mxu2 %vm597_vm0, %v13435_v26  ;;  %12190 = vmatpush.msk.msrb.mxu3 %vm597_vm0, %v13440_v27  ;;  %v2603_v39 = vpop.f32.mrf.mxu2  ;;  %v2624_v40 = vpop.f32.mrf.mxu3  ;;  %v14207_v27 = vld [vmem:[%s17208_s1 + $0x10] sm:$0x3f]  ;;  %17435 = vst [vmem:[#allocation20_spill] sm:$0xff] %v14218_v18 }
 0x1a4   : > { %6080 = vrot.lane.b32.xlu1 %v14191_v52, %s13148_s21  ;;  %17437 = vst [vmem:[#allocation22_spill] sm:$0xff] %v14265_v29  ;;  %8207 = vrot.lane.b32.xlu2 %v14265_v29, %s13148_s21 }
 0x1a5   : > { %v2459_v19 = vadd.f32 %v2456_v1, %v2438_v21  ;;  %v14226_v1 = vld [vmem:[%s13264_s17 + $0x51] sm:$0x3f]  ;;  %v11871_v21 = vld [vmem:[%s13264_s17 + $0x79] sm:$0x3f] }
 0x1a6   : > { %v2477_v10 = vpop.f32.mrf.mxu0  ;;  %v2498_v63 = vpop.f32.mrf.mxu1 }
 0x1a7   : > { %v2480_v31 = vadd.f32 %v2477_v10, %v2459_v19 }
 0x1a8   : > { %12181 = vmatmul.msk.f32.vlgmr.msra.gmra.mxu2 %vm593_vm1, %v13999_v0  ;;  %12183 = vmatmul.msk.f32.vlgmr.msra.gmra.mxu3 %vm593_vm1, %v13557_v46  ;;  %v2192_v46 = vadd.f32 %v14087_v62, %v2171_v49 }
 0x1a9   : > { %v2501_v32 = vadd.f32 %v2498_v63, %v2480_v31  ;;  %12161 = vmatmul.msk.f32.vlgmr.msrb.gmra.mxu0 %vm593_vm1, %v14184_v22  ;;  %12163 = vmatmul.msk.f32.vlgmr.msrb.gmra.mxu1 %vm593_vm1, %v13548_v45  ;;  %v14214_v45 = vld [vmem:[%s17208_s1 + $0x18] sm:$0x3f]  ;;  %v14287_v63 = vld [vmem:[%s17208_s1 + $0x50] sm:$0x3f] }
 0x1aa   : > { %12176 = vmatpush.msk.msrb.mxu0 %vm597_vm0, %v14207_v27  ;;  %12178 = vmatpush.msk.msrb.mxu1 %vm597_vm0, %v14214_v45 }
 0x1ab   : > { %v2522_v26 = vadd.f32 %v2519_v13, %v2501_v32  ;;  %12196 = vmatpush.msk.msra.mxu2 %vm597_vm0, %v13494_v35  ;;  %12198 = vmatpush.msk.msra.mxu3 %vm597_vm0, %v13463_v30  ;;  %v2687_v34 = vpop.f32.mrf.mxu2  ;;  %v2708_v15 = vpop.f32.mrf.mxu3  ;;  %v2213_v30 = vadd.f32 %v14130_v33, %v2192_v46  ;;  %v14247_v33 = vld [vmem:[%s17208_s1 + $0x30] sm:$0x3f] }
 0x1ac   : > { %7680 = vrot.lane.b32.xlu1 %v14226_v1, %s13148_s21 }
 0x1ad   : > { %v2543_v36 = vadd.f32 %v2540_v24, %v2522_v26  ;;  %v14254_v24 = vld [vmem:[%s17208_s1 + $0x38] sm:$0x3f]  ;;  %v2234_v6 = vadd.f32 %v14132_v53, %v2213_v30  ;;  %v14342_v30 = vld [vmem:[%s17208_s1 + $0x8] sm:$0x3f] }
 0x1ae   : > { %v2561_v8 = vpop.f32.mrf.mxu0  ;;  %v2582_v13 = vpop.f32.mrf.mxu1 }
 0x1af   : > { %v2564_v35 = vadd.f32 %v2561_v8, %v2543_v36 }
 0x1b0   : > { %12189 = vmatmul.msk.f32.vlgmr.msrb.gmra.mxu2 %vm593_vm1, %v13649_v54  ;;  %12191 = vmatmul.msk.f32.vlgmr.msrb.gmra.mxu3 %vm593_vm1, %v13985_v59 }
 0x1b1   : > { %v2585_v17 = vadd.f32 %v2582_v13, %v2564_v35  ;;  %12169 = vmatmul.msk.f32.vlgmr.msra.gmra.mxu0 %vm593_vm1, %v14079_v14  ;;  %12171 = vmatmul.msk.f32.vlgmr.msra.gmra.mxu1 %vm593_vm1, %v14218_v18  ;;  %v14305_v35 = vld [vmem:[%s13264_s17 + $0x58] sm:$0x3f] }
 0x1b2   : > { %12184 = vmatpush.msk.msra.mxu0 %vm597_vm0, %v14247_v33  ;;  %12186 = vmatpush.msk.msra.mxu1 %vm597_vm0, %v14254_v24 }
 0x1b3   : > { %v2606_v62 = vadd.f32 %v2603_v39, %v2585_v17  ;;  %12204 = vmatpush.msk.msrb.mxu2 %vm597_vm0, %v13528_v43  ;;  %12206 = vmatpush.msk.msrb.mxu3 %vm597_vm0, %v13533_v44  ;;  %v2771_v38 = vpop.f32.mrf.mxu2  ;;  %v2792_v11 = vpop.f32.mrf.mxu3  ;;  %v14268_v39 = vld [vmem:[%s13264_s17 + $0x41] sm:$0x3f]  ;;  %v2258_v44 = vadd.f32 %v14107_v12, %v2234_v6  ;;  %v14294_v12 = vld [vmem:[%s17208_s1 + $0x58] sm:$0x3f] }
 0x1b4   : > { %17438 = vst [vmem:[#allocation23_spill] sm:$0xff] %v14268_v39  ;;  %9263 = vrot.lane.b32.xlu1 %v11871_v21, %s13148_s21  ;;  %5553 = vrot.lane.b32.xlu0 %v14268_v39, %s13148_s21 }
 0x1b5   : > { %v2627_v28 = vadd.f32 %v2624_v40, %v2606_v62  ;;  %v2282_v31 = vadd.f32 %v14109_v20, %v2258_v44  ;;  %v14321_v20 = vld [vmem:[%s17208_s1 + $0x70] sm:$0x3f] }
 0x1b6   : > { %v2645_v19 = vpop.f32.mrf.mxu0  ;;  %v2666_v10 = vpop.f32.mrf.mxu1  ;;  %v14349_v44 = vld [vmem:[%s13264_s17 + $0x70] sm:$0x3f] }
 0x1b7   : > { %v2648_v43 = vadd.f32 %v2645_v19, %v2627_v28  ;;  %v2306_v8 = vadd.f32 %v14150_v9, %v2282_v31  ;;  %v14328_v9 = vld [vmem:[%s17208_s1 + $0x78] sm:$0x3f]  ;;  %v14391_v31 = vld [vmem:[%s17209_s2] ss:$0 sm:$0xff] }
 0x1b8   : > { %12197 = vmatmul.msk.f32.vlgmr.msra.gmra.mxu2 %vm593_vm1, %v13521_v41  ;;  %12199 = vmatmul.msk.f32.vlgmr.msra.gmra.mxu3 %vm593_vm1, %v13721_v55  ;;  %17440 = vst [vmem:[#allocation25_spill] sm:$0xff] %v14391_v31 }
 0x1b9   : > { %v2669_v53 = vadd.f32 %v2666_v10, %v2648_v43  ;;  %12177 = vmatmul.msk.f32.vlgmr.msrb.gmra.mxu0 %vm593_vm1, %v13523_v42  ;;  %12179 = vmatmul.msk.f32.vlgmr.msrb.gmra.mxu1 %vm593_vm1, %v13624_v51  ;;  %v2330_v17 = vadd.f32 %v14152_v4, %v2306_v8 }
 0x1ba   : > { %12192 = vmatpush.msk.msrb.mxu0 %vm597_vm0, %v14287_v63  ;;  %12194 = vmatpush.msk.msrb.mxu1 %vm597_vm0, %v14294_v12 }
 0x1bb   : > { %v2690_v40 = vadd.f32 %v2687_v34, %v2669_v53  ;;  %12212 = vmatpush.msk.msra.mxu2 %vm597_vm0, %v13562_v47  ;;  %12214 = vmatpush.msk.msra.mxu3 %vm597_vm0, %v13567_v48  ;;  %v2855_v49 = vpop.f32.mrf.mxu2  ;;  %v2880_v32 = vpop.f32.mrf.mxu3  ;;  %v14312_v47 = vld [vmem:[%s13264_s17 + $0x19] sm:$0x3f]  ;;  %v2355_v10 = vadd.f32 %v14128_v57, %v2330_v17  ;;  %v14365_v57 = vld [vmem:[%s17208_s1 + $0x90] sm:$0x3f] }
 0x1bc   : > { %v14354_v53 = vld [vmem:[%s13264_s17 + $0x78] sm:$0x3f]  ;;  %17439 = vst [vmem:[#allocation24_spill] sm:$0xff] %v14365_v57 }
 0x1bd   : > { %v2711_v26 = vadd.f32 %v2708_v15, %v2690_v40  ;;  %v14335_v15 = vld [vmem:[%s17208_s1 + $0xc0] sm:$0x3f] }
 0x1be   : > { %v2729_v46 = vpop.f32.mrf.mxu0  ;;  %v2750_v34 = vpop.f32.mrf.mxu1 }
 0x1bf   : > { %v2732_v36 = vadd.f32 %v2729_v46, %v2711_v26 }
 0x1c0   : > { %12205 = vmatmul.msk.f32.vlgmr.msrb.gmra.mxu2 %vm593_vm1, %v14312_v47  ;;  %12207 = vmatmul.msk.f32.vlgmr.msrb.gmra.mxu3 %vm593_vm1, %v13618_v50 }
 0x1c1   : > { %v2753_v13 = vadd.f32 %v2750_v34, %v2732_v36  ;;  %12185 = vmatmul.msk.f32.vlgmr.msra.gmra.mxu0 %vm593_vm1, %v14305_v35  ;;  %12187 = vmatmul.msk.f32.vlgmr.msra.gmra.mxu1 %vm593_vm1, %v13501_v37 }
 0x1c2   : > { %12200 = vmatpush.msk.msra.mxu0 %vm597_vm0, %v14321_v20  ;;  %12202 = vmatpush.msk.msra.mxu1 %vm597_vm0, %v14328_v9 }
 0x1c3   : > { %v2774_v48 = vadd.f32 %v2771_v38, %v2753_v13  ;;  %12220 = vmatpush.msk.msrb.mxu2 %vm597_vm0, %v14335_v15  ;;  %12222 = vmatpush.msk.msrb.mxu3 %vm597_vm0, %v14342_v30  ;;  %v2949_v62 = vpop.f32.mrf.mxu2  ;;  %v2970_v6 = vpop.f32.mrf.mxu3 }
 0x1c4   : > { %v14393_v13 = vpop.permute.xlu1 %4481 }
 0x1c5   : > { %v2795_v38 = vadd.f32 %v2792_v11, %v2774_v48  ;;  %v14372_v11 = vld [vmem:[%s17208_s1 + $0x98] sm:$0x3f]  ;;  %17441 = vst [vmem:[#allocation26_spill] sm:$0xff] %v14393_v13 }
 0x1c6   : > { %v2813_v28 = vpop.f32.mrf.mxu0  ;;  %v2834_v21 = vpop.f32.mrf.mxu1 }
 0x1c7   : > { %v2816_v19 = vadd.f32 %v2813_v28, %v2795_v38 }
 0x1c8   : > { %12213 = vmatmul.msk.f32.vlgmr.msra.gmra.mxu2 %vm593_vm1, %v13790_v60  ;;  %12215 = vmatmul.msk.f32.vlgmr.msra.gmra.mxu3 %vm593_vm1, %v13793_v61  ;;  %v14381_v60 = vld [vmem:[%s17208_s1 + $0x20] sm:$0x3f]  ;;  %v2356_v61 = vmax.f32 %v1816_v3, %v2355_v10 }
 0x1c9   : > { %v2837_v43 = vadd.f32 %v2834_v21, %v2816_v19  ;;  %12193 = vmatmul.msk.f32.vlgmr.msrb.gmra.mxu0 %vm593_vm1, %v14349_v44  ;;  %12195 = vmatmul.msk.f32.vlgmr.msrb.gmra.mxu1 %vm593_vm1, %v14354_v53 }
 0x1ca   : > { %12208 = vmatpush.msk.msrb.mxu0 %vm597_vm0, %v14365_v57  ;;  %12210 = vmatpush.msk.msrb.mxu1 %vm597_vm0, %v14372_v11 }
 0x1cb   : > { %v2858_v4 = vadd.f32 %v2855_v49, %v2837_v43  ;;  %12228 = vmatpush.msk.msra.mxu2 %vm597_vm0, %v14214_v45  ;;  %12230 = vmatpush.msk.msra.mxu3 %vm597_vm0, %v14381_v60  ;;  %v3037_v49 = vpop.f32.mrf.mxu2  ;;  %v3058_v26 = vpop.f32.mrf.mxu3 }
 0x1cd   : > { %v2883_v40 = vadd.f32 %v2880_v32, %v2858_v4  ;;  %v14410_v32 = vld [vmem:[%s17208_s1 + $0xb0] sm:$0x3f]  ;;  %v14442_v4 = vld [vmem:[%s17208_s1] sm:$0x3f] }
 0x1ce   : > { %v2909_v46 = vpop.f32.mrf.mxu0  ;;  %v2929_v34 = vpop.f32.mrf.mxu1  ;;  %17442 = vst [vmem:[#allocation27_spill] sm:$0xff] %v14410_v32 }
 0x1cf   : > { %v2884_v36 = vmax.f32 %v2356_v61, %v2883_v40  ;;  %v2930_v8 = vadd.f32 %v2929_v34, %v2909_v46  ;;  %17443 = vst [vmem:[#allocation28_spill] sm:$0xff] %v14442_v4 }
 0x1d0   : > { %12221 = vmatmul.msk.f32.vlgmr.msrb.gmra.mxu2 %vm593_vm1, %v14393_v13  ;;  %12223 = vmatmul.msk.f32.vlgmr.msrb.gmra.mxu3 %vm593_vm1, %v13523_v42  ;;  %v14426_v42 = vld [vmem:[%s17208_s1 + $0x40] sm:$0x3f] }
 0x1d1   : > { %v2888_v48 = vadd.f32 %v14391_v31, %v2884_v36  ;;  %v2952_v17 = vadd.f32 %v2949_v62, %v2930_v8  ;;  %12201 = vmatmul.msk.f32.vlgmr.msra.gmra.mxu0 %vm593_vm1, %v14005_v25  ;;  %12203 = vmatmul.msk.f32.vlgmr.msra.gmra.mxu1 %vm593_vm1, %v14399_v58  ;;  %v14417_v62 = vld [vmem:[%s17208_s1 + $0xb8] sm:$0x3f]  ;;  %v14656_v31 = vld [vmem:[%s13264_s17 + $0x21] sm:$0x3f] }
 0x1d2   : > { %12216 = vmatpush.msk.msra.mxu0 %vm597_vm0, %v14410_v32  ;;  %12218 = vmatpush.msk.msra.mxu1 %vm597_vm0, %v14417_v62  ;;  %17447 = vst [vmem:[#allocation30_spill] sm:$0xff] %v14656_v31 }
 0x1d3   : > { %v2889_v16 = vmax.f32 %v2888_v48, 0.0  ;;  %v2973_v3 = vadd.f32 %v2970_v6, %v2952_v17  ;;  %12236 = vmatpush.msk.msrb.mxu2 %vm597_vm0, %v14254_v24  ;;  %12238 = vmatpush.msk.msrb.mxu3 %vm597_vm0, %v14426_v42  ;;  %v3125_v6 = vpop.f32.mrf.mxu2  ;;  %v3146_v38 = vpop.f32.mrf.mxu3  ;;  %v17444_v48 = vld [vmem:[#allocation16_spill] sm:$0xff] }
 0x1d5   : > { %2891 = vst.msk [vmem:[#allocation2] sm:$0x3f] %vm2890_vm2, %v2889_v16  ;;  %v14481_v16 = vld [vmem:[%s17208_s1 + $0x80] sm:$0x3f] }
 0x1d6   : > { %v2995_v28 = vpop.f32.mrf.mxu0  ;;  %v3016_v21 = vpop.f32.mrf.mxu1 }
 0x1d7   : > { %v2998_v19 = vadd.f32 %v2995_v28, %v2973_v3 }
 0x1d8   : > { %12229 = vmatmul.msk.f32.vlgmr.msra.gmra.mxu2 %vm593_vm1, %v13999_v0  ;;  %12231 = vmatmul.msk.f32.vlgmr.msra.gmra.mxu3 %vm593_vm1, %v14089_v2  ;;  %v14453_v0 = vld [vmem:[%s17208_s1 + $0x60] sm:$0x3f] }
 0x1d9   : > { %v3019_v10 = vadd.f32 %v3016_v21, %v2998_v19  ;;  %12209 = vmatmul.msk.f32.vlgmr.msrb.gmra.mxu0 %vm593_vm1, %v13739_v56  ;;  %12211 = vmatmul.msk.f32.vlgmr.msrb.gmra.mxu1 %vm593_vm1, %v14079_v14 }
 0x1da   : > { %12224 = vmatpush.msk.msrb.mxu0 %vm597_vm0, %v14442_v4  ;;  %12226 = vmatpush.msk.msrb.mxu1 %vm597_vm0, %v14207_v27 }
 0x1db   : > { %v3040_v43 = vadd.f32 %v3037_v49, %v3019_v10  ;;  %12244 = vmatpush.msk.msra.mxu2 %vm597_vm0, %v14294_v12  ;;  %12246 = vmatpush.msk.msra.mxu3 %vm597_vm0, %v14453_v0  ;;  %v3213_v2 = vpop.f32.mrf.mxu2  ;;  %v3234_v40 = vpop.f32.mrf.mxu3 }
 0x1dc   : > { %v9293_v61 = vld [vmem:[#allocation2] sm:$0xf] }
 0x1dd   : > { %9403 = vrot.lane.b32.xlu1 %v9293_v61, %s13149_s14  ;;  %9353 = vrot.lane.b32.xlu2 %v9293_v61, %s13150_s16  ;;  %v3061_v49 = vadd.f32 %v3058_v26, %v3040_v43  ;;  %v14470_v26 = vld [vmem:[%s17208_s1 + $0x28] sm:$0x3f]  ;;  %v12897_v61 = vld [vmem:[%s13264_s17 + $0x38] sm:$0x3f] }
 0x1de   : > { %v3079_v46 = vpop.f32.mrf.mxu0  ;;  %v3104_v34 = vpop.f32.mrf.mxu1 }
 0x1df   : > { %v3082_v36 = vadd.f32 %v3079_v46, %v3061_v49 }
 0x1e0   : > { %12237 = vmatmul.msk.f32.vlgmr.msrb.gmra.mxu2 %vm593_vm1, %v13649_v54  ;;  %12239 = vmatmul.msk.f32.vlgmr.msrb.gmra.mxu3 %vm593_vm1, %v13985_v59  ;;  %v14634_v59 = vld [vmem:[%s13264_s17 + $0x9] sm:$0x3f] }
 0x1e1   : > { %v3107_v8 = vadd.f32 %v3104_v34, %v3082_v36  ;;  %12217 = vmatmul.msk.f32.vlgmr.msra.gmra.mxu0 %vm593_vm1, %v13815_v5  ;;  %12219 = vmatmul.msk.f32.vlgmr.msra.gmra.mxu1 %vm593_vm1, %v17444_v48 }
 0x1e2   : > { %12232 = vmatpush.msk.msra.mxu0 %vm597_vm0, %v14470_v26  ;;  %12234 = vmatpush.msk.msra.mxu1 %vm597_vm0, %v14247_v33 }
 0x1e3   : > { %v3128_v17 = vadd.f32 %v3125_v6, %v3107_v8  ;;  %12252 = vmatpush.msk.msrb.mxu2 %vm597_vm0, %v14328_v9  ;;  %12254 = vmatpush.msk.msrb.mxu3 %vm597_vm0, %v14481_v16  ;;  %v3297_v3 = vpop.f32.mrf.mxu2  ;;  %v3322_v6 = vpop.f32.mrf.mxu3 }
 0x1e5   : > { %v3149_v28 = vadd.f32 %v3146_v38, %v3128_v17  ;;  %v14496_v38 = vld [vmem:[%s17208_s1 + $0x48] sm:$0x3f] }
 0x1e6   : > { %v3167_v21 = vpop.f32.mrf.mxu0  ;;  %v3188_v19 = vpop.f32.mrf.mxu1 }
 0x1e7   : > { %v3170_v10 = vadd.f32 %v3167_v21, %v3149_v28 }
 0x1e8   : > { %12245 = vmatmul.msk.f32.vlgmr.msra.gmra.mxu2 %vm593_vm1, %v13521_v41  ;;  %12247 = vmatmul.msk.f32.vlgmr.msra.gmra.mxu3 %vm593_vm1, %v13721_v55 }
 0x1e9   : > { %v3191_v43 = vadd.f32 %v3188_v19, %v3170_v10  ;;  %12225 = vmatmul.msk.f32.vlgmr.msrb.gmra.mxu0 %vm593_vm1, %v12897_v61  ;;  %12227 = vmatmul.msk.f32.vlgmr.msrb.gmra.mxu1 %vm593_vm1, %v13624_v51  ;;  %v14507_v51 = vld [vmem:[%s17208_s1 + $0xa0] sm:$0x3f] }
 0x1ea   : > { %12240 = vmatpush.msk.msrb.mxu0 %vm597_vm0, %v14496_v38  ;;  %12242 = vmatpush.msk.msrb.mxu1 %vm597_vm0, %v14287_v63 }
 0x1eb   : > { %v3216_v49 = vadd.f32 %v3213_v2, %v3191_v43  ;;  %12260 = vmatpush.msk.msra.mxu2 %vm597_vm0, %v14372_v11  ;;  %12262 = vmatpush.msk.msra.mxu3 %vm597_vm0, %v14507_v51  ;;  %v3385_v2 = vpop.f32.mrf.mxu2  ;;  %v3406_v46 = vpop.f32.mrf.mxu3 }
 0x1ed   : > { %v3237_v34 = vadd.f32 %v3234_v40, %v3216_v49  ;;  %v14522_v40 = vld [vmem:[%s17208_s1 + $0x68] sm:$0x3f] }
 0x1ee   : > { %v3255_v36 = vpop.f32.mrf.mxu0  ;;  %v3276_v8 = vpop.f32.mrf.mxu1 }
 0x1ef   : > { %v3258_v17 = vadd.f32 %v3255_v36, %v3237_v34  ;;  %v14539_v36 = vld [vmem:[%s13264_s17 + $0x39] sm:$0x3f] }
 0x1f0   : > { %12253 = vmatmul.msk.f32.vlgmr.msrb.gmra.mxu2 %vm593_vm1, %v14312_v47  ;;  %12255 = vmatmul.msk.f32.vlgmr.msrb.gmra.mxu3 %vm593_vm1, %v13618_v50 }
 0x1f1   : > { %v3279_v28 = vadd.f32 %v3276_v8, %v3258_v17  ;;  %12233 = vmatmul.msk.f32.vlgmr.msra.gmra.mxu0 %vm593_vm1, %v14305_v35  ;;  %12235 = vmatmul.msk.f32.vlgmr.msra.gmra.mxu1 %vm593_vm1, %v13501_v37 }
 0x1f2   : > { %12248 = vmatpush.msk.msra.mxu0 %vm597_vm0, %v14522_v40  ;;  %12250 = vmatpush.msk.msra.mxu1 %vm597_vm0, %v14321_v20 }
 0x1f3   : > { %v3300_v21 = vadd.f32 %v3297_v3, %v3279_v28  ;;  %12268 = vmatpush.msk.msrb.mxu2 %vm597_vm0, %v14417_v62  ;;  %12270 = vmatpush.msk.msrb.mxu3 %vm597_vm0, %v14335_v15  ;;  %v3472_v19 = vpop.f32.mrf.mxu2  ;;  %v3492_v3 = vpop.f32.mrf.mxu3 }
 0x1f5   : > { %v3325_v10 = vadd.f32 %v3322_v6, %v3300_v21  ;;  %v14546_v6 = vld [vmem:[%s17208_s1 + $0x88] sm:$0x3f] }
 0x1f6   : > { %v3343_v43 = vpop.f32.mrf.mxu0  ;;  %v3364_v61 = vpop.f32.mrf.mxu1 }
 0x1f7   : > { %v3346_v49 = vadd.f32 %v3343_v43, %v3325_v10 }
 0x1f8   : > { %12261 = vmatmul.msk.f32.vlgmr.msra.gmra.mxu2 %vm593_vm1, %v14218_v18  ;;  %12263 = vmatmul.msk.f32.vlgmr.msra.gmra.mxu3 %vm593_vm1, %v14539_v36 }
 0x1f9   : > { %v3367_v34 = vadd.f32 %v3364_v61, %v3346_v49  ;;  %12241 = vmatmul.msk.f32.vlgmr.msrb.gmra.mxu0 %vm593_vm1, %v14111_v7  ;;  %12243 = vmatmul.msk.f32.vlgmr.msrb.gmra.mxu1 %vm593_vm1, %v14354_v53  ;;  %v14560_v61 = vpop.permute.xlu2 %5009 }
 0x1fa   : > { %12256 = vmatpush.msk.msrb.mxu0 %vm597_vm0, %v14546_v6  ;;  %12258 = vmatpush.msk.msrb.mxu1 %vm597_vm0, %v14365_v57  ;;  %17445 = vst [vmem:[#allocation16_spill] sm:$0xff] %v14560_v61 }
 0x1fb   : > { %v3388_v8 = vadd.f32 %v3385_v2, %v3367_v34  ;;  %12276 = vmatpush.msk.msra.mxu2 %vm597_vm0, %v14207_v27  ;;  %12278 = vmatpush.msk.msra.mxu3 %vm597_vm0, %v14214_v45  ;;  %v3559_v17 = vpop.f32.mrf.mxu2  ;;  %v3580_v28 = vpop.f32.mrf.mxu3 }
 0x1fd   : > { %v14556_v2 = vadd.f32 %v3406_v46, %v3388_v8  ;;  %v14573_v46 = vld [vmem:[%s17208_s1 + $0xa8] sm:$0x3f] }
 0x1fe   : > { %v14558_v21 = vpop.f32.mrf.mxu0  ;;  %v3452_v10 = vpop.f32.mrf.mxu1 }
 0x1ff   : > { %v3473_v43 = vadd.f32 %v3472_v19, %v3452_v10 }
 0x200   : > { %12269 = vmatmul.msk.f32.vlgmr.msrb.gmra.mxu2 %vm593_vm1, %v14393_v13  ;;  %12271 = vmatmul.msk.f32.vlgmr.msrb.gmra.mxu3 %vm593_vm1, %v14560_v61  ;;  %v14588_v61 = vld [vmem:[%s13264_s17 + $0x50] sm:$0x3f] }
 0x201   : > { %12249 = vmatmul.msk.f32.vlgmr.msra.gmra.mxu0 %vm593_vm1, %v14005_v25  ;;  %12251 = vmatmul.msk.f32.vlgmr.msra.gmra.mxu1 %vm593_vm1, %v14184_v22  ;;  %v3495_v49 = vadd.f32 %v3492_v3, %v3473_v43  ;;  %17446 = vst [vmem:[#allocation29_spill] sm:$0xff] %v14588_v61  ;;  %v12907_v25 = vld [vmem:[%s13264_s17 + $0x40] sm:$0x3f] }
 0x202   : > { %12264 = vmatpush.msk.msra.mxu0 %vm597_vm0, %v14573_v46  ;;  %12266 = vmatpush.msk.msra.mxu1 %vm597_vm0, %v14410_v32 }
 0x203   : > { %12284 = vmatpush.msk.msrb.mxu2 %vm597_vm0, %v14247_v33  ;;  %12286 = vmatpush.msk.msrb.mxu3 %vm597_vm0, %v14254_v24  ;;  %v3647_v19 = vpop.f32.mrf.mxu2  ;;  %v3668_v3 = vpop.f32.mrf.mxu3 }
 0x206   : > { %v3513_v34 = vpop.f32.mrf.mxu0  ;;  %v3538_v8 = vpop.f32.mrf.mxu1 }
 0x207   : > { %v3516_v10 = vadd.f32 %v3513_v34, %v3495_v49 }
 0x208   : > { %12277 = vmatmul.msk.f32.vlgmr.msra.gmra.mxu2 %vm593_vm1, %v14588_v61  ;;  %12279 = vmatmul.msk.f32.vlgmr.msra.gmra.mxu3 %vm593_vm1, %v14305_v35 }
 0x209   : > { %v3541_v43 = vadd.f32 %v3538_v8, %v3516_v10  ;;  %12257 = vmatmul.msk.f32.vlgmr.msrb.gmra.mxu0 %vm593_vm1, %v13739_v56  ;;  %12259 = vmatmul.msk.f32.vlgmr.msrb.gmra.mxu1 %vm593_vm1, %v14079_v14  ;;  %v14629_v14 = vld [vmem:[%s13264_s17 + $0x1] sm:$0x3f] }
 0x20a   : > { %12272 = vmatpush.msk.msrb.mxu0 %vm597_vm0, %v14342_v30  ;;  %12274 = vmatpush.msk.msrb.mxu1 %vm597_vm0, %v14442_v4 }
 0x20b   : > { %v3562_v18 = vadd.f32 %v3559_v17, %v3541_v43  ;;  %12292 = vmatpush.msk.msra.mxu2 %vm597_vm0, %v14287_v63  ;;  %12294 = vmatpush.msk.msra.mxu3 %vm597_vm0, %v14294_v12  ;;  %v3731_v49 = vpop.f32.mrf.mxu2  ;;  %v3756_v34 = vpop.f32.mrf.mxu3  ;;  %v14607_v17 = vld [vmem:[%s13264_s17 + $0x68] sm:$0x3f] }
 0x20d   : > { %v3583_v8 = vadd.f32 %v3580_v28, %v3562_v18 }
 0x20e   : > { %v3601_v10 = vpop.f32.mrf.mxu0  ;;  %v3622_v7 = vpop.f32.mrf.mxu1 }
 0x20f   : > { %v3604_v22 = vadd.f32 %v3601_v10, %v3583_v8  ;;  %v14622_v10 = vld [vmem:[%s13264_s17 + $0x48] sm:$0x3f] }
 0x210   : > { %12285 = vmatmul.msk.f32.vlgmr.msrb.gmra.mxu2 %vm593_vm1, %v14607_v17  ;;  %12287 = vmatmul.msk.f32.vlgmr.msrb.gmra.mxu3 %vm593_vm1, %v14349_v44 }
 0x211   : > { %v3625_v13 = vadd.f32 %v3622_v7, %v3604_v22  ;;  %12265 = vmatmul.msk.f32.vlgmr.msra.gmra.mxu0 %vm593_vm1, %v13815_v5  ;;  %12267 = vmatmul.msk.f32.vlgmr.msra.gmra.mxu1 %vm593_vm1, %v17444_v48 }
 0x212   : > { %12280 = vmatpush.msk.msra.mxu0 %vm597_vm0, %v14381_v60  ;;  %12282 = vmatpush.msk.msra.mxu1 %vm597_vm0, %v14470_v26 }
 0x213   : > { %v3650_v18 = vadd.f32 %v3647_v19, %v3625_v13  ;;  %12300 = vmatpush.msk.msrb.mxu2 %vm597_vm0, %v14321_v20  ;;  %12302 = vmatpush.msk.msrb.mxu3 %vm597_vm0, %v14328_v9  ;;  %v3819_v7 = vpop.f32.mrf.mxu2  ;;  %v3840_v22 = vpop.f32.mrf.mxu3 }
 0x215   : > { %v3671_v28 = vadd.f32 %v3668_v3, %v3650_v18 }
 0x216   : > { %v3689_v43 = vpop.f32.mrf.mxu0  ;;  %v3710_v8 = vpop.f32.mrf.mxu1 }
 0x217   : > { %v3692_v13 = vadd.f32 %v3689_v43, %v3671_v28 }
 0x218   : > { %12293 = vmatmul.msk.f32.vlgmr.msra.gmra.mxu2 %vm593_vm1, %v14629_v14  ;;  %12295 = vmatmul.msk.f32.vlgmr.msra.gmra.mxu3 %vm593_vm1, %v14634_v59 }
 0x219   : > { %v3713_v19 = vadd.f32 %v3710_v8, %v3692_v13  ;;  %12273 = vmatmul.msk.f32.vlgmr.msrb.gmra.mxu0 %vm593_vm1, %v14622_v10  ;;  %12275 = vmatmul.msk.f32.vlgmr.msrb.gmra.mxu1 %vm593_vm1, %v12907_v25 }
 0x21a   : > { %12288 = vmatpush.msk.msrb.mxu0 %vm597_vm0, %v14426_v42  ;;  %12290 = vmatpush.msk.msrb.mxu1 %vm597_vm0, %v14496_v38 }
 0x21b   : > { %v3734_v3 = vadd.f32 %v3731_v49, %v3713_v19  ;;  %12308 = vmatpush.msk.msra.mxu2 %vm597_vm0, %v14365_v57  ;;  %12310 = vmatpush.msk.msra.mxu3 %vm597_vm0, %v14372_v11  ;;  %v3907_v25 = vpop.f32.mrf.mxu2  ;;  %v3928_v18 = vpop.f32.mrf.mxu3  ;;  %v14649_v19 = vld [vmem:[%s13264_s17 + $0x60] sm:$0x3f] }
 0x21d   : > { %v3759_v28 = vadd.f32 %v3756_v34, %v3734_v3 }
 0x21e   : > { %v3777_v43 = vpop.f32.mrf.mxu0  ;;  %v3798_v8 = vpop.f32.mrf.mxu1 }
 0x21f   : > { %v3780_v13 = vadd.f32 %v3777_v43, %v3759_v28 }
 0x220   : > { %12301 = vmatmul.msk.f32.vlgmr.msrb.gmra.mxu2 %vm593_vm1, %v13618_v50  ;;  %12303 = vmatmul.msk.f32.vlgmr.msrb.gmra.mxu3 %vm593_vm1, %v14656_v31 }
 0x221   : > { %v3801_v49 = vadd.f32 %v3798_v8, %v3780_v13  ;;  %12281 = vmatmul.msk.f32.vlgmr.msra.gmra.mxu0 %vm593_vm1, %v13501_v37  ;;  %12283 = vmatmul.msk.f32.vlgmr.msra.gmra.mxu1 %vm593_vm1, %v14649_v19 }
 0x222   : > { %12296 = vmatpush.msk.msra.mxu0 %vm597_vm0, %v14453_v0  ;;  %12298 = vmatpush.msk.msra.mxu1 %vm597_vm0, %v14522_v40 }
 0x223   : > { %v3822_v34 = vadd.f32 %v3819_v7, %v3801_v49  ;;  %12316 = vmatpush.msk.msrb.mxu2 %vm597_vm0, %v14410_v32  ;;  %12318 = vmatpush.msk.msrb.mxu3 %vm597_vm0, %v14417_v62  ;;  %v3996_v3 = vpop.f32.mrf.mxu2  ;;  %v4016_v28 = vpop.f32.mrf.mxu3 }
 0x225   : > { %v3843_v43 = vadd.f32 %v3840_v22, %v3822_v34 }
 0x226   : > { %v3865_v8 = vpop.f32.mrf.mxu0  ;;  %v3886_v13 = vpop.f32.mrf.mxu1 }
 0x227   : > { %v3868_v23 = vadd.f32 %v3865_v8, %v3843_v43 }
 0x228   : > { %12309 = vmatmul.msk.f32.vlgmr.msra.gmra.mxu2 %vm593_vm1, %v14539_v36  ;;  %12311 = vmatmul.msk.f32.vlgmr.msra.gmra.mxu3 %vm593_vm1, %v13815_v5 }
 0x229   : > { %v3889_v31 = vadd.f32 %v3886_v13, %v3868_v23  ;;  %12289 = vmatmul.msk.f32.vlgmr.msrb.gmra.mxu0 %vm593_vm1, %v14354_v53  ;;  %12291 = vmatmul.msk.f32.vlgmr.msrb.gmra.mxu1 %vm593_vm1, %v13521_v41  ;;  %v14709_v13 = vld [vmem:[%s13264_s17 + $0x69] sm:$0x3f] }
 0x22a   : > { %12304 = vmatpush.msk.msrb.mxu0 %vm597_vm0, %v14481_v16  ;;  %12306 = vmatpush.msk.msrb.mxu1 %vm597_vm0, %v14546_v6 }
 0x22b   : > { %v3910_v7 = vadd.f32 %v3907_v25, %v3889_v31  ;;  %12324 = vmatpush.msk.msra.mxu2 %vm597_vm0, %v14442_v4  ;;  %12326 = vmatpush.msk.msra.mxu3 %vm597_vm0, %v14207_v27  ;;  %v4078_v23 = vpop.f32.mrf.mxu2  ;;  %v4099_v22 = vpop.f32.mrf.mxu3  ;;  %v14686_v31 = vadd.f32 %v14558_v21, %v14556_v2  ;;  %v14719_v2 = vld [vmem:[%s13264_s17 + $0x31] sm:$0x3f] }
 0x22c   : > { %7148 = vrot.lane.b32.xlu0 %v14709_v13, %s13148_s21 }
 0x22d   : > { %v3931_v49 = vadd.f32 %v3928_v18, %v3910_v7  ;;  %17448 = vst [vmem:[#allocation31_spill] sm:$0xff] %v14686_v31 }
 0x22e   : > { %v3949_v34 = vpop.f32.mrf.mxu0  ;;  %v3974_v43 = vpop.f32.mrf.mxu1 }
 0x22f   : > { %v3952_v8 = vadd.f32 %v3949_v34, %v3931_v49  ;;  %v4017_v34 = vadd.f32 %v4016_v28, %v3996_v3 }
 0x230   : > { %12317 = vmatmul.msk.f32.vlgmr.msrb.gmra.mxu2 %vm593_vm1, %v14226_v1  ;;  %12319 = vmatmul.msk.f32.vlgmr.msrb.gmra.mxu3 %vm593_vm1, %v14265_v29 }
 0x231   : > { %v14688_v25 = vadd.f32 %v3974_v43, %v3952_v8  ;;  %12297 = vmatmul.msk.f32.vlgmr.msra.gmra.mxu0 %vm593_vm1, %v14399_v58  ;;  %12299 = vmatmul.msk.f32.vlgmr.msra.gmra.mxu1 %vm593_vm1, %v14312_v47  ;;  %v14714_v8 = vld [vmem:[%s13264_s17 + $0x29] sm:$0x3f] }
 0x232   : > { %12312 = vmatpush.msk.msra.mxu0 %vm597_vm0, %v14507_v51  ;;  %12314 = vmatpush.msk.msra.mxu1 %vm597_vm0, %v14573_v46 }
 0x233   : > { %17449 = vst [vmem:[#allocation32_spill] sm:$0xff] %v14688_v25  ;;  %12332 = vmatpush.msk.msrb.mxu2 %vm597_vm0, %v14470_v26  ;;  %12334 = vmatpush.msk.msrb.mxu3 %vm597_vm0, %v14247_v33  ;;  %v4162_v21 = vpop.f32.mrf.mxu2  ;;  %v4183_v18 = vpop.f32.mrf.mxu3 }
 0x236   : > { %v4036_v7 = vpop.f32.mrf.mxu0  ;;  %v4057_v49 = vpop.f32.mrf.mxu1 }
 0x237   : > { %v4039_v43 = vadd.f32 %v4036_v7, %v4017_v34 }
 0x238   : > { %12325 = vmatmul.msk.f32.vlgmr.msra.gmra.mxu2 %vm593_vm1, %v14622_v10  ;;  %12327 = vmatmul.msk.f32.vlgmr.msra.gmra.mxu3 %vm593_vm1, %v14305_v35  ;;  %v14749_v35 = vpop.permute.xlu0 %5553 }
 0x239   : > { %12305 = vmatmul.msk.f32.vlgmr.msrb.gmra.mxu0 %vm593_vm1, %v14714_v8  ;;  %12307 = vmatmul.msk.f32.vlgmr.msrb.gmra.mxu1 %vm593_vm1, %v14719_v2  ;;  %v4060_v3 = vadd.f32 %v4057_v49, %v4039_v43 }
 0x23a   : > { %12320 = vmatpush.msk.msrb.mxu0 %vm597_vm0, %v14335_v15  ;;  %12322 = vmatpush.msk.msrb.mxu1 %vm597_vm0, %v14342_v30 }
 0x23b   : > { %12340 = vmatpush.msk.msra.mxu2 %vm597_vm0, %v14496_v38  ;;  %12342 = vmatpush.msk.msra.mxu3 %vm597_vm0, %v14287_v63  ;;  %v4246_v28 = vpop.f32.mrf.mxu2  ;;  %v14735_v7 = vpop.f32.mrf.mxu3  ;;  %v4081_v25 = vadd.f32 %v4078_v23, %v4060_v3 }
 0x23d   : > { %v4102_v23 = vadd.f32 %v4099_v22, %v4081_v25 }
 0x23e   : > { %v4120_v10 = vpop.f32.mrf.mxu0  ;;  %v4141_v34 = vpop.f32.mrf.mxu1 }
 0x23f   : > { %v4123_v31 = vadd.f32 %v4120_v10, %v4102_v23 }
 0x240   : > { %12333 = vmatmul.msk.f32.vlgmr.msrb.gmra.mxu2 %vm593_vm1, %v14607_v17  ;;  %12335 = vmatmul.msk.f32.vlgmr.msrb.gmra.mxu3 %vm593_vm1, %v14349_v44 }
 0x241   : > { %12313 = vmatmul.msk.f32.vlgmr.msra.gmra.mxu0 %vm593_vm1, %v14268_v39  ;;  %12315 = vmatmul.msk.f32.vlgmr.msra.gmra.mxu1 %vm593_vm1, %v14191_v52  ;;  %v4144_v22 = vadd.f32 %v4141_v34, %v4123_v31 }
 0x242   : > { %12328 = vmatpush.msk.msra.mxu0 %vm597_vm0, %v14214_v45  ;;  %12330 = vmatpush.msk.msra.mxu1 %vm597_vm0, %v14381_v60 }
 0x243   : > { %12348 = vmatpush.msk.msrb.mxu2 %vm597_vm0, %v14522_v40  ;;  %12350 = vmatpush.msk.msrb.mxu3 %vm597_vm0, %v14321_v20  ;;  %v14755_v49 = vpop.f32.mrf.mxu2  ;;  %v14757_v43 = vpop.f32.mrf.mxu3 }
 0x246   : > { %v4204_v3 = vpop.f32.mrf.mxu0  ;;  %v4225_v39 = vpop.f32.mrf.mxu1 }
 0x248   : > { %12341 = vmatmul.msk.f32.vlgmr.msra.gmra.mxu2 %vm593_vm1, %v13721_v55  ;;  %12343 = vmatmul.msk.f32.vlgmr.msra.gmra.mxu3 %vm593_vm1, %v14634_v59  ;;  %v4165_v55 = vadd.f32 %v4162_v21, %v4144_v22 }
 0x249   : > { %12321 = vmatmul.msk.f32.vlgmr.msrb.gmra.mxu0 %vm593_vm1, %v14749_v35  ;;  %12323 = vmatmul.msk.f32.vlgmr.msrb.gmra.mxu1 %vm593_vm1, %v14588_v61 }
 0x24a   : > { %12336 = vmatpush.msk.msrb.mxu0 %vm597_vm0, %v14254_v24  ;;  %12338 = vmatpush.msk.msrb.mxu1 %vm597_vm0, %v14426_v42  ;;  %v4186_v31 = vadd.f32 %v4183_v18, %v4165_v55 }
 0x24b   : > { %12356 = vmatpush.msk.msra.mxu2 %vm597_vm0, %v14546_v6  ;;  %12358 = vmatpush.msk.msra.mxu3 %vm597_vm0, %v14365_v57  ;;  %v14775_v25 = vpop.f32.mrf.mxu2  ;;  %v14777_v10 = vpop.f32.mrf.mxu3 }
 0x24e   : > { %v4288_v23 = vpop.f32.mrf.mxu0  ;;  %v4309_v61 = vpop.f32.mrf.mxu1 }
 0x250   : > { %12349 = vmatmul.msk.f32.vlgmr.msrb.gmra.mxu2 %vm593_vm1, %v13618_v50  ;;  %12351 = vmatmul.msk.f32.vlgmr.msrb.gmra.mxu3 %vm593_vm1, %v13739_v56 }
 0x251   : > { %12329 = vmatmul.msk.f32.vlgmr.msra.gmra.mxu0 %vm593_vm1, %v13501_v37  ;;  %12331 = vmatmul.msk.f32.vlgmr.msra.gmra.mxu1 %vm593_vm1, %v13649_v54  ;;  %v4207_v37 = vadd.f32 %v4204_v3, %v4186_v31 }
 0x252   : > { %12344 = vmatpush.msk.msra.mxu0 %vm597_vm0, %v14294_v12  ;;  %12346 = vmatpush.msk.msra.mxu1 %vm597_vm0, %v14453_v0 }
 0x253   : > { %12364 = vmatpush.msk.msrb.mxu2 %vm597_vm0, %v14573_v46  ;;  %12366 = vmatpush.msk.msrb.mxu3 %vm597_vm0, %v14410_v32  ;;  %v14795_v21 = vpop.f32.mrf.mxu2  ;;  %v4524_v34 = vpop.f32.mrf.mxu3  ;;  %v4228_v55 = vadd.f32 %v4225_v39, %v4207_v37 }
 0x255   : > { %v4249_v32 = vadd.f32 %v4246_v28, %v4228_v55 }
 0x256   : > { %v14797_v22 = vpop.f32.mrf.mxu0  ;;  %v14799_v54 = vpop.f32.mrf.mxu1 }
 0x257   : > { %v4270_v37 = vadd.f32 %v14735_v7, %v4249_v32 }
 0x258   : > { %12357 = vmatmul.msk.f32.vlgmr.msra.gmra.mxu2 %vm593_vm1, %v14539_v36  ;;  %12359 = vmatmul.msk.f32.vlgmr.msra.gmra.mxu3 %vm593_vm1, %v13815_v5 }
 0x259   : > { %12337 = vmatmul.msk.f32.vlgmr.msrb.gmra.mxu0 %vm593_vm1, %v14354_v53  ;;  %12339 = vmatmul.msk.f32.vlgmr.msrb.gmra.mxu1 %vm593_vm1, %v13521_v41 }
 0x25a   : > { %12352 = vmatpush.msk.msrb.mxu0 %vm597_vm0, %v14328_v9  ;;  %12354 = vmatpush.msk.msrb.mxu1 %vm597_vm0, %v14481_v16 }
 0x25b   : > { %12372 = vmatpush.msk.msra.mxu2 %vm597_vm0, %v14342_v30  ;;  %12374 = vmatpush.msk.msra.mxu3 %vm597_vm0, %v14442_v4  ;;  %v4585_v18 = vpop.f32.mrf.mxu2  ;;  %v4606_v3 = vpop.f32.mrf.mxu3 }
 0x25e   : > { %v14817_v31 = vpop.f32.mrf.mxu0  ;;  %v14819_v56 = vpop.f32.mrf.mxu1 }
 0x260   : > { %12365 = vmatmul.msk.f32.vlgmr.msrb.gmra.mxu2 %vm593_vm1, %v14226_v1  ;;  %12367 = vmatmul.msk.f32.vlgmr.msrb.gmra.mxu3 %vm593_vm1, %v14265_v29  ;;  %v4291_v29 = vadd.f32 %v4288_v23, %v4270_v37 }
 0x261   : > { %12345 = vmatmul.msk.f32.vlgmr.msra.gmra.mxu0 %vm593_vm1, %v14399_v58  ;;  %12347 = vmatmul.msk.f32.vlgmr.msra.gmra.mxu1 %vm593_vm1, %v14312_v47 }
 0x262   : > { %12360 = vmatpush.msk.msra.mxu0 %vm597_vm0, %v14372_v11  ;;  %12362 = vmatpush.msk.msra.mxu1 %vm597_vm0, %v14507_v51 }
 0x263   : > { %12380 = vmatpush.msk.msrb.mxu2 %vm597_vm0, %v14381_v60  ;;  %12382 = vmatpush.msk.msrb.mxu3 %vm597_vm0, %v14470_v26  ;;  %v4669_v39 = vpop.f32.mrf.mxu2  ;;  %v4690_v28 = vpop.f32.mrf.mxu3 }
 0x266   : > { %v4544_v55 = vpop.f32.mrf.mxu0  ;;  %v4564_v4 = vpop.f32.mrf.mxu1 }
 0x267   : > { %v4545_v5 = vadd.f32 %v4544_v55, %v4524_v34 }
 0x268   : > { %12373 = vmatmul.msk.f32.vlgmr.msra.gmra.mxu2 %vm593_vm1, %v14607_v17  ;;  %12375 = vmatmul.msk.f32.vlgmr.msra.gmra.mxu3 %vm593_vm1, %v14649_v19 }
 0x269   : > { %v4567_v57 = vadd.f32 %v4564_v4, %v4545_v5  ;;  %12353 = vmatmul.msk.f32.vlgmr.msrb.gmra.mxu0 %vm593_vm1, %v14714_v8  ;;  %12355 = vmatmul.msk.f32.vlgmr.msrb.gmra.mxu1 %vm593_vm1, %v14719_v2  ;;  %v4312_v5 = vadd.f32 %v4309_v61, %v4291_v29 }
 0x26a   : > { %12368 = vmatpush.msk.msrb.mxu0 %vm597_vm0, %v14417_v62  ;;  %12370 = vmatpush.msk.msrb.mxu1 %vm597_vm0, %v14335_v15 }
 0x26b   : > { %v4588_v32 = vadd.f32 %v4585_v18, %v4567_v57  ;;  %12388 = vmatpush.msk.msra.mxu2 %vm597_vm0, %v14426_v42  ;;  %12390 = vmatpush.msk.msra.mxu3 %vm597_vm0, %v14496_v38  ;;  %v4753_v4 = vpop.f32.mrf.mxu2  ;;  %v4774_v7 = vpop.f32.mrf.mxu3  ;;  %v4333_v57 = vadd.f32 %v14755_v49, %v4312_v5 }
 0x26c   : > { %v14872_v5 = vpop.permute.xlu1 %6080 }
 0x26d   : > { %v4609_v23 = vadd.f32 %v4606_v3, %v4588_v32  ;;  %v4354_v61 = vadd.f32 %v14757_v43, %v4333_v57  ;;  %17450 = vst [vmem:[#allocation33_spill] sm:$0xff] %v14872_v5 }
 0x26e   : > { %v4627_v34 = vpop.f32.mrf.mxu0  ;;  %v4648_v37 = vpop.f32.mrf.mxu1 }
 0x26f   : > { %v4630_v19 = vadd.f32 %v4627_v34, %v4609_v23 }
 0x270   : > { %12381 = vmatmul.msk.f32.vlgmr.msrb.gmra.mxu2 %vm593_vm1, %v13521_v41  ;;  %12383 = vmatmul.msk.f32.vlgmr.msrb.gmra.mxu3 %vm593_vm1, %v14629_v14 }
 0x271   : > { %v4651_v18 = vadd.f32 %v4648_v37, %v4630_v19  ;;  %12361 = vmatmul.msk.f32.vlgmr.msra.gmra.mxu0 %vm593_vm1, %v17444_v48  ;;  %12363 = vmatmul.msk.f32.vlgmr.msra.gmra.mxu1 %vm593_vm1, %v14191_v52  ;;  %v14893_v19 = vld [vmem:[%s13264_s17 + $0x71] sm:$0x3f] }
 0x272   : > { %12376 = vmatpush.msk.msra.mxu0 %vm597_vm0, %v14207_v27  ;;  %12378 = vmatpush.msk.msra.mxu1 %vm597_vm0, %v14214_v45  ;;  %v4375_v27 = vadd.f32 %v14797_v22, %v4354_v61 }
 0x273   : > { %v4672_v29 = vadd.f32 %v4669_v39, %v4651_v18  ;;  %12396 = vmatpush.msk.msrb.mxu2 %vm597_vm0, %v14453_v0  ;;  %12398 = vmatpush.msk.msrb.mxu3 %vm597_vm0, %v14522_v40  ;;  %v4837_v49 = vpop.f32.mrf.mxu2  ;;  %v4858_v3 = vpop.f32.mrf.mxu3 }
 0x274   : > { %v4396_v22 = vadd.f32 %v14799_v54, %v4375_v27  ;;  %8735 = vrot.lane.b32.xlu0 %v14893_v19, %s13148_s21 }
 0x275   : > { %v4693_v55 = vadd.f32 %v4690_v28, %v4672_v29 }
 0x276   : > { %v4711_v32 = vpop.f32.mrf.mxu0  ;;  %v4732_v14 = vpop.f32.mrf.mxu1  ;;  %v4417_v18 = vadd.f32 %v14775_v25, %v4396_v22 }
 0x277   : > { %v4714_v39 = vadd.f32 %v4711_v32, %v4693_v55 }
 0x278   : > { %12389 = vmatmul.msk.f32.vlgmr.msra.gmra.mxu2 %vm593_vm1, %v14312_v47  ;;  %12391 = vmatmul.msk.f32.vlgmr.msra.gmra.mxu3 %vm593_vm1, %v13618_v50  ;;  %v4438_v25 = vadd.f32 %v14777_v10, %v4417_v18 }
 0x279   : > { %v4735_v23 = vadd.f32 %v4732_v14, %v4714_v39  ;;  %12369 = vmatmul.msk.f32.vlgmr.msrb.gmra.mxu0 %vm593_vm1, %v14749_v35  ;;  %12371 = vmatmul.msk.f32.vlgmr.msrb.gmra.mxu1 %vm593_vm1, %v14872_v5 }
 0x27a   : > { %12384 = vmatpush.msk.msrb.mxu0 %vm597_vm0, %v14247_v33  ;;  %12386 = vmatpush.msk.msrb.mxu1 %vm597_vm0, %v14254_v24  ;;  %v4459_v39 = vadd.f32 %v14817_v31, %v4438_v25 }
 0x27b   : > { %v4756_v43 = vadd.f32 %v4753_v4, %v4735_v23  ;;  %12404 = vmatpush.msk.msra.mxu2 %vm597_vm0, %v14481_v16  ;;  %12406 = vmatpush.msk.msra.mxu3 %vm597_vm0, %v14546_v6  ;;  %v4921_v28 = vpop.f32.mrf.mxu2  ;;  %v4942_v34 = vpop.f32.mrf.mxu3 }
 0x27c   : > { %v4480_v31 = vadd.f32 %v14819_v56, %v4459_v39 }
 0x27d   : > { %v4777_v37 = vadd.f32 %v4774_v7, %v4756_v43 }
 0x27e   : > { %v4795_v4 = vpop.f32.mrf.mxu0  ;;  %v4816_v57 = vpop.f32.mrf.mxu1  ;;  %v4505_v22 = vadd.f32 %v14795_v21, %v4480_v31  ;;  %v17454_v21 = vld [vmem:[#allocation31_spill] sm:$0xff] }
 0x27f   : > { %v4798_v33 = vadd.f32 %v4795_v4, %v4777_v37 }
 0x280   : > { %12397 = vmatmul.msk.f32.vlgmr.msrb.gmra.mxu2 %vm593_vm1, %v14719_v2  ;;  %12399 = vmatmul.msk.f32.vlgmr.msrb.gmra.mxu3 %vm593_vm1, %v14539_v36 }
 0x281   : > { %v4819_v29 = vadd.f32 %v4816_v57, %v4798_v33  ;;  %12377 = vmatmul.msk.f32.vlgmr.msra.gmra.mxu0 %vm593_vm1, %v14349_v44  ;;  %12379 = vmatmul.msk.f32.vlgmr.msra.gmra.mxu1 %vm593_vm1, %v14354_v53 }
 0x282   : > { %12392 = vmatpush.msk.msra.mxu0 %vm597_vm0, %v14287_v63  ;;  %12394 = vmatpush.msk.msra.mxu1 %vm597_vm0, %v14294_v12 }
 0x283   : > { %v4840_v54 = vadd.f32 %v4837_v49, %v4819_v29  ;;  %12412 = vmatpush.msk.msrb.mxu2 %vm597_vm0, %v14507_v51  ;;  %12414 = vmatpush.msk.msrb.mxu3 %vm597_vm0, %v14573_v46  ;;  %v5005_v7 = vpop.f32.mrf.mxu2  ;;  %v5030_v61 = vpop.f32.mrf.mxu3 }
 0x285   : > { %v4861_v55 = vadd.f32 %v4858_v3, %v4840_v54 }
 0x286   : > { %v4879_v32 = vpop.f32.mrf.mxu0  ;;  %v4900_v14 = vpop.f32.mrf.mxu1 }
 0x287   : > { %v4882_v49 = vadd.f32 %v4879_v32, %v4861_v55  ;;  %v14953_v55 = vpop.permute.xlu2 %6620  ;;  %v17458_v32 = vld [vmem:[#allocation25_spill] sm:$0xff] }
 0x288   : > { %12405 = vmatmul.msk.f32.vlgmr.msra.gmra.mxu2 %vm593_vm1, %v14191_v52  ;;  %12407 = vmatmul.msk.f32.vlgmr.msra.gmra.mxu3 %vm593_vm1, %v14226_v1 }
 0x289   : > { %v4903_v63 = vadd.f32 %v4900_v14, %v4882_v49  ;;  %12385 = vmatmul.msk.f32.vlgmr.msrb.gmra.mxu0 %vm593_vm1, %v14634_v59  ;;  %12387 = vmatmul.msk.f32.vlgmr.msrb.gmra.mxu1 %vm593_vm1, %v14399_v58 }
 0x28a   : > { %12400 = vmatpush.msk.msrb.mxu0 %vm597_vm0, %v14321_v20  ;;  %12402 = vmatpush.msk.msrb.mxu1 %vm597_vm0, %v14328_v9 }
 0x28b   : > { %v4924_v10 = vadd.f32 %v4921_v28, %v4903_v63  ;;  %12420 = vmatpush.msk.msra.mxu2 %vm597_vm0, %v14335_v15  ;;  %12422 = vmatpush.msk.msra.mxu3 %vm597_vm0, %v14342_v30  ;;  %v5096_v3 = vpop.f32.mrf.mxu2  ;;  %v5117_v52 = vpop.f32.mrf.mxu3  ;;  %v17451_v28 = vld [vmem:[#allocation30_spill] sm:$0xff]  ;;  %v17452_v15 = vld [vmem:[#allocation21_spill] sm:$0xff]  ;;  %v17453_v30 = vld [vmem:[#allocation24_spill] sm:$0xff] }
 0x28c   : > { %17457 = vst [vmem:[#allocation30_spill] sm:$0xff] %v14953_v55  ;;  %v17461_v63 = vld [vmem:[#allocation27_spill] sm:$0xff] }
 0x28d   : > { %v4945_v27 = vadd.f32 %v4942_v34, %v4924_v10  ;;  %v17455_v34 = vld [vmem:[#allocation32_spill] sm:$0xff] }
 0x28e   : > { %v4963_v23 = vpop.f32.mrf.mxu0  ;;  %v4984_v1 = vpop.f32.mrf.mxu1  ;;  %v17456_v37 = vmax.f32 %v17454_v21, %v17455_v34 }
 0x28f   : > { %v4966_v43 = vadd.f32 %v4963_v23, %v4945_v27  ;;  %v17462_v23 = vld [vmem:[#allocation22_spill] sm:$0xff] }
 0x290   : > { %12413 = vmatmul.msk.f32.vlgmr.msrb.gmra.mxu2 %vm593_vm1, %v17452_v15  ;;  %12415 = vmatmul.msk.f32.vlgmr.msrb.gmra.mxu3 %vm593_vm1, %v14709_v13  ;;  %v4506_v4 = vmax.f32 %v17456_v37, %v4505_v22  ;;  %v14998_v37 = vld [vmem:[%s13264_s17 + $0x79] sm:$0x3f] }
 0x291   : > { %v4987_v20 = vadd.f32 %v4984_v1, %v4966_v43  ;;  %12393 = vmatmul.msk.f32.vlgmr.msra.gmra.mxu0 %vm593_vm1, %v17451_v28  ;;  %12395 = vmatmul.msk.f32.vlgmr.msra.gmra.mxu1 %vm593_vm1, %v14714_v8  ;;  %v17464_v1 = vld [vmem:[#allocation28_spill] sm:$0xff]  ;;  %v14986_v43 = vld [vmem:[%s17208_s1 + $0x10] sm:$0x3f] }
 0x292   : > { %12408 = vmatpush.msk.msra.mxu0 %vm597_vm0, %v17453_v30  ;;  %12410 = vmatpush.msk.msra.mxu1 %vm597_vm0, %v14372_v11 }
 0x293   : > { %v5008_v56 = vadd.f32 %v5005_v7, %v4987_v20  ;;  %12428 = vmatpush.msk.msrb.mxu2 %vm597_vm0, %v14214_v45  ;;  %12430 = vmatpush.msk.msrb.mxu3 %vm597_vm0, %v14381_v60  ;;  %v5180_v33 = vpop.f32.mrf.mxu2  ;;  %v5201_v18 = vpop.f32.mrf.mxu3  ;;  %v17459_v45 = vld [vmem:[#allocation15_spill] sm:$0xff] }
 0x294   : > { %v17460_v60 = vld [vmem:[#allocation23_spill] sm:$0xff] }
 0x295   : > { %v5033_v57 = vadd.f32 %v5030_v61, %v5008_v56 }
 0x296   : > { %v5056_v29 = vpop.f32.mrf.mxu0  ;;  %v5076_v54 = vpop.f32.mrf.mxu1 }
 0x297   : > { %v5034_v25 = vmax.f32 %v4506_v4, %v5033_v57  ;;  %v5077_v7 = vadd.f32 %v5076_v54, %v5056_v29 }
 0x298   : > { %12421 = vmatmul.msk.f32.vlgmr.msra.gmra.mxu2 %vm593_vm1, %v14953_v55  ;;  %12423 = vmatmul.msk.f32.vlgmr.msra.gmra.mxu3 %vm593_vm1, %v14349_v44 }
 0x299   : > { %v5035_v14 = vadd.f32 %v17458_v32, %v5034_v25  ;;  %v5099_v49 = vadd.f32 %v5096_v3, %v5077_v7  ;;  %12401 = vmatmul.msk.f32.vlgmr.msrb.gmra.mxu0 %vm593_vm1, %v17459_v45  ;;  %12403 = vmatmul.msk.f32.vlgmr.msrb.gmra.mxu1 %vm593_vm1, %v17460_v60  ;;  %v15056_v60 = vld [vmem:[%s17208_s1 + $0x70] sm:$0x3f] }
 0x29a   : > { %12416 = vmatpush.msk.msrb.mxu0 %vm597_vm0, %v17461_v63  ;;  %12418 = vmatpush.msk.msrb.mxu1 %vm597_vm0, %v14417_v62 }
 0x29b   : > { %v5036_v61 = vmax.f32 %v5035_v14, 0.0  ;;  %v5120_v39 = vadd.f32 %v5117_v52, %v5099_v49  ;;  %12436 = vmatpush.msk.msra.mxu2 %vm597_vm0, %v14254_v24  ;;  %12438 = vmatpush.msk.msra.mxu3 %vm597_vm0, %v14426_v42  ;;  %v5264_v10 = vpop.f32.mrf.mxu2  ;;  %v5285_v31 = vpop.f32.mrf.mxu3  ;;  %v17463_v24 = vld [vmem:[#allocation13_spill] sm:$0xff] }
 0x29c   : > { %v12918_v49 = vld [vmem:[%s13264_s17 + $0x49] sm:$0x3f] }
 0x29d   : > { %5038 = vst.msk [vmem:[#allocation2 + $0x8] sm:$0x3f] %vm2890_vm2, %v5036_v61 }
 0x29e   : > { %v5138_v3 = vpop.f32.mrf.mxu0  ;;  %v5159_v44 = vpop.f32.mrf.mxu1 }
 0x29f   : > { %v5141_v27 = vadd.f32 %v5138_v3, %v5120_v39 }
 0x2a0   : > { %12429 = vmatmul.msk.f32.vlgmr.msrb.gmra.mxu2 %vm593_vm1, %v13521_v41  ;;  %12431 = vmatmul.msk.f32.vlgmr.msrb.gmra.mxu3 %vm593_vm1, %v17463_v24 }
 0x2a1   : > { %v5162_v52 = vadd.f32 %v5159_v44, %v5141_v27  ;;  %12409 = vmatmul.msk.f32.vlgmr.msra.gmra.mxu0 %vm593_vm1, %v17462_v23  ;;  %12411 = vmatmul.msk.f32.vlgmr.msra.gmra.mxu1 %vm593_vm1, %v14749_v35  ;;  %v17466_v44 = vld [vmem:[#allocation14_spill] sm:$0xff] }
 0x2a2   : > { %12424 = vmatpush.msk.msra.mxu0 %vm597_vm0, %v17464_v1  ;;  %12426 = vmatpush.msk.msra.mxu1 %vm597_vm0, %v14986_v43  ;;  %v15082_v27 = vld [vmem:[%s17208_s1 + $0x90] sm:$0x3f] }
 0x2a3   : > { %v5183_v42 = vadd.f32 %v5180_v33, %v5162_v52  ;;  %12444 = vmatpush.msk.msrb.mxu2 %vm597_vm0, %v14294_v12  ;;  %12446 = vmatpush.msk.msrb.mxu3 %vm597_vm0, %v14453_v0  ;;  %v5348_v20 = vpop.f32.mrf.mxu2  ;;  %v5369_v28 = vpop.f32.mrf.mxu3  ;;  %v15011_v0 = vld [vmem:[%s17208_s1 + $0x30] sm:$0x3f]  ;;  %17467 = vst [vmem:[#allocation24_spill] sm:$0xff] %v15082_v27 }
 0x2a4   : > { %v9294_v22 = vld [vmem:[#allocation2 + $0x8] sm:$0xf] }
 0x2a5   : > { %9378 = vrot.lane.b32.xlu0 %v9294_v22, %s13150_s16  ;;  %v5204_v15 = vadd.f32 %v5201_v18, %v5183_v42 }
 0x2a6   : > { %v5222_v56 = vpop.f32.mrf.mxu0  ;;  %v5243_v30 = vpop.f32.mrf.mxu1 }
 0x2a7   : > { %v5225_v21 = vadd.f32 %v5222_v56, %v5204_v15  ;;  %v15114_v56 = vld [vmem:[%s17208_s1 + $0xb0] sm:$0x3f] }
 0x2a8   : > { %12437 = vmatmul.msk.f32.vlgmr.msra.gmra.mxu2 %vm593_vm1, %v14312_v47  ;;  %12439 = vmatmul.msk.f32.vlgmr.msra.gmra.mxu3 %vm593_vm1, %v13618_v50  ;;  %17469 = vst [vmem:[#allocation32_spill] sm:$0xff] %v15114_v56 }
 0x2a9   : > { %v5246_v34 = vadd.f32 %v5243_v30, %v5225_v21  ;;  %12417 = vmatmul.msk.f32.vlgmr.msrb.gmra.mxu0 %vm593_vm1, %v14893_v19  ;;  %12419 = vmatmul.msk.f32.vlgmr.msrb.gmra.mxu1 %vm593_vm1, %v14998_v37  ;;  %v15123_v30 = vld [vmem:[%s17208_s1 + $0x38] sm:$0x3f] }
 0x2aa   : > { %12432 = vmatpush.msk.msrb.mxu0 %vm597_vm0, %v14470_v26  ;;  %12434 = vmatpush.msk.msrb.mxu1 %vm597_vm0, %v15011_v0 }
 0x2ab   : > { %v5267_v12 = vadd.f32 %v5264_v10, %v5246_v34  ;;  %12452 = vmatpush.msk.msra.mxu2 %vm597_vm0, %v14328_v9  ;;  %12454 = vmatpush.msk.msra.mxu3 %vm597_vm0, %v14481_v16  ;;  %v5432_v47 = vpop.f32.mrf.mxu2  ;;  %v5453_v4 = vpop.f32.mrf.mxu3  ;;  %v15032_v16 = vld [vmem:[%s17208_s1 + $0x50] sm:$0x3f] }
 0x2ad   : > { %v5288_v57 = vadd.f32 %v5285_v31, %v5267_v12 }
 0x2ae   : > { %v5306_v33 = vpop.f32.mrf.mxu0  ;;  %v5327_v18 = vpop.f32.mrf.mxu1 }
 0x2af   : > { %v5309_v29 = vadd.f32 %v5306_v33, %v5288_v57  ;;  %v15128_v33 = vld [vmem:[%s13264_s17 + $0x59] sm:$0x3f] }
 0x2b0   : > { %12445 = vmatmul.msk.f32.vlgmr.msrb.gmra.mxu2 %vm593_vm1, %v14719_v2  ;;  %12447 = vmatmul.msk.f32.vlgmr.msrb.gmra.mxu3 %vm593_vm1, %v14539_v36 }
 0x2b1   : > { %v5330_v54 = vadd.f32 %v5327_v18, %v5309_v29  ;;  %12425 = vmatmul.msk.f32.vlgmr.msra.gmra.mxu0 %vm593_vm1, %v14607_v17  ;;  %12427 = vmatmul.msk.f32.vlgmr.msra.gmra.mxu1 %vm593_vm1, %v14354_v53  ;;  %v17470_v18 = vld [vmem:[#allocation11_spill] sm:$0xff]  ;;  %v17471_v29 = vld [vmem:[#allocation12_spill] sm:$0xff] }
 0x2b2   : > { %12440 = vmatpush.msk.msra.mxu0 %vm597_vm0, %v14496_v38  ;;  %12442 = vmatpush.msk.msra.mxu1 %vm597_vm0, %v15032_v16 }
 0x2b3   : > { %v5351_v9 = vadd.f32 %v5348_v20, %v5330_v54  ;;  %12460 = vmatpush.msk.msrb.mxu2 %vm597_vm0, %v14372_v11  ;;  %12462 = vmatpush.msk.msrb.mxu3 %vm597_vm0, %v14507_v51  ;;  %v5525_v53 = vpop.f32.mrf.mxu2  ;;  %v5549_v36 = vpop.f32.mrf.mxu3  ;;  %v15047_v11 = vld [vmem:[%s13264_s17 + $0x51] sm:$0x3f] }
 0x2b4   : > { %17465 = vst [vmem:[#allocation21_spill] sm:$0xff] %v15047_v11 }
 0x2b5   : > { %v5372_v17 = vadd.f32 %v5369_v28, %v5351_v9  ;;  %v15099_v28 = vpop.permute.xlu0 %7148  ;;  %v15141_v9 = vld [vmem:[%s17208_s1 + $0x8] sm:$0x3f] }
 0x2b6   : > { %v5390_v25 = vpop.f32.mrf.mxu0  ;;  %v5411_v7 = vpop.f32.mrf.mxu1  ;;  %17468 = vst [vmem:[#allocation31_spill] sm:$0xff] %v15099_v28 }
 0x2b7   : > { %v5393_v32 = vadd.f32 %v5390_v25, %v5372_v17 }
 0x2b8   : > { %12453 = vmatmul.msk.f32.vlgmr.msra.gmra.mxu2 %vm593_vm1, %v12918_v49  ;;  %12455 = vmatmul.msk.f32.vlgmr.msra.gmra.mxu3 %vm593_vm1, %v15047_v11 }
 0x2b9   : > { %v5414_v14 = vadd.f32 %v5411_v7, %v5393_v32  ;;  %12433 = vmatmul.msk.f32.vlgmr.msrb.gmra.mxu0 %vm593_vm1, %v14634_v59  ;;  %12435 = vmatmul.msk.f32.vlgmr.msrb.gmra.mxu1 %vm593_vm1, %v14399_v58  ;;  %v15065_v59 = vld [vmem:[%s17208_s1 + $0xc0] sm:$0x3f] }
 0x2ba   : > { %12448 = vmatpush.msk.msrb.mxu0 %vm597_vm0, %v14522_v40  ;;  %12450 = vmatpush.msk.msrb.mxu1 %vm597_vm0, %v15056_v60 }
 0x2bb   : > { %v5435_v51 = vadd.f32 %v5432_v47, %v5414_v14  ;;  %12468 = vmatpush.msk.msra.mxu2 %vm597_vm0, %v14417_v62  ;;  %12470 = vmatpush.msk.msra.mxu3 %vm597_vm0, %v15065_v59  ;;  %v5615_v58 = vpop.f32.mrf.mxu2  ;;  %v5635_v61 = vpop.f32.mrf.mxu3 }
 0x2bd   : > { %v5456_v39 = vadd.f32 %v5453_v4, %v5435_v51 }
 0x2be   : > { %v5477_v63 = vpop.f32.mrf.mxu0  ;;  %v5501_v10 = vpop.f32.mrf.mxu1 }
 0x2bf   : > { %v5480_v31 = vadd.f32 %v5477_v63, %v5456_v39 }
 0x2c0   : > { %12461 = vmatmul.msk.f32.vlgmr.msrb.gmra.mxu2 %vm593_vm1, %v14872_v5  ;;  %12463 = vmatmul.msk.f32.vlgmr.msrb.gmra.mxu3 %vm593_vm1, %v14709_v13 }
 0x2c1   : > { %v5504_v3 = vadd.f32 %v5501_v10, %v5480_v31  ;;  %12441 = vmatmul.msk.f32.vlgmr.msra.gmra.mxu0 %vm593_vm1, %v17466_v44  ;;  %12443 = vmatmul.msk.f32.vlgmr.msra.gmra.mxu1 %vm593_vm1, %v14714_v8  ;;  %v15091_v8 = vld [vmem:[%s17208_s1 + $0x18] sm:$0x3f] }
 0x2c2   : > { %12456 = vmatpush.msk.msra.mxu0 %vm597_vm0, %v14546_v6  ;;  %12458 = vmatpush.msk.msra.mxu1 %vm597_vm0, %v15082_v27 }
 0x2c3   : > { %v5528_v62 = vadd.f32 %v5525_v53, %v5504_v3  ;;  %12476 = vmatpush.msk.msrb.mxu2 %vm597_vm0, %v14986_v43  ;;  %12478 = vmatpush.msk.msrb.mxu3 %vm597_vm0, %v15091_v8  ;;  %v5698_v13 = vpop.f32.mrf.mxu2  ;;  %v5719_v52 = vpop.f32.mrf.mxu3  ;;  %v15152_v53 = vld [vmem:[%s17208_s1 + $0x58] sm:$0x3f] }
 0x2c5   : > { %v15095_v23 = vadd.f32 %v5549_v36, %v5528_v62 }
 0x2c6   : > { %v15097_v42 = vpop.f32.mrf.mxu0  ;;  %v5595_v22 = vpop.f32.mrf.mxu1 }
 0x2c7   : > { %v5616_v20 = vadd.f32 %v5615_v58, %v5595_v22  ;;  %v15170_v58 = vld [vmem:[%s17208_s1 + $0x20] sm:$0x3f]  ;;  %v15193_v22 = vld [vmem:[%s13264_s17 + $0x11] sm:$0x3f] }
 0x2c8   : > { %12469 = vmatmul.msk.f32.vlgmr.msra.gmra.mxu2 %vm593_vm1, %v14953_v55  ;;  %12471 = vmatmul.msk.f32.vlgmr.msra.gmra.mxu3 %vm593_vm1, %v15099_v28  ;;  %v17480_v28 = vld [vmem:[#allocation19_spill] sm:$0xff] }
 0x2c9   : > { %12449 = vmatmul.msk.f32.vlgmr.msrb.gmra.mxu0 %vm593_vm1, %v17459_v45  ;;  %12451 = vmatmul.msk.f32.vlgmr.msrb.gmra.mxu1 %vm593_vm1, %v17444_v48  ;;  %v5638_v15 = vadd.f32 %v5635_v61, %v5616_v20  ;;  %v15181_v61 = vld [vmem:[%s17208_s1 + $0x78] sm:$0x3f] }
 0x2ca   : > { %12464 = vmatpush.msk.msrb.mxu0 %vm597_vm0, %v14573_v46  ;;  %12466 = vmatpush.msk.msrb.mxu1 %vm597_vm0, %v15114_v56  ;;  %v15198_v20 = vld [vmem:[%s13264_s17 + $0x19] sm:$0x3f] }
 0x2cb   : > { %12484 = vmatpush.msk.msra.mxu2 %vm597_vm0, %v15011_v0  ;;  %12486 = vmatpush.msk.msra.mxu3 %vm597_vm0, %v15123_v30  ;;  %v5782_v21 = vpop.f32.mrf.mxu2  ;;  %v5803_v34 = vpop.f32.mrf.mxu3 }
 0x2ce   : > { %v5656_v12 = vpop.f32.mrf.mxu0  ;;  %v5677_v47 = vpop.f32.mrf.mxu1 }
 0x2cf   : > { %v5659_v4 = vadd.f32 %v5656_v12, %v5638_v15 }
 0x2d0   : > { %12477 = vmatmul.msk.f32.vlgmr.msrb.gmra.mxu2 %vm593_vm1, %v17470_v18  ;;  %12479 = vmatmul.msk.f32.vlgmr.msrb.gmra.mxu3 %vm593_vm1, %v17471_v29 }
 0x2d1   : > { %v5680_v57 = vadd.f32 %v5677_v47, %v5659_v4  ;;  %12457 = vmatmul.msk.f32.vlgmr.msra.gmra.mxu0 %vm593_vm1, %v15128_v33  ;;  %12459 = vmatmul.msk.f32.vlgmr.msra.gmra.mxu1 %vm593_vm1, %v14749_v35 }
 0x2d2   : > { %12472 = vmatpush.msk.msra.mxu0 %vm597_vm0, %v15141_v9  ;;  %12474 = vmatpush.msk.msra.mxu1 %vm597_vm0, %v17464_v1  ;;  %v15161_v1 = vld [vmem:[%s13264_s17 + $0x78] sm:$0x3f] }
 0x2d3   : > { %v5701_v54 = vadd.f32 %v5698_v13, %v5680_v57  ;;  %12492 = vmatpush.msk.msrb.mxu2 %vm597_vm0, %v15032_v16  ;;  %12494 = vmatpush.msk.msrb.mxu3 %vm597_vm0, %v15152_v53  ;;  %v5866_v36 = vpop.f32.mrf.mxu2  ;;  %v5887_v17 = vpop.f32.mrf.mxu3 }
 0x2d5   : > { %v5722_v25 = vadd.f32 %v5719_v52, %v5701_v54  ;;  %v17472_v52 = vld [vmem:[#allocation29_spill] sm:$0xff] }
 0x2d6   : > { %v5740_v7 = vpop.f32.mrf.mxu0  ;;  %v5761_v32 = vpop.f32.mrf.mxu1 }
 0x2d7   : > { %v5743_v14 = vadd.f32 %v5740_v7, %v5722_v25  ;;  %v17473_v7 = vld [vmem:[#allocation9_spill] sm:$0xff] }
 0x2d8   : > { %12485 = vmatmul.msk.f32.vlgmr.msra.gmra.mxu2 %vm593_vm1, %v15161_v1  ;;  %12487 = vmatmul.msk.f32.vlgmr.msra.gmra.mxu3 %vm593_vm1, %v13521_v41 }
 0x2d9   : > { %v5764_v49 = vadd.f32 %v5761_v32, %v5743_v14  ;;  %12465 = vmatmul.msk.f32.vlgmr.msrb.gmra.mxu0 %vm593_vm1, %v14893_v19  ;;  %12467 = vmatmul.msk.f32.vlgmr.msrb.gmra.mxu1 %vm593_vm1, %v14998_v37  ;;  %v17474_v32 = vld [vmem:[#allocation17_spill] sm:$0xff] }
 0x2da   : > { %12480 = vmatpush.msk.msrb.mxu0 %vm597_vm0, %v15170_v58  ;;  %12482 = vmatpush.msk.msrb.mxu1 %vm597_vm0, %v14470_v26  ;;  %v15186_v26 = vld [vmem:[%s13264_s17 + $0x58] sm:$0x3f] }
 0x2db   : > { %v5785_v51 = vadd.f32 %v5782_v21, %v5764_v49  ;;  %12500 = vmatpush.msk.msra.mxu2 %vm597_vm0, %v15056_v60  ;;  %12502 = vmatpush.msk.msra.mxu3 %vm597_vm0, %v15181_v61  ;;  %v5950_v39 = vpop.f32.mrf.mxu2  ;;  %v5971_v63 = vpop.f32.mrf.mxu3  ;;  %v15205_v21 = vld [vmem:[%s17208_s1 + $0x40] sm:$0x3f]  ;;  %v15245_v49 = vld [vmem:[%s17208_s1 + $0xb8] sm:$0x3f] }
 0x2dd   : > { %v5806_v10 = vadd.f32 %v5803_v34, %v5785_v51  ;;  %v15216_v34 = vld [vmem:[%s17208_s1 + $0x98] sm:$0x3f] }
 0x2de   : > { %v5824_v31 = vpop.f32.mrf.mxu0  ;;  %v5845_v3 = vpop.f32.mrf.mxu1 }
 0x2df   : > { %v5827_v62 = vadd.f32 %v5824_v31, %v5806_v10 }
 0x2e0   : > { %12493 = vmatmul.msk.f32.vlgmr.msrb.gmra.mxu2 %vm593_vm1, %v15193_v22  ;;  %12495 = vmatmul.msk.f32.vlgmr.msrb.gmra.mxu3 %vm593_vm1, %v15198_v20 }
 0x2e1   : > { %v5848_v13 = vadd.f32 %v5845_v3, %v5827_v62  ;;  %12473 = vmatmul.msk.f32.vlgmr.msra.gmra.mxu0 %vm593_vm1, %v15186_v26  ;;  %12475 = vmatmul.msk.f32.vlgmr.msra.gmra.mxu1 %vm593_vm1, %v17472_v52 }
 0x2e2   : > { %12488 = vmatpush.msk.msra.mxu0 %vm597_vm0, %v15205_v21  ;;  %12490 = vmatpush.msk.msra.mxu1 %vm597_vm0, %v14496_v38  ;;  %v15223_v38 = vld [vmem:[%s13264_s17 + $0x70] sm:$0x3f] }
 0x2e3   : > { %v5869_v15 = vadd.f32 %v5866_v36, %v5848_v13  ;;  %12508 = vmatpush.msk.msrb.mxu2 %vm597_vm0, %v15082_v27  ;;  %12510 = vmatpush.msk.msrb.mxu3 %vm597_vm0, %v15216_v34  ;;  %v6034_v12 = vpop.f32.mrf.mxu2  ;;  %v6055_v47 = vpop.f32.mrf.mxu3  ;;  %v17476_v13 = vld [vmem:[#allocation26_spill] sm:$0xff] }
 0x2e5   : > { %v5890_v4 = vadd.f32 %v5887_v17, %v5869_v15  ;;  %v15234_v17 = vld [vmem:[%s17208_s1 + $0x60] sm:$0x3f] }
 0x2e6   : > { %v5908_v57 = vpop.f32.mrf.mxu0  ;;  %v5929_v54 = vpop.f32.mrf.mxu1  ;;  %v15269_v15 = vld [vmem:[%s17208_s1] sm:$0x3f] }
 0x2e7   : > { %v5911_v36 = vadd.f32 %v5908_v57, %v5890_v4  ;;  %17477 = vst [vmem:[#allocation25_spill] sm:$0xff] %v15269_v15 }
 0x2e8   : > { %12501 = vmatmul.msk.f32.vlgmr.msra.gmra.mxu2 %vm593_vm1, %v17474_v32  ;;  %12503 = vmatmul.msk.f32.vlgmr.msra.gmra.mxu3 %vm593_vm1, %v14719_v2 }
 0x2e9   : > { %v5932_v25 = vadd.f32 %v5929_v54, %v5911_v36  ;;  %12481 = vmatmul.msk.f32.vlgmr.msrb.gmra.mxu0 %vm593_vm1, %v17473_v7  ;;  %12483 = vmatmul.msk.f32.vlgmr.msrb.gmra.mxu1 %vm593_vm1, %v15223_v38 }
 0x2ea   : > { %12496 = vmatpush.msk.msrb.mxu0 %vm597_vm0, %v15234_v17  ;;  %12498 = vmatpush.msk.msrb.mxu1 %vm597_vm0, %v14522_v40  ;;  %v17475_v40 = vld [vmem:[#allocation10_spill] sm:$0xff] }
 0x2eb   : > { %v5953_v14 = vadd.f32 %v5950_v39, %v5932_v25  ;;  %12516 = vmatpush.msk.msra.mxu2 %vm597_vm0, %v15114_v56  ;;  %12518 = vmatpush.msk.msra.mxu3 %vm597_vm0, %v15245_v49  ;;  %v6123_v2 = vpop.f32.mrf.mxu2  ;;  %v6143_v51 = vpop.f32.mrf.mxu3 }
 0x2ed   : > { %v5974_v39 = vadd.f32 %v5971_v63, %v5953_v14  ;;  %v15260_v63 = vld [vmem:[%s17208_s1 + $0x80] sm:$0x3f] }
 0x2ee   : > { %v5992_v10 = vpop.f32.mrf.mxu0  ;;  %v6013_v31 = vpop.f32.mrf.mxu1 }
 0x2ef   : > { %v5995_v3 = vadd.f32 %v5992_v10, %v5974_v39 }
 0x2f0   : > { %12509 = vmatmul.msk.f32.vlgmr.msrb.gmra.mxu2 %vm593_vm1, %v17444_v48  ;;  %12511 = vmatmul.msk.f32.vlgmr.msrb.gmra.mxu3 %vm593_vm1, %v17476_v13 }
 0x2f1   : > { %v6016_v62 = vadd.f32 %v6013_v31, %v5995_v3  ;;  %12489 = vmatmul.msk.f32.vlgmr.msra.gmra.mxu0 %vm593_vm1, %v17463_v24  ;;  %12491 = vmatmul.msk.f32.vlgmr.msra.gmra.mxu1 %vm593_vm1, %v17475_v40 }
 0x2f2   : > { %12504 = vmatpush.msk.msra.mxu0 %vm597_vm0, %v15260_v63  ;;  %12506 = vmatpush.msk.msra.mxu1 %vm597_vm0, %v14546_v6  ;;  %v15277_v6 = vadd.f32 %v15097_v42, %v15095_v23  ;;  %v15294_v23 = vld [vmem:[%s17208_s1 + $0xa0] sm:$0x3f]  ;;  %v15303_v42 = vld [vmem:[%s17208_s1 + $0x28] sm:$0x3f] }
 0x2f3   : > { %v6037_v52 = vadd.f32 %v6034_v12, %v6016_v62  ;;  %12524 = vmatpush.msk.msrb.mxu2 %vm597_vm0, %v15269_v15  ;;  %12526 = vmatpush.msk.msrb.mxu3 %vm597_vm0, %v14986_v43  ;;  %v6205_v12 = vpop.f32.mrf.mxu2  ;;  %v6226_v4 = vpop.f32.mrf.mxu3  ;;  %v6144_v62 = vadd.f32 %v6143_v51, %v6123_v2 }
 0x2f4   : > { %17478 = vst [vmem:[#allocation15_spill] sm:$0xff] %v15277_v6 }
 0x2f5   : > { %v6058_v57 = vadd.f32 %v6055_v47, %v6037_v52 }
 0x2f6   : > { %v6076_v54 = vpop.f32.mrf.mxu0  ;;  %v6101_v36 = vpop.f32.mrf.mxu1 }
 0x2f7   : > { %v6079_v25 = vadd.f32 %v6076_v54, %v6058_v57  ;;  %v15310_v57 = vld [vmem:[%s13264_s17 + $0x39] sm:$0x3f] }
 0x2f8   : > { %12517 = vmatmul.msk.f32.vlgmr.msra.gmra.mxu2 %vm593_vm1, %v14749_v35  ;;  %12519 = vmatmul.msk.f32.vlgmr.msra.gmra.mxu3 %vm593_vm1, %v14872_v5 }
 0x2f9   : > { %v15279_v14 = vadd.f32 %v6101_v36, %v6079_v25  ;;  %12497 = vmatmul.msk.f32.vlgmr.msrb.gmra.mxu0 %vm593_vm1, %v13618_v50  ;;  %12499 = vmatmul.msk.f32.vlgmr.msrb.gmra.mxu1 %vm593_vm1, %v17466_v44 }
 0x2fa   : > { %12512 = vmatpush.msk.msrb.mxu0 %vm597_vm0, %v15294_v23  ;;  %12514 = vmatpush.msk.msrb.mxu1 %vm597_vm0, %v14573_v46  ;;  %v15327_v46 = vld [vmem:[%s17208_s1 + $0x48] sm:$0x3f] }
 0x2fb   : > { %17479 = vst [vmem:[#allocation23_spill] sm:$0xff] %v15279_v14  ;;  %12532 = vmatpush.msk.msra.mxu2 %vm597_vm0, %v15303_v42  ;;  %12534 = vmatpush.msk.msra.mxu3 %vm597_vm0, %v15011_v0  ;;  %v6289_v39 = vpop.f32.mrf.mxu2  ;;  %v6310_v10 = vpop.f32.mrf.mxu3  ;;  %v17482_v14 = vld [vmem:[#allocation20_spill] sm:$0xff] }
 0x2fe   : > { %v6163_v31 = vpop.f32.mrf.mxu0  ;;  %v6184_v3 = vpop.f32.mrf.mxu1 }
 0x2ff   : > { %v6166_v52 = vadd.f32 %v6163_v31, %v6144_v62 }
 0x300   : > { %12525 = vmatmul.msk.f32.vlgmr.msrb.gmra.mxu2 %vm593_vm1, %v15186_v26  ;;  %12527 = vmatmul.msk.f32.vlgmr.msrb.gmra.mxu3 %vm593_vm1, %v17471_v29 }
 0x301   : > { %12505 = vmatmul.msk.f32.vlgmr.msra.gmra.mxu0 %vm593_vm1, %v15310_v57  ;;  %12507 = vmatmul.msk.f32.vlgmr.msra.gmra.mxu1 %vm593_vm1, %v17459_v45  ;;  %v6187_v26 = vadd.f32 %v6184_v3, %v6166_v52 }
 0x302   : > { %12520 = vmatpush.msk.msra.mxu0 %vm597_vm0, %v15065_v59  ;;  %12522 = vmatpush.msk.msra.mxu1 %vm597_vm0, %v15141_v9 }
 0x303   : > { %12540 = vmatpush.msk.msrb.mxu2 %vm597_vm0, %v15327_v46  ;;  %12542 = vmatpush.msk.msrb.mxu3 %vm597_vm0, %v15032_v16  ;;  %v15333_v2 = vpop.f32.mrf.mxu2  ;;  %v15335_v29 = vpop.f32.mrf.mxu3  ;;  %v6208_v36 = vadd.f32 %v6205_v12, %v6187_v26  ;;  %v15352_v12 = vld [vmem:[%s17208_s1 + $0x68] sm:$0x3f] }
 0x304   : > { %v15362_v26 = vpop.permute.xlu1 %7680 }
 0x305   : > { %v6229_v25 = vadd.f32 %v6226_v4, %v6208_v36  ;;  %v15379_v4 = vld [vmem:[%s17208_s1 + $0x88] sm:$0x3f] }
 0x306   : > { %v6247_v51 = vpop.f32.mrf.mxu0  ;;  %v6268_v54 = vpop.f32.mrf.mxu1 }
 0x307   : > { %v6250_v47 = vadd.f32 %v6247_v51, %v6229_v25 }
 0x308   : > { %12533 = vmatmul.msk.f32.vlgmr.msra.gmra.mxu2 %vm593_vm1, %v15161_v1  ;;  %12535 = vmatmul.msk.f32.vlgmr.msra.gmra.mxu3 %vm593_vm1, %v13521_v41 }
 0x309   : > { %12513 = vmatmul.msk.f32.vlgmr.msrb.gmra.mxu0 %vm593_vm1, %v15047_v11  ;;  %12515 = vmatmul.msk.f32.vlgmr.msrb.gmra.mxu1 %vm593_vm1, %v15128_v33  ;;  %v17481_v11 = vld [vmem:[#allocation18_spill] sm:$0xff] }
 0x30a   : > { %12528 = vmatpush.msk.msrb.mxu0 %vm597_vm0, %v15091_v8  ;;  %12530 = vmatpush.msk.msrb.mxu1 %vm597_vm0, %v15170_v58 }
 0x30b   : > { %12548 = vmatpush.msk.msra.mxu2 %vm597_vm0, %v15352_v12  ;;  %12550 = vmatpush.msk.msra.mxu3 %vm597_vm0, %v15056_v60  ;;  %v15358_v31 = vpop.f32.mrf.mxu2  ;;  %v15360_v3 = vpop.f32.mrf.mxu3 }
 0x30e   : > { %v6331_v62 = vpop.f32.mrf.mxu0  ;;  %v6352_v52 = vpop.f32.mrf.mxu1 }
 0x310   : > { %12541 = vmatmul.msk.f32.vlgmr.msrb.gmra.mxu2 %vm593_vm1, %v17480_v28  ;;  %12543 = vmatmul.msk.f32.vlgmr.msrb.gmra.mxu3 %vm593_vm1, %v15198_v20 }
 0x311   : > { %12521 = vmatmul.msk.f32.vlgmr.msra.gmra.mxu0 %vm593_vm1, %v15362_v26  ;;  %12523 = vmatmul.msk.f32.vlgmr.msra.gmra.mxu1 %vm593_vm1, %v17470_v18  ;;  %v6271_v18 = vadd.f32 %v6268_v54, %v6250_v47  ;;  %v15404_v47 = vld [vmem:[%s17208_s1 + $0xa8] sm:$0x3f] }
 0x312   : > { %12536 = vmatpush.msk.msra.mxu0 %vm597_vm0, %v15123_v30  ;;  %12538 = vmatpush.msk.msra.mxu1 %vm597_vm0, %v15205_v21 }
 0x313   : > { %12556 = vmatpush.msk.msrb.mxu2 %vm597_vm0, %v15379_v4  ;;  %12558 = vmatpush.msk.msrb.mxu3 %vm597_vm0, %v15082_v27  ;;  %v15385_v51 = vpop.f32.mrf.mxu2  ;;  %v15387_v36 = vpop.f32.mrf.mxu3  ;;  %v6292_v28 = vadd.f32 %v6289_v39, %v6271_v18 }
 0x316   : > { %v6415_v25 = vpop.f32.mrf.mxu0  ;;  %v6436_v55 = vpop.f32.mrf.mxu1 }
 0x318   : > { %12549 = vmatmul.msk.f32.vlgmr.msra.gmra.mxu2 %vm593_vm1, %v17474_v32  ;;  %12551 = vmatmul.msk.f32.vlgmr.msra.gmra.mxu3 %vm593_vm1, %v17482_v14 }
 0x319   : > { %12529 = vmatmul.msk.f32.vlgmr.msrb.gmra.mxu0 %vm593_vm1, %v17473_v7  ;;  %12531 = vmatmul.msk.f32.vlgmr.msrb.gmra.mxu1 %vm593_vm1, %v17481_v11  ;;  %v6313_v11 = vadd.f32 %v6310_v10, %v6292_v28 }
 0x31a   : > { %12544 = vmatpush.msk.msrb.mxu0 %vm597_vm0, %v15152_v53  ;;  %12546 = vmatpush.msk.msrb.mxu1 %vm597_vm0, %v15234_v17 }
 0x31b   : > { %12564 = vmatpush.msk.msra.mxu2 %vm597_vm0, %v15404_v47  ;;  %12566 = vmatpush.msk.msra.mxu3 %vm597_vm0, %v15114_v56  ;;  %v15410_v7 = vpop.f32.mrf.mxu2  ;;  %v6663_v39 = vpop.f32.mrf.mxu3  ;;  %v6334_v14 = vadd.f32 %v6331_v62, %v6313_v11 }
 0x31d   : > { %v6355_v28 = vadd.f32 %v6352_v52, %v6334_v14 }
 0x31e   : > { %v15412_v54 = vpop.f32.mrf.mxu0  ;;  %v15414_v18 = vpop.f32.mrf.mxu1 }
 0x320   : > { %12557 = vmatmul.msk.f32.vlgmr.msrb.gmra.mxu2 %vm593_vm1, %v17444_v48  ;;  %12559 = vmatmul.msk.f32.vlgmr.msrb.gmra.mxu3 %vm593_vm1, %v17476_v13  ;;  %v6376_v13 = vadd.f32 %v15333_v2, %v6355_v28 }
 0x321   : > { %12537 = vmatmul.msk.f32.vlgmr.msra.gmra.mxu0 %vm593_vm1, %v17463_v24  ;;  %12539 = vmatmul.msk.f32.vlgmr.msra.gmra.mxu1 %vm593_vm1, %v17475_v40 }
 0x322   : > { %12552 = vmatpush.msk.msra.mxu0 %vm597_vm0, %v15181_v61  ;;  %12554 = vmatpush.msk.msra.mxu1 %vm597_vm0, %v15260_v63  ;;  %v6397_v14 = vadd.f32 %v15335_v29, %v6376_v13 }
 0x323   : > { %12572 = vmatpush.msk.msrb.mxu2 %vm597_vm0, %v15141_v9  ;;  %12574 = vmatpush.msk.msrb.mxu3 %vm597_vm0, %v15269_v15  ;;  %v6724_v10 = vpop.f32.mrf.mxu2  ;;  %v6745_v62 = vpop.f32.mrf.mxu3 }
 0x326   : > { %v15432_v11 = vpop.f32.mrf.mxu0  ;;  %v15434_v56 = vpop.f32.mrf.mxu1 }
 0x328   : > { %12565 = vmatmul.msk.f32.vlgmr.msra.gmra.mxu2 %vm593_vm1, %v14749_v35  ;;  %12567 = vmatmul.msk.f32.vlgmr.msra.gmra.mxu3 %vm593_vm1, %v14872_v5  ;;  %v6418_v5 = vadd.f32 %v6415_v25, %v6397_v14 }
 0x329   : > { %12545 = vmatmul.msk.f32.vlgmr.msrb.gmra.mxu0 %vm593_vm1, %v13618_v50  ;;  %12547 = vmatmul.msk.f32.vlgmr.msrb.gmra.mxu1 %vm593_vm1, %v17466_v44 }
 0x32a   : > { %12560 = vmatpush.msk.msrb.mxu0 %vm597_vm0, %v15216_v34  ;;  %12562 = vmatpush.msk.msrb.mxu1 %vm597_vm0, %v15294_v23 }
 0x32b   : > { %12580 = vmatpush.msk.msra.mxu2 %vm597_vm0, %v15170_v58  ;;  %12582 = vmatpush.msk.msra.mxu3 %vm597_vm0, %v15303_v42  ;;  %v6808_v2 = vpop.f32.mrf.mxu2  ;;  %v6829_v52 = vpop.f32.mrf.mxu3 }
 0x32e   : > { %v6683_v28 = vpop.f32.mrf.mxu0  ;;  %v6703_v15 = vpop.f32.mrf.mxu1 }
 0x32f   : > { %v6684_v6 = vadd.f32 %v6683_v28, %v6663_v39  ;;  %v17483_v28 = vld [vmem:[#allocation16_spill] sm:$0xff] }
 0x330   : > { %12573 = vmatmul.msk.f32.vlgmr.msrb.gmra.mxu2 %vm593_vm1, %v15161_v1  ;;  %12575 = vmatmul.msk.f32.vlgmr.msrb.gmra.mxu3 %vm593_vm1, %v15223_v38 }
 0x331   : > { %v6706_v27 = vadd.f32 %v6703_v15, %v6684_v6  ;;  %12553 = vmatmul.msk.f32.vlgmr.msra.gmra.mxu0 %vm593_vm1, %v15310_v57  ;;  %12555 = vmatmul.msk.f32.vlgmr.msra.gmra.mxu1 %vm593_vm1, %v17459_v45  ;;  %v6439_v15 = vadd.f32 %v6436_v55, %v6418_v5 }
 0x332   : > { %12568 = vmatpush.msk.msra.mxu0 %vm597_vm0, %v15245_v49  ;;  %12570 = vmatpush.msk.msra.mxu1 %vm597_vm0, %v15065_v59 }
 0x333   : > { %v6727_v13 = vadd.f32 %v6724_v10, %v6706_v27  ;;  %12588 = vmatpush.msk.msrb.mxu2 %vm597_vm0, %v15205_v21  ;;  %12590 = vmatpush.msk.msrb.mxu3 %vm597_vm0, %v15327_v46  ;;  %v6892_v6 = vpop.f32.mrf.mxu2  ;;  %v6913_v29 = vpop.f32.mrf.mxu3  ;;  %v6460_v27 = vadd.f32 %v15358_v31, %v6439_v15 }
 0x335   : > { %v6748_v25 = vadd.f32 %v6745_v62, %v6727_v13  ;;  %v6481_v55 = vadd.f32 %v15360_v3, %v6460_v27 }
 0x336   : > { %v6766_v39 = vpop.f32.mrf.mxu0  ;;  %v6787_v14 = vpop.f32.mrf.mxu1 }
 0x337   : > { %v6769_v38 = vadd.f32 %v6766_v39, %v6748_v25  ;;  %v15488_v25 = vpop.permute.xlu2 %8207  ;;  %v6502_v39 = vadd.f32 %v15412_v54, %v6481_v55 }
 0x338   : > { %12581 = vmatmul.msk.f32.vlgmr.msra.gmra.mxu2 %vm593_vm1, %v17475_v40  ;;  %12583 = vmatmul.msk.f32.vlgmr.msra.gmra.mxu3 %vm593_vm1, %v15193_v22 }
 0x339   : > { %v6790_v10 = vadd.f32 %v6787_v14, %v6769_v38  ;;  %12561 = vmatmul.msk.f32.vlgmr.msrb.gmra.mxu0 %vm593_vm1, %v17483_v28  ;;  %12563 = vmatmul.msk.f32.vlgmr.msrb.gmra.mxu1 %vm593_vm1, %v15128_v33  ;;  %v6523_v54 = vadd.f32 %v15414_v18, %v6502_v39 }
 0x33a   : > { %12576 = vmatpush.msk.msrb.mxu0 %vm597_vm0, %v14986_v43  ;;  %12578 = vmatpush.msk.msrb.mxu1 %vm597_vm0, %v15091_v8 }
 0x33b   : > { %v6811_v5 = vadd.f32 %v6808_v2, %v6790_v10  ;;  %12596 = vmatpush.msk.msra.mxu2 %vm597_vm0, %v15234_v17  ;;  %12598 = vmatpush.msk.msra.mxu3 %vm597_vm0, %v15352_v12  ;;  %v6976_v31 = vpop.f32.mrf.mxu2  ;;  %v6997_v62 = vpop.f32.mrf.mxu3  ;;  %v6547_v55 = vadd.f32 %v15385_v51, %v6523_v54 }
 0x33d   : > { %v6832_v13 = vadd.f32 %v6829_v52, %v6811_v5  ;;  %v6571_v51 = vadd.f32 %v15387_v36, %v6547_v55 }
 0x33e   : > { %v6850_v15 = vpop.f32.mrf.mxu0  ;;  %v6871_v22 = vpop.f32.mrf.mxu1 }
 0x33f   : > { %v6853_v2 = vadd.f32 %v6850_v15, %v6832_v13 }
 0x340   : > { %12589 = vmatmul.msk.f32.vlgmr.msrb.gmra.mxu2 %vm593_vm1, %v17466_v44  ;;  %12591 = vmatmul.msk.f32.vlgmr.msrb.gmra.mxu3 %vm593_vm1, %v17474_v32 }
 0x341   : > { %v6874_v14 = vadd.f32 %v6871_v22, %v6853_v2  ;;  %12569 = vmatmul.msk.f32.vlgmr.msra.gmra.mxu0 %vm593_vm1, %v15362_v26  ;;  %12571 = vmatmul.msk.f32.vlgmr.msra.gmra.mxu1 %vm593_vm1, %v15488_v25 }
 0x342   : > { %12584 = vmatpush.msk.msra.mxu0 %vm597_vm0, %v15011_v0  ;;  %12586 = vmatpush.msk.msra.mxu1 %vm597_vm0, %v15123_v30 }
 0x343   : > { %v6895_v3 = vadd.f32 %v6892_v6, %v6874_v14  ;;  %12604 = vmatpush.msk.msrb.mxu2 %vm597_vm0, %v15260_v63  ;;  %12606 = vmatpush.msk.msrb.mxu3 %vm597_vm0, %v15379_v4  ;;  %v7060_v52 = vpop.f32.mrf.mxu2  ;;  %v7081_v38 = vpop.f32.mrf.mxu3  ;;  %v6595_v14 = vadd.f32 %v15432_v11, %v6571_v51 }
 0x345   : > { %v6916_v27 = vadd.f32 %v6913_v29, %v6895_v3  ;;  %v6619_v11 = vadd.f32 %v15434_v56, %v6595_v14 }
 0x346   : > { %v6934_v10 = vpop.f32.mrf.mxu0  ;;  %v6955_v5 = vpop.f32.mrf.mxu1 }
 0x347   : > { %v6937_v6 = vadd.f32 %v6934_v10, %v6916_v27 }
 0x348   : > { %12597 = vmatmul.msk.f32.vlgmr.msra.gmra.mxu2 %vm593_vm1, %v17459_v45  ;;  %12599 = vmatmul.msk.f32.vlgmr.msra.gmra.mxu3 %vm593_vm1, %v17444_v48 }
 0x349   : > { %v6958_v13 = vadd.f32 %v6955_v5, %v6937_v6  ;;  %12577 = vmatmul.msk.f32.vlgmr.msrb.gmra.mxu0 %vm593_vm1, %v13521_v41  ;;  %12579 = vmatmul.msk.f32.vlgmr.msrb.gmra.mxu1 %vm593_vm1, %v17463_v24  ;;  %v6644_v6 = vadd.f32 %v15410_v7, %v6619_v11  ;;  %v17485_v7 = vld [vmem:[#allocation15_spill] sm:$0xff]  ;;  %v17489_v11 = vld [vmem:[#allocation26_spill] sm:$0xff] }
 0x34a   : > { %12592 = vmatpush.msk.msrb.mxu0 %vm597_vm0, %v15032_v16  ;;  %12594 = vmatpush.msk.msrb.mxu1 %vm597_vm0, %v15152_v53 }
 0x34b   : > { %v6979_v18 = vadd.f32 %v6976_v31, %v6958_v13  ;;  %12612 = vmatpush.msk.msra.mxu2 %vm597_vm0, %v15294_v23  ;;  %12614 = vmatpush.msk.msra.mxu3 %vm597_vm0, %v15404_v47  ;;  %v7144_v29 = vpop.f32.mrf.mxu2  ;;  %v7169_v15 = vpop.f32.mrf.mxu3  ;;  %v12949_v13 = vld [vmem:[%s13264_s17 + $0x31] sm:$0x3f]  ;;  %s11743_s17 = sshll.u32 %s11739_s29, 4  ;;  %s11744_s17 = int_to_ptr.hbm [resolvable:$true] %s11743_s17 }
 0x34d   : > { %v7000_v22 = vadd.f32 %v6997_v62, %v6979_v18 }
 0x34e   : > { %v7018_v2 = vpop.f32.mrf.mxu0  ;;  %v7039_v39 = vpop.f32.mrf.mxu1 }
 0x34f   : > { %v7021_v31 = vadd.f32 %v7018_v2, %v7000_v22 }
 0x350   : > { %12605 = vmatmul.msk.f32.vlgmr.msrb.gmra.mxu2 %vm593_vm1, %v15128_v33  ;;  %12607 = vmatmul.msk.f32.vlgmr.msrb.gmra.mxu3 %vm593_vm1, %v14749_v35 }
 0x351   : > { %v7042_v3 = vadd.f32 %v7039_v39, %v7021_v31  ;;  %12585 = vmatmul.msk.f32.vlgmr.msra.gmra.mxu0 %vm593_vm1, %v15198_v20  ;;  %12587 = vmatmul.msk.f32.vlgmr.msra.gmra.mxu1 %vm593_vm1, %v13618_v50 }
 0x352   : > { %12600 = vmatpush.msk.msra.mxu0 %vm597_vm0, %v15056_v60  ;;  %12602 = vmatpush.msk.msra.mxu1 %vm597_vm0, %v15181_v61 }
 0x353   : > { %v7063_v36 = vadd.f32 %v7060_v52, %v7042_v3  ;;  %12620 = vmatpush.msk.msrb.mxu2 %vm597_vm0, %v15065_v59  ;;  %12622 = vmatpush.msk.msrb.mxu3 %vm597_vm0, %v15141_v9  ;;  %v7235_v62 = vpop.f32.mrf.mxu2  ;;  %v7256_v54 = vpop.f32.mrf.mxu3  ;;  %v17484_v9 = vld [vmem:[#allocation24_spill] sm:$0xff] }
 0x354   : > { %v15564_v3 = vpop.permute.xlu0 %8735 }
 0x355   : > { %v7084_v27 = vadd.f32 %v7081_v38, %v7063_v36  ;;  %v17486_v38 = vld [vmem:[#allocation23_spill] sm:$0xff] }
 0x356   : > { %v7102_v10 = vpop.f32.mrf.mxu0  ;;  %v7123_v5 = vpop.f32.mrf.mxu1  ;;  %v17487_v18 = vmax.f32 %v17485_v7, %v17486_v38 }
 0x357   : > { %v7105_v52 = vadd.f32 %v7102_v10, %v7084_v27 }
 0x358   : > { %12613 = vmatmul.msk.f32.vlgmr.msra.gmra.mxu2 %vm593_vm1, %v14893_v19  ;;  %12615 = vmatmul.msk.f32.vlgmr.msra.gmra.mxu3 %vm593_vm1, %v14998_v37  ;;  %v6645_v19 = vmax.f32 %v17487_v18, %v6644_v6 }
 0x359   : > { %v7126_v55 = vadd.f32 %v7123_v5, %v7105_v52  ;;  %12593 = vmatmul.msk.f32.vlgmr.msrb.gmra.mxu0 %vm593_vm1, %v12949_v13  ;;  %12595 = vmatmul.msk.f32.vlgmr.msrb.gmra.mxu1 %vm593_vm1, %v15310_v57  ;;  %v17491_v5 = vld [vmem:[#allocation32_spill] sm:$0xff]  ;;  %v17492_v13 = vld [vmem:[#allocation33_spill] sm:$0xff] }
 0x35a   : > { %12608 = vmatpush.msk.msrb.mxu0 %vm597_vm0, %v17484_v9  ;;  %12610 = vmatpush.msk.msrb.mxu1 %vm597_vm0, %v15216_v34 }
 0x35b   : > { %v7147_v56 = vadd.f32 %v7144_v29, %v7126_v55  ;;  %12628 = vmatpush.msk.msra.mxu2 %vm597_vm0, %v15091_v8  ;;  %12630 = vmatpush.msk.msra.mxu3 %vm597_vm0, %v15170_v58  ;;  %v7319_v22 = vpop.f32.mrf.mxu2  ;;  %v7340_v2 = vpop.f32.mrf.mxu3  ;;  %v15569_v8 = vld [vmem:[%s17209_s2] ss:$0 sm:$0xff] }
 0x35c   : > { %17488 = vst [vmem:[#allocation27_spill] sm:$0xff] %v15569_v8 }
 0x35d   : > { %v7172_v51 = vadd.f32 %v7169_v15, %v7147_v56  ;;  %v17490_v15 = vld [vmem:[#allocation21_spill] sm:$0xff] }
 0x35e   : > { %v7195_v29 = vpop.f32.mrf.mxu0  ;;  %v7215_v39 = vpop.f32.mrf.mxu1  ;;  %v17494_v56 = vld [vmem:[#allocation25_spill] sm:$0xff] }
 0x35f   : > { %v7173_v31 = vmax.f32 %v6645_v19, %v7172_v51  ;;  %v7216_v14 = vadd.f32 %v7215_v39, %v7195_v29  ;;  %v15635_v29 = vld [vmem:[#allocation2 + $0x1] sm:$0xf] }
 0x360   : > { %12621 = vmatmul.msk.f32.vlgmr.msrb.gmra.mxu2 %vm593_vm1, %v15564_v3  ;;  %12623 = vmatmul.msk.f32.vlgmr.msrb.gmra.mxu3 %vm593_vm1, %v13521_v41  ;;  %17497 = vst [vmem:[#allocation22_spill] sm:$0xff] %v15635_v29 }
 0x361   : > { %v7174_v58 = vadd.f32 %v15569_v8, %v7173_v31  ;;  %v7238_v36 = vadd.f32 %v7235_v62, %v7216_v14  ;;  %12601 = vmatmul.msk.f32.vlgmr.msra.gmra.mxu0 %vm593_vm1, %v17489_v11  ;;  %12603 = vmatmul.msk.f32.vlgmr.msra.gmra.mxu1 %vm593_vm1, %v17490_v15  ;;  %v9264_v31 = vpop.permute.xlu1 %9263  ;;  %v414_v14 = vld [vmem:[#allocation3 + $0x78] sm:$0xff]  ;;  %v15754_v15 = vld [vmem:[#allocation3 + $0x48] sm:$0xff] }
 0x362   : > { %12616 = vmatpush.msk.msra.mxu0 %vm597_vm0, %v17491_v5  ;;  %12618 = vmatpush.msk.msra.mxu1 %vm597_vm0, %v15245_v49 }
 0x363   : > { %v7175_v27 = vmax.f32 %v7174_v58, 0.0  ;;  %v7259_v10 = vadd.f32 %v7256_v54, %v7238_v36  ;;  %12636 = vmatpush.msk.msrb.mxu2 %vm597_vm0, %v15123_v30  ;;  %12638 = vmatpush.msk.msrb.mxu3 %vm597_vm0, %v15205_v21  ;;  %v15589_v62 = vpop.f32.mrf.mxu2  ;;  %v15591_v52 = vpop.f32.mrf.mxu3  ;;  %v17493_v30 = vld [vmem:[#allocation19_spill] sm:$0xff] }
 0x365   : > { %7177 = vst.msk [vmem:[#allocation2 + $0x10] sm:$0x3f] %vm2890_vm2, %v7175_v27  ;;  %v15758_v27 = vpop.permute.xlu2 %9353 }
 0x366   : > { %v7277_v41 = vpop.f32.mrf.mxu0  ;;  %v7298_v54 = vpop.f32.mrf.mxu1 }
 0x367   : > { %v7280_v6 = vadd.f32 %v7277_v41, %v7259_v10  ;;  %v15760_v10 = vpop.permute.xlu0 %9378  ;;  %v15772_v41 = vld [vmem:[#allocation3 + $0x18] sm:$0xff] }
 0x368   : > { %12629 = vmatmul.msk.f32.vlgmr.msra.gmra.mxu2 %vm593_vm1, %v17475_v40  ;;  %12631 = vmatmul.msk.f32.vlgmr.msra.gmra.mxu3 %vm593_vm1, %v17493_v30  ;;  %17506 = vst [vmem:[#allocation17_spill] sm:$0xff] %v15760_v10 }
 0x369   : > { %v7301_v55 = vadd.f32 %v7298_v54, %v7280_v6  ;;  %12609 = vmatmul.msk.f32.vlgmr.msrb.gmra.mxu0 %vm593_vm1, %v17492_v13  ;;  %12611 = vmatmul.msk.f32.vlgmr.msrb.gmra.mxu1 %vm593_vm1, %v15362_v26  ;;  %17507 = vst [vmem:[#allocation10_spill] sm:$0xff] %v15772_v41  ;;  %v15776_v54 = vld [vmem:[#allocation3 + $0x38] sm:$0xff]  ;;  %v15778_v6 = vld [vmem:[#allocation3 + $0x10] sm:$0xff] }
 0x36a   : > { %12624 = vmatpush.msk.msrb.mxu0 %vm597_vm0, %v17494_v56  ;;  %12626 = vmatpush.msk.msrb.mxu1 %vm597_vm0, %v14986_v43  ;;  %17508 = vst [vmem:[#allocation18_spill] sm:$0xff] %v15778_v6  ;;  %v15792_v56 = vld [vmem:[#allocation3 + $0x30] sm:$0xff] }
 0x36b   : > { %v7322_v21 = vadd.f32 %v7319_v22, %v7301_v55  ;;  %12644 = vmatpush.msk.msra.mxu2 %vm597_vm0, %v15152_v53  ;;  %12646 = vmatpush.msk.msra.mxu3 %vm597_vm0, %v15234_v17  ;;  %v15611_v38 = vpop.f32.mrf.mxu2  ;;  %v15613_v40 = vpop.f32.mrf.mxu3  ;;  %v17495_v53 = vld [vmem:[#allocation30_spill] sm:$0xff]  ;;  %v17496_v17 = vld [vmem:[#allocation31_spill] sm:$0xff] }
 0x36c   : > { %v15605_v7 = vld [vmem:[#allocation2 + $0x10] sm:$0xf] }
 0x36d   : > { %9526 = vrot.lane.b32.xlu1 %v15605_v7, %s13149_s14  ;;  %9476 = vrot.lane.b32.xlu2 %v15605_v7, %s13150_s16  ;;  %v7343_v18 = vadd.f32 %v7340_v2, %v7322_v21  ;;  %v15633_v2 = vld [vmem:[#allocation2 + $0x9] sm:$0xf]  ;;  %v15738_v58 = vld [vmem:[#allocation2 + $0x12] sm:$0xf] }
 0x36e   : > { %v7361_v43 = vpop.f32.mrf.mxu0  ;;  %v7382_v19 = vpop.f32.mrf.mxu1  ;;  %17504 = vst [vmem:[#allocation29_spill] sm:$0xff] %v15738_v58 }
 0x36f   : > { %v7364_v51 = vadd.f32 %v7361_v43, %v7343_v18  ;;  %v15794_v18 = vld [vmem:[#allocation3 + $0x8] sm:$0xff]  ;;  %v441_v43 = vld [vmem:[#allocation3 + $0x130] sm:$0xff] }
 0x370   : > { %12637 = vmatmul.msk.f32.vlgmr.msrb.gmra.mxu2 %vm593_vm1, %v17466_v44  ;;  %12639 = vmatmul.msk.f32.vlgmr.msrb.gmra.mxu3 %vm593_vm1, %v17474_v32  ;;  %17509 = vst [vmem:[#allocation16_spill] sm:$0xff] %v15794_v18 }
 0x371   : > { %v15619_v22 = vadd.f32 %v7382_v19, %v7364_v51  ;;  %12617 = vmatmul.msk.f32.vlgmr.msra.gmra.mxu0 %vm593_vm1, %v17495_v53  ;;  %12619 = vmatmul.msk.f32.vlgmr.msra.gmra.mxu1 %vm593_vm1, %v17496_v17  ;;  %v15800_v19 = vld [vmem:[#allocation3 + $0x28] sm:$0xff]  ;;  %v15802_v51 = vld [vmem:[#allocation3] sm:$0xff] }
 0x372   : > { %12632 = vmatpush.msk.msra.mxu0 %vm597_vm0, %v15303_v42  ;;  %12634 = vmatpush.msk.msra.mxu1 %vm597_vm0, %v15011_v0  ;;  %17510 = vst [vmem:[#allocation24_spill] sm:$0xff] %v15802_v51 }
 0x373   : > { %12652 = vmatpush.msk.msrb.mxu2 %vm597_vm0, %v15181_v61  ;;  %12654 = vmatpush.msk.msrb.mxu3 %vm597_vm0, %v15260_v63  ;;  %v15641_v44 = vpop.f32.mrf.mxu2  ;;  %v15643_v39 = vpop.f32.mrf.mxu3  ;;  %v15665_v61 = vld [vmem:[#allocation2 + $0x11] sm:$0xf] }
 0x374   : > { %v417_v63 = vld [vmem:[#allocation3 + $0x90] sm:$0xff] }
 0x375   : > { %9624 = vrot.lane.b32.xlu1 %v15633_v2, %s13150_s16  ;;  %9649 = vrot.lane.b32.xlu2 %v15635_v29, %s13149_s14  ;;  %v15906_v29 = vld [vmem:[#allocation3 + $0x220] sm:$0xff] }
 0x376   : > { %v15649_v0 = vpop.f32.mrf.mxu0  ;;  %v15651_v32 = vpop.f32.mrf.mxu1  ;;  %17532 = vst [vmem:[#allocation44_spill] sm:$0xff] %v15906_v29 }
 0x378   : > { %12645 = vmatmul.msk.f32.vlgmr.msra.gmra.mxu2 %vm593_vm1, %v17459_v45  ;;  %12647 = vmatmul.msk.f32.vlgmr.msra.gmra.mxu3 %vm593_vm1, %v17444_v48 }
 0x379   : > { %12625 = vmatmul.msk.f32.vlgmr.msrb.gmra.mxu0 %vm593_vm1, %v15161_v1  ;;  %12627 = vmatmul.msk.f32.vlgmr.msrb.gmra.mxu1 %vm593_vm1, %v17463_v24 }
 0x37a   : > { %12640 = vmatpush.msk.msrb.mxu0 %vm597_vm0, %v15327_v46  ;;  %12642 = vmatpush.msk.msrb.mxu1 %vm597_vm0, %v15032_v16  ;;  %v15693_v16 = vld [vmem:[#allocation2 + $0x2] sm:$0xf] }
 0x37b   : > { %12660 = vmatpush.msk.msra.mxu2 %vm597_vm0, %v15216_v34  ;;  %12662 = vmatpush.msk.msra.mxu3 %vm597_vm0, %v15294_v23  ;;  %v15671_v24 = vpop.f32.mrf.mxu2  ;;  %v15673_v45 = vpop.f32.mrf.mxu3  ;;  %17500 = vst [vmem:[#allocation14_spill] sm:$0xff] %v15693_v16  ;;  %v418_v34 = vld [vmem:[#allocation3 + $0x98] sm:$0xff]  ;;  %v410_v23 = vld [vmem:[#allocation3 + $0x60] sm:$0xff] }
 0x37c   : > { %17498 = vst [vmem:[#allocation13_spill] sm:$0xff] %v15671_v24 }
 0x37d   : > { %17499 = vst [vmem:[#allocation28_spill] sm:$0xff] %v15673_v45  ;;  %9722 = vrot.lane.b32.xlu1 %v15665_v61, %s13150_s16 }
 0x37e   : > { %v15677_v48 = vpop.f32.mrf.mxu0  ;;  %v15679_v1 = vpop.f32.mrf.mxu1 }
 0x380   : > { %12653 = vmatmul.msk.f32.vlgmr.msrb.gmra.mxu2 %vm593_vm1, %v15128_v33  ;;  %12655 = vmatmul.msk.f32.vlgmr.msrb.gmra.mxu3 %vm593_vm1, %v14749_v35 }
 0x381   : > { %12633 = vmatmul.msk.f32.vlgmr.msra.gmra.mxu0 %vm593_vm1, %v15198_v20  ;;  %12635 = vmatmul.msk.f32.vlgmr.msra.gmra.mxu1 %vm593_vm1, %v13618_v50 }
 0x382   : > { %12668 = vmatpush.msk.msrb.mxu2 %vm597_vm0, %v15245_v49  ;;  %12670 = vmatpush.msk.msrb.mxu3 %vm597_vm0, %v15065_v59  ;;  %v412_v59 = vld [vmem:[#allocation3 + $0x70] sm:$0xff]  ;;  %v17502_v49 = vld [vmem:[#allocation20_spill] sm:$0xff] }
 0x383   : > { %12648 = vmatpush.msk.msra.mxu0 %vm597_vm0, %v15352_v12  ;;  %12650 = vmatpush.msk.msra.mxu1 %vm597_vm0, %v15056_v60  ;;  %v15699_v50 = vpop.f32.mrf.mxu2  ;;  %v15701_v33 = vpop.f32.mrf.mxu3  ;;  %v411_v60 = vld [vmem:[#allocation3 + $0x68] sm:$0xff] }
 0x385   : > { %9895 = vrot.lane.b32.xlu1 %v15693_v16, %s13149_s14 }
 0x386   : > { %v15705_v35 = vpop.f32.mrf.mxu0  ;;  %v15707_v20 = vpop.f32.mrf.mxu1 }
 0x387   : > { %17501 = vst [vmem:[#allocation11_spill] sm:$0xff] %v15707_v20 }
 0x388   : > { %12661 = vmatmul.msk.f32.vlgmr.msra.gmra.mxu2 %vm593_vm1, %v15488_v25  ;;  %12663 = vmatmul.msk.f32.vlgmr.msra.gmra.mxu3 %vm593_vm1, %v14998_v37  ;;  %v416_v37 = vld [vmem:[#allocation3 + $0x88] sm:$0xff]  ;;  %v415_v25 = vld [vmem:[#allocation3 + $0x80] sm:$0xff] }
 0x389   : > { %12641 = vmatmul.msk.f32.vlgmr.msrb.gmra.mxu0 %vm593_vm1, %v17502_v49  ;;  %12643 = vmatmul.msk.f32.vlgmr.msrb.gmra.mxu1 %vm593_vm1, %v15310_v57  ;;  %v15808_v49 = vld [vmem:[#allocation3 + $0xe8] sm:$0xff] }
 0x38a   : > { %9368 = vmatpush.msra.mxu2 %v412_v59  ;;  %9393 = vmatpush.msra.mxu3 %v418_v34  ;;  %v440_v59 = vld [vmem:[#allocation3 + $0x128] sm:$0xff]  ;;  %v15806_v34 = vld [vmem:[#allocation3 + $0xc0] sm:$0xff]  ;;  %17511 = vst [vmem:[#allocation15_spill] sm:$0xff] %v15808_v49 }
 0x38b   : > { %12656 = vmatpush.msk.msrb.mxu0 %vm597_vm0, %v15379_v4  ;;  %12658 = vmatpush.msk.msrb.mxu1 %vm597_vm0, %v17484_v9  ;;  %v15721_v42 = vpop.f32.mrf.mxu2  ;;  %v15723_v57 = vpop.f32.mrf.mxu3  ;;  %v409_v4 = vld [vmem:[#allocation3 + $0x58] sm:$0xff]  ;;  %v408_v9 = vld [vmem:[#allocation3 + $0x50] sm:$0xff] }
 0x38c   : > { %9369 = vmatpush.msra.mxu2 %v411_v60  ;;  %9394 = vmatpush.msra.mxu3 %v417_v63  ;;  %v439_v60 = vld [vmem:[#allocation3 + $0x120] sm:$0xff] }
 0x38d   : > { %10220 = vrot.lane.b32.xlu1 %v15633_v2, %s13149_s14 }
 0x38e   : > { %v15727_v46 = vpop.f32.mrf.mxu0  ;;  %v15729_v12 = vpop.f32.mrf.mxu1  ;;  %9370 = vmatpush.msra.mxu2 %v410_v23  ;;  %9395 = vmatpush.msra.mxu3 %v416_v37  ;;  %v438_v37 = vld [vmem:[#allocation3 + $0x118] sm:$0xff] }
 0x38f   : > { %17503 = vst [vmem:[#allocation12_spill] sm:$0xff] %v15727_v46 }
 0x390   : > { %12669 = vmatmul.msk.f32.vlgmr.msrb.gmra.mxu2 %vm593_vm1, %v15564_v3  ;;  %12671 = vmatmul.msk.f32.vlgmr.msrb.gmra.mxu3 %vm593_vm1, %v9264_v31  ;;  %v15828_v31 = vld [vmem:[#allocation3 + $0xb0] sm:$0xff] }
 0x391   : > { %12649 = vmatmul.msk.f32.vlgmr.msra.gmra.mxu0 %vm593_vm1, %v17489_v11  ;;  %12651 = vmatmul.msk.f32.vlgmr.msra.gmra.mxu1 %vm593_vm1, %v17483_v28 }
 0x392   : > { %9371 = vmatpush.msra.mxu2 %v409_v4  ;;  %9396 = vmatpush.msra.mxu3 %v415_v25 }
 0x393   : > { %12664 = vmatpush.msk.msra.mxu0 %vm597_vm0, %v15404_v47  ;;  %12666 = vmatpush.msk.msra.mxu1 %vm597_vm0, %v17491_v5  ;;  %v15744_v36 = vpop.f32.mrf.mxu2  ;;  %v15746_v28 = vpop.f32.mrf.mxu3  ;;  %v15756_v47 = vld [vmem:[#allocation3 + $0x20] sm:$0xff] }
 0x394   : > { %9372 = vmatpush.msra.mxu2 %v408_v9  ;;  %9397 = vmatpush.msra.mxu3 %v414_v14  ;;  %17505 = vst [vmem:[#allocation9_spill] sm:$0xff] %v15756_v47  ;;  %v15770_v5 = vld [vmem:[#allocation3 + $0x40] sm:$0xff]  ;;  %v15830_v9 = vld [vmem:[#allocation3 + $0xd8] sm:$0xff] }
 0x395   : > { %10980 = vrot.lane.b32.xlu1 %v15738_v58, %s13149_s14  ;;  %17513 = vst [vmem:[#allocation26_spill] sm:$0xff] %v15830_v9  ;;  %v15832_v14 = vld [vmem:[#allocation3 + $0x1d8] sm:$0xff] }
 0x396   : > { %v15750_v3 = vpop.f32.mrf.mxu0  ;;  %v15752_v11 = vpop.f32.mrf.mxu1  ;;  %17514 = vst [vmem:[#allocation21_spill] sm:$0xff] %v15832_v14 }
 0x398   : > { %12674 = vmatmul.msk.f32.vlgmr.msra.gmra.mxu2 %vm9306_vm3, %v15758_v27  ;;  %12675 = vmatmul.msk.f32.vlgmr.msra.gmra.mxu3 %vm9306_vm3, %v15760_v10  ;;  %v15845_v10 = vld [vmem:[#allocation3 + $0x1d0] sm:$0xff] }
 0x399   : > { %12657 = vmatmul.msk.f32.vlgmr.msrb.gmra.mxu0 %vm593_vm1, %v17492_v13  ;;  %12659 = vmatmul.msk.f32.vlgmr.msrb.gmra.mxu1 %vm593_vm1, %v15362_v26  ;;  %v442_v13 = vld [vmem:[#allocation3 + $0x138] sm:$0xff]  ;;  %17517 = vst [vmem:[#allocation19_spill] sm:$0xff] %v15845_v10 }
 0x39a   : > { %9321 = vmatpush.msrb.mxu0 %v15754_v15  ;;  %9344 = vmatpush.msrb.mxu1 %v15756_v47 }
 0x39b   : > { %v15780_v55 = vpop.f32.mrf.mxu2  ;;  %v15782_v26 = vpop.f32.mrf.mxu3  ;;  %9491 = vmatpush.msrb.mxu3 %v442_v13  ;;  %v15834_v13 = vld [vmem:[#allocation2 + $0x8] sm:$0xf] }
 0x39c   : > { %9322 = vmatpush.msrb.mxu0 %v15770_v5  ;;  %9345 = vmatpush.msrb.mxu1 %v15772_v41  ;;  %17515 = vst [vmem:[#allocation32_spill] sm:$0xff] %v15834_v13  ;;  %v15883_v41 = vld [vmem:[#allocation3 + $0x180] sm:$0xff] }
 0x39d   : > { %9492 = vmatpush.msrb.mxu3 %v441_v43  ;;  %v12952_v43 = vld [vmem:[#allocation2] sm:$0xf]  ;;  %17525 = vst [vmem:[#allocation37_spill] sm:$0xff] %v15883_v41 }
 0x39e   : > { %v15786_v30 = vpop.f32.mrf.mxu0  ;;  %v15788_v21 = vpop.f32.mrf.mxu1  ;;  %9323 = vmatpush.msrb.mxu0 %v15776_v54  ;;  %9346 = vmatpush.msrb.mxu1 %v15778_v6  ;;  %v15879_v6 = vld [vmem:[#allocation3 + $0x188] sm:$0xff] }
 0x39f   : > { %9493 = vmatpush.msrb.mxu3 %v440_v59  ;;  %v15839_v59 = vld [vmem:[#allocation3 + $0xa8] sm:$0xff]  ;;  %17524 = vst [vmem:[#allocation36_spill] sm:$0xff] %v15879_v6 }
 0x3a0   : > { %9324 = vmatpush.msrb.mxu0 %v15792_v56  ;;  %9347 = vmatpush.msrb.mxu1 %v15794_v18 }
 0x3a1   : > { %12665 = vmatmul.msk.f32.vlgmr.msra.gmra.mxu0 %vm593_vm1, %v17495_v53  ;;  %12667 = vmatmul.msk.f32.vlgmr.msra.gmra.mxu1 %vm593_vm1, %v17496_v17  ;;  %v15812_v53 = vld [vmem:[#allocation3 + $0xb8] sm:$0xff]  ;;  %v15814_v17 = vld [vmem:[#allocation3 + $0xe0] sm:$0xff] }
 0x3a2   : > { %9325 = vmatpush.msrb.mxu0 %v15800_v19  ;;  %9348 = vmatpush.msrb.mxu1 %v15802_v51  ;;  %17512 = vst [vmem:[#allocation23_spill] sm:$0xff] %v15814_v17 }
 0x3a3   : > { %v15816_v63 = vpop.f32.mrf.mxu2  ;;  %v15818_v23 = vpop.f32.mrf.mxu3  ;;  %9494 = vmatpush.msrb.mxu3 %v439_v60  ;;  %v15841_v60 = vld [vmem:[#allocation3 + $0xd0] sm:$0xff] }
 0x3a4   : > { %9418 = vmatpush.msra.mxu0 %v15806_v34  ;;  %9442 = vmatpush.msra.mxu1 %v15808_v49  ;;  %17516 = vst [vmem:[#allocation33_spill] sm:$0xff] %v15841_v60 }
 0x3a5   : > { %9495 = vmatpush.msrb.mxu3 %v438_v37  ;;  %v15847_v37 = vld [vmem:[#allocation3 + $0xa0] sm:$0xff] }
 0x3a6   : > { %v15822_v4 = vpop.f32.mrf.mxu0  ;;  %v15824_v25 = vpop.f32.mrf.mxu1  ;;  %9419 = vmatpush.msra.mxu0 %v15812_v53  ;;  %9443 = vmatpush.msra.mxu1 %v15814_v17  ;;  %v15849_v17 = vld [vmem:[#allocation3 + $0xc8] sm:$0xff] }
 0x3a7   : > { %17518 = vst [vmem:[#allocation25_spill] sm:$0xff] %v15849_v17  ;;  %9589 = vmatpush.msra.mxu3 %v15832_v14  ;;  %v15868_v14 = vld [vmem:[#allocation3 + $0x1c0] sm:$0xff] }
 0x3a8   : > { %9420 = vmatpush.msra.mxu0 %v15828_v31  ;;  %9444 = vmatpush.msra.mxu1 %v15830_v9  ;;  %17521 = vst [vmem:[#allocation20_spill] sm:$0xff] %v15868_v14 }
 0x3a9   : > { %12672 = vmatmul.msk.f32.vlgmr.msrb.gmra.mxu0 %vm9306_vm3, %v15834_v13  ;;  %12673 = vmatmul.msk.f32.vlgmr.msrb.gmra.mxu1 %vm9306_vm3, %v12952_v43  ;;  %v15854_v43 = vld [vmem:[#allocation3 + $0x1c8] sm:$0xff] }
 0x3aa   : > { %9421 = vmatpush.msra.mxu0 %v15839_v59  ;;  %9445 = vmatpush.msra.mxu1 %v15841_v60  ;;  %17519 = vst [vmem:[#allocation30_spill] sm:$0xff] %v15854_v43  ;;  %v15870_v60 = vpop.permute.xlu1 %9403 }
 0x3ab   : > { %v15856_v49 = vpop.f32.mrf.mxu2  ;;  %v15858_v51 = vpop.f32.mrf.mxu3  ;;  %9590 = vmatpush.msra.mxu3 %v15845_v10  ;;  %17522 = vst [vmem:[#allocation34_spill] sm:$0xff] %v15870_v60  ;;  %v15876_v10 = vld [vmem:[#allocation3 + $0x1b8] sm:$0xff] }
 0x3ac   : > { %17520 = vst [vmem:[#allocation31_spill] sm:$0xff] %v15858_v51  ;;  %9422 = vmatpush.msra.mxu0 %v15847_v37  ;;  %9446 = vmatpush.msra.mxu1 %v15849_v17 }
 0x3ad   : > { %9591 = vmatpush.msra.mxu3 %v15854_v43  ;;  %17523 = vst [vmem:[#allocation35_spill] sm:$0xff] %v15876_v10 }
 0x3ae   : > { %v15861_v9 = vpop.f32.mrf.mxu0  ;;  %v15863_v18 = vpop.f32.mrf.mxu1  ;;  %9541 = vmatpush.msrb.mxu1 %v15879_v6  ;;  %v15899_v6 = vld [vmem:[#allocation3 + $0x228] sm:$0xff] }
 0x3af   : > { %9592 = vmatpush.msra.mxu3 %v15868_v14  ;;  %v15893_v14 = vld [vmem:[#allocation3 + $0x170] sm:$0xff]  ;;  %17529 = vst [vmem:[#allocation41_spill] sm:$0xff] %v15899_v6 }
 0x3b0   : > { %9542 = vmatpush.msrb.mxu1 %v15883_v41  ;;  %17527 = vst [vmem:[#allocation39_spill] sm:$0xff] %v15893_v14 }
 0x3b1   : > { %12676 = vmatmul.msk.f32.vlgmr.msra.gmra.mxu0 %vm9306_vm3, %v15870_v60  ;;  %12677 = vmatmul.msk.f32.vlgmr.msra.gmra.mxu1 %vm9306_vm3, %v15605_v7  ;;  %v15890_v7 = vld [vmem:[#allocation3 + $0x178] sm:$0xff] }
 0x3b2   : > { %9593 = vmatpush.msra.mxu3 %v15876_v10  ;;  %17526 = vst [vmem:[#allocation38_spill] sm:$0xff] %v15890_v7  ;;  %9543 = vmatpush.msrb.mxu1 %v15890_v7  ;;  %v15896_v10 = vld [vmem:[#allocation3 + $0x168] sm:$0xff]  ;;  %v15909_v7 = vld [vmem:[#allocation3 + $0x218] sm:$0xff] }
 0x3b3   : > { %v8250_v43 = vpop.f32.mrf.mxu2  ;;  %v8270_v17 = vpop.f32.mrf.mxu3  ;;  %17528 = vst [vmem:[#allocation40_spill] sm:$0xff] %v15896_v10 }
 0x3b4   : > { %9544 = vmatpush.msrb.mxu1 %v15893_v14  ;;  %17533 = vst [vmem:[#allocation45_spill] sm:$0xff] %v15909_v7  ;;  %v15912_v14 = vld [vmem:[#allocation3 + $0x210] sm:$0xff] }
 0x3b5   : > { %17534 = vst [vmem:[#allocation46_spill] sm:$0xff] %v15912_v14 }
 0x3b6   : > { %v15885_v47 = vpop.f32.mrf.mxu0  ;;  %v15887_v60 = vpop.f32.mrf.mxu1  ;;  %9545 = vmatpush.msrb.mxu1 %v15896_v10  ;;  %v15915_v10 = vld [vmem:[#allocation3 + $0x208] sm:$0xff] }
 0x3b7   : > { %17535 = vst [vmem:[#allocation47_spill] sm:$0xff] %v15915_v10 }
 0x3b8   : > { %9639 = vmatpush.msra.mxu1 %v15899_v6  ;;  %v7743_v6 = vadd.f32 %v15699_v50, %v15729_v12  ;;  %v15930_v50 = vld [vmem:[#allocation3 + $0x268] sm:$0xff] }
 0x3b9   : > { %17539 = vst [vmem:[#allocation51_spill] sm:$0xff] %v15930_v50 }
 0x3ba   : > { %9640 = vmatpush.msra.mxu1 %v15906_v29  ;;  %v15920_v29 = vld [vmem:[#allocation3 + $0x278] sm:$0xff] }
 0x3bb   : > { %v8332_v58 = vpop.f32.mrf.mxu2  ;;  %v8353_v13 = vpop.f32.mrf.mxu3  ;;  %17536 = vst [vmem:[#allocation48_spill] sm:$0xff] %v15920_v29 }
 0x3bc   : > { %9641 = vmatpush.msra.mxu1 %v15909_v7  ;;  %v7765_v7 = vadd.f32 %v15701_v33, %v7743_v6 }
 0x3be   : > { %v15902_v16 = vpop.f32.mrf.mxu0  ;;  %v15904_v41 = vpop.f32.mrf.mxu1  ;;  %9642 = vmatpush.msra.mxu1 %v15912_v14  ;;  %v15926_v14 = vld [vmem:[#allocation3 + $0x270] sm:$0xff]  ;;  %v7786_v12 = vadd.f32 %v15750_v3, %v7765_v7 }
 0x3bf   : > { %17530 = vst [vmem:[#allocation42_spill] sm:$0xff] %v15902_v16  ;;  %v8271_v16 = vadd.f32 %v8270_v17, %v8250_v43 }
 0x3c0   : > { %17531 = vst [vmem:[#allocation43_spill] sm:$0xff] %v15904_v41  ;;  %9643 = vmatpush.msra.mxu1 %v15915_v10  ;;  %v15934_v10 = vld [vmem:[#allocation3 + $0x260] sm:$0xff] }
 0x3c1   : > { %17538 = vst [vmem:[#allocation50_spill] sm:$0xff] %v15926_v14 }
 0x3c2   : > { %17540 = vst [vmem:[#allocation52_spill] sm:$0xff] %v15934_v10 }
 0x3c3   : > { %v8416_v8 = vpop.f32.mrf.mxu2  ;;  %v8437_v46 = vpop.f32.mrf.mxu3 }
 0x3c6   : > { %v8290_v41 = vpop.f32.mrf.mxu0  ;;  %v8311_v45 = vpop.f32.mrf.mxu1 }
 0x3c7   : > { %v15922_v24 = vpop.permute.xlu2 %9476  ;;  %v8293_v51 = vadd.f32 %v8290_v41, %v8271_v16  ;;  %v15941_v16 = vld [vmem:[#allocation3 + $0x258] sm:$0xff]  ;;  %v7807_v41 = vadd.f32 %v15752_v11, %v7786_v12 }
 0x3c8   : > { %17537 = vst [vmem:[#allocation49_spill] sm:$0xff] %v15922_v24  ;;  %12679 = vmatmul.msk.f32.vlgmr.msrb.gmra.mxu3 %vm9306_vm3, %v15922_v24 }
 0x3c9   : > { %9688 = vmatpush.msrb.mxu3 %v15920_v29  ;;  %v8314_v17 = vadd.f32 %v8311_v45, %v8293_v51  ;;  %17541 = vst [vmem:[#allocation53_spill] sm:$0xff] %v15941_v16  ;;  %v7828_v45 = vadd.f32 %v15721_v42, %v7807_v41  ;;  %v15963_v41 = vld [vmem:[#allocation3 + $0x2c8] sm:$0xff] }
 0x3ca   : > { %17542 = vst [vmem:[#allocation54_spill] sm:$0xff] %v15963_v41 }
 0x3cb   : > { %9689 = vmatpush.msrb.mxu3 %v15926_v14  ;;  %v15936_v43 = vpop.f32.mrf.mxu2  ;;  %v15938_v20 = vpop.f32.mrf.mxu3  ;;  %v8335_v3 = vadd.f32 %v8332_v58, %v8314_v17  ;;  %v7849_v29 = vadd.f32 %v15723_v57, %v7828_v45  ;;  %v15973_v57 = vld [vmem:[#allocation3 + $0x2b8] sm:$0xff] }
 0x3cc   : > { %17544 = vst [vmem:[#allocation56_spill] sm:$0xff] %v15973_v57 }
 0x3cd   : > { %9690 = vmatpush.msrb.mxu3 %v15930_v50  ;;  %v8356_v6 = vadd.f32 %v8353_v13, %v8335_v3 }
 0x3ce   : > { %v8374_v24 = vpop.f32.mrf.mxu0  ;;  %v8395_v33 = vpop.f32.mrf.mxu1 }
 0x3cf   : > { %9691 = vmatpush.msrb.mxu3 %v15934_v10  ;;  %v8377_v11 = vadd.f32 %v8374_v24, %v8356_v6  ;;  %v15970_v24 = vld [vmem:[#allocation3 + $0x2c0] sm:$0xff] }
 0x3d0   : > { %12683 = vmatmul.msk.f32.vlgmr.msra.gmra.mxu3 %vm9306_vm3, %v15633_v2  ;;  %v7870_v2 = vadd.f32 %v15786_v30, %v7849_v29  ;;  %17543 = vst [vmem:[#allocation55_spill] sm:$0xff] %v15970_v24 }
 0x3d1   : > { %9692 = vmatpush.msrb.mxu3 %v15941_v16  ;;  %v8398_v58 = vadd.f32 %v8395_v33, %v8377_v11  ;;  %v15977_v33 = vld [vmem:[#allocation3 + $0x2b0] sm:$0xff] }
 0x3d2   : > { %v7891_v3 = vadd.f32 %v15788_v21, %v7870_v2  ;;  %17545 = vst [vmem:[#allocation57_spill] sm:$0xff] %v15977_v33 }
 0x3d3   : > { %v15949_v51 = vpop.f32.mrf.mxu2  ;;  %v15951_v7 = vpop.f32.mrf.mxu3  ;;  %v8419_v29 = vadd.f32 %v8416_v8, %v8398_v58  ;;  %v15986_v8 = vld [vmem:[#allocation3 + $0x2a8] sm:$0xff] }
 0x3d4   : > { %v7912_v30 = vadd.f32 %v15744_v36, %v7891_v3  ;;  %v15992_v36 = vld [vmem:[#allocation3 + $0x368] sm:$0xff] }
 0x3d5   : > { %v8440_v45 = vadd.f32 %v8437_v46, %v8419_v29  ;;  %v7406_v46 = vadd.f32 %v15589_v62, %v15619_v22  ;;  %v15999_v29 = vld [vmem:[#allocation3 + $0x360] sm:$0xff]  ;;  %v16012_v62 = vld [vmem:[#allocation3 + $0x350] sm:$0xff] }
 0x3d6   : > { %v8458_v50 = vpop.f32.mrf.mxu0  ;;  %v8479_v14 = vpop.f32.mrf.mxu1  ;;  %v7933_v2 = vadd.f32 %v15746_v28, %v7912_v30  ;;  %v16003_v30 = vld [vmem:[#allocation3 + $0x358] sm:$0xff] }
 0x3d7   : > { %v8461_v3 = vadd.f32 %v8458_v50, %v8440_v45  ;;  %17547 = vst [vmem:[#allocation59_spill] sm:$0xff] %v16003_v30 }
 0x3d8   : > { %12687 = vmatmul.msk.f32.vlgmr.msrb.gmra.mxu3 %vm9306_vm3, %v15665_v61  ;;  %v7954_v28 = vadd.f32 %v15822_v4, %v7933_v2  ;;  %v16019_v4 = vld [vmem:[#allocation3 + $0x348] sm:$0xff] }
 0x3da   : > { %v7975_v22 = vadd.f32 %v15824_v25, %v7954_v28 }
 0x3db   : > { %v15957_v12 = vpop.f32.mrf.mxu2  ;;  %v15959_v17 = vpop.f32.mrf.mxu3 }
 0x3de   : > { %v8542_v42 = vpop.f32.mrf.mxu0  ;;  %v15961_v13 = vpop.f32.mrf.mxu1 }
 0x3df   : > { %v15966_v16 = vpop.permute.xlu1 %9526 }
 0x3e0   : > { %12681 = vmatmul.msk.f32.vlgmr.msrb.gmra.mxu1 %vm9306_vm3, %v15966_v16 }
 0x3e1   : > { %9737 = vmatpush.msrb.mxu1 %v15963_v41 }
 0x3e3   : > { %9738 = vmatpush.msrb.mxu1 %v15970_v24  ;;  %v15979_v21 = vpop.f32.mrf.mxu2  ;;  %v8778_v58 = vpop.f32.mrf.mxu3 }
 0x3e5   : > { %9739 = vmatpush.msrb.mxu1 %v15973_v57  ;;  %v8482_v57 = vadd.f32 %v8479_v14, %v8461_v3 }
 0x3e6   : > { %v15982_v6 = vpop.f32.mrf.mxu0  ;;  %v15984_v11 = vpop.f32.mrf.mxu1 }
 0x3e7   : > { %v15989_v10 = vpop.permute.xlu1 %9624  ;;  %9740 = vmatpush.msrb.mxu1 %v15977_v33  ;;  %v7427_v33 = vadd.f32 %v15591_v52, %v7406_v46  ;;  %v8503_v14 = vadd.f32 %v15936_v43, %v8482_v57  ;;  %v7996_v46 = vadd.f32 %v15780_v55, %v7975_v22  ;;  %v16031_v57 = vld [vmem:[#allocation2 + $0xa] sm:$0xf] }
 0x3e8   : > { %17546 = vst [vmem:[#allocation58_spill] sm:$0xff] %v15989_v10  ;;  %12685 = vmatmul.msk.f32.vlgmr.msra.gmra.mxu1 %vm9306_vm3, %v15989_v10 }
 0x3e9   : > { %9741 = vmatpush.msrb.mxu1 %v15986_v8  ;;  %v7448_v52 = vadd.f32 %v15649_v0, %v7427_v33  ;;  %v8524_v3 = vadd.f32 %v15938_v20, %v8503_v14  ;;  %v8017_v0 = vadd.f32 %v15782_v26, %v7996_v46 }
 0x3eb   : > { %9835 = vmatpush.msra.mxu1 %v15992_v36  ;;  %v8839_v50 = vpop.f32.mrf.mxu2  ;;  %v8860_v2 = vpop.f32.mrf.mxu3  ;;  %v7469_v25 = vadd.f32 %v15651_v32, %v7448_v52  ;;  %v8545_v33 = vadd.f32 %v8542_v42, %v8524_v3  ;;  %v8038_v32 = vadd.f32 %v15861_v9, %v8017_v0  ;;  %v16067_v0 = vld [vmem:[#allocation3 + $0x100] sm:$0xff] }
 0x3ec   : > { %17549 = vst [vmem:[#allocation61_spill] sm:$0xff] %v16067_v0 }
 0x3ed   : > { %9836 = vmatpush.msra.mxu1 %v15999_v29  ;;  %v7490_v55 = vadd.f32 %v15611_v38, %v7469_v25  ;;  %v8566_v26 = vadd.f32 %v15961_v13, %v8545_v33  ;;  %v8059_v42 = vadd.f32 %v15863_v18, %v8038_v32  ;;  %v16058_v25 = vld [vmem:[#allocation3 + $0x110] sm:$0xff]  ;;  %v16071_v33 = vld [vmem:[#allocation3 + $0xf8] sm:$0xff] }
 0x3ee   : > { %v16007_v24 = vpop.f32.mrf.mxu0  ;;  %v16009_v41 = vpop.f32.mrf.mxu1  ;;  %9466 = vmatpush.msrb.mxu2 %v16058_v25  ;;  %v16078_v32 = vld [vmem:[#allocation3 + $0x1b0] sm:$0xff] }
 0x3ef   : > { %9837 = vmatpush.msra.mxu1 %v16003_v30  ;;  %v16015_v45 = vpop.permute.xlu1 %9722  ;;  %v8080_v13 = vadd.f32 %v15816_v63, %v8059_v42  ;;  %v17552_v42 = vld [vmem:[#allocation31_spill] sm:$0xff] }
 0x3f0   : > { %17548 = vst [vmem:[#allocation60_spill] sm:$0xff] %v16015_v45  ;;  %12689 = vmatmul.msk.f32.vlgmr.msrb.gmra.mxu1 %vm9306_vm3, %v16015_v45 }
 0x3f1   : > { %9838 = vmatpush.msra.mxu1 %v16012_v62 }
 0x3f3   : > { %9839 = vmatpush.msra.mxu1 %v16019_v4  ;;  %v8944_v20 = vpop.f32.mrf.mxu3 }
 0x3f5   : > { %9931 = vmatpush.msrb.mxu1 %v15754_v15  ;;  %v8923_v15 = vpop.f32.mrf.mxu2 }
 0x3f6   : > { %v8798_v28 = vpop.f32.mrf.mxu0  ;;  %v8818_v30 = vpop.f32.mrf.mxu1 }
 0x3f7   : > { %9932 = vmatpush.msrb.mxu1 %v15770_v5  ;;  %v8799_v43 = vadd.f32 %v8798_v28, %v8778_v58  ;;  %v7511_v5 = vadd.f32 %v15613_v40, %v7490_v55 }
 0x3f8   : > { %12693 = vmatmul.msk.f32.vlgmr.msra.gmra.mxu1 %vm9306_vm3, %v16031_v57 }
 0x3f9   : > { %v8821_v22 = vadd.f32 %v8818_v30, %v8799_v43  ;;  %9933 = vmatpush.msrb.mxu1 %v15776_v54  ;;  %v7532_v9 = vadd.f32 %v15677_v48, %v7511_v5 }
 0x3fb   : > { %v8842_v52 = vadd.f32 %v8839_v50, %v8821_v22  ;;  %9934 = vmatpush.msrb.mxu1 %v15792_v56  ;;  %v8587_v56 = vadd.f32 %v15949_v51, %v8566_v26  ;;  %v9028_v50 = vpop.f32.mrf.mxu3  ;;  %v8101_v51 = vadd.f32 %v15818_v23, %v8080_v13  ;;  %v16076_v22 = vld [vmem:[#allocation3 + $0xf0] sm:$0xff] }
 0x3fd   : > { %v8863_v58 = vadd.f32 %v8860_v2, %v8842_v52  ;;  %9935 = vmatpush.msrb.mxu1 %v15800_v19  ;;  %v9007_v19 = vpop.f32.mrf.mxu2  ;;  %v8608_v18 = vadd.f32 %v15951_v7, %v8587_v56  ;;  %v17550_v52 = vld [vmem:[#allocation11_spill] sm:$0xff] }
 0x3fe   : > { %v8881_v14 = vpop.f32.mrf.mxu0  ;;  %v8902_v38 = vpop.f32.mrf.mxu1 }
 0x3ff   : > { %10017 = vmatpush.msra.mxu1 %v15806_v34  ;;  %v8884_v54 = vadd.f32 %v8881_v14, %v8863_v58  ;;  %v7553_v34 = vadd.f32 %v15679_v1, %v7532_v9  ;;  %v8629_v63 = vadd.f32 %v15982_v6, %v8608_v18  ;;  %v8122_v1 = vadd.f32 %v15885_v47, %v8101_v51  ;;  %v16091_v9 = vld [vmem:[#allocation3 + $0x198] sm:$0xff] }
 0x400   : > { %12697 = vmatmul.msk.f32.vlgmr.msrb.gmra.mxu1 %vm9306_vm3, %v15758_v27  ;;  %v17554_v18 = vld [vmem:[#allocation42_spill] sm:$0xff] }
 0x401   : > { %v8905_v40 = vadd.f32 %v8902_v38, %v8884_v54  ;;  %10018 = vmatpush.msra.mxu1 %v15812_v53  ;;  %v7574_v53 = vadd.f32 %v15641_v44, %v7553_v34  ;;  %v8650_v23 = vadd.f32 %v15984_v11, %v8629_v63  ;;  %v8143_v43 = vadd.f32 %v15887_v60, %v8122_v1  ;;  %v16088_v38 = vld [vmem:[#allocation3 + $0x1a0] sm:$0xff] }
 0x402   : > { %v17556_v63 = vld [vmem:[#allocation43_spill] sm:$0xff] }
 0x403   : > { %v8926_v30 = vadd.f32 %v8923_v15, %v8905_v40  ;;  %10019 = vmatpush.msra.mxu1 %v15828_v31  ;;  %v7595_v3 = vadd.f32 %v15643_v39, %v7574_v53  ;;  %v9112_v55 = vpop.f32.mrf.mxu3  ;;  %v8671_v11 = vadd.f32 %v15957_v12, %v8650_v23  ;;  %v16085_v12 = vld [vmem:[#allocation3 + $0x1a8] sm:$0xff] }
 0x404   : > { %17551 = vst [vmem:[#allocation11_spill] sm:$0xff] %v16085_v12  ;;  %v17553_v40 = vld [vmem:[#allocation13_spill] sm:$0xff] }
 0x405   : > { %v8947_v2 = vadd.f32 %v8944_v20, %v8926_v30  ;;  %10020 = vmatpush.msra.mxu1 %v15839_v59  ;;  %v16062_v59 = vld [vmem:[#allocation3 + $0x108] sm:$0xff]  ;;  %v9091_v28 = vpop.f32.mrf.mxu2  ;;  %v7616_v39 = vadd.f32 %v15705_v35, %v7595_v3  ;;  %v8164_v20 = vadd.f32 %v15856_v49, %v8143_v43  ;;  %v8692_v35 = vadd.f32 %v15959_v17, %v8671_v11  ;;  %v16096_v30 = vld [vmem:[#allocation3 + $0x190] sm:$0xff]  ;;  %v17558_v11 = vld [vmem:[#allocation27_spill] sm:$0xff] }
 0x406   : > { %v8965_v48 = vpop.f32.mrf.mxu0  ;;  %v8986_v27 = vpop.f32.mrf.mxu1  ;;  %9467 = vmatpush.msrb.mxu2 %v16062_v59 }
 0x407   : > { %v8968_v46 = vadd.f32 %v8965_v48, %v8947_v2  ;;  %10021 = vmatpush.msra.mxu1 %v15847_v37  ;;  %v7637_v5 = vadd.f32 %v17550_v52, %v7616_v39  ;;  %v8185_v49 = vadd.f32 %v17552_v42, %v8164_v20  ;;  %v8713_v17 = vadd.f32 %v16007_v24, %v8692_v35  ;;  %v17555_v48 = vld [vmem:[#allocation28_spill] sm:$0xff]  ;;  %v16108_v20 = vld [vmem:[#allocation3 + $0x250] sm:$0xff] }
 0x408   : > { %9468 = vmatpush.msrb.mxu2 %v16067_v0  ;;  %v16127_v35 = vld [vmem:[#allocation3 + $0x240] sm:$0xff]  ;;  %v17561_v42 = vld [vmem:[#allocation14_spill] sm:$0xff] }
 0x409   : > { %v8989_v31 = vadd.f32 %v8986_v27, %v8968_v46  ;;  %v7658_v13 = vadd.f32 %v17553_v40, %v7637_v5  ;;  %v8734_v51 = vadd.f32 %v16009_v41, %v8713_v17  ;;  %v16124_v5 = vld [vmem:[#allocation3 + $0x248] sm:$0xff]  ;;  %v16169_v17 = vld [vmem:[#allocation3 + $0x2d8] sm:$0xff] }
 0x40a   : > { %9469 = vmatpush.msrb.mxu2 %v16071_v33  ;;  %v16163_v40 = vld [vmem:[#allocation3 + $0x2e8] sm:$0xff]  ;;  %17564 = vst [vmem:[#allocation13_spill] sm:$0xff] %v16169_v17 }
 0x40b   : > { %v9010_v7 = vadd.f32 %v9007_v19, %v8989_v31  ;;  %v9196_v34 = vpop.f32.mrf.mxu3  ;;  %v7679_v27 = vadd.f32 %v17555_v48, %v7658_v13  ;;  %v8759_v23 = vadd.f32 %v15979_v21, %v8734_v51  ;;  %v16166_v13 = vld [vmem:[#allocation3 + $0x2e0] sm:$0xff]  ;;  %v16197_v51 = vld [vmem:[#allocation3 + $0x158] sm:$0xff] }
 0x40c   : > { %9470 = vmatpush.msrb.mxu2 %v16076_v22  ;;  %v16189_v48 = vld [vmem:[#allocation3 + $0x160] sm:$0xff] }
 0x40d   : > { %v9031_v37 = vadd.f32 %v9028_v50, %v9010_v7  ;;  %v9175_v56 = vpop.f32.mrf.mxu2  ;;  %v8206_v50 = vadd.f32 %v17554_v18, %v8185_v49  ;;  %v17557_v7 = vld [vmem:[#allocation12_spill] sm:$0xff]  ;;  %v16143_v49 = vpop.permute.xlu2 %9649  ;;  %9516 = vmatpush.msrb.mxu0 %v16189_v48  ;;  %10101 = vmatpush.msrb.mxu1 %v16189_v48 }
 0x40e   : > { %v9049_v44 = vpop.f32.mrf.mxu0  ;;  %v9070_v6 = vpop.f32.mrf.mxu1  ;;  %9565 = vmatpush.msra.mxu2 %v16078_v32  ;;  %v7704_v3 = vadd.f32 %v17557_v7, %v7679_v27  ;;  %v16180_v18 = vld [vmem:[#allocation3 + $0x388] sm:$0xff]  ;;  %v16191_v27 = vld [vmem:[#allocation3 + $0x370] sm:$0xff] }
 0x40f   : > { %v9052_v47 = vadd.f32 %v9049_v44, %v9031_v37  ;;  %v8231_v31 = vadd.f32 %v17556_v63, %v8206_v50  ;;  %v16184_v50 = vld [vmem:[#allocation3 + $0x380] sm:$0xff]  ;;  %9517 = vmatpush.msrb.mxu0 %v16197_v51  ;;  %10102 = vmatpush.msrb.mxu1 %v16197_v51  ;;  %v16221_v7 = vld [vmem:[#allocation3 + $0x1e8] sm:$0xff] }
 0x410   : > { %9566 = vmatpush.msra.mxu2 %v16085_v12  ;;  %v16207_v63 = vld [vmem:[#allocation3 + $0x140] sm:$0xff]  ;;  %17567 = vst [vmem:[#allocation43_spill] sm:$0xff] %v16221_v7 }
 0x411   : > { %v9073_v15 = vadd.f32 %v9070_v6, %v9052_v47  ;;  %v8232_v44 = vmax.f32 %v7704_v3, %v8231_v31  ;;  %17565 = vst [vmem:[#allocation42_spill] sm:$0xff] %v16207_v63  ;;  %v16210_v31 = vld [vmem:[#allocation3 + $0x200] sm:$0xff]  ;;  %v16224_v3 = vld [vmem:[#allocation3 + $0x318] sm:$0xff] }
 0x412   : > { %9567 = vmatpush.msra.mxu2 %v16088_v38  ;;  %9787 = vmatpush.msra.mxu3 %v16224_v3 }
 0x413   : > { %v9094_v60 = vadd.f32 %v9091_v28, %v9073_v15  ;;  %v9284_v43 = vpop.f32.mrf.mxu3  ;;  %v8760_v47 = vmax.f32 %v8232_v44, %v8759_v23  ;;  %v16228_v23 = vld [vmem:[#allocation3 + $0x1e0] sm:$0xff] }
 0x414   : > { %9568 = vmatpush.msra.mxu2 %v16091_v9  ;;  %17568 = vst [vmem:[#allocation12_spill] sm:$0xff] %v16228_v23  ;;  %v16237_v44 = vld [vmem:[#allocation3 + $0x300] sm:$0xff] }
 0x415   : > { %v9115_v26 = vadd.f32 %v9112_v55, %v9094_v60  ;;  %v9259_v37 = vpop.f32.mrf.mxu2 }
 0x416   : > { %v9133_v58 = vpop.f32.mrf.mxu0  ;;  %v9154_v14 = vpop.f32.mrf.mxu1  ;;  %9569 = vmatpush.msra.mxu2 %v16096_v30 }
 0x417   : > { %v9136_v54 = vadd.f32 %v9133_v58, %v9115_v26  ;;  %v16130_v26 = vld [vmem:[#allocation3 + $0x238] sm:$0xff]  ;;  %v16133_v58 = vld [vmem:[#allocation3 + $0x230] sm:$0xff] }
 0x419   : > { %v9157_v19 = vadd.f32 %v9154_v14, %v9136_v54  ;;  %v17560_v14 = vld [vmem:[#allocation22_spill] sm:$0xff]  ;;  %v17562_v54 = vld [vmem:[#allocation32_spill] sm:$0xff] }
 0x41b   : > { %v9178_v2 = vadd.f32 %v9175_v56, %v9157_v19  ;;  %v17563_v56 = vld [vmem:[#allocation29_spill] sm:$0xff] }
 0x41c   : > { %v16172_v19 = vld [vmem:[#allocation3 + $0x2d0] sm:$0xff] }
 0x41d   : > { %v9199_v46 = vadd.f32 %v9196_v34, %v9178_v2  ;;  %v16175_v34 = vld [vmem:[#allocation3 + $0x390] sm:$0xff]  ;;  %v16186_v2 = vld [vmem:[#allocation3 + $0x378] sm:$0xff] }
 0x41e   : > { %v9217_v53 = vpop.f32.mrf.mxu0  ;;  %v9238_v1 = vpop.f32.mrf.mxu1 }
 0x41f   : > { %v9220_v24 = vadd.f32 %v9217_v53, %v9199_v46  ;;  %v16200_v46 = vld [vmem:[#allocation3 + $0x150] sm:$0xff]  ;;  %v16203_v53 = vld [vmem:[#allocation3 + $0x148] sm:$0xff] }
 0x420   : > { %9518 = vmatpush.msrb.mxu0 %v16200_v46  ;;  %10103 = vmatpush.msrb.mxu1 %v16200_v46 }
 0x421   : > { %v9241_v28 = vadd.f32 %v9238_v1, %v9220_v24  ;;  %v16216_v24 = vld [vmem:[#allocation3 + $0x1f8] sm:$0xff]  ;;  %v16218_v1 = vld [vmem:[#allocation3 + $0x1f0] sm:$0xff] }
 0x422   : > { %9519 = vmatpush.msrb.mxu0 %v16203_v53  ;;  %10104 = vmatpush.msrb.mxu1 %v16203_v53  ;;  %17566 = vst [vmem:[#allocation28_spill] sm:$0xff] %v16218_v1 }
 0x423   : > { %v9262_v6 = vadd.f32 %v9259_v37, %v9241_v28  ;;  %v16231_v28 = vld [vmem:[#allocation3 + $0x310] sm:$0xff]  ;;  %v16234_v37 = vld [vmem:[#allocation3 + $0x308] sm:$0xff] }
 0x424   : > { %9520 = vmatpush.msrb.mxu0 %v16207_v63  ;;  %10105 = vmatpush.msrb.mxu1 %v16207_v63  ;;  %v17578_v63 = vld [vmem:[#allocation26_spill] sm:$0xff] }
 0x425   : > { %v9287_v55 = vadd.f32 %v9284_v43, %v9262_v6  ;;  %9788 = vmatpush.msra.mxu3 %v16231_v28  ;;  %v16240_v6 = vld [vmem:[#allocation3 + $0x2f8] sm:$0xff] }
 0x426   : > { %9614 = vmatpush.msra.mxu0 %v16210_v31  ;;  %v16242_v43 = vld [vmem:[#allocation3 + $0x3b8] sm:$0xff] }
 0x427   : > { %v9288_v39 = vmax.f32 %v8760_v47, %v9287_v55  ;;  %9789 = vmatpush.msra.mxu3 %v16234_v37  ;;  %v17569_v55 = vld [vmem:[#allocation9_spill] sm:$0xff] }
 0x428   : > { %9615 = vmatpush.msra.mxu0 %v16216_v24 }
 0x429   : > { %v9289_v41 = vadd.f32 %v17558_v11, %v9288_v39  ;;  %9790 = vmatpush.msra.mxu3 %v16237_v44  ;;  %v16251_v39 = vld [vmem:[#allocation3 + $0x3b0] sm:$0xff] }
 0x42a   : > { %9616 = vmatpush.msra.mxu0 %v16218_v1  ;;  %v17570_v11 = vld [vmem:[#allocation10_spill] sm:$0xff] }
 0x42b   : > { %v9290_v15 = vmax.f32 %v9289_v41, 0.0  ;;  %9791 = vmatpush.msra.mxu3 %v16240_v6  ;;  %v16255_v41 = vld [vmem:[#allocation3 + $0x3a8] sm:$0xff] }
 0x42c   : > { %9617 = vmatpush.msra.mxu0 %v16221_v7 }
 0x42d   : > { %9292 = vst.msk [vmem:[#allocation2 + $0x18] sm:$0x3f] %vm2890_vm2, %v9290_v15  ;;  %9885 = vmatpush.msrb.mxu3 %v16242_v43  ;;  %v17571_v15 = vld [vmem:[#allocation18_spill] sm:$0xff] }
 0x42e   : > { %9618 = vmatpush.msra.mxu0 %v16228_v23 }
 0x42f   : > { %9886 = vmatpush.msrb.mxu3 %v16251_v39 }
 0x431   : > { %9887 = vmatpush.msrb.mxu3 %v16255_v41 }
 0x434   : > { %v16110_v60 = vld [vmem:[#allocation2 + $0x18] sm:$0xf] }
 0x435   : > { %v16112_v52 = vld [vmem:[#allocation2 + $0x1a] sm:$0xf]  ;;  %9501 = vrot.lane.b32.xlu0 %v16110_v60, %s13150_s16  ;;  %12678 = vmatmul.msk.f32.vlgmr.msrb.gmra.mxu2 %vm9306_vm3, %v16110_v60 }
 0x436   : > { %17559 = vst [vmem:[#allocation31_spill] sm:$0xff] %v16112_v52  ;;  %v16114_v21 = vld [vmem:[#allocation2 + $0x19] sm:$0xf]  ;;  %11508 = vrot.lane.b32.xlu1 %v16112_v52, %s13149_s14  ;;  %9664 = vmatpush.msrb.mxu2 %v16108_v20 }
 0x437   : > { %9747 = vrot.lane.b32.xlu2 %v16114_v21, %s13150_s16 }
 0x438   : > { %9665 = vmatpush.msrb.mxu2 %v16124_v5 }
 0x43a   : > { %9666 = vmatpush.msrb.mxu2 %v16127_v35 }
 0x43c   : > { %9667 = vmatpush.msrb.mxu2 %v16130_v26 }
 0x43d   : > { %9599 = vrot.lane.b32.xlu0 %v17560_v14, %s13150_s16  ;;  %12682 = vmatmul.msk.f32.vlgmr.msra.gmra.mxu2 %vm9306_vm3, %v17560_v14  ;;  %v16259_v14 = vld [vmem:[#allocation3 + $0x3a0] sm:$0xff] }
 0x43e   : > { %9668 = vmatpush.msrb.mxu2 %v16133_v58  ;;  %17572 = vst [vmem:[#allocation27_spill] sm:$0xff] %v16259_v14  ;;  %9888 = vmatpush.msrb.mxu3 %v16259_v14 }
 0x43f   : > { %9845 = vrot.lane.b32.xlu2 %v17561_v42, %s13150_s16 }
 0x445   : > { %9772 = vrot.lane.b32.xlu0 %v15665_v61, %s13149_s14  ;;  %12686 = vmatmul.msk.f32.vlgmr.msrb.gmra.mxu2 %vm9306_vm3, %v16143_v49  ;;  %v16161_v61 = vld [vmem:[#allocation3 + $0x2f0] sm:$0xff] }
 0x446   : > { %9762 = vmatpush.msra.mxu2 %v16161_v61 }
 0x447   : > { %10002 = vrot.lane.b32.xlu2 %v17562_v54, %s13149_s14 }
 0x448   : > { %9763 = vmatpush.msra.mxu2 %v16163_v40 }
 0x44a   : > { %9764 = vmatpush.msra.mxu2 %v16166_v13 }
 0x44c   : > { %9765 = vmatpush.msra.mxu2 %v16169_v17 }
 0x44d   : > { %9870 = vrot.lane.b32.xlu0 %v16031_v57, %s13150_s16 }
 0x44e   : > { %9766 = vmatpush.msra.mxu2 %v16172_v19 }
 0x44f   : > { %10329 = vrot.lane.b32.xlu2 %v16114_v21, %s13149_s14 }
 0x450   : > { %9860 = vmatpush.msrb.mxu2 %v16175_v34 }
 0x452   : > { %9861 = vmatpush.msrb.mxu2 %v16180_v18 }
 0x454   : > { %9862 = vmatpush.msrb.mxu2 %v16184_v50 }
 0x455   : > { %10111 = vrot.lane.b32.xlu0 %v16110_v60, %s13149_s14 }
 0x456   : > { %9863 = vmatpush.msrb.mxu2 %v16186_v2 }
 0x457   : > { %10930 = vrot.lane.b32.xlu2 %v17563_v56, %s13150_s16  ;;  %v17573_v56 = vld [vmem:[#allocation16_spill] sm:$0xff] }
 0x458   : > { %9864 = vmatpush.msrb.mxu2 %v16191_v27 }
 0x45d   : > { %10438 = vrot.lane.b32.xlu0 %v16031_v57, %s13149_s14  ;;  %s13091_s14 = sshra.s32 %s11744_s17, 4  ;;  %s13092_s14 = int_to_ptr.hbm [resolvable:$true] %s13091_s14 }
 0x45e   : > { %p13098_p3 = scmp.lt.s32.totalorder %s13092_s14, %s17216_s9 }
 0x465   : > { %10955 = vrot.lane.b32.xlu0 %v16112_v52, %s13150_s16  ;;  %v17576_v52 = vld [vmem:[#allocation15_spill] sm:$0xff]  ;;  %s13093_s16 = scalar_lea.hbm %s13092_s14, 1 }
 0x466   : > { %p13094_p0 = scmp.ne.s32.totalorder %s13092_s14, %s13093_s16  ;;  %p13099_p4 = scmp.lt.s32.totalorder %s13097_s26, %s13093_s16 }
 0x468   : > { %p13095_p1 = pnand %p13094_p0, %p13239_p5  ;;  %p13100_p7 = por %p13099_p4, %p13098_p3 }
 0x46a   : > { %p13096_p2 = pneg %p13095_p1 }
 0x46c   : > { %p13101_p8 = pnand %p13100_p7, %p13096_p2 }
 0x491   : > { %v16244_v47 = vpop.permute.xlu2 %9747 }
 0x492   : > { %12690 = vmatmul.msk.f32.vlgmr.msra.gmra.mxu2 %vm9306_vm3, %v16244_v47 }
 0x493   : > { %9951 = vmatpush.msra.mxu2 %v17569_v55  ;;  %v16265_v55 = vld [vmem:[#allocation3 + $0x398] sm:$0xff] }
 0x494   : > { %17574 = vst [vmem:[#allocation22_spill] sm:$0xff] %v16265_v55  ;;  %9889 = vmatpush.msrb.mxu3 %v16265_v55  ;;  %v17580_v55 = vld [vmem:[#allocation25_spill] sm:$0xff] }
 0x495   : > { %9952 = vmatpush.msra.mxu2 %v17570_v11  ;;  %v17575_v11 = vld [vmem:[#allocation24_spill] sm:$0xff] }
 0x497   : > { %9953 = vmatpush.msra.mxu2 %v17571_v15  ;;  %v17577_v15 = vld [vmem:[#allocation23_spill] sm:$0xff] }
 0x499   : > { %v16262_v42 = vpop.permute.xlu2 %9845  ;;  %9954 = vmatpush.msra.mxu2 %v17573_v56  ;;  %v17579_v56 = vld [vmem:[#allocation33_spill] sm:$0xff] }
 0x49a   : > { %12694 = vmatmul.msk.f32.vlgmr.msrb.gmra.mxu2 %vm9306_vm3, %v16262_v42 }
 0x49b   : > { %9955 = vmatpush.msra.mxu2 %v17575_v11  ;;  %v17581_v11 = vld [vmem:[#allocation36_spill] sm:$0xff] }
 0x49d   : > { %10038 = vmatpush.msrb.mxu2 %v17576_v52  ;;  %v16283_v52 = vld [vmem:[#allocation3 + $0x2a0] sm:$0xff] }
 0x49e   : > { %17582 = vst [vmem:[#allocation14_spill] sm:$0xff] %v16283_v52 }
 0x49f   : > { %10039 = vmatpush.msrb.mxu2 %v17577_v15  ;;  %v17583_v15 = vld [vmem:[#allocation37_spill] sm:$0xff] }
 0x4a1   : > { %10040 = vmatpush.msrb.mxu2 %v17578_v63  ;;  %v10003_v14 = vpop.permute.xlu2 %10002 }
 0x4a2   : > { %12698 = vmatmul.msk.f32.vlgmr.msra.gmra.mxu2 %vm9306_vm3, %v17562_v54  ;;  %12701 = vmatmul.msk.f32.vlgmr.msra.gmra.mxu1 %vm9306_vm3, %v10003_v14  ;;  %v16291_v54 = vld [vmem:[#allocation3 + $0x298] sm:$0xff]  ;;  %v16298_v14 = vld [vmem:[#allocation3 + $0x290] sm:$0xff] }
 0x4a3   : > { %10189 = vmatpush.msra.mxu1 %v16210_v31  ;;  %10041 = vmatpush.msrb.mxu2 %v17579_v56  ;;  %17584 = vst [vmem:[#allocation32_spill] sm:$0xff] %v16291_v54  ;;  %v16304_v56 = vld [vmem:[#allocation3 + $0x288] sm:$0xff] }
 0x4a4   : > { %17585 = vst [vmem:[#allocation29_spill] sm:$0xff] %v16298_v14 }
 0x4a5   : > { %10190 = vmatpush.msra.mxu1 %v16216_v24  ;;  %10042 = vmatpush.msrb.mxu2 %v17580_v55  ;;  %v17586_v55 = vld [vmem:[#allocation38_spill] sm:$0xff]  ;;  %17587 = vst [vmem:[#allocation9_spill] sm:$0xff] %v16304_v56 }
 0x4a7   : > { %10126 = vmatpush.msra.mxu2 %v17581_v11  ;;  %10191 = vmatpush.msra.mxu1 %v16218_v1  ;;  %v16285_v63 = vpop.permute.xlu0 %9501  ;;  %v17588_v11 = vld [vmem:[#allocation39_spill] sm:$0xff] }
 0x4a8   : > { %12680 = vmatmul.msk.f32.vlgmr.msrb.gmra.mxu0 %vm9306_vm3, %v16285_v63  ;;  %v16315_v1 = vld [vmem:[#allocation3 + $0x340] sm:$0xff] }
 0x4a9   : > { %10127 = vmatpush.msra.mxu2 %v17583_v15  ;;  %10192 = vmatpush.msra.mxu1 %v16221_v7  ;;  %v16309_v15 = vld [vmem:[#allocation3 + $0x280] sm:$0xff]  ;;  %17591 = vst [vmem:[#allocation18_spill] sm:$0xff] %v16315_v1 }
 0x4aa   : > { %9712 = vmatpush.msrb.mxu0 %v16283_v52  ;;  %12702 = vmatmul.msk.f32.vlgmr.msrb.gmra.mxu2 %vm9306_vm3, %v16110_v60  ;;  %17589 = vst [vmem:[#allocation10_spill] sm:$0xff] %v16309_v15  ;;  %v17590_v7 = vld [vmem:[#allocation40_spill] sm:$0xff] }
 0x4ab   : > { %12705 = vmatmul.msk.f32.vlgmr.msrb.gmra.mxu1 %vm9306_vm3, %v15966_v16  ;;  %10128 = vmatpush.msra.mxu2 %v17586_v55 }
 0x4ac   : > { %9713 = vmatpush.msrb.mxu0 %v16291_v54  ;;  %10193 = vmatpush.msra.mxu1 %v16228_v23  ;;  %v17592_v23 = vld [vmem:[#allocation41_spill] sm:$0xff] }
 0x4ad   : > { %10129 = vmatpush.msra.mxu2 %v17588_v11  ;;  %v16322_v11 = vld [vmem:[#allocation3 + $0x338] sm:$0xff] }
 0x4ae   : > { %10277 = vmatpush.msrb.mxu1 %v16283_v52  ;;  %9714 = vmatpush.msrb.mxu0 %v16298_v14  ;;  %17593 = vst [vmem:[#allocation16_spill] sm:$0xff] %v16322_v11  ;;  %v17598_v52 = vld [vmem:[#allocation46_spill] sm:$0xff] }
 0x4af   : > { %10130 = vmatpush.msra.mxu2 %v17590_v7  ;;  %v16313_v55 = vpop.permute.xlu0 %9599  ;;  %v16329_v7 = vld [vmem:[#allocation3 + $0x330] sm:$0xff] }
 0x4b0   : > { %10278 = vmatpush.msrb.mxu1 %v16291_v54  ;;  %9715 = vmatpush.msrb.mxu0 %v16304_v56  ;;  %v17594_v54 = vld [vmem:[#allocation44_spill] sm:$0xff]  ;;  %17595 = vst [vmem:[#allocation24_spill] sm:$0xff] %v16329_v7 }
 0x4b1   : > { %10210 = vmatpush.msrb.mxu2 %v17592_v23  ;;  %12684 = vmatmul.msk.f32.vlgmr.msra.gmra.mxu0 %vm9306_vm3, %v16313_v55  ;;  %v17596_v23 = vld [vmem:[#allocation45_spill] sm:$0xff] }
 0x4b2   : > { %10279 = vmatpush.msrb.mxu1 %v16298_v14  ;;  %9716 = vmatpush.msrb.mxu0 %v16309_v15  ;;  %v16334_v14 = vld [vmem:[#allocation3 + $0x328] sm:$0xff] }
 0x4b3   : > { %10211 = vmatpush.msrb.mxu2 %v17594_v54  ;;  %12709 = vmatmul.msk.f32.vlgmr.msra.gmra.mxu1 %vm9306_vm3, %v15989_v10  ;;  %17597 = vst [vmem:[#allocation15_spill] sm:$0xff] %v16334_v14  ;;  %v17599_v10 = vld [vmem:[#allocation47_spill] sm:$0xff] }
 0x4b4   : > { %9811 = vmatpush.msra.mxu0 %v16315_v1  ;;  %10280 = vmatpush.msrb.mxu1 %v16304_v56  ;;  %v16369_v56 = vld [vmem:[#allocation3 + $0x60] sm:$0xff] }
 0x4b5   : > { %10212 = vmatpush.msrb.mxu2 %v17596_v23  ;;  %v16344_v23 = vld [vmem:[#allocation3 + $0x320] sm:$0xff]  ;;  %17605 = vst [vmem:[#allocation37_spill] sm:$0xff] %v16369_v56 }
 0x4b6   : > { %9812 = vmatpush.msra.mxu0 %v16322_v11  ;;  %10281 = vmatpush.msrb.mxu1 %v16309_v15  ;;  %17600 = vst [vmem:[#allocation23_spill] sm:$0xff] %v16344_v23  ;;  %v16352_v15 = vld [vmem:[#allocation3 + $0x70] sm:$0xff] }
 0x4b7   : > { %10213 = vmatpush.msrb.mxu2 %v17598_v52  ;;  %v16339_v54 = vpop.permute.xlu0 %9772  ;;  %v16350_v52 = vld [vmem:[#allocation3 + $0x3e0] sm:$0xff]  ;;  %17602 = vst [vmem:[#allocation33_spill] sm:$0xff] %v16352_v15 }
 0x4b8   : > { %9813 = vmatpush.msra.mxu0 %v16329_v7  ;;  %10365 = vmatpush.msra.mxu1 %v16315_v1  ;;  %17601 = vst [vmem:[#allocation26_spill] sm:$0xff] %v16350_v52  ;;  %v16366_v1 = vld [vmem:[#allocation3 + $0x3d0] sm:$0xff] }
 0x4b9   : > { %10214 = vmatpush.msrb.mxu2 %v17599_v10  ;;  %12688 = vmatmul.msk.f32.vlgmr.msrb.gmra.mxu0 %vm9306_vm3, %v16114_v21  ;;  %v16359_v10 = vld [vmem:[#allocation3 + $0x3d8] sm:$0xff]  ;;  %17604 = vst [vmem:[#allocation36_spill] sm:$0xff] %v16366_v1 }
 0x4ba   : > { %9814 = vmatpush.msra.mxu0 %v16334_v14  ;;  %10366 = vmatpush.msra.mxu1 %v16322_v11  ;;  %17603 = vst [vmem:[#allocation25_spill] sm:$0xff] %v16359_v10  ;;  %v16362_v11 = vld [vmem:[#allocation3 + $0x68] sm:$0xff] }
 0x4bb   : > { %12691 = vmatmul.msk.f32.vlgmr.msra.gmra.mxu3 %vm9306_vm3, %v16339_v54  ;;  %12713 = vmatmul.msk.f32.vlgmr.msrb.gmra.mxu1 %vm9306_vm3, %v16015_v45  ;;  %v16375_v45 = vld [vmem:[#allocation3 + $0x3c8] sm:$0xff] }
 0x4bc   : > { %9971 = vmatpush.msra.mxu3 %v16352_v15  ;;  %9815 = vmatpush.msra.mxu0 %v16344_v23  ;;  %17606 = vst [vmem:[#allocation38_spill] sm:$0xff] %v16375_v45  ;;  %v16378_v15 = vld [vmem:[#allocation3 + $0x58] sm:$0xff] }
 0x4bd   : > { %10367 = vmatpush.msra.mxu1 %v16329_v7  ;;  %17607 = vst [vmem:[#allocation39_spill] sm:$0xff] %v16378_v15 }
 0x4be   : > { %9910 = vmatpush.msrb.mxu0 %v16350_v52  ;;  %9972 = vmatpush.msra.mxu3 %v16362_v11 }
 0x4bf   : > { %10368 = vmatpush.msra.mxu1 %v16334_v14  ;;  %v16373_v7 = vpop.permute.xlu0 %9870  ;;  %v16382_v14 = vld [vmem:[#allocation2 + $0x2] sm:$0xf] }
 0x4c0   : > { %9911 = vmatpush.msrb.mxu0 %v16359_v10  ;;  %9973 = vmatpush.msra.mxu3 %v16369_v56  ;;  %v16391_v56 = vld [vmem:[#allocation3 + $0x50] sm:$0xff] }
 0x4c1   : > { %10369 = vmatpush.msra.mxu1 %v16344_v23  ;;  %12692 = vmatmul.msk.f32.vlgmr.msra.gmra.mxu0 %vm9306_vm3, %v16382_v14  ;;  %v16389_v23 = vld [vmem:[#allocation3 + $0x3c0] sm:$0xff]  ;;  %17609 = vst [vmem:[#allocation41_spill] sm:$0xff] %v16391_v56 }
 0x4c2   : > { %9912 = vmatpush.msrb.mxu0 %v16366_v1  ;;  %9974 = vmatpush.msra.mxu3 %v16378_v15  ;;  %17608 = vst [vmem:[#allocation40_spill] sm:$0xff] %v16389_v23  ;;  %v16404_v15 = vpop.permute.xlu1 %9895 }
 0x4c3   : > { %10453 = vmatpush.msrb.mxu1 %v16350_v52  ;;  %12695 = vmatmul.msk.f32.vlgmr.msrb.gmra.mxu3 %vm9306_vm3, %v16373_v7  ;;  %v16400_v52 = vld [vmem:[#allocation3 + $0x98] sm:$0xff] }
 0x4c4   : > { %9913 = vmatpush.msrb.mxu0 %v16375_v45  ;;  %9975 = vmatpush.msra.mxu3 %v16391_v56  ;;  %17610 = vst [vmem:[#allocation44_spill] sm:$0xff] %v16400_v52  ;;  %v16407_v56 = vld [vmem:[#allocation3 + $0x90] sm:$0xff] }
 0x4c5   : > { %12717 = vmatmul.msk.f32.vlgmr.msra.gmra.mxu1 %vm9306_vm3, %v16031_v57  ;;  %17611 = vst [vmem:[#allocation45_spill] sm:$0xff] %v16407_v56 }
 0x4c6   : > { %10454 = vmatpush.msrb.mxu1 %v16359_v10  ;;  %10059 = vmatpush.msrb.mxu3 %v16058_v25  ;;  %v17615_v10 = vld [vmem:[#allocation54_spill] sm:$0xff] }
 0x4c7   : > { %9914 = vmatpush.msrb.mxu0 %v16389_v23  ;;  %v16411_v57 = vpop.permute.xlu0 %10111 }
 0x4c8   : > { %10455 = vmatpush.msrb.mxu1 %v16366_v1  ;;  %10060 = vmatpush.msrb.mxu3 %v16062_v59  ;;  %17612 = vst [vmem:[#allocation46_spill] sm:$0xff] %v16411_v57  ;;  %v16416_v1 = vld [vmem:[#allocation3 + $0x88] sm:$0xff] }
 0x4c9   : > { %9992 = vmatpush.msra.mxu0 %v16400_v52  ;;  %17613 = vst [vmem:[#allocation47_spill] sm:$0xff] %v16416_v1  ;;  %12706 = vmatmul.msk.f32.vlgmr.msra.gmra.mxu2 %vm9306_vm3, %v16411_v57  ;;  %v16443_v57 = vld [vmem:[#allocation3 + $0x130] sm:$0xff] }
 0x4ca   : > { %10456 = vmatpush.msrb.mxu1 %v16375_v45  ;;  %10061 = vmatpush.msrb.mxu3 %v16067_v0  ;;  %v17614_v45 = vld [vmem:[#allocation17_spill] sm:$0xff]  ;;  %v16426_v0 = vld [vmem:[#allocation3 + $0x80] sm:$0xff] }
 0x4cb   : > { %9993 = vmatpush.msra.mxu0 %v16407_v56  ;;  %12699 = vmatmul.msk.f32.vlgmr.msra.gmra.mxu3 %vm9306_vm3, %v17614_v45  ;;  %v16437_v45 = vld [vmem:[#allocation3 + $0x138] sm:$0xff]  ;;  %17618 = vst [vmem:[#allocation17_spill] sm:$0xff] %v16443_v57 }
 0x4cc   : > { %12696 = vmatmul.msk.f32.vlgmr.msrb.gmra.mxu0 %vm9306_vm3, %v16404_v15  ;;  %10457 = vmatpush.msrb.mxu1 %v16389_v23  ;;  %v17616_v23 = vld [vmem:[#allocation55_spill] sm:$0xff] }
 0x4cd   : > { %9994 = vmatpush.msra.mxu0 %v16416_v1  ;;  %10062 = vmatpush.msrb.mxu3 %v16071_v33 }
 0x4ce   : > { %10536 = vmatpush.msra.mxu1 %v16400_v52  ;;  %10298 = vmatpush.msra.mxu2 %v17615_v10  ;;  %v16433_v52 = vld [vmem:[#allocation3 + $0x78] sm:$0xff]  ;;  %v17617_v10 = vld [vmem:[#allocation56_spill] sm:$0xff] }
 0x4cf   : > { %9995 = vmatpush.msra.mxu0 %v16426_v0  ;;  %10063 = vmatpush.msrb.mxu3 %v16076_v22 }
 0x4d0   : > { %10537 = vmatpush.msra.mxu1 %v16407_v56  ;;  %10299 = vmatpush.msra.mxu2 %v17616_v23  ;;  %v17619_v23 = vld [vmem:[#allocation57_spill] sm:$0xff]  ;;  %v16448_v56 = vpop.permute.xlu0 %10438 }
 0x4d1   : > { %10147 = vmatpush.msra.mxu3 %v16078_v32  ;;  %9996 = vmatpush.msra.mxu0 %v16433_v52  ;;  %17620 = vst [vmem:[#allocation54_spill] sm:$0xff] %v16448_v56 }
 0x4d2   : > { %10538 = vmatpush.msra.mxu1 %v16416_v1  ;;  %10300 = vmatpush.msra.mxu2 %v17617_v10  ;;  %v17621_v1 = vld [vmem:[#allocation34_spill] sm:$0xff]  ;;  %v16455_v10 = vld [vmem:[#allocation3 + $0x128] sm:$0xff] }
 0x4d3   : > { %10080 = vmatpush.msrb.mxu0 %v16437_v45  ;;  %10148 = vmatpush.msra.mxu3 %v16085_v12  ;;  %v17622_v12 = vld [vmem:[#allocation49_spill] sm:$0xff]  ;;  %17623 = vst [vmem:[#allocation55_spill] sm:$0xff] %v16455_v10 }
 0x4d4   : > { %10539 = vmatpush.msra.mxu1 %v16426_v0  ;;  %10301 = vmatpush.msra.mxu2 %v17619_v23  ;;  %v16473_v23 = vld [vmem:[#allocation3 + $0x118] sm:$0xff] }
 0x4d5   : > { %10081 = vmatpush.msrb.mxu0 %v16443_v57  ;;  %10149 = vmatpush.msra.mxu3 %v16088_v38  ;;  %17625 = vst [vmem:[#allocation57_spill] sm:$0xff] %v16473_v23 }
 0x4d6   : > { %10540 = vmatpush.msra.mxu1 %v16433_v52  ;;  %12700 = vmatmul.msk.f32.vlgmr.msra.gmra.mxu0 %vm9306_vm3, %v17621_v1  ;;  %v16466_v1 = vld [vmem:[#allocation3 + $0x120] sm:$0xff] }
 0x4d7   : > { %12703 = vmatmul.msk.f32.vlgmr.msrb.gmra.mxu3 %vm9306_vm3, %v17622_v12  ;;  %10082 = vmatpush.msrb.mxu0 %v16455_v10  ;;  %17624 = vst [vmem:[#allocation56_spill] sm:$0xff] %v16466_v1 }
 0x4d8   : > { %10150 = vmatpush.msra.mxu3 %v16091_v9  ;;  %12710 = vmatmul.msk.f32.vlgmr.msrb.gmra.mxu2 %vm9306_vm3, %v16143_v49 }
 0x4d9   : > { %12721 = vmatmul.msk.f32.vlgmr.msrb.gmra.mxu1 %vm9306_vm3, %v16448_v56  ;;  %10302 = vmatpush.msra.mxu2 %v15986_v8  ;;  %v17626_v8 = vld [vmem:[#allocation21_spill] sm:$0xff]  ;;  %v17628_v56 = vld [vmem:[#allocation19_spill] sm:$0xff] }
 0x4da   : > { %10620 = vmatpush.msrb.mxu1 %v16437_v45  ;;  %10083 = vmatpush.msrb.mxu0 %v16466_v1 }
 0x4db   : > { %10386 = vmatpush.msrb.mxu2 %v15992_v36  ;;  %10151 = vmatpush.msra.mxu3 %v16096_v30  ;;  %v17627_v36 = vld [vmem:[#allocation59_spill] sm:$0xff] }
 0x4dc   : > { %10621 = vmatpush.msrb.mxu1 %v16443_v57  ;;  %10084 = vmatpush.msrb.mxu0 %v16473_v23  ;;  %v16553_v57 = vld [vmem:[#allocation3 + $0xc0] sm:$0xff] }
 0x4dd   : > { %10235 = vmatpush.msrb.mxu3 %v16108_v20  ;;  %10387 = vmatpush.msrb.mxu2 %v15999_v29  ;;  %v16486_v29 = vld [vmem:[#allocation2 + $0x9] sm:$0xf] }
 0x4de   : > { %10622 = vmatpush.msrb.mxu1 %v16455_v10  ;;  %10168 = vmatpush.msra.mxu0 %v17626_v8  ;;  %v17629_v8 = vld [vmem:[#allocation30_spill] sm:$0xff] }
 0x4df   : > { %10236 = vmatpush.msrb.mxu3 %v16124_v5  ;;  %10388 = vmatpush.msrb.mxu2 %v17627_v36  ;;  %v17632_v36 = vld [vmem:[#allocation20_spill] sm:$0xff]  ;;  %v16521_v10 = vld [vmem:[#allocation3 + $0x38] sm:$0xff] }
 0x4e0   : > { %10623 = vmatpush.msrb.mxu1 %v16466_v1  ;;  %10169 = vmatpush.msra.mxu0 %v17628_v56  ;;  %v16501_v56 = vld [vmem:[#allocation3 + $0x48] sm:$0xff]  ;;  %v16506_v1 = vld [vmem:[#allocation3 + $0x1d0] sm:$0xff]  ;;  %17639 = vst [vmem:[#allocation20_spill] sm:$0xff] %v16521_v10 }
 0x4e1   : > { %10237 = vmatpush.msrb.mxu3 %v16127_v35  ;;  %10389 = vmatpush.msrb.mxu2 %v16012_v62  ;;  %v16498_v62 = vld [vmem:[#allocation3 + $0x1d8] sm:$0xff]  ;;  %17631 = vst [vmem:[#allocation49_spill] sm:$0xff] %v16501_v56 }
 0x4e2   : > { %12704 = vmatmul.msk.f32.vlgmr.msrb.gmra.mxu0 %vm9306_vm3, %v16285_v63  ;;  %12707 = vmatmul.msk.f32.vlgmr.msra.gmra.mxu3 %vm9306_vm3, %v16486_v29  ;;  %17630 = vst [vmem:[#allocation34_spill] sm:$0xff] %v16498_v62 }
 0x4e3   : > { %12714 = vmatmul.msk.f32.vlgmr.msra.gmra.mxu2 %vm9306_vm3, %v16244_v47  ;;  %12725 = vmatmul.msk.f32.vlgmr.msra.gmra.mxu1 %vm9306_vm3, %v16285_v63  ;;  %17633 = vst [vmem:[#allocation21_spill] sm:$0xff] %v16506_v1 }
 0x4e4   : > { %10170 = vmatpush.msra.mxu0 %v17629_v8  ;;  %10624 = vmatpush.msrb.mxu1 %v16473_v23  ;;  %v16510_v8 = vld [vmem:[#allocation3 + $0x40] sm:$0xff] }
 0x4e5   : > { %10238 = vmatpush.msrb.mxu3 %v16130_v26  ;;  %10390 = vmatpush.msrb.mxu2 %v16019_v4  ;;  %17634 = vst [vmem:[#allocation59_spill] sm:$0xff] %v16510_v8  ;;  %v17635_v4 = vld [vmem:[#allocation35_spill] sm:$0xff]  ;;  %v17637_v23 = vld [vmem:[#allocation48_spill] sm:$0xff] }
 0x4e6   : > { %10704 = vmatpush.msra.mxu1 %v16498_v62  ;;  %10171 = vmatpush.msra.mxu0 %v17632_v36  ;;  %v16514_v62 = vld [vmem:[#allocation3 + $0x1c8] sm:$0xff]  ;;  %v16519_v36 = vpop.permute.xlu1 %10220 }
 0x4e7   : > { %10475 = vmatpush.msra.mxu2 %v16501_v56  ;;  %10239 = vmatpush.msrb.mxu3 %v16133_v58  ;;  %17636 = vst [vmem:[#allocation19_spill] sm:$0xff] %v16514_v62  ;;  %v16549_v56 = vld [vmem:[#allocation3 + $0x28] sm:$0xff] }
 0x4e8   : > { %10705 = vmatpush.msra.mxu1 %v16506_v1  ;;  %10172 = vmatpush.msra.mxu0 %v17635_v4  ;;  %17638 = vst [vmem:[#allocation30_spill] sm:$0xff] %v16519_v36  ;;  %v16524_v1 = vld [vmem:[#allocation3 + $0x1c0] sm:$0xff]  ;;  %v16531_v4 = vpop.f32.mrf.mxu1 }
 0x4e9   : > { %10319 = vmatpush.msra.mxu3 %v16161_v61  ;;  %10476 = vmatpush.msra.mxu2 %v16510_v8  ;;  %17640 = vst [vmem:[#allocation35_spill] sm:$0xff] %v16524_v1  ;;  %v16547_v8 = vpop.f32.mrf.mxu2 }
 0x4ea   : > { %10706 = vmatpush.msra.mxu1 %v16514_v62  ;;  %10256 = vmatpush.msrb.mxu0 %v17637_v23  ;;  %v17641_v62 = vld [vmem:[#allocation50_spill] sm:$0xff] }
 0x4eb   : > { %10320 = vmatpush.msra.mxu3 %v16163_v40  ;;  %10477 = vmatpush.msra.mxu2 %v16521_v10  ;;  %v16539_v10 = vld [vmem:[#allocation3 + $0x30] sm:$0xff] }
 0x4ec   : > { %10707 = vmatpush.msra.mxu1 %v16524_v1  ;;  %12708 = vmatmul.msk.f32.vlgmr.msra.gmra.mxu0 %vm9306_vm3, %v16313_v55  ;;  %17642 = vst [vmem:[#allocation48_spill] sm:$0xff] %v16539_v10  ;;  %v16542_v1 = vld [vmem:[#allocation3 + $0x1b8] sm:$0xff] }
 0x4ed   : > { %12711 = vmatmul.msk.f32.vlgmr.msrb.gmra.mxu3 %vm9306_vm3, %v16519_v36  ;;  %10257 = vmatpush.msrb.mxu0 %v17641_v62  ;;  %17643 = vst [vmem:[#allocation50_spill] sm:$0xff] %v16542_v1  ;;  %v17644_v36 = vld [vmem:[#allocation51_spill] sm:$0xff] }
 0x4ee   : > { %10321 = vmatpush.msra.mxu3 %v16166_v13  ;;  %12718 = vmatmul.msk.f32.vlgmr.msrb.gmra.mxu2 %vm9306_vm3, %v16262_v42  ;;  %17645 = vst [vmem:[#allocation51_spill] sm:$0xff] %v16553_v57 }
 0x4ef   : > { %12729 = vmatmul.msk.f32.vlgmr.msrb.gmra.mxu1 %vm9306_vm3, %v16313_v55  ;;  %10478 = vmatpush.msra.mxu2 %v16539_v10  ;;  %v17646_v10 = vld [vmem:[#allocation52_spill] sm:$0xff] }
 0x4f0   : > { %10708 = vmatpush.msra.mxu1 %v16542_v1  ;;  %10258 = vmatpush.msrb.mxu0 %v17644_v36  ;;  %v16560_v1 = vld [vmem:[#allocation3 + $0xb8] sm:$0xff] }
 0x4f1   : > { %10322 = vmatpush.msra.mxu3 %v16169_v17  ;;  %10479 = vmatpush.msra.mxu2 %v16549_v56  ;;  %v17647_v17 = vld [vmem:[#allocation53_spill] sm:$0xff] }
 0x4f2   : > { %10788 = vmatpush.msrb.mxu1 %v17637_v23  ;;  %10259 = vmatpush.msrb.mxu0 %v17646_v10  ;;  %v16567_v23 = vpop.f32.mrf.mxu1 }
 0x4f3   : > { %10557 = vmatpush.msrb.mxu2 %v16553_v57  ;;  %10323 = vmatpush.msra.mxu3 %v16172_v19  ;;  %v16569_v57 = vld [vmem:[#allocation3 + $0xb0] sm:$0xff] }
 0x4f4   : > { %10789 = vmatpush.msrb.mxu1 %v17641_v62  ;;  %10260 = vmatpush.msrb.mxu0 %v17647_v17  ;;  %17648 = vst [vmem:[#allocation52_spill] sm:$0xff] %v16569_v57  ;;  %v16578_v62 = vpop.f32.mrf.mxu2 }
 0x4f5   : > { %10407 = vmatpush.msrb.mxu3 %v16175_v34  ;;  %10558 = vmatpush.msrb.mxu2 %v16560_v1 }
 0x4f6   : > { %10790 = vmatpush.msrb.mxu1 %v17644_v36  ;;  %10344 = vmatpush.msra.mxu0 %v16224_v3  ;;  %v16585_v36 = vld [vmem:[#allocation3 + $0xa8] sm:$0xff] }
 0x4f7   : > { %10408 = vmatpush.msrb.mxu3 %v16180_v18  ;;  %10559 = vmatpush.msrb.mxu2 %v16569_v57  ;;  %17649 = vst [vmem:[#allocation53_spill] sm:$0xff] %v16585_v36  ;;  %v17668_v57 = vld [vmem:[#allocation39_spill] sm:$0xff] }
 0x4f8   : > { %12712 = vmatmul.msk.f32.vlgmr.msrb.gmra.mxu0 %vm9306_vm3, %v16114_v21  ;;  %12715 = vmatmul.msk.f32.vlgmr.msra.gmra.mxu3 %vm9306_vm3, %v16339_v54 }
 0x4f9   : > { %12722 = vmatmul.msk.f32.vlgmr.msra.gmra.mxu2 %vm9306_vm3, %v16110_v60  ;;  %12733 = vmatmul.msk.f32.vlgmr.msra.gmra.mxu1 %vm9306_vm3, %v16114_v21  ;;  %v16591_v60 = vld [vmem:[#allocation3 + $0xa0] sm:$0xff] }
 0x4fa   : > { %10345 = vmatpush.msra.mxu0 %v16231_v28  ;;  %10791 = vmatpush.msrb.mxu1 %v17646_v10  ;;  %17650 = vst [vmem:[#allocation62_spill] sm:$0xff] %v16591_v60  ;;  %v16597_v10 = vpop.f32.mrf.mxu1 }
 0x4fb   : > { %10409 = vmatpush.msrb.mxu3 %v16184_v50  ;;  %10560 = vmatpush.msrb.mxu2 %v16585_v36  ;;  %v16601_v36 = vld [vmem:[#allocation3 + $0x20] sm:$0xff] }
 0x4fc   : > { %10346 = vmatpush.msra.mxu0 %v16234_v37  ;;  %10792 = vmatpush.msrb.mxu1 %v17647_v17  ;;  %v16605_v17 = vpop.permute.xlu2 %10329 }
 0x4fd   : > { %10410 = vmatpush.msrb.mxu3 %v16186_v2  ;;  %10561 = vmatpush.msrb.mxu2 %v16591_v60  ;;  %v17663_v60 = vld [vmem:[#allocation43_spill] sm:$0xff] }
 0x4fe   : > { %10872 = vmatpush.msra.mxu1 %v16224_v3  ;;  %10347 = vmatpush.msra.mxu0 %v16237_v44  ;;  %v16616_v3 = vld [vmem:[#allocation3 + $0x18] sm:$0xff] }
 0x4ff   : > { %10641 = vmatpush.msra.mxu2 %v16189_v48  ;;  %10411 = vmatpush.msrb.mxu3 %v16191_v27  ;;  %v16613_v48 = vpop.f32.mrf.mxu2 }
 0x500   : > { %10873 = vmatpush.msra.mxu1 %v16231_v28  ;;  %10348 = vmatpush.msra.mxu0 %v16240_v6  ;;  %v16632_v28 = vld [vmem:[#allocation3 + $0x8] sm:$0xff] }
 0x501   : > { %10495 = vmatpush.msra.mxu3 %v16601_v36  ;;  %10642 = vmatpush.msra.mxu2 %v16197_v51  ;;  %v16626_v51 = vld [vmem:[#allocation3 + $0x10] sm:$0xff]  ;;  %17652 = vst [vmem:[#allocation64_spill] sm:$0xff] %v16632_v28 }
 0x502   : > { %10874 = vmatpush.msra.mxu1 %v16234_v37  ;;  %12716 = vmatmul.msk.f32.vlgmr.msra.gmra.mxu0 %vm9306_vm3, %v16605_v17  ;;  %17651 = vst [vmem:[#allocation63_spill] sm:$0xff] %v16626_v51  ;;  %v16635_v37 = vpop.f32.mrf.mxu1 }
 0x503   : > { %12719 = vmatmul.msk.f32.vlgmr.msrb.gmra.mxu3 %vm9306_vm3, %v16373_v7  ;;  %10428 = vmatpush.msrb.mxu0 %v16242_v43 }
 0x504   : > { %10496 = vmatpush.msra.mxu3 %v16616_v3  ;;  %12726 = vmatmul.msk.f32.vlgmr.msrb.gmra.mxu2 %vm9306_vm3, %v15966_v16 }
 0x505   : > { %12737 = vmatmul.msk.f32.vlgmr.msrb.gmra.mxu1 %vm9306_vm3, %v16382_v14  ;;  %10643 = vmatpush.msra.mxu2 %v16200_v46  ;;  %v17653_v46 = vld [vmem:[#allocation42_spill] sm:$0xff]  ;;  %v16641_v14 = vld [vmem:[#allocation3] sm:$0xff] }
 0x506   : > { %10875 = vmatpush.msra.mxu1 %v16237_v44  ;;  %10429 = vmatpush.msrb.mxu0 %v16251_v39  ;;  %v17654_v44 = vld [vmem:[#allocation27_spill] sm:$0xff]  ;;  %17655 = vst [vmem:[#allocation42_spill] sm:$0xff] %v16641_v14 }
 0x507   : > { %10497 = vmatpush.msra.mxu3 %v16626_v51  ;;  %10644 = vmatpush.msra.mxu2 %v16203_v53  ;;  %v16645_v53 = vld [vmem:[#allocation3 + $0xe8] sm:$0xff] }
 0x508   : > { %10876 = vmatpush.msra.mxu1 %v16240_v6  ;;  %10430 = vmatpush.msrb.mxu0 %v16255_v41  ;;  %17656 = vst [vmem:[#allocation27_spill] sm:$0xff] %v16645_v53  ;;  %v16649_v6 = vpop.f32.mrf.mxu2 }
 0x509   : > { %10498 = vmatpush.msra.mxu3 %v16632_v28  ;;  %10645 = vmatpush.msra.mxu2 %v17653_v46  ;;  %v17657_v46 = vld [vmem:[#allocation22_spill] sm:$0xff]  ;;  %v17664_v28 = vld [vmem:[#allocation37_spill] sm:$0xff] }
 0x50a   : > { %10970 = vmatpush.msrb.mxu1 %v16242_v43  ;;  %10431 = vmatpush.msrb.mxu0 %v17654_v44  ;;  %v12991_v43 = vld [vmem:[#allocation2 + $0x10] sm:$0xf] }
 0x50b   : > { %10725 = vmatpush.msrb.mxu2 %v16210_v31  ;;  %10499 = vmatpush.msra.mxu3 %v16641_v14  ;;  %v17658_v31 = vld [vmem:[#allocation58_spill] sm:$0xff] }
 0x50c   : > { %10971 = vmatpush.msrb.mxu1 %v16251_v39  ;;  %10432 = vmatpush.msrb.mxu0 %v17657_v46  ;;  %v17659_v39 = vld [vmem:[#allocation33_spill] sm:$0xff]  ;;  %v16667_v14 = vld [vmem:[#allocation3 + $0xd8] sm:$0xff] }
 0x50d   : > { %10578 = vmatpush.msrb.mxu3 %v16645_v53  ;;  %10726 = vmatpush.msrb.mxu2 %v16216_v24  ;;  %v16661_v24 = vld [vmem:[#allocation3 + $0xe0] sm:$0xff]  ;;  %17662 = vst [vmem:[#allocation58_spill] sm:$0xff] %v16667_v14 }
 0x50e   : > { %12723 = vmatmul.msk.f32.vlgmr.msra.gmra.mxu3 %vm9306_vm3, %v12991_v43  ;;  %12730 = vmatmul.msk.f32.vlgmr.msra.gmra.mxu2 %vm9306_vm3, %v17658_v31  ;;  %17660 = vst [vmem:[#allocation22_spill] sm:$0xff] %v16661_v24  ;;  %v17661_v53 = vld [vmem:[#allocation28_spill] sm:$0xff]  ;;  %v9327_v43 = vpop.f32.mrf.mxu0 }
 0x50f   : > { %12741 = vmatmul.msk.f32.vlgmr.msra.gmra.mxu1 %vm9306_vm3, %v16404_v15  ;;  %12720 = vmatmul.msk.f32.vlgmr.msrb.gmra.mxu0 %vm9306_vm3, %v16404_v15 }
 0x510   : > { %10972 = vmatpush.msrb.mxu1 %v16255_v41  ;;  %10515 = vmatpush.msra.mxu0 %v17659_v39  ;;  %v16670_v41 = vpop.f32.mrf.mxu1 }
 0x511   : > { %10579 = vmatpush.msrb.mxu3 %v16661_v24  ;;  %10727 = vmatpush.msrb.mxu2 %v17661_v53  ;;  %v16675_v24 = vld [vmem:[#allocation3 + $0xd0] sm:$0xff]  ;;  %v17666_v53 = vld [vmem:[#allocation12_spill] sm:$0xff] }
 0x512   : > { %10973 = vmatpush.msrb.mxu1 %v17654_v44  ;;  %10516 = vmatpush.msra.mxu0 %v16362_v11  ;;  %17665 = vst [vmem:[#allocation33_spill] sm:$0xff] %v16675_v24  ;;  %v9351_v44 = vadd.f32 %v16531_v4, %v9327_v43  ;;  %v17670_v4 = vld [vmem:[#allocation60_spill] sm:$0xff]  ;;  %v16693_v43 = vpop.permute.xlu0 %10955 }
 0x513   : > { %10580 = vmatpush.msrb.mxu3 %v16667_v14  ;;  %10728 = vmatpush.msrb.mxu2 %v17663_v60  ;;  %v17667_v14 = vld [vmem:[#allocation14_spill] sm:$0xff]  ;;  %v16685_v60 = vld [vmem:[#allocation3 + $0xc8] sm:$0xff]  ;;  %17671 = vst [vmem:[#allocation43_spill] sm:$0xff] %v16693_v43 }
 0x514   : > { %10974 = vmatpush.msrb.mxu1 %v17657_v46  ;;  %10517 = vmatpush.msra.mxu0 %v17664_v28  ;;  %17669 = vst [vmem:[#allocation28_spill] sm:$0xff] %v16685_v60  ;;  %v12996_v46 = vld [vmem:[#allocation2 + $0x1] sm:$0xf] }
 0x515   : > { %10581 = vmatpush.msrb.mxu3 %v16675_v24  ;;  %10729 = vmatpush.msrb.mxu2 %v17666_v53  ;;  %v16681_v51 = vpop.f32.mrf.mxu2  ;;  %v16695_v53 = vld [vmem:[#allocation3 + $0x188] sm:$0xff] }
 0x516   : > { %11057 = vmatpush.msra.mxu1 %v17659_v39  ;;  %10518 = vmatpush.msra.mxu0 %v17668_v57  ;;  %v9377_v39 = vadd.f32 %v16547_v8, %v9351_v44  ;;  %17672 = vst [vmem:[#allocation37_spill] sm:$0xff] %v16695_v53  ;;  %v9424_v8 = vpop.f32.mrf.mxu0  ;;  %v16706_v44 = vld [vmem:[#allocation3 + $0x180] sm:$0xff] }
 0x517   : > { %10809 = vmatpush.msra.mxu2 %v17667_v14  ;;  %10582 = vmatpush.msrb.mxu3 %v16685_v60  ;;  %v17673_v14 = vld [vmem:[#allocation32_spill] sm:$0xff]  ;;  %v17675_v60 = vld [vmem:[#allocation29_spill] sm:$0xff] }
 0x518   : > { %11058 = vmatpush.msra.mxu1 %v16362_v11  ;;  %12727 = vmatmul.msk.f32.vlgmr.msrb.gmra.mxu3 %vm9306_vm3, %v12996_v46  ;;  %v17674_v11 = vld [vmem:[#allocation41_spill] sm:$0xff]  ;;  %v9399_v46 = vpop.f32.mrf.mxu3 }
 0x519   : > { %12734 = vmatmul.msk.f32.vlgmr.msrb.gmra.mxu2 %vm9306_vm3, %v17670_v4  ;;  %10662 = vmatpush.msra.mxu3 %v16695_v53  ;;  %v9402_v53 = vadd.f32 %v9399_v46, %v9377_v39  ;;  %v17677_v39 = vld [vmem:[#allocation61_spill] sm:$0xff] }
 0x51a   : > { %10810 = vmatpush.msra.mxu2 %v17673_v14  ;;  %12745 = vmatmul.msk.f32.vlgmr.msrb.gmra.mxu1 %vm9306_vm3, %v16693_v43  ;;  %v16709_v14 = vpop.f32.mrf.mxu1  ;;  %v17676_v43 = vld [vmem:[#allocation9_spill] sm:$0xff] }
 0x51b   : > { %10519 = vmatpush.msra.mxu0 %v17674_v11  ;;  %11059 = vmatpush.msra.mxu1 %v17664_v28  ;;  %v16716_v28 = vld [vmem:[#allocation3 + $0x178] sm:$0xff]  ;;  %v9427_v4 = vadd.f32 %v9424_v8, %v9402_v53  ;;  %v16722_v46 = vld [vmem:[#allocation3 + $0x170] sm:$0xff]  ;;  %v16730_v8 = vld [vmem:[#allocation3 + $0x168] sm:$0xff] }
 0x51c   : > { %12724 = vmatmul.msk.f32.vlgmr.msra.gmra.mxu0 %vm9306_vm3, %v17622_v12  ;;  %10663 = vmatpush.msra.mxu3 %v16706_v44  ;;  %17678 = vst [vmem:[#allocation12_spill] sm:$0xff] %v16722_v46 }
 0x51d   : > { %10599 = vmatpush.msrb.mxu0 %v16058_v25  ;;  %10811 = vmatpush.msra.mxu2 %v17675_v60  ;;  %v16713_v24 = vpop.f32.mrf.mxu2  ;;  %v17680_v60 = vld [vmem:[#allocation18_spill] sm:$0xff]  ;;  %v9451_v53 = vadd.f32 %v16567_v23, %v9427_v4  ;;  %17681 = vst [vmem:[#allocation39_spill] sm:$0xff] %v16730_v8  ;;  %v16743_v23 = vld [vmem:[#allocation3 + $0x228] sm:$0xff] }
 0x51e   : > { %11060 = vmatpush.msra.mxu1 %v17668_v57  ;;  %10664 = vmatpush.msra.mxu3 %v16716_v28  ;;  %v17679_v57 = vld [vmem:[#allocation10_spill] sm:$0xff]  ;;  %17682 = vst [vmem:[#allocation41_spill] sm:$0xff] %v16743_v23  ;;  %v17683_v4 = vld [vmem:[#allocation16_spill] sm:$0xff] }
 0x51f   : > { %10600 = vmatpush.msrb.mxu0 %v16062_v59  ;;  %10812 = vmatpush.msra.mxu2 %v17676_v43  ;;  %v17685_v43 = vld [vmem:[#allocation11_spill] sm:$0xff] }
 0x520   : > { %11061 = vmatpush.msra.mxu1 %v17674_v11  ;;  %10665 = vmatpush.msra.mxu3 %v16722_v46  ;;  %v16733_v11 = vld [vmem:[#allocation2 + $0xa] sm:$0xf] }
 0x521   : > { %10601 = vmatpush.msrb.mxu0 %v17677_v39  ;;  %10813 = vmatpush.msra.mxu2 %v17679_v57  ;;  %v9497_v57 = vpop.f32.mrf.mxu3 }
 0x522   : > { %11141 = vmatpush.msrb.mxu1 %v16058_v25  ;;  %10666 = vmatpush.msra.mxu3 %v16730_v8  ;;  %v9475_v25 = vadd.f32 %v16578_v62, %v9451_v53  ;;  %v16752_v62 = vld [vmem:[#allocation3 + $0x220] sm:$0xff] }
 0x523   : > { %10896 = vmatpush.msrb.mxu2 %v17680_v60  ;;  %10602 = vmatpush.msrb.mxu0 %v16071_v33  ;;  %v9937_v60 = vpop.f32.mrf.mxu1  ;;  %v17684_v53 = vld [vmem:[#allocation24_spill] sm:$0xff]  ;;  %v17686_v8 = vld [vmem:[#allocation15_spill] sm:$0xff] }
 0x524   : > { %12738 = vmatmul.msk.f32.vlgmr.msra.gmra.mxu2 %vm9306_vm3, %v16733_v11  ;;  %12749 = vmatmul.msk.f32.vlgmr.msra.gmra.mxu1 %vm9306_vm3, %v16285_v63 }
 0x525   : > { %12731 = vmatmul.msk.f32.vlgmr.msra.gmra.mxu3 %vm9306_vm3, %v16143_v49  ;;  %11142 = vmatpush.msrb.mxu1 %v16062_v59  ;;  %v9957_v63 = vpop.f32.mrf.mxu2 }
 0x526   : > { %10746 = vmatpush.msrb.mxu3 %v16743_v23  ;;  %10897 = vmatpush.msrb.mxu2 %v17683_v4  ;;  %v16755_v59 = vadd.f32 %v9957_v63, %v9937_v60  ;;  %v9500_v4 = vadd.f32 %v9497_v57, %v9475_v25  ;;  %v9522_v23 = vpop.f32.mrf.mxu0  ;;  %v16766_v60 = vld [vmem:[#allocation3 + $0x210] sm:$0xff] }
 0x527   : > { %10603 = vmatpush.msrb.mxu0 %v16076_v22  ;;  %11143 = vmatpush.msrb.mxu1 %v17677_v39  ;;  %v16760_v39 = vld [vmem:[#allocation3 + $0x218] sm:$0xff]  ;;  %v13007_v57 = vld [vmem:[#allocation2 + $0x12] sm:$0xf] }
 0x528   : > { %12728 = vmatmul.msk.f32.vlgmr.msrb.gmra.mxu0 %vm9306_vm3, %v16486_v29  ;;  %10747 = vmatpush.msrb.mxu3 %v16752_v62  ;;  %v9525_v46 = vadd.f32 %v9522_v23, %v9500_v4  ;;  %v16777_v23 = vld [vmem:[#allocation3 + $0x208] sm:$0xff] }
 0x529   : > { %10683 = vmatpush.msra.mxu0 %v16078_v32  ;;  %10898 = vmatpush.msrb.mxu2 %v17684_v53  ;;  %v16784_v4 = vld [vmem:[#allocation3 + $0x2c8] sm:$0xff] }
 0x52a   : > { %11144 = vmatpush.msrb.mxu1 %v16071_v33  ;;  %10748 = vmatpush.msrb.mxu3 %v16760_v39  ;;  %v17687_v33 = vld [vmem:[#allocation23_spill] sm:$0xff]  ;;  %v9550_v25 = vadd.f32 %v16597_v10, %v9525_v46  ;;  %v9595_v10 = vpop.f32.mrf.mxu3  ;;  %v13010_v46 = vld [vmem:[#allocation2 + $0x11] sm:$0xf] }
 0x52b   : > { %10684 = vmatpush.msra.mxu0 %v17685_v43  ;;  %10899 = vmatpush.msrb.mxu2 %v17686_v8 }
 0x52c   : > { %11145 = vmatpush.msrb.mxu1 %v16076_v22  ;;  %10749 = vmatpush.msrb.mxu3 %v16766_v60  ;;  %v17688_v22 = vld [vmem:[#allocation26_spill] sm:$0xff] }
 0x52d   : > { %10685 = vmatpush.msra.mxu0 %v16088_v38  ;;  %10900 = vmatpush.msrb.mxu2 %v17687_v33 }
 0x52e   : > { %11225 = vmatpush.msra.mxu1 %v16078_v32  ;;  %12742 = vmatmul.msk.f32.vlgmr.msrb.gmra.mxu2 %vm9306_vm3, %v13007_v57  ;;  %v17689_v32 = vld [vmem:[#allocation25_spill] sm:$0xff]  ;;  %v9620_v57 = vpop.f32.mrf.mxu0 }
 0x52f   : > { %12753 = vmatmul.msk.f32.vlgmr.msrb.gmra.mxu1 %vm9306_vm3, %v16313_v55  ;;  %10995 = vmatpush.msra.mxu2 %v17688_v22  ;;  %v9574_v55 = vadd.f32 %v16613_v48, %v9550_v25  ;;  %v16798_v48 = vld [vmem:[#allocation3 + $0x2b8] sm:$0xff] }
 0x530   : > { %10686 = vmatpush.msra.mxu0 %v16091_v9  ;;  %10750 = vmatpush.msrb.mxu3 %v16777_v23  ;;  %v17691_v25 = vld [vmem:[#allocation38_spill] sm:$0xff] }
 0x531   : > { %11226 = vmatpush.msra.mxu1 %v17685_v43  ;;  %12735 = vmatmul.msk.f32.vlgmr.msrb.gmra.mxu3 %vm9306_vm3, %v16244_v47  ;;  %v16792_v43 = vld [vmem:[#allocation3 + $0x2c0] sm:$0xff]  ;;  %v9598_v63 = vadd.f32 %v9595_v10, %v9574_v55  ;;  %v16807_v55 = vpop.permute.xlu1 %10980 }
 0x532   : > { %10996 = vmatpush.msra.mxu2 %v17689_v32  ;;  %10830 = vmatpush.msra.mxu3 %v16784_v4  ;;  %v17690_v32 = vld [vmem:[#allocation36_spill] sm:$0xff] }
 0x533   : > { %10687 = vmatpush.msra.mxu0 %v16096_v30  ;;  %11227 = vmatpush.msra.mxu1 %v16088_v38  ;;  %v9623_v38 = vadd.f32 %v9620_v57, %v9598_v63  ;;  %v16818_v63 = vld [vmem:[#allocation3 + $0x2a8] sm:$0xff] }
 0x534   : > { %12732 = vmatmul.msk.f32.vlgmr.msra.gmra.mxu0 %vm9306_vm3, %v13010_v46  ;;  %10831 = vmatpush.msra.mxu3 %v16792_v43  ;;  %v16804_v46 = vld [vmem:[#allocation3 + $0x2b0] sm:$0xff]  ;;  %v16826_v57 = vld [vmem:[#allocation3 + $0x368] sm:$0xff] }
 0x535   : > { %10767 = vmatpush.msrb.mxu0 %v16108_v20  ;;  %10997 = vmatpush.msra.mxu2 %v17690_v32  ;;  %v9648_v10 = vadd.f32 %v16635_v37, %v9623_v38  ;;  %v9694_v37 = vpop.f32.mrf.mxu3 }
 0x536   : > { %11228 = vmatpush.msra.mxu1 %v16091_v9  ;;  %10832 = vmatpush.msra.mxu3 %v16798_v48  ;;  %v17692_v9 = vld [vmem:[#allocation40_spill] sm:$0xff]  ;;  %v9718_v38 = vpop.f32.mrf.mxu0 }
 0x537   : > { %10768 = vmatpush.msrb.mxu0 %v16124_v5  ;;  %10998 = vmatpush.msra.mxu2 %v17691_v25 }
 0x538   : > { %11229 = vmatpush.msra.mxu1 %v16096_v30  ;;  %10833 = vmatpush.msra.mxu3 %v16804_v46  ;;  %v17693_v30 = vld [vmem:[#allocation44_spill] sm:$0xff] }
 0x539   : > { %10769 = vmatpush.msrb.mxu0 %v16127_v35  ;;  %10999 = vmatpush.msra.mxu2 %v17692_v9 }
 0x53a   : > { %12757 = vmatmul.msk.f32.vlgmr.msra.gmra.mxu1 %vm9306_vm3, %v16114_v21  ;;  %12746 = vmatmul.msk.f32.vlgmr.msra.gmra.mxu2 %vm9306_vm3, %v16807_v55  ;;  %v17694_v21 = vld [vmem:[#allocation45_spill] sm:$0xff] }
 0x53b   : > { %11309 = vmatpush.msrb.mxu1 %v16108_v20  ;;  %11078 = vmatpush.msrb.mxu2 %v17693_v30  ;;  %v9673_v20 = vadd.f32 %v16649_v6, %v9648_v10  ;;  %v16834_v30 = vld [vmem:[#allocation3 + $0x360] sm:$0xff] }
 0x53c   : > { %10770 = vmatpush.msrb.mxu0 %v16130_v26  ;;  %10834 = vmatpush.msra.mxu3 %v16818_v63  ;;  %v17695_v6 = vld [vmem:[#allocation47_spill] sm:$0xff] }
 0x53d   : > { %11310 = vmatpush.msrb.mxu1 %v16124_v5  ;;  %12739 = vmatmul.msk.f32.vlgmr.msra.gmra.mxu3 %vm9306_vm3, %v16262_v42  ;;  %v9697_v5 = vadd.f32 %v9694_v37, %v9673_v20  ;;  %v16847_v20 = vld [vmem:[#allocation3 + $0x350] sm:$0xff]  ;;  %v17697_v37 = vld [vmem:[#allocation31_spill] sm:$0xff] }
 0x53e   : > { %11079 = vmatpush.msrb.mxu2 %v17694_v21  ;;  %10920 = vmatpush.msrb.mxu3 %v16826_v57  ;;  %v16840_v21 = vld [vmem:[#allocation3 + $0x358] sm:$0xff] }
 0x53f   : > { %10771 = vmatpush.msrb.mxu0 %v16133_v58  ;;  %11311 = vmatpush.msrb.mxu1 %v16127_v35  ;;  %v9721_v10 = vadd.f32 %v9718_v38, %v9697_v5  ;;  %v17701_v5 = vld [vmem:[#allocation55_spill] sm:$0xff]  ;;  %v17702_v38 = vld [vmem:[#allocation20_spill] sm:$0xff] }
 0x540   : > { %12736 = vmatmul.msk.f32.vlgmr.msrb.gmra.mxu0 %vm9306_vm3, %v16339_v54  ;;  %10921 = vmatpush.msrb.mxu3 %v16834_v30 }
 0x541   : > { %10851 = vmatpush.msra.mxu0 %v16161_v61  ;;  %11080 = vmatpush.msrb.mxu2 %v17695_v6  ;;  %v9746_v35 = vadd.f32 %v16670_v41, %v9721_v10  ;;  %v16859_v41 = vld [vmem:[#allocation3 + $0x348] sm:$0xff] }
 0x542   : > { %11312 = vmatpush.msrb.mxu1 %v16130_v26  ;;  %10922 = vmatpush.msrb.mxu3 %v16840_v21  ;;  %v9793_v26 = vpop.f32.mrf.mxu3  ;;  %v17703_v6 = vld [vmem:[#allocation56_spill] sm:$0xff] }
 0x543   : > { %10852 = vmatpush.msra.mxu0 %v16163_v40  ;;  %11081 = vmatpush.msrb.mxu2 %v16426_v0  ;;  %v9771_v0 = vadd.f32 %v16681_v51, %v9746_v35  ;;  %v17704_v35 = vld [vmem:[#allocation48_spill] sm:$0xff] }
 0x544   : > { %11313 = vmatpush.msrb.mxu1 %v16133_v58  ;;  %10923 = vmatpush.msrb.mxu3 %v16847_v20  ;;  %v17696_v58 = vld [vmem:[#allocation13_spill] sm:$0xff] }
 0x545   : > { %10853 = vmatpush.msra.mxu0 %v16166_v13  ;;  %11082 = vmatpush.msrb.mxu2 %v16433_v52  ;;  %v9796_v52 = vadd.f32 %v9793_v26, %v9771_v0 }
 0x546   : > { %12761 = vmatmul.msk.f32.vlgmr.msrb.gmra.mxu1 %vm9306_vm3, %v16605_v17  ;;  %12750 = vmatmul.msk.f32.vlgmr.msrb.gmra.mxu2 %vm9306_vm3, %v15966_v16  ;;  %v9817_v17 = vpop.f32.mrf.mxu0  ;;  %v17699_v16 = vld [vmem:[#allocation49_spill] sm:$0xff] }
 0x547   : > { %11393 = vmatpush.msra.mxu1 %v16161_v61  ;;  %11162 = vmatpush.msra.mxu2 %v16437_v45  ;;  %v17698_v61 = vld [vmem:[#allocation17_spill] sm:$0xff]  ;;  %v9820_v45 = vadd.f32 %v9817_v17, %v9796_v52  ;;  %v17711_v52 = vld [vmem:[#allocation35_spill] sm:$0xff] }
 0x548   : > { %10854 = vmatpush.msra.mxu0 %v17696_v58  ;;  %10924 = vmatpush.msrb.mxu3 %v16859_v41  ;;  %v17712_v17 = vld [vmem:[#allocation63_spill] sm:$0xff] }
 0x549   : > { %11394 = vmatpush.msra.mxu1 %v16163_v40  ;;  %12743 = vmatmul.msk.f32.vlgmr.msrb.gmra.mxu3 %vm9306_vm3, %v17697_v37  ;;  %v17700_v40 = vld [vmem:[#allocation59_spill] sm:$0xff]  ;;  %v9844_v51 = vadd.f32 %v16709_v14, %v9820_v45  ;;  %v17705_v14 = vld [vmem:[#allocation57_spill] sm:$0xff]  ;;  %v10044_v37 = vpop.f32.mrf.mxu2  ;;  %v17717_v45 = vld [vmem:[#allocation64_spill] sm:$0xff] }
 0x54a   : > { %11163 = vmatpush.msra.mxu2 %v17698_v61  ;;  %11017 = vmatpush.msra.mxu3 %v17699_v16  ;;  %v9891_v10 = vpop.f32.mrf.mxu3  ;;  %v17714_v61 = vld [vmem:[#allocation50_spill] sm:$0xff]  ;;  %v17716_v16 = vld [vmem:[#allocation60_spill] sm:$0xff] }
 0x54b   : > { %10855 = vmatpush.msra.mxu0 %v16172_v19  ;;  %11395 = vmatpush.msra.mxu1 %v16166_v13  ;;  %v9869_v13 = vadd.f32 %v16713_v24, %v9844_v51  ;;  %v17719_v51 = vld [vmem:[#allocation46_spill] sm:$0xff] }
 0x54c   : > { %12740 = vmatmul.msk.f32.vlgmr.msra.gmra.mxu0 %vm9306_vm3, %v16373_v7  ;;  %11018 = vmatpush.msra.mxu3 %v17700_v40 }
 0x54d   : > { %10945 = vmatpush.msrb.mxu0 %v16175_v34  ;;  %11164 = vmatpush.msra.mxu2 %v17701_v5  ;;  %v9894_v0 = vadd.f32 %v9891_v10, %v9869_v13  ;;  %v17720_v5 = vld [vmem:[#allocation42_spill] sm:$0xff] }
 0x54e   : > { %11396 = vmatpush.msra.mxu1 %v17696_v58  ;;  %11019 = vmatpush.msra.mxu3 %v17702_v38  ;;  %v9916_v26 = vpop.f32.mrf.mxu0  ;;  %v16898_v58 = vpop.permute.xlu2 %10930  ;;  %v13021_v38 = vld [vmem:[#allocation3 + $0x160] sm:$0xff]  ;;  %v13023_v13 = vld [vmem:[#allocation2 + $0x18] sm:$0xf] }
 0x54f   : > { %10946 = vmatpush.msrb.mxu0 %v16180_v18  ;;  %11165 = vmatpush.msra.mxu2 %v17703_v6  ;;  %v16891_v24 = vadd.f32 %v9916_v26, %v9894_v0  ;;  %v13022_v6 = vld [vmem:[#allocation3 + $0x270] sm:$0xff]  ;;  %v17721_v0 = vld [vmem:[#allocation27_spill] sm:$0xff] }
 0x550   : > { %11397 = vmatpush.msra.mxu1 %v16172_v19  ;;  %11020 = vmatpush.msra.mxu3 %v17704_v35  ;;  %v17706_v19 = vld [vmem:[#allocation34_spill] sm:$0xff] }
 0x551   : > { %10947 = vmatpush.msrb.mxu0 %v16184_v50  ;;  %11166 = vmatpush.msra.mxu2 %v17705_v14  ;;  %v13024_v26 = vld [vmem:[#allocation3 + $0x158] sm:$0xff] }
 0x552   : > { %12765 = vmatmul.msk.f32.vlgmr.msra.gmra.mxu1 %vm9306_vm3, %v16404_v15  ;;  %12754 = vmatmul.msk.f32.vlgmr.msra.gmra.mxu2 %vm9306_vm3, %v17658_v31  ;;  %v17707_v15 = vld [vmem:[#allocation21_spill] sm:$0xff]  ;;  %v9977_v31 = vpop.f32.mrf.mxu3 }
 0x553   : > { %11477 = vmatpush.msrb.mxu1 %v16175_v34  ;;  %11246 = vmatpush.msrb.mxu2 %v17706_v19  ;;  %v17708_v34 = vld [vmem:[#allocation51_spill] sm:$0xff]  ;;  %v13025_v19 = vld [vmem:[#allocation3 + $0x268] sm:$0xff] }
 0x554   : > { %10948 = vmatpush.msrb.mxu0 %v16186_v2  ;;  %11021 = vmatpush.msra.mxu3 %v16549_v56  ;;  %v17709_v56 = vld [vmem:[#allocation19_spill] sm:$0xff] }
 0x555   : > { %11478 = vmatpush.msrb.mxu1 %v16180_v18  ;;  %12747 = vmatmul.msk.f32.vlgmr.msra.gmra.mxu3 %vm9306_vm3, %v17622_v12  ;;  %v10023_v18 = vpop.f32.mrf.mxu1  ;;  %v17710_v12 = vld [vmem:[#allocation52_spill] sm:$0xff] }
 0x556   : > { %11247 = vmatpush.msrb.mxu2 %v17707_v15  ;;  %11099 = vmatpush.msrb.mxu3 %v17708_v34 }
 0x557   : > { %10949 = vmatpush.msrb.mxu0 %v16191_v27  ;;  %11479 = vmatpush.msrb.mxu1 %v16184_v50  ;;  %v9980_v50 = vadd.f32 %v9977_v31, %v16755_v59  ;;  %v17718_v59 = vld [vmem:[#allocation62_spill] sm:$0xff]  ;;  %v13027_v31 = vld [vmem:[#allocation3 + $0x260] sm:$0xff] }
 0x558   : > { %12744 = vmatmul.msk.f32.vlgmr.msrb.gmra.mxu0 %vm9306_vm3, %v16898_v58  ;;  %11100 = vmatpush.msrb.mxu3 %v16560_v1  ;;  %v9998_v1 = vpop.f32.mrf.mxu0 }
 0x559   : > { %11037 = vmatpush.msra.mxu0 %v16601_v36  ;;  %11248 = vmatpush.msrb.mxu2 %v17709_v56  ;;  %v17713_v36 = vld [vmem:[#allocation53_spill] sm:$0xff] }
 0x55a   : > { %11480 = vmatpush.msrb.mxu1 %v16186_v2  ;;  %11101 = vmatpush.msrb.mxu3 %v17710_v12  ;;  %v17715_v2 = vld [vmem:[#allocation43_spill] sm:$0xff]  ;;  %v10065_v35 = vpop.f32.mrf.mxu3  ;;  %v13026_v56 = vld [vmem:[#allocation3 + $0x150] sm:$0xff]  ;;  %v10132_v12 = vpop.f32.mrf.mxu2 }
 0x55b   : > { %11038 = vmatpush.msra.mxu0 %v16616_v3  ;;  %11249 = vmatpush.msrb.mxu2 %v17711_v52  ;;  %v10001_v3 = vadd.f32 %v9998_v1, %v9980_v50  ;;  %v17723_v50 = vld [vmem:[#allocation58_spill] sm:$0xff] }
 0x55c   : > { %11481 = vmatpush.msrb.mxu1 %v16191_v27  ;;  %11102 = vmatpush.msrb.mxu3 %v17713_v36  ;;  %v13020_v27 = vld [vmem:[#allocation3 + $0x278] sm:$0xff] }
 0x55d   : > { %11039 = vmatpush.msra.mxu0 %v17712_v17  ;;  %11250 = vmatpush.msrb.mxu2 %v17714_v61  ;;  %v10026_v40 = vadd.f32 %v10023_v18, %v10001_v3  ;;  %v10107_v14 = vpop.f32.mrf.mxu1  ;;  %v17722_v18 = vld [vmem:[#allocation22_spill] sm:$0xff]  ;;  %v13028_v17 = vld [vmem:[#allocation3 + $0x148] sm:$0xff] }
 0x55e   : > { %12769 = vmatmul.msk.f32.vlgmr.msrb.gmra.mxu1 %vm9306_vm3, %v17715_v2  ;;  %12758 = vmatmul.msk.f32.vlgmr.msrb.gmra.mxu2 %vm9306_vm3, %v17716_v16  ;;  %v13029_v36 = vld [vmem:[#allocation3 + $0x258] sm:$0xff]  ;;  %v13031_v2 = vld [vmem:[#allocation3 + $0x140] sm:$0xff] }
 0x55f   : > { %11040 = vmatpush.msra.mxu0 %v17717_v45  ;;  %11330 = vmatpush.msra.mxu2 %v13020_v27  ;;  %v10047_v10 = vadd.f32 %v10044_v37, %v10026_v40  ;;  %v17724_v37 = vld [vmem:[#allocation33_spill] sm:$0xff]  ;;  %v13030_v61 = vld [vmem:[#allocation3 + $0x318] sm:$0xff]  ;;  %v17725_v3 = vld [vmem:[#allocation28_spill] sm:$0xff] }
 0x560   : > { %11103 = vmatpush.msrb.mxu3 %v17718_v59  ;;  %v10086_v34 = vpop.f32.mrf.mxu0  ;;  %v13032_v16 = vld [vmem:[#allocation3 + $0x200] sm:$0xff]  ;;  %v13033_v45 = vld [vmem:[#allocation3 + $0x310] sm:$0xff] }
 0x561   : > { %12751 = vmatmul.msk.f32.vlgmr.msrb.gmra.mxu3 %vm9306_vm3, %v17719_v51  ;;  %11041 = vmatpush.msra.mxu0 %v17720_v5  ;;  %v10068_v15 = vadd.f32 %v10065_v35, %v10047_v10  ;;  %v13034_v51 = vld [vmem:[#allocation3 + $0x1f8] sm:$0xff]  ;;  %v13037_v35 = vld [vmem:[#allocation3 + $0x300] sm:$0xff] }
 0x562   : > { %11183 = vmatpush.msra.mxu3 %v13021_v38  ;;  %11331 = vmatpush.msra.mxu2 %v13022_v6  ;;  %v13035_v6 = vld [vmem:[#allocation3 + $0x308] sm:$0xff] }
 0x563   : > { %12748 = vmatmul.msk.f32.vlgmr.msra.gmra.mxu0 %vm9306_vm3, %v13023_v13  ;;  %v10089_v52 = vadd.f32 %v10086_v34, %v10068_v15  ;;  %v13036_v13 = vld [vmem:[#allocation3 + $0x1f0] sm:$0xff] }
 0x564   : > { %11120 = vmatpush.msrb.mxu0 %v17721_v0  ;;  %11184 = vmatpush.msra.mxu3 %v13024_v26  ;;  %v13039_v0 = vld [vmem:[#allocation3 + $0x2f8] sm:$0xff] }
 0x565   : > { %11332 = vmatpush.msra.mxu2 %v13025_v19  ;;  %v10110_v1 = vadd.f32 %v10107_v14, %v10089_v52  ;;  %v10153_v59 = vpop.f32.mrf.mxu3  ;;  %v10195_v40 = vpop.f32.mrf.mxu1  ;;  %v13038_v14 = vld [vmem:[#allocation3 + $0x1e8] sm:$0xff]  ;;  %v17727_v26 = vld [vmem:[#allocation54_spill] sm:$0xff] }
 0x566   : > { %11121 = vmatpush.msrb.mxu0 %v17722_v18  ;;  %11185 = vmatpush.msra.mxu3 %v13026_v56  ;;  %v17728_v19 = vld [vmem:[#allocation12_spill] sm:$0xff]  ;;  %v17730_v52 = vld [vmem:[#allocation14_spill] sm:$0xff] }
 0x567   : > { %11333 = vmatpush.msra.mxu2 %v13027_v31  ;;  %v10135_v27 = vadd.f32 %v10132_v12, %v10110_v1  ;;  %v13041_v18 = vld [vmem:[#allocation3 + $0x1e0] sm:$0xff]  ;;  %v17732_v1 = vld [vmem:[#allocation41_spill] sm:$0xff] }
 0x568   : > { %11122 = vmatpush.msrb.mxu0 %v17723_v50  ;;  %11186 = vmatpush.msra.mxu3 %v13028_v17  ;;  %v13042_v50 = vld [vmem:[#allocation3 + $0x3b0] sm:$0xff] }
 0x569   : > { %11334 = vmatpush.msra.mxu2 %v13029_v36  ;;  %v10156_v5 = vadd.f32 %v10153_v59, %v10135_v27  ;;  %v10174_v38 = vpop.f32.mrf.mxu0  ;;  %v17731_v17 = vld [vmem:[#allocation30_spill] sm:$0xff]  ;;  %v17735_v59 = vld [vmem:[#allocation9_spill] sm:$0xff] }
 0x56a   : > { %12762 = vmatmul.msk.f32.vlgmr.msra.gmra.mxu2 %vm9306_vm3, %v16733_v11  ;;  %11123 = vmatpush.msrb.mxu0 %v17724_v37  ;;  %v17726_v11 = vld [vmem:[#allocation37_spill] sm:$0xff]  ;;  %v17733_v37 = vld [vmem:[#allocation32_spill] sm:$0xff] }
 0x56b   : > { %11414 = vmatpush.msrb.mxu2 %v13030_v61  ;;  %11187 = vmatpush.msra.mxu3 %v13031_v2  ;;  %v10177_v10 = vadd.f32 %v10174_v38, %v10156_v5  ;;  %v13043_v2 = vld [vmem:[#allocation3 + $0x3a8] sm:$0xff] }
 0x56c   : > { %12755 = vmatmul.msk.f32.vlgmr.msra.gmra.mxu3 %vm9306_vm3, %v16143_v49  ;;  %11124 = vmatpush.msrb.mxu0 %v17725_v3  ;;  %v10216_v49 = vpop.f32.mrf.mxu2  ;;  %v17734_v3 = vld [vmem:[#allocation29_spill] sm:$0xff] }
 0x56d   : > { %11267 = vmatpush.msrb.mxu3 %v13032_v16  ;;  %11415 = vmatpush.msrb.mxu2 %v13033_v45  ;;  %v10283_v31 = vpop.f32.mrf.mxu1  ;;  %v13044_v16 = vld [vmem:[#allocation3 + $0x3a0] sm:$0xff] }
 0x56e   : > { %12752 = vmatmul.msk.f32.vlgmr.msrb.gmra.mxu0 %vm9306_vm3, %v16486_v29  ;;  %v10198_v29 = vadd.f32 %v10195_v40, %v10177_v10  ;;  %v13045_v40 = vld [vmem:[#allocation3 + $0x398] sm:$0xff] }
 0x56f   : > { %11204 = vmatpush.msra.mxu0 %v17726_v11  ;;  %11268 = vmatpush.msrb.mxu3 %v13034_v51 }
 0x570   : > { %11416 = vmatpush.msrb.mxu2 %v13035_v6  ;;  %v10219_v15 = vadd.f32 %v10216_v49, %v10198_v29  ;;  %v10241_v34 = vpop.f32.mrf.mxu3 }
 0x571   : > { %11205 = vmatpush.msra.mxu0 %v16706_v44  ;;  %11269 = vmatpush.msrb.mxu3 %v13036_v13  ;;  %v13040_v44 = vld [vmem:[#allocation3 + $0x3b8] sm:$0xff] }
 0x572   : > { %11417 = vmatpush.msrb.mxu2 %v13037_v35  ;;  %v10244_v56 = vadd.f32 %v10241_v34, %v10219_v15 }
 0x573   : > { %11206 = vmatpush.msra.mxu0 %v16716_v28  ;;  %11270 = vmatpush.msrb.mxu3 %v13038_v14  ;;  %v17729_v28 = vld [vmem:[#allocation39_spill] sm:$0xff] }
 0x574   : > { %11418 = vmatpush.msrb.mxu2 %v13039_v0  ;;  %v10304_v61 = vpop.f32.mrf.mxu2 }
 0x575   : > { %12766 = vmatmul.msk.f32.vlgmr.msrb.gmra.mxu2 %vm9306_vm3, %v17727_v26  ;;  %11207 = vmatpush.msra.mxu0 %v17728_v19  ;;  %v10262_v12 = vpop.f32.mrf.mxu0  ;;  %v10371_v38 = vpop.f32.mrf.mxu1 }
 0x576   : > { %11498 = vmatpush.msra.mxu2 %v13040_v44  ;;  %11271 = vmatpush.msrb.mxu3 %v13041_v18  ;;  %v10265_v36 = vadd.f32 %v10262_v12, %v10244_v56 }
 0x577   : > { %12759 = vmatmul.msk.f32.vlgmr.msrb.gmra.mxu3 %vm9306_vm3, %v16244_v47  ;;  %11208 = vmatpush.msra.mxu0 %v17729_v28 }
 0x578   : > { %11351 = vmatpush.msra.mxu3 %v17730_v52  ;;  %11499 = vmatpush.msra.mxu2 %v13042_v50  ;;  %v10286_v47 = vadd.f32 %v10283_v31, %v10265_v36 }
 0x579   : > { %12756 = vmatmul.msk.f32.vlgmr.msra.gmra.mxu0 %vm9306_vm3, %v17731_v17 }
 0x57a   : > { %11288 = vmatpush.msrb.mxu0 %v17732_v1  ;;  %11352 = vmatpush.msra.mxu3 %v17733_v37  ;;  %v10307_v45 = vadd.f32 %v10304_v61, %v10286_v47 }
 0x57b   : > { %11500 = vmatpush.msra.mxu2 %v13043_v2  ;;  %v10325_v27 = vpop.f32.mrf.mxu3 }
 0x57c   : > { %11289 = vmatpush.msrb.mxu0 %v16752_v62  ;;  %11353 = vmatpush.msra.mxu3 %v17734_v3  ;;  %v10328_v11 = vadd.f32 %v10325_v27, %v10307_v45  ;;  %v17736_v62 = vld [vmem:[#allocation10_spill] sm:$0xff] }
 0x57d   : > { %11501 = vmatpush.msra.mxu2 %v13044_v16 }
 0x57e   : > { %11290 = vmatpush.msrb.mxu0 %v16760_v39  ;;  %11354 = vmatpush.msra.mxu3 %v17735_v59  ;;  %v17737_v39 = vld [vmem:[#allocation18_spill] sm:$0xff] }
 0x57f   : > { %11502 = vmatpush.msra.mxu2 %v13045_v40  ;;  %v10350_v51 = vpop.f32.mrf.mxu0 }
 0x580   : > { %12770 = vmatmul.msk.f32.vlgmr.msra.gmra.mxu2 %vm9306_vm3, %v16807_v55  ;;  %11291 = vmatpush.msrb.mxu0 %v16766_v60  ;;  %v10353_v5 = vadd.f32 %v10350_v51, %v10328_v11  ;;  %v10392_v55 = vpop.f32.mrf.mxu2  ;;  %v17738_v60 = vld [vmem:[#allocation16_spill] sm:$0xff] }
 0x581   : > { %11355 = vmatpush.msra.mxu3 %v17736_v62 }
 0x582   : > { %12763 = vmatmul.msk.f32.vlgmr.msra.gmra.mxu3 %vm9306_vm3, %v16262_v42  ;;  %11292 = vmatpush.msrb.mxu0 %v16777_v23  ;;  %v10374_v6 = vadd.f32 %v10371_v38, %v10353_v5 }
 0x583   : > { %11435 = vmatpush.msrb.mxu3 %v17737_v39  ;;  %12760 = vmatmul.msk.f32.vlgmr.msrb.gmra.mxu0 %vm9306_vm3, %v16339_v54  ;;  %v13046_v54 = vld [vmem:[#allocation2 + $0x1a] sm:$0xf] }
 0x584   : > { %11372 = vmatpush.msra.mxu0 %v16784_v4  ;;  %v10395_v49 = vadd.f32 %v10392_v55, %v10374_v6  ;;  %v10459_v4 = vpop.f32.mrf.mxu1 }
 0x585   : > { %11436 = vmatpush.msrb.mxu3 %v17738_v60 }
 0x586   : > { %11373 = vmatpush.msra.mxu0 %v16792_v43  ;;  %v10413_v13 = vpop.f32.mrf.mxu3 }
 0x587   : > { %11437 = vmatpush.msrb.mxu3 %v17684_v53  ;;  %v10416_v42 = vadd.f32 %v10413_v13, %v10395_v49 }
 0x588   : > { %11374 = vmatpush.msra.mxu0 %v16798_v48 }
 0x589   : > { %11438 = vmatpush.msrb.mxu3 %v17686_v8  ;;  %v17739_v8 = vld [vmem:[#allocation25_spill] sm:$0xff] }
 0x58a   : > { %11375 = vmatpush.msra.mxu0 %v16804_v46 }
 0x58b   : > { %11439 = vmatpush.msrb.mxu3 %v17687_v33 }
 0x58c   : > { %12767 = vmatmul.msk.f32.vlgmr.msrb.gmra.mxu3 %vm9306_vm3, %v13046_v54  ;;  %11376 = vmatpush.msra.mxu0 %v16818_v63  ;;  %v10434_v53 = vpop.f32.mrf.mxu0  ;;  %v10542_v46 = vpop.f32.mrf.mxu1  ;;  %v12781_v54 = vld [vmem:[%s17212_s5 + $0x98] sm:$0xff] }
 0x58d   : > { %11523 = vmatpush.msra.mxu3 %v17688_v22  ;;  %12764 = vmatmul.msk.f32.vlgmr.msra.gmra.mxu0 %vm9306_vm3, %v16373_v7  ;;  %v10437_v23 = vadd.f32 %v10434_v53, %v10416_v42  ;;  %v11509_v7 = vpop.permute.xlu1 %11508  ;;  %v11548_v42 = vld [vmem:[%s17212_s5 + $0x48] sm:$0xff]  ;;  %v11547_v53 = vld [vmem:[%s17212_s5 + $0x40] sm:$0xff] }
 0x58e   : > { %11456 = vmatpush.msrb.mxu0 %v16826_v57  ;;  %11593 = vmatpush.msra.mxu1 %v11548_v42  ;;  %v12796_v42 = vld [vmem:[%s17212_s5 + $0xf8] sm:$0xff] }
 0x58f   : > { %11524 = vmatpush.msra.mxu3 %v17739_v8  ;;  %v16982_v33 = vadd.f32 %v10459_v4, %v10437_v23  ;;  %v12793_v23 = vld [vmem:[%s17212_s5 + $0xe8] sm:$0xff]  ;;  %v12804_v8 = vld [vmem:[%s17212_s5 + $0x138] sm:$0xff] }
 0x590   : > { %11457 = vmatpush.msrb.mxu0 %v16834_v30  ;;  %11627 = vmatpush.msrb.mxu2 %v12793_v23 }
 0x591   : > { %11525 = vmatpush.msra.mxu3 %v17690_v32  ;;  %v10463_v22 = vmax.f32 %v16891_v24, %v16982_v33  ;;  %v10481_v32 = vpop.f32.mrf.mxu2  ;;  %v10501_v43 = vpop.f32.mrf.mxu3  ;;  %11594 = vmatpush.msra.mxu1 %v11547_v53  ;;  %v12784_v53 = vld [vmem:[%s17212_s5 + $0xa0] sm:$0xff]  ;;  %v11686_v24 = vld [vmem:[%s17214_s7 + $0x30] sm:$0x3]  ;;  %v11685_v33 = vld [vmem:[%s17214_s7 + $0x28] sm:$0xff] }
 0x592   : > { %11458 = vmatpush.msrb.mxu0 %v16840_v21  ;;  %v10502_v14 = vadd.f32 %v10501_v43, %v10481_v32  ;;  %v12780_v43 = vld [vmem:[%s17212_s5 + $0x90] sm:$0xff] }
 0x593   : > { %11526 = vmatpush.msra.mxu3 %v17691_v25 }
 0x594   : > { %11459 = vmatpush.msrb.mxu0 %v16847_v20  ;;  %v10626_v25 = vpop.f32.mrf.mxu1 }
 0x595   : > { %11527 = vmatpush.msra.mxu3 %v17692_v9 }
 0x596   : > { %12771 = vmatmul.msk.f32.vlgmr.msra.gmra.mxu3 %vm9306_vm3, %v11509_v7  ;;  %11460 = vmatpush.msrb.mxu0 %v16859_v41 }
 0x597   : > { %12768 = vmatmul.msk.f32.vlgmr.msrb.gmra.mxu0 %vm9306_vm3, %v16898_v58  ;;  %11662 = vmatpush.msrb.mxu3 %v12804_v8 }
 0x598   : > { %11571 = vmatpush.msra.mxu0 %v12781_v54  ;;  %v12772_v54 = vld [vmem:[%s17212_s5 + $0x50] sm:$0xff] }
 0x599   : > { %v10521_v48 = vpop.f32.mrf.mxu0  ;;  %v10563_v63 = vpop.f32.mrf.mxu2 }
 0x59a   : > { %v10524_v29 = vadd.f32 %v10521_v48, %v10502_v14  ;;  %v11546_v48 = vld [vmem:[%s17212_s5 + $0x38] sm:$0xff]  ;;  %11572 = vmatpush.msra.mxu0 %v12780_v43  ;;  %v12778_v14 = vld [vmem:[%s17212_s5 + $0x80] sm:$0xff] }
 0x59b   : > { %v10584_v57 = vpop.f32.mrf.mxu3  ;;  %11595 = vmatpush.msra.mxu1 %v11546_v48 }
 0x59c   : > { %v10710_v35 = vpop.f32.mrf.mxu1  ;;  %v10545_v26 = vadd.f32 %v10542_v46, %v10524_v29  ;;  %v12792_v46 = vld [vmem:[%s17212_s5 + $0xe0] sm:$0xff]  ;;  %v11544_v29 = vld [vmem:[%s17212_s5 + $0x28] sm:$0xff] }
 0x59d   : > { %11628 = vmatpush.msrb.mxu2 %v12792_v46 }
 0x59e   : > { %v10566_v15 = vadd.f32 %v10563_v63, %v10545_v26  ;;  %v12803_v63 = vld [vmem:[%s17212_s5 + $0x130] sm:$0xff]  ;;  %v12801_v26 = vld [vmem:[%s17212_s5 + $0x120] sm:$0xff] }
 0x59f   : > { %11663 = vmatpush.msrb.mxu3 %v12803_v63 }
 0x5a0   : > { %v10587_v44 = vadd.f32 %v10584_v57, %v10566_v15  ;;  %v11543_v15 = vld [vmem:[%s17212_s5 + $0x20] sm:$0xff] }
 0x5a1   : > { %v10647_v21 = vpop.f32.mrf.mxu2 }
 0x5a4   : > { %v10794_v19 = vpop.f32.mrf.mxu1 }
 0x5a5   : > { %v10605_v30 = vpop.f32.mrf.mxu0 }
 0x5a6   : > { %v10608_v56 = vadd.f32 %v10605_v30, %v10587_v44  ;;  %v12779_v30 = vld [vmem:[%s17212_s5 + $0x88] sm:$0xff] }
 0x5a7   : > { %11573 = vmatpush.msra.mxu0 %v12779_v30  ;;  %v12789_v44 = vld [vmem:[%s17212_s5 + $0xc8] sm:$0xff] }
 0x5a8   : > { %v10668_v20 = vpop.f32.mrf.mxu3  ;;  %v10629_v31 = vadd.f32 %v10626_v25, %v10608_v56  ;;  %v11545_v25 = vld [vmem:[%s17212_s5 + $0x30] sm:$0xff] }
 0x5a9   : > { %v10731_v9 = vpop.f32.mrf.mxu2  ;;  %11596 = vmatpush.msra.mxu1 %v11545_v25  ;;  %11574 = vmatpush.msra.mxu0 %v12778_v14 }
 0x5aa   : > { %v10650_v17 = vadd.f32 %v10647_v21, %v10629_v31  ;;  %v12791_v21 = vld [vmem:[%s17212_s5 + $0xd8] sm:$0xff] }
 0x5ab   : > { %11629 = vmatpush.msrb.mxu2 %v12791_v21  ;;  %11597 = vmatpush.msra.mxu1 %v11544_v29 }
 0x5ac   : > { %v16999_v28 = vpop.f32.mrf.mxu1  ;;  %v10671_v37 = vadd.f32 %v10668_v20, %v10650_v17  ;;  %v12800_v17 = vld [vmem:[%s17212_s5 + $0x118] sm:$0xff] }
 0x5ad   : > { %11598 = vmatpush.msra.mxu1 %v11543_v15 }
 0x5b1   : > { %v10689_v10 = vpop.f32.mrf.mxu0  ;;  %v10815_v58 = vpop.f32.mrf.mxu2 }
 0x5b2   : > { %v10692_v2 = vadd.f32 %v10689_v10, %v10671_v37 }
 0x5b4   : > { %v10752_v0 = vpop.f32.mrf.mxu3  ;;  %v17007_v36 = vpop.f32.mrf.mxu1  ;;  %v10713_v45 = vadd.f32 %v10710_v35, %v10692_v2  ;;  %v12802_v35 = vld [vmem:[%s17212_s5 + $0x128] sm:$0xff]  ;;  %v11542_v2 = vld [vmem:[%s17212_s5 + $0x18] sm:$0xff] }
 0x5b5   : > { %11664 = vmatpush.msrb.mxu3 %v12802_v35  ;;  %11599 = vmatpush.msra.mxu1 %v11542_v2  ;;  %v11680_v2 = vld [vmem:[%s17214_s7] sm:$0xff] }
 0x5b6   : > { %v10734_v11 = vadd.f32 %v10731_v9, %v10713_v45  ;;  %v11541_v45 = vld [vmem:[%s17212_s5 + $0x10] sm:$0xff] }
 0x5b7   : > { %11665 = vmatpush.msrb.mxu3 %v12801_v26  ;;  %11600 = vmatpush.msra.mxu1 %v11541_v45 }
 0x5b8   : > { %v10755_v5 = vadd.f32 %v10752_v0, %v10734_v11  ;;  %v12790_v0 = vld [vmem:[%s17212_s5 + $0xd0] sm:$0xff] }
 0x5b9   : > { %v17001_v12 = vpop.f32.mrf.mxu2  ;;  %11630 = vmatpush.msrb.mxu2 %v12790_v0  ;;  %11666 = vmatpush.msrb.mxu3 %v12800_v17  ;;  %v11683_v17 = vld [vmem:[%s17214_s7 + $0x18] sm:$0xff] }
 0x5bb   : > { %11631 = vmatpush.msrb.mxu2 %v12789_v44 }
 0x5bc   : > { %v11063_v16 = vpop.f32.mrf.mxu1 }
 0x5bd   : > { %v10773_v41 = vpop.f32.mrf.mxu0 }
 0x5be   : > { %v10776_v60 = vadd.f32 %v10773_v41, %v10755_v5 }
 0x5c0   : > { %v16995_v34 = vpop.f32.mrf.mxu3  ;;  %v10797_v7 = vadd.f32 %v10794_v19, %v10776_v60  ;;  %v12785_v60 = vld [vmem:[%s17212_s5 + $0xa8] sm:$0xff] }
 0x5c1   : > { %v17009_v1 = vpop.f32.mrf.mxu2 }
 0x5c2   : > { %v10818_v20 = vadd.f32 %v10815_v58, %v10797_v7  ;;  %v12777_v58 = vld [vmem:[%s17212_s5 + $0x78] sm:$0xff] }
 0x5c3   : > { %11575 = vmatpush.msra.mxu0 %v12777_v58 }
 0x5c4   : > { %v11147_v6 = vpop.f32.mrf.mxu1  ;;  %v10839_v56 = vadd.f32 %v16995_v34, %v10818_v20  ;;  %v12788_v34 = vld [vmem:[%s17212_s5 + $0xc0] sm:$0xff] }
 0x5c5   : > { %11632 = vmatpush.msrb.mxu2 %v12788_v34 }
 0x5c9   : > { %v16997_v18 = vpop.f32.mrf.mxu0  ;;  %v11084_v59 = vpop.f32.mrf.mxu2 }
 0x5cc   : > { %v17003_v52 = vpop.f32.mrf.mxu3  ;;  %v11231_v9 = vpop.f32.mrf.mxu1 }
 0x5d5   : > { %v17005_v50 = vpop.f32.mrf.mxu0  ;;  %v11168_v49 = vpop.f32.mrf.mxu2 }
 0x5d8   : > { %v11023_v61 = vpop.f32.mrf.mxu3 }
 0x5e0   : > { %v11043_v47 = vpop.f32.mrf.mxu0 }
 0x5e1   : > { %v11044_v3 = vadd.f32 %v11043_v47, %v11023_v61  ;;  %v11252_v19 = vpop.f32.mrf.mxu2  ;;  %v12776_v61 = vld [vmem:[%s17212_s5 + $0x70] sm:$0xff] }
 0x5e2   : > { %11576 = vmatpush.msra.mxu0 %v12776_v61  ;;  %v11681_v61 = vld [vmem:[%s17214_s7 + $0x8] sm:$0xff] }
 0x5e3   : > { %v11066_v27 = vadd.f32 %v11063_v16, %v11044_v3  ;;  %v12799_v3 = vld [vmem:[%s17212_s5 + $0x110] sm:$0xff]  ;;  %v12775_v16 = vld [vmem:[%s17212_s5 + $0x68] sm:$0xff] }
 0x5e4   : > { %v11105_v51 = vpop.f32.mrf.mxu3  ;;  %11667 = vmatpush.msrb.mxu3 %v12799_v3  ;;  %11577 = vmatpush.msra.mxu0 %v12775_v16 }
 0x5e5   : > { %v11087_v40 = vadd.f32 %v11084_v59, %v11066_v27  ;;  %v12787_v27 = vld [vmem:[%s17212_s5 + $0xb8] sm:$0xff]  ;;  %v10860_v59 = vadd.f32 %v16997_v18, %v10839_v56  ;;  %v12786_v18 = vld [vmem:[%s17212_s5 + $0xb0] sm:$0xff] }
 0x5e6   : > { %11633 = vmatpush.msrb.mxu2 %v12787_v27 }
 0x5e7   : > { %v11108_v62 = vadd.f32 %v11105_v51, %v11087_v40  ;;  %v12798_v40 = vld [vmem:[%s17212_s5 + $0x108] sm:$0xff]  ;;  %v12774_v51 = vld [vmem:[%s17212_s5 + $0x60] sm:$0xff] }
 0x5e8   : > { %11668 = vmatpush.msrb.mxu3 %v12798_v40  ;;  %11578 = vmatpush.msra.mxu0 %v12774_v51 }
 0x5e9   : > { %11634 = vmatpush.msrb.mxu2 %v12786_v18 }
 0x5eb   : > { %v11126_v38 = vpop.f32.mrf.mxu0  ;;  %11635 = vmatpush.msrb.mxu2 %v12785_v60 }
 0x5ec   : > { %v11129_v39 = vadd.f32 %v11126_v38, %v11108_v62  ;;  %v11540_v62 = vld [vmem:[%s17212_s5 + $0x8] sm:$0xff]  ;;  %v12797_v38 = vld [vmem:[%s17212_s5 + $0x100] sm:$0xff] }
 0x5ed   : > { %11601 = vmatpush.msra.mxu1 %v11540_v62  ;;  %11669 = vmatpush.msrb.mxu3 %v12797_v38  ;;  %v11336_v23 = vpop.f32.mrf.mxu2  ;;  %v11687_v62 = vld [vmem:[%s17215_s8] sm:$0x1] }
 0x5ee   : > { %v11150_v55 = vadd.f32 %v11147_v6, %v11129_v39  ;;  %v11315_v39 = vpop.f32.mrf.mxu1  ;;  %v12773_v6 = vld [vmem:[%s17212_s5 + $0x58] sm:$0xff]  ;;  %11636 = vmatpush.msrb.mxu2 %v12784_v53 }
 0x5ef   : > { %v11189_v4 = vpop.f32.mrf.mxu3  ;;  %11579 = vmatpush.msra.mxu0 %v12773_v6  ;;  %11670 = vmatpush.msrb.mxu3 %v12796_v42 }
 0x5f0   : > { %v11171_v13 = vadd.f32 %v11168_v49, %v11150_v55  ;;  %v11539_v55 = vld [vmem:[%s17212_s5] sm:$0xff]  ;;  %v10881_v49 = vadd.f32 %v16999_v28, %v10860_v59  ;;  %v12795_v28 = vld [vmem:[%s17212_s5 + $0xf0] sm:$0xff] }
 0x5f1   : > { %11602 = vmatpush.msra.mxu1 %v11539_v55  ;;  %11580 = vmatpush.msra.mxu0 %v12772_v54  ;;  %v11677_v59 = vld [vmem:[%s17213_s6] sm:$0x1] }
 0x5f2   : > { %v11192_v32 = vadd.f32 %v11189_v4, %v11171_v13  ;;  %11671 = vmatpush.msrb.mxu3 %v12795_v28  ;;  %v10905_v7 = vadd.f32 %v17001_v12, %v10881_v49 }
 0x5f3   : > { %12806 = vmatpush.msk.msrb.mxu0 %vm11692_vm5, %v11686_v24 }
 0x5f4   : > { %v10929_v48 = vadd.f32 %v17003_v52, %v10905_v7 }
 0x5f5   : > { %11706 = vmatpush.msrb.mxu0 %v11685_v33 }
 0x5f6   : > { %v11210_v57 = vpop.f32.mrf.mxu0  ;;  %v11399_v63 = vpop.f32.mrf.mxu1  ;;  %v10954_v25 = vadd.f32 %v17005_v50, %v10929_v48  ;;  %v12867_v50 = vld [vmem:[%s17211_s4] ss:$0 sm:$0xff] }
 0x5f7   : > { %v11213_v10 = vadd.f32 %v11210_v57, %v11192_v32 }
 0x5f8   : > { %v11420_v30 = vpop.f32.mrf.mxu2  ;;  %v10979_v35 = vadd.f32 %v17007_v36, %v10954_v25 }
 0x5f9   : > { %v11234_v41 = vadd.f32 %v11231_v9, %v11213_v10 }
 0x5fa   : > { %v11273_v37 = vpop.f32.mrf.mxu3  ;;  %v11004_v12 = vadd.f32 %v17009_v1, %v10979_v35 }
 0x5fb   : > { %v11255_v31 = vadd.f32 %v11252_v19, %v11234_v41 }
 0x5fc   : > { %v11005_v19 = vmax.f32 %v10463_v22, %v11004_v12  ;;  %v11684_v22 = vld [vmem:[%s17214_s7 + $0x20] sm:$0xff] }
 0x5fd   : > { %v11276_v47 = vadd.f32 %v11273_v37, %v11255_v31  ;;  %11707 = vmatpush.msrb.mxu0 %v11684_v22  ;;  %v11682_v37 = vld [vmem:[%s17214_s7 + $0x10] sm:$0xff] }
 0x5fe   : > { %v11483_v29 = vpop.f32.mrf.mxu1 }
 0x5ff   : > { %11708 = vmatpush.msrb.mxu0 %v11683_v17 }
 0x600   : > { %v11294_v11 = vpop.f32.mrf.mxu0 }
 0x601   : > { %v11297_v5 = vadd.f32 %v11294_v11, %v11276_v47  ;;  %11709 = vmatpush.msrb.mxu0 %v11682_v37 }
 0x603   : > { %v11318_v13 = vadd.f32 %v11315_v39, %v11297_v5  ;;  %v11504_v41 = vpop.f32.mrf.mxu2  ;;  %11710 = vmatpush.msrb.mxu0 %v11681_v61 }
 0x605   : > { %v11339_v4 = vadd.f32 %v11336_v23, %v11318_v13  ;;  %v11357_v8 = vpop.f32.mrf.mxu3  ;;  %11711 = vmatpush.msrb.mxu0 %v11680_v2 }
 0x607   : > { %v11360_v32 = vadd.f32 %v11357_v8, %v11339_v4 }
 0x60a   : > { %v11378_v43 = vpop.f32.mrf.mxu0 }
 0x60b   : > { %v11381_v46 = vadd.f32 %v11378_v43, %v11360_v32 }
 0x60d   : > { %v11402_v57 = vadd.f32 %v11399_v63, %v11381_v46 }
 0x60f   : > { %v11423_v21 = vadd.f32 %v11420_v30, %v11402_v57  ;;  %v11441_v20 = vpop.f32.mrf.mxu3 }
 0x611   : > { %v11444_v10 = vadd.f32 %v11441_v20, %v11423_v21 }
 0x614   : > { %v11462_v9 = vpop.f32.mrf.mxu0 }
 0x615   : > { %v11465_v14 = vadd.f32 %v11462_v9, %v11444_v10 }
 0x617   : > { %v11486_v0 = vadd.f32 %v11483_v29, %v11465_v14 }
 0x619   : > { %v11507_v26 = vadd.f32 %v11504_v41, %v11486_v0  ;;  %v11529_v52 = vpop.f32.mrf.mxu3 }
 0x61b   : > { %v11532_v58 = vadd.f32 %v11529_v52, %v11507_v26 }
 0x61d   : > { %v11533_v15 = vmax.f32 %v11005_v19, %v11532_v58 }
 0x61f   : > { %v11537_v36 = vadd.f32 %v12867_v50, %v11533_v15 }
 0x621   : > { %v11538_v44 = vmax.f32 %v11537_v36, 0.0 }
 0x623   : > { %v11561_v56 = vrot.slane %v11538_v44, 1  ;;  %v11618_v31 = vrot.slane %v11538_v44, 2  ;;  %v11653_v1 = vrot.slane %v11538_v44, 3  ;;  %12783 = vmatmul.msk.f32.vlgmr.msra.gmra.mxu1 %vm11562_vm4, %v11538_v44 }
 0x625   : > { %12782 = vmatmul.msk.f32.vlgmr.msra.gmra.mxu0 %vm11562_vm4, %v11561_v56  ;;  %12794 = vmatmul.msk.f32.vlgmr.msrb.gmra.mxu2 %vm11562_vm4, %v11618_v31 }
 0x626   : > { %12805 = vmatmul.msk.f32.vlgmr.msrb.gmra.mxu3 %vm11562_vm4, %v11653_v1 }
 0x6a0   : > { %v11604_v47 = vpop.f32.mrf.mxu1 }
 0x6a2   : > { %v11582_v34 = vpop.f32.mrf.mxu0 }
 0x6a3   : > { %v11605_v3 = vadd.f32 %v11604_v47, %v11582_v34 }
 0x6a8   : > { %v11638_v16 = vpop.f32.mrf.mxu2 }
 0x6a9   : > { %v11641_v45 = vadd.f32 %v11638_v16, %v11605_v3  ;;  %v11673_v27 = vpop.f32.mrf.mxu3 }
 0x6ab   : > { %v11676_v40 = vadd.f32 %v11673_v27, %v11641_v45 }
 0x6ad   : > { %v11678_v11 = vadd.f32 %v11677_v59, %v11676_v40 }
 0x6af   : > { %v11679_v51 = vmax.f32 %v11678_v11, 0.0 }
 0x6b1   : > { %12807 = vmatmul.msk.f32.vlgmr.msrb.gmra.mxu0 %vm11688_vm6, %v11679_v51 }
 0x72e   : > { %v11713_v18 = vpop.f32.mrf.mxu0 }
 0x72f   : > { %v11714_v5 = vadd.f32 %v11713_v18, %v11687_v62 }
 0x731   : > { %v11717_v38 = vsel %vm11716_vm7, %v11714_v5, -inf }
 0x732   : > { %11718 = vmax.xlane.f32.xlu2 %v11717_v38 }
 0x7a5   : > { %v11719_v39 = vpop.xlane.xlu2 %11718 }
 0x7a6   : > { %v11720_v6 = vsub.f32 %v11714_v5, %v11719_v39 }
 0x7a8   : > { %v11721_v55 = vmul.f32 1.442695, %v11720_v6 }
 0x7aa   : > { %12868 = vpow2.f32 %v11721_v55 }
 0x7b0   : > { %v12869_v60 = vpop.eup %12868 }
 0x7b1   : > { %v11723_v49 = vsel %vm11716_vm7, %v12869_v60, 0.0 }
 0x7b2   : > { %11724 = vadd.xlane.f32.xlu0 %v11723_v49 }
 0x825   : > { %v11725_v13 = vpop.xlane.xlu0 %11724 }
 0x826   : > { %12870 = vlog2.f32 %v11725_v13 }
 0x82c   : > { %v12871_v42 = vpop.eup %12870 }
 0x82d   : > { %v11727_v54 = vmul.f32 0.6931472, %v12871_v42 }
 0x82f   : > { %v11728_v53 = vsub.f32 %v11720_v6, %v11727_v54 }
 0x831   : > { %11729 = vst.msk [vmem:[%s341_s22] sm:$0x1] %vm11716_vm7, %v11728_v53 }
 0x832   : > { %13104 = shalt.err (!%p13101_p8)
}
 0x833   : > { %12815 = dma.vmem_to_hbm [thread:$0]  (%p13239_p5), %s11742_s23, 16, %s11744_s17, %s11731_s24  }
 0x834 PF: > { %p12827_p9 = scmp.ge.s32.totalorder %s13143_s12, 2  ;;  %s11755_s27 = sand.u32 1, %s13131_s30  }
 0x835   : > { %s11756_s29 = scalar_lea.sflag [#allocation5], %s11755_s27 }
 0x836   : > { %p12822_p10 = pnand %p12827_p9, %p13243_p6 }
 0x838   : > { %p12823_p11 = pneg %p12822_p10 }
 0x83a   : > { %13126 = dma.done.wait (%p12823_p11), %s11756_s29, 16  }
 0x83b   : > { %13128 = vsyncadd (%p12823_p11), %s11756_s29, 4294967280  ;;  %p20_p12 = scmp.ge.s32.totalorder %s13226_s15, 4   ;;  %s17740_s30 = smov %s13135_s10 }
 0x83c   : > { %s17741_s10 = smov %s13139_s11  ;;  %s17742_s11 = smov %s13237_s18 }
 0x83d   : > { %s17743_s12 = smov %s13226_s15  ;;  %22 = sbr.rel (!%p20_p12) target bundleno = 4 (0x4), region = 165 }
 0x842   :  { %11761 = vsyncpa [#allocation4], 1 }
 0x843   :  { %11763 = vsyncpa [#allocation4 + $0x1], 1 }
 0x844   :  { %11764 = vsyncpa [#allocation5], 1 }
 0x845   :  { %11766 = vsyncpa [#allocation5 + $0x1], 1 }

</bundles_post_ra>
